<compile_context>
chip_gen: v5e
topology: v5e:2x2
jax: 0.10.0
libtpu: 0.0.40
codegen_flags: <defaults>
</compile_context>

<pallas_src>
import functools

import jax
import jax.numpy as jnp
import numpy as np
from jax.experimental import pallas as pl
from jax.experimental.pallas import tpu as pltpu


def _round_up(x, m):
    return (x + m - 1) // m * m


def _vmem_info():
    """(physical VMEM capacity, scoped limit to request) - generation aware."""
    try:
        cap = int(pltpu.get_tpu_info().vmem_capacity_bytes)
    except Exception:
        cap = 64 * 1024 * 1024                 # conservative (v7x-sized) fallback
    limit = max(32 * 1024 * 1024, cap - 16 * 1024 * 1024)
    return cap, limit


def _choose_tile_h(H, n_batch, est_bytes, budget, max_th, tile_h=None):
    """Largest multiple-of-8 row tile whose estimated VMEM footprint fits."""
    granule = 8
    hi = min(max_th, _round_up(max(H, 1), granule))
    if tile_h is not None:
        hi = min(hi, max(granule, _round_up(tile_h, granule)))
    best = granule
    t = granule
    while t <= hi:
        if est_bytes(t) <= budget:
            best = t
        t += granule
    # v7x has two TensorCores; for batch==1 keep >=2 grid steps per image so
    # dimension_semantics="parallel" can feed both cores.
    if n_batch == 1 and best >= H and H > granule:
        best = min(best, _round_up((H + 1) // 2, granule))
    return best


# --------------------------------------------------------------------------
# Kernels
# --------------------------------------------------------------------------
def _conv3x3_kernel(xm_ref, xh_ref, w_ref, b_ref, o_ref, *, relu):
    """One row-tile of a 3x3 'same' conv + bias (+ optional ReLU), as a single
    im2col matmul with K = 9*Cin.

    xm_ref: (1, TH, Wp+2, Cin)   main rows of the zero-padded input
    xh_ref: (1, 2,  Wp+2, Cin)   2-row bottom halo (same padded tensor)
    w_ref : (9*Cin, Cout)        im2col weights
    b_ref : (1, Cout)
    o_ref : (1, TH*Wp, Cout)
    """
    TH, Wp2, Cin = xm_ref.shape[1], xm_ref.shape[2], xm_ref.shape[3]
    Wp = Wp2 - 2
    x = jnp.concatenate([xm_ref[0], xh_ref[0]], axis=0)       # (TH+2, Wp+2, Cin)
    taps = []
    for dy in range(3):
        xr = x[dy:dy + TH]
        for dx in range(3):
            taps.append(xr[:, dx:dx + Wp, :])
    slab = jnp.concatenate(taps, axis=-1).reshape(TH * Wp, 9 * Cin)
    acc = jnp.dot(slab, w_ref[...], preferred_element_type=jnp.float32)
    acc = acc + b_ref[...].astype(jnp.float32)
    if relu:
        acc = jnp.maximum(acc, 0.0)
    o_ref[0] = acc.astype(o_ref.dtype)


def _conv3x3_res_kernel(xm_ref, xh_ref, w_ref, b_ref, r_ref, o_ref, *, scale):
    """3x3 conv + bias, then out = conv * scale + residual (fused epilogue)."""
    TH, Wp2, Cin = xm_ref.shape[1], xm_ref.shape[2], xm_ref.shape[3]
    Wp = Wp2 - 2
    x = jnp.concatenate([xm_ref[0], xh_ref[0]], axis=0)
    taps = []
    for dy in range(3):
        xr = x[dy:dy + TH]
        for dx in range(3):
            taps.append(xr[:, dx:dx + Wp, :])
    slab = jnp.concatenate(taps, axis=-1).reshape(TH * Wp, 9 * Cin)
    acc = jnp.dot(slab, w_ref[...], preferred_element_type=jnp.float32)
    acc = acc + b_ref[...].astype(jnp.float32)
    acc = acc * scale + r_ref[0].astype(jnp.float32)
    o_ref[0] = acc.astype(o_ref.dtype)


def _resblock_kernel(xm_ref, xh_ref, w1_ref, b1_ref, w2_ref, b2_ref, o_ref,
                     *, res_scale, valid_h, valid_w):
    """Fused EDSR residual block on one row-tile (intermediate stays in VMEM).

    out = conv2(relu(conv1(x))) * res_scale + x
    xm_ref: (1, TH, Wp+4, C)   main rows of the 2-pixel zero-padded input
    xh_ref: (1, 4,  Wp+4, C)   4-row bottom halo
    w*_ref: (9*C, C)           im2col weights, b*_ref: (1, C)
    o_ref : (1, TH*Wp, C)
    """
    TH, Wp4, C = xm_ref.shape[1], xm_ref.shape[2], xm_ref.shape[3]
    Wp = Wp4 - 4
    He = TH + 2
    x = jnp.concatenate([xm_ref[0], xh_ref[0]], axis=0)        # (TH+4, Wp+4, C)
    dt = x.dtype

    # ---- conv1 (+bias, ReLU) on the row-extended (He, Wp) region -----------
    taps = []
    for dy in range(3):
        xr = x[dy:dy + He]
        for dx in range(3):
            taps.append(xr[:, dx + 1:dx + 1 + Wp, :])
    slab1 = jnp.concatenate(taps, axis=-1).reshape(He * Wp, 9 * C)
    h = jnp.dot(slab1, w1_ref[...], preferred_element_type=jnp.float32)
    h = jnp.maximum(h + b1_ref[...].astype(jnp.float32), 0.0)
    h = h.reshape(He, Wp, C)

    # conv2 must see zeros wherever `h` lies outside the true image.
    row = jax.lax.broadcasted_iota(jnp.int32, (He, Wp, 1), 0)
    col = jax.lax.broadcasted_iota(jnp.int32, (He, Wp, 1), 1)
    row_g = pl.program_id(1) * TH - 1 + row                    # global row of h
    inside = (row_g >= 0) & (row_g < valid_h) & (col < valid_w)
    h = jnp.where(inside, h, 0.0).astype(dt)
    zcol = jnp.zeros((He, 1, C), dt)
    hp = jnp.concatenate([zcol, h, zcol], axis=1)              # (He, Wp+2, C)

    # ---- conv2 (+bias), *res_scale, + identity ------------------------------
    taps2 = []
    for dy in range(3):
        hr = hp[dy:dy + TH]
        for dx in range(3):
            taps2.append(hr[:, dx:dx + Wp, :])
    slab2 = jnp.concatenate(taps2, axis=-1).reshape(TH * Wp, 9 * C)
    y = jnp.dot(slab2, w2_ref[...], preferred_element_type=jnp.float32)
    y = y + b2_ref[...].astype(jnp.float32)
    identity = x[2:2 + TH, 2:2 + Wp, :].astype(jnp.float32).reshape(TH * Wp, C)
    o_ref[0] = (y * res_scale + identity).astype(o_ref.dtype)


# --------------------------------------------------------------------------
# Wrappers
# --------------------------------------------------------------------------
def conv3x3_nhwc(x, w, b, *, relu=False, residual=None, scale=1.0, tile_h=None):
    """Row-tiled 3x3 'same' conv. x: (N,H,W,Cin), w: (3,3,Cin,Cout), b: (Cout,).

    If `residual` is given (shape (N,H,W,Cout)), returns conv*scale + residual.
    """
    N, H, W, Cin = x.shape
    Cout = w.shape[-1]
    dtype = x.dtype
    itemsize = jnp.dtype(dtype).itemsize

    # Lane/sublane friendliness: Cin -> multiple of 8 (handles the Cin=3 stem
    # conv), W -> multiple of 8 (keeps in-kernel reshapes layout-preserving).
    # Zero padding is exact for a 'same' conv; padded rows/cols are cropped.
    Cin_p = max(8, _round_up(Cin, 8))
    Wp = max(8, _round_up(W, 8))
    if Cin_p != Cin:
        x = jnp.pad(x, ((0, 0), (0, 0), (0, 0), (0, Cin_p - Cin)))
        w = jnp.pad(w, ((0, 0), (0, 0), (0, Cin_p - Cin), (0, 0)))

    cap, limit = _vmem_info()
    budget = int(limit * 0.6)
    max_th = 256 if cap >= 96 * 1024 * 1024 else 64
    n_res = 1 if residual is None else 2

    def est(th):   # double-buffered DMA blocks + in-kernel im2col intermediates
        dma = 2 * itemsize * (th * (Wp + 2) * Cin_p + 2 * (Wp + 2) * Cin_p
                              + n_res * th * Wp * Cout)
        dma += 2 * itemsize * (9 * Cin_p * Cout + Cout)
        interm = itemsize * ((th + 2) * (Wp + 2) * Cin_p + th * Wp * 9 * Cin_p)
        interm += 4 * 2 * th * Wp * Cout
        return dma + interm

    TH = _choose_tile_h(H, N, est, budget, max_th, tile_h)
    Hp = _round_up(H, TH)
    n_tiles = Hp // TH

    xp = jnp.pad(x, ((0, 0), (1, 1 + Hp - H), (1, 1 + Wp - W), (0, 0)))
    wmat = w.reshape(9 * Cin_p, Cout)
    brow = b.reshape(1, Cout)

    xm_spec = pl.BlockSpec((1, TH, Wp + 2, Cin_p), lambda n, i: (n, i, 0, 0))
    xh_spec = pl.BlockSpec((1, 2, Wp + 2, Cin_p),
                           lambda n, i: (n, (i + 1) * (TH // 2), 0, 0))
    w_spec = pl.BlockSpec((9 * Cin_p, Cout), lambda n, i: (0, 0))
    b_spec = pl.BlockSpec((1, Cout), lambda n, i: (0, 0))
    o_spec = pl.BlockSpec((1, TH * Wp, Cout), lambda n, i: (n, i, 0))

    if residual is None:
        kernel = functools.partial(_conv3x3_kernel, relu=relu)
        in_specs = [xm_spec, xh_spec, w_spec, b_spec]
        args = (xp, xp, wmat, brow)
    else:
        r = jnp.pad(residual, ((0, 0), (0, Hp - H), (0, Wp - W), (0, 0)))
        r = r.reshape(N, Hp * Wp, Cout)
        kernel = functools.partial(_conv3x3_res_kernel, scale=scale)
        r_spec = pl.BlockSpec((1, TH * Wp, Cout), lambda n, i: (n, i, 0))
        in_specs = [xm_spec, xh_spec, w_spec, b_spec, r_spec]
        args = (xp, xp, wmat, brow, r)

    flops = int(2 * 9 * N * Hp * Wp * Cin_p * Cout)
    bytes_accessed = int(itemsize * N * ((Hp + 2) * (Wp + 2) * Cin_p
                                         + n_res * Hp * Wp * Cout)
                         + itemsize * (9 * Cin_p * Cout + Cout))

    out = pl.pallas_call(
        kernel,
        out_shape=jax.ShapeDtypeStruct((N, Hp * Wp, Cout), dtype),
        grid_spec=pltpu.PrefetchScalarGridSpec(
            num_scalar_prefetch=0,
            grid=(N, n_tiles),
            in_specs=in_specs,
            out_specs=o_spec),
        compiler_params=pltpu.CompilerParams(
            dimension_semantics=("parallel", "parallel"),
            vmem_limit_bytes=limit),
        cost_estimate=pl.CostEstimate(flops=flops, transcendentals=0,
                                      bytes_accessed=bytes_accessed),
    )(*args)
    out = out.reshape(N, Hp, Wp, Cout)
    return out[:, :H, :W, :]


def residual_block_nhwc(x, w1, b1, w2, b2, *, res_scale=0.1, tile_h=None):
    """Fused EDSR residual block: conv -> ReLU -> conv, *res_scale, + identity."""
    N, H, W, C = x.shape
    dtype = x.dtype
    itemsize = jnp.dtype(dtype).itemsize
    Wp = max(8, _round_up(W, 8))

    cap, limit = _vmem_info()
    budget = int(limit * 0.6)
    max_th = 256 if cap >= 96 * 1024 * 1024 else 64

    def est(th):
        dma = 2 * itemsize * (th * (Wp + 4) * C + 4 * (Wp + 4) * C + th * Wp * C)
        dma += 4 * itemsize * (9 * C * C + C)
        interm = itemsize * ((th + 4) * (Wp + 4) * C
                             + (th + 2) * Wp * 9 * C      # conv1 im2col slab
                             + (th + 2) * (Wp + 2) * C    # masked h (compute dt)
                             + th * Wp * 9 * C)           # conv2 im2col slab
        interm += 4 * ((th + 2) * Wp * C + 2 * th * Wp * C)   # f32 h / acc / out
        return dma + interm

    TH = _choose_tile_h(H, N, est, budget, max_th, tile_h)
    Hp = _round_up(H, TH)
    n_tiles = Hp // TH

    xp = jnp.pad(x, ((0, 0), (2, 2 + Hp - H), (2, 2 + Wp - W), (0, 0)))
    w1m, w2m = w1.reshape(9 * C, C), w2.reshape(9 * C, C)
    b1r, b2r = b1.reshape(1, C), b2.reshape(1, C)

    xm_spec = pl.BlockSpec((1, TH, Wp + 4, C), lambda n, i: (n, i, 0, 0))
    xh_spec = pl.BlockSpec((1, 4, Wp + 4, C),
                           lambda n, i: (n, (i + 1) * (TH // 4), 0, 0))
    w_spec = pl.BlockSpec((9 * C, C), lambda n, i: (0, 0))
    b_spec = pl.BlockSpec((1, C), lambda n, i: (0, 0))
    o_spec = pl.BlockSpec((1, TH * Wp, C), lambda n, i: (n, i, 0))

    flops = int(2 * 9 * N * C * C * ((Hp + 2) * Wp + Hp * Wp))
    bytes_accessed = int(itemsize * N * ((Hp + 4) * (Wp + 4) * C + Hp * Wp * C)
                         + 2 * itemsize * (9 * C * C + C))

    kernel = functools.partial(_resblock_kernel, res_scale=res_scale,
                               valid_h=H, valid_w=W)
    out = pl.pallas_call(
        kernel,
        out_shape=jax.ShapeDtypeStruct((N, Hp * Wp, C), dtype),
        grid_spec=pltpu.PrefetchScalarGridSpec(
            num_scalar_prefetch=0,
            grid=(N, n_tiles),
            in_specs=[xm_spec, xh_spec, w_spec, b_spec, w_spec, b_spec],
            out_specs=o_spec),
        compiler_params=pltpu.CompilerParams(
            dimension_semantics=("parallel", "parallel"),
            vmem_limit_bytes=limit),
        cost_estimate=pl.CostEstimate(flops=flops, transcendentals=0,
                                      bytes_accessed=bytes_accessed),
    )(xp, xp, w1m, b1r, w2m, b2r)
    out = out.reshape(N, Hp, Wp, C)
    return out[:, :H, :W, :]


# --------------------------------------------------------------------------
# EDSR parameters + forward
# --------------------------------------------------------------------------
def init_edsr_params(key, in_channels=3, out_channels=64, channels=64,
                     num_blocks=16, dtype=jnp.float32):
    """Deterministic synthetic weights (HWIO layout)."""
    def conv_init(k, cin, cout):
        kw, kb = jax.random.split(k)
        w = 0.05 * jax.random.normal(kw, (3, 3, cin, cout), dtype)
        b = 0.05 * jax.random.normal(kb, (cout,), dtype)
        return w, b

    keys = jax.random.split(key, 2 + 2 * num_blocks)
    conv1_w, conv1_b = conv_init(keys[0], in_channels, channels)
    conv2_w, conv2_b = conv_init(keys[1], channels, out_channels)
    blocks = []
    for i in range(num_blocks):
        w1, b1 = conv_init(keys[2 + 2 * i], channels, channels)
        w2, b2 = conv_init(keys[3 + 2 * i], channels, channels)
        blocks.append((w1, b1, w2, b2))
    return {"conv1_w": conv1_w, "conv1_b": conv1_b,
            "conv2_w": conv2_w, "conv2_b": conv2_b,
            "blocks": blocks}


def edsr_forward(params, x_nchw, *, act_dtype=None, tile_h=None):
    """Matches _EDSR.forward: conv1 -> residual trunk -> conv2 + out1.

    act_dtype=jnp.bfloat16 runs the trunk in bf16 (f32 MXU accumulation).
    """
    in_dtype = x_nchw.dtype
    x = jnp.transpose(x_nchw, (0, 2, 3, 1))                  # NCHW -> NHWC
    if act_dtype is not None:
        x = x.astype(act_dtype)
        params = jax.tree_util.tree_map(lambda p: p.astype(act_dtype), params)

    out1 = conv3x3_nhwc(x, params["conv1_w"], params["conv1_b"], tile_h=tile_h)
    out = out1
    for (w1, b1, w2, b2) in params["blocks"]:
        out = residual_block_nhwc(out, w1, b1, w2, b2, res_scale=0.1,
                                  tile_h=tile_h)
    # fused: conv2(out) + out1
    out = conv3x3_nhwc(out, params["conv2_w"], params["conv2_b"],
                       residual=out1, scale=1.0, tile_h=tile_h)
    out = jnp.transpose(out, (0, 3, 1, 2))                   # NHWC -> NCHW
    return out.astype(in_dtype) if act_dtype is not None else out


# --------------------------------------------------------------------------
# Pure-JAX reference (for correctness check)
# --------------------------------------------------------------------------
def _conv3x3_ref(x, w, b):
    y = jax.lax.conv_general_dilated(
        x, w, window_strides=(1, 1), padding="SAME",
        dimension_numbers=("NHWC", "HWIO", "NHWC"))
    return y + b


def edsr_reference(params, x_nchw):
    x = jnp.transpose(x_nchw, (0, 2, 3, 1))
    out1 = _conv3x3_ref(x, params["conv1_w"], params["conv1_b"])
    out = out1
    for (w1, b1, w2, b2) in params["blocks"]:
        h = jnp.maximum(_conv3x3_ref(out, w1, b1), 0.0)
        out = _conv3x3_ref(h, w2, b2) * 0.1 + out
    out = _conv3x3_ref(out, params["conv2_w"], params["conv2_b"]) + out1
    return jnp.transpose(out, (0, 3, 1, 2))


# --------------------------------------------------------------------------
if __name__ == "__main__":
    key = jax.random.PRNGKey(0)
    kp, kx = jax.random.split(key)

    # Small, module-consistent shapes.
    in_channels, out_channels, channels, num_blocks = 3, 8, 8, 2
    N, H, W = 2, 16, 16

    params = init_edsr_params(kp, in_channels, out_channels, channels,
                              num_blocks)
    x = jax.random.normal(kx, (N, in_channels, H, W), jnp.float32)

    ref = jax.block_until_ready(edsr_reference(params, x))

    # f32 path; tile_h=8 -> two row tiles per image, exercising halo/tiling.
    fwd = jax.jit(functools.partial(edsr_forward, tile_h=8))
    out = jax.block_until_ready(fwd(params, x))
    assert out.shape == (N, out_channels, H, W), out.shape
    np.testing.assert_allclose(np.asarray(out), np.asarray(ref),
                               rtol=1e-2, atol=1e-2)

    # bf16 trunk (f32 accumulation in-kernel) -- the fast path on all TPU gens.
    fwd_bf16 = jax.jit(functools.partial(edsr_forward,
                                         act_dtype=jnp.bfloat16, tile_h=8))
    out_bf16 = jax.block_until_ready(fwd_bf16(params, x))
    assert out_bf16.shape == (N, out_channels, H, W), out_bf16.shape
    np.testing.assert_allclose(np.asarray(out_bf16), np.asarray(ref),
                               rtol=5e-2, atol=5e-2)

    print("KERNEL_OK")
</pallas_src>

<mosaic_0001>
module attributes {stable_mosaic.version = 11 : i64} {
  func.func @_conv3x3_kernel(%arg0: i32, %arg1: i32, %arg2: memref<1x8x18x8xf32, #tpu.memory_space<vmem>>, %arg3: memref<1x2x18x8xf32, #tpu.memory_space<vmem>>, %arg4: memref<72x8xf32, #tpu.memory_space<vmem>>, %arg5: memref<1x8xf32, #tpu.memory_space<vmem>>, %arg6: memref<1x128x8xf32, #tpu.memory_space<vmem>>) attributes {dimension_semantics = [#tpu.dimension_semantics<parallel>, #tpu.dimension_semantics<parallel>], iteration_bounds = array<i64: 2, 2>, scalar_prefetch = 0 : i64, scratch_operands = 0 : i64, tpu.core_type = #tpu.core_type<tc>, window_params = [{transform_indices = @transform_0, window_bounds = array<i64: 1, 8, 18, 8>}, {transform_indices = @transform_1, window_bounds = array<i64: 1, 2, 18, 8>}, {pipeline_mode = #tpu.pipeline_mode<synchronous>, transform_indices = @transform_2, window_bounds = array<i64: 72, 8>}, {pipeline_mode = #tpu.pipeline_mode<synchronous>, transform_indices = @transform_3, window_bounds = array<i64: 1, 8>}, {transform_indices = @transform_4, window_bounds = array<i64: 1, 128, 8>}]} {
    %c0 = arith.constant 0 : index
    %c0_0 = arith.constant 0 : index
    %c0_1 = arith.constant 0 : index
    %c0_2 = arith.constant 0 : index
    %0 = vector.load %arg2[%c0, %c0_0, %c0_1, %c0_2] : memref<1x8x18x8xf32, #tpu.memory_space<vmem>>, vector<1x8x18x8xf32>
    %1 = vector.shape_cast %0 : vector<1x8x18x8xf32> to vector<8x18x8xf32>
    %c0_3 = arith.constant 0 : index
    %c0_4 = arith.constant 0 : index
    %c0_5 = arith.constant 0 : index
    %c0_6 = arith.constant 0 : index
    %2 = vector.load %arg3[%c0_3, %c0_4, %c0_5, %c0_6] : memref<1x2x18x8xf32, #tpu.memory_space<vmem>>, vector<1x2x18x8xf32>
    %3 = vector.shape_cast %2 : vector<1x2x18x8xf32> to vector<2x18x8xf32>
    %4 = tpu.concatenate %1, %3 in 0 : vector<8x18x8xf32>, vector<2x18x8xf32> -> vector<10x18x8xf32>
    %5 = vector.extract_strided_slice %4 {offsets = [0, 0, 0], sizes = [8, 18, 8], strides = [1, 1, 1]} : vector<10x18x8xf32> to vector<8x18x8xf32>
    %6 = vector.extract_strided_slice %5 {offsets = [0, 0, 0], sizes = [8, 16, 8], strides = [1, 1, 1]} : vector<8x18x8xf32> to vector<8x16x8xf32>
    %7 = vector.extract_strided_slice %5 {offsets = [0, 1, 0], sizes = [8, 16, 8], strides = [1, 1, 1]} : vector<8x18x8xf32> to vector<8x16x8xf32>
    %8 = vector.extract_strided_slice %5 {offsets = [0, 2, 0], sizes = [8, 16, 8], strides = [1, 1, 1]} : vector<8x18x8xf32> to vector<8x16x8xf32>
    %9 = vector.extract_strided_slice %4 {offsets = [1, 0, 0], sizes = [8, 18, 8], strides = [1, 1, 1]} : vector<10x18x8xf32> to vector<8x18x8xf32>
    %10 = vector.extract_strided_slice %9 {offsets = [0, 0, 0], sizes = [8, 16, 8], strides = [1, 1, 1]} : vector<8x18x8xf32> to vector<8x16x8xf32>
    %11 = vector.extract_strided_slice %9 {offsets = [0, 1, 0], sizes = [8, 16, 8], strides = [1, 1, 1]} : vector<8x18x8xf32> to vector<8x16x8xf32>
    %12 = vector.extract_strided_slice %9 {offsets = [0, 2, 0], sizes = [8, 16, 8], strides = [1, 1, 1]} : vector<8x18x8xf32> to vector<8x16x8xf32>
    %13 = vector.extract_strided_slice %4 {offsets = [2, 0, 0], sizes = [8, 18, 8], strides = [1, 1, 1]} : vector<10x18x8xf32> to vector<8x18x8xf32>
    %14 = vector.extract_strided_slice %13 {offsets = [0, 0, 0], sizes = [8, 16, 8], strides = [1, 1, 1]} : vector<8x18x8xf32> to vector<8x16x8xf32>
    %15 = vector.extract_strided_slice %13 {offsets = [0, 1, 0], sizes = [8, 16, 8], strides = [1, 1, 1]} : vector<8x18x8xf32> to vector<8x16x8xf32>
    %16 = vector.extract_strided_slice %13 {offsets = [0, 2, 0], sizes = [8, 16, 8], strides = [1, 1, 1]} : vector<8x18x8xf32> to vector<8x16x8xf32>
    %17 = tpu.concatenate %6, %7, %8, %10, %11, %12, %14, %15, %16 in 2 : vector<8x16x8xf32>, vector<8x16x8xf32>, vector<8x16x8xf32>, vector<8x16x8xf32>, vector<8x16x8xf32>, vector<8x16x8xf32>, vector<8x16x8xf32>, vector<8x16x8xf32>, vector<8x16x8xf32> -> vector<8x16x72xf32>
    %18 = vector.shape_cast %17 : vector<8x16x72xf32> to vector<128x72xf32>
    %c0_7 = arith.constant 0 : index
    %c0_8 = arith.constant 0 : index
    %19 = vector.load %arg4[%c0_7, %c0_8] : memref<72x8xf32, #tpu.memory_space<vmem>>, vector<72x8xf32>
    %cst = arith.constant dense<0.000000e+00> : vector<128x8xf32>
    %20 = tpu.matmul %18, %19, %cst {dimension_numbers = #tpu.dot_dimension_numbers<[1], [0], [0], [1], [0, 0, 1, 1], [], []>} : vector<128x72xf32>, vector<72x8xf32>, vector<128x8xf32> -> vector<128x8xf32>
    %c0_9 = arith.constant 0 : index
    %c0_10 = arith.constant 0 : index
    %21 = vector.load %arg5[%c0_9, %c0_10] : memref<1x8xf32, #tpu.memory_space<vmem>>, vector<1x8xf32>
    %22 = vector.broadcast %21 : vector<1x8xf32> to vector<128x8xf32>
    %23 = arith.addf %20, %22 : vector<128x8xf32>
    %c0_11 = arith.constant 0 : index
    %c0_12 = arith.constant 0 : index
    %c0_13 = arith.constant 0 : index
    %24 = vector.load %arg6[%c0_11, %c0_12, %c0_13] : memref<1x128x8xf32, #tpu.memory_space<vmem>>, vector<1x128x8xf32>
    %25 = vector.shape_cast %24 : vector<1x128x8xf32> to vector<128x8xf32>
    %26 = vector.shape_cast %23 : vector<128x8xf32> to vector<1x128x8xf32>
    tpu.vector_store %arg6[%c0_11, %c0_12, %c0_13], %26 {strides = array<i32>} : memref<1x128x8xf32, #tpu.memory_space<vmem>>, vector<1x128x8xf32>,
    return
  }
  func.func @transform_0(%arg0: i32, %arg1: i32) -> (i32, i32, i32, i32) {
    %c0_i32 = arith.constant 0 : i32
    %c0_i32_0 = arith.constant 0 : i32
    %c0_i32_1 = arith.constant 0 : i32
    return %arg0, %arg1, %c0_i32, %c0_i32_0 : i32, i32, i32, i32
  }
  func.func @transform_1(%arg0: i32, %arg1: i32) -> (i32, i32, i32, i32) {
    %c1_i32 = arith.constant 1 : i32
    %0 = arith.addi %arg1, %c1_i32 : i32
    %c4_i32 = arith.constant 4 : i32
    %1 = arith.muli %0, %c4_i32 : i32
    %c0_i32 = arith.constant 0 : i32
    %c0_i32_0 = arith.constant 0 : i32
    %c0_i32_1 = arith.constant 0 : i32
    return %arg0, %1, %c0_i32, %c0_i32_0 : i32, i32, i32, i32
  }
  func.func @transform_2(%arg0: i32, %arg1: i32) -> (i32, i32) {
    %c0_i32 = arith.constant 0 : i32
    %c0_i32_0 = arith.constant 0 : i32
    %c0_i32_1 = arith.constant 0 : i32
    return %c0_i32, %c0_i32_0 : i32, i32
  }
  func.func @transform_3(%arg0: i32, %arg1: i32) -> (i32, i32) {
    %c0_i32 = arith.constant 0 : i32
    %c0_i32_0 = arith.constant 0 : i32
    %c0_i32_1 = arith.constant 0 : i32
    return %c0_i32, %c0_i32_0 : i32, i32
  }
  func.func @transform_4(%arg0: i32, %arg1: i32) -> (i32, i32, i32) {
    %c0_i32 = arith.constant 0 : i32
    %c0_i32_0 = arith.constant 0 : i32
    return %arg0, %arg1, %c0_i32 : i32, i32, i32
  }
}

module attributes {stable_mosaic.version = 11 : i64} {
  func.func @_resblock_kernel(%arg0: i32, %arg1: i32, %arg2: memref<1x8x20x8xf32, #tpu.memory_space<vmem>>, %arg3: memref<1x4x20x8xf32, #tpu.memory_space<vmem>>, %arg4: memref<72x8xf32, #tpu.memory_space<vmem>>, %arg5: memref<1x8xf32, #tpu.memory_space<vmem>>, %arg6: memref<72x8xf32, #tpu.memory_space<vmem>>, %arg7: memref<1x8xf32, #tpu.memory_space<vmem>>, %arg8: memref<1x128x8xf32, #tpu.memory_space<vmem>>) attributes {dimension_semantics = [#tpu.dimension_semantics<parallel>, #tpu.dimension_semantics<parallel>], iteration_bounds = array<i64: 2, 2>, scalar_prefetch = 0 : i64, scratch_operands = 0 : i64, tpu.core_type = #tpu.core_type<tc>, window_params = [{transform_indices = @transform_0, window_bounds = array<i64: 1, 8, 20, 8>}, {transform_indices = @transform_1, window_bounds = array<i64: 1, 4, 20, 8>}, {pipeline_mode = #tpu.pipeline_mode<synchronous>, transform_indices = @transform_2, window_bounds = array<i64: 72, 8>}, {pipeline_mode = #tpu.pipeline_mode<synchronous>, transform_indices = @transform_3, window_bounds = array<i64: 1, 8>}, {pipeline_mode = #tpu.pipeline_mode<synchronous>, transform_indices = @transform_4, window_bounds = array<i64: 72, 8>}, {pipeline_mode = #tpu.pipeline_mode<synchronous>, transform_indices = @transform_5, window_bounds = array<i64: 1, 8>}, {transform_indices = @transform_6, window_bounds = array<i64: 1, 128, 8>}]} {
    %c0 = arith.constant 0 : index
    %c0_0 = arith.constant 0 : index
    %c0_1 = arith.constant 0 : index
    %c0_2 = arith.constant 0 : index
    %0 = vector.load %arg2[%c0, %c0_0, %c0_1, %c0_2] : memref<1x8x20x8xf32, #tpu.memory_space<vmem>>, vector<1x8x20x8xf32>
    %1 = vector.shape_cast %0 : vector<1x8x20x8xf32> to vector<8x20x8xf32>
    %c0_3 = arith.constant 0 : index
    %c0_4 = arith.constant 0 : index
    %c0_5 = arith.constant 0 : index
    %c0_6 = arith.constant 0 : index
    %2 = vector.load %arg3[%c0_3, %c0_4, %c0_5, %c0_6] : memref<1x4x20x8xf32, #tpu.memory_space<vmem>>, vector<1x4x20x8xf32>
    %3 = vector.shape_cast %2 : vector<1x4x20x8xf32> to vector<4x20x8xf32>
    %4 = tpu.concatenate %1, %3 in 0 : vector<8x20x8xf32>, vector<4x20x8xf32> -> vector<12x20x8xf32>
    %5 = vector.extract_strided_slice %4 {offsets = [0, 0, 0], sizes = [10, 20, 8], strides = [1, 1, 1]} : vector<12x20x8xf32> to vector<10x20x8xf32>
    %6 = vector.extract_strided_slice %5 {offsets = [0, 1, 0], sizes = [10, 16, 8], strides = [1, 1, 1]} : vector<10x20x8xf32> to vector<10x16x8xf32>
    %7 = vector.extract_strided_slice %5 {offsets = [0, 2, 0], sizes = [10, 16, 8], strides = [1, 1, 1]} : vector<10x20x8xf32> to vector<10x16x8xf32>
    %8 = vector.extract_strided_slice %5 {offsets = [0, 3, 0], sizes = [10, 16, 8], strides = [1, 1, 1]} : vector<10x20x8xf32> to vector<10x16x8xf32>
    %9 = vector.extract_strided_slice %4 {offsets = [1, 0, 0], sizes = [10, 20, 8], strides = [1, 1, 1]} : vector<12x20x8xf32> to vector<10x20x8xf32>
    %10 = vector.extract_strided_slice %9 {offsets = [0, 1, 0], sizes = [10, 16, 8], strides = [1, 1, 1]} : vector<10x20x8xf32> to vector<10x16x8xf32>
    %11 = vector.extract_strided_slice %9 {offsets = [0, 2, 0], sizes = [10, 16, 8], strides = [1, 1, 1]} : vector<10x20x8xf32> to vector<10x16x8xf32>
    %12 = vector.extract_strided_slice %9 {offsets = [0, 3, 0], sizes = [10, 16, 8], strides = [1, 1, 1]} : vector<10x20x8xf32> to vector<10x16x8xf32>
    %13 = vector.extract_strided_slice %4 {offsets = [2, 0, 0], sizes = [10, 20, 8], strides = [1, 1, 1]} : vector<12x20x8xf32> to vector<10x20x8xf32>
    %14 = vector.extract_strided_slice %13 {offsets = [0, 1, 0], sizes = [10, 16, 8], strides = [1, 1, 1]} : vector<10x20x8xf32> to vector<10x16x8xf32>
    %15 = vector.extract_strided_slice %13 {offsets = [0, 2, 0], sizes = [10, 16, 8], strides = [1, 1, 1]} : vector<10x20x8xf32> to vector<10x16x8xf32>
    %16 = vector.extract_strided_slice %13 {offsets = [0, 3, 0], sizes = [10, 16, 8], strides = [1, 1, 1]} : vector<10x20x8xf32> to vector<10x16x8xf32>
    %17 = tpu.concatenate %6, %7, %8, %10, %11, %12, %14, %15, %16 in 2 : vector<10x16x8xf32>, vector<10x16x8xf32>, vector<10x16x8xf32>, vector<10x16x8xf32>, vector<10x16x8xf32>, vector<10x16x8xf32>, vector<10x16x8xf32>, vector<10x16x8xf32>, vector<10x16x8xf32> -> vector<10x16x72xf32>
    %18 = vector.shape_cast %17 : vector<10x16x72xf32> to vector<160x72xf32>
    %c0_7 = arith.constant 0 : index
    %c0_8 = arith.constant 0 : index
    %19 = vector.load %arg4[%c0_7, %c0_8] : memref<72x8xf32, #tpu.memory_space<vmem>>, vector<72x8xf32>
    %cst = arith.constant dense<0.000000e+00> : vector<160x8xf32>
    %20 = tpu.matmul %18, %19, %cst {dimension_numbers = #tpu.dot_dimension_numbers<[1], [0], [0], [1], [0, 0, 1, 1], [], []>} : vector<160x72xf32>, vector<72x8xf32>, vector<160x8xf32> -> vector<160x8xf32>
    %c0_9 = arith.constant 0 : index
    %c0_10 = arith.constant 0 : index
    %21 = vector.load %arg5[%c0_9, %c0_10] : memref<1x8xf32, #tpu.memory_space<vmem>>, vector<1x8xf32>
    %22 = vector.broadcast %21 : vector<1x8xf32> to vector<160x8xf32>
    %23 = arith.addf %20, %22 : vector<160x8xf32>
    %cst_11 = arith.constant 0.000000e+00 : f32
    %24 = vector.broadcast %cst_11 : f32 to vector<160x8xf32>
    %25 = arith.maximumf %23, %24 : vector<160x8xf32>
    %26 = vector.shape_cast %25 : vector<160x8xf32> to vector<10x16x8xf32>
    %27 = tpu.iota {dimensions = array<i32: 0>} : vector<10x16x1xi32>
    %28 = tpu.iota {dimensions = array<i32: 1>} : vector<10x16x1xi32>
    %c8_i32 = arith.constant 8 : i32
    %29 = arith.muli %arg1, %c8_i32 : i32
    %c1_i32 = arith.constant 1 : i32
    %30 = arith.subi %29, %c1_i32 : i32
    %31 = vector.broadcast %30 : i32 to vector<10x16x1xi32>
    %32 = arith.addi %31, %27 : vector<10x16x1xi32>
    %c0_i32 = arith.constant 0 : i32
    %33 = vector.broadcast %c0_i32 : i32 to vector<10x16x1xi32>
    %34 = arith.cmpi sge, %32, %33 : vector<10x16x1xi32>
    %c16_i32 = arith.constant 16 : i32
    %35 = vector.broadcast %c16_i32 : i32 to vector<10x16x1xi32>
    %36 = arith.cmpi slt, %32, %35 : vector<10x16x1xi32>
    %37 = arith.andi %34, %36 : vector<10x16x1xi1>
    %c16_i32_12 = arith.constant 16 : i32
    %38 = vector.broadcast %c16_i32_12 : i32 to vector<10x16x1xi32>
    %39 = arith.cmpi slt, %28, %38 : vector<10x16x1xi32>
    %40 = arith.andi %37, %39 : vector<10x16x1xi1>
    %cst_13 = arith.constant 0.000000e+00 : f32
    %41 = vector.shape_cast %40 : vector<10x16x1xi1> to vector<10x16x1xi1>
    %42 = vector.broadcast %41 : vector<10x16x1xi1> to vector<10x16x8xi1>
    %43 = vector.broadcast %cst_13 : f32 to vector<10x16x8xf32>
    %44 = arith.select %42, %26, %43 : vector<10x16x8xi1>, vector<10x16x8xf32>
    %cst_14 = arith.constant 0.000000e+00 : f32
    %45 = vector.broadcast %cst_14 : f32 to vector<10x1x8xf32>
    %46 = tpu.concatenate %45, %44, %45 in 1 : vector<10x1x8xf32>, vector<10x16x8xf32>, vector<10x1x8xf32> -> vector<10x18x8xf32>
    %47 = vector.extract_strided_slice %46 {offsets = [0, 0, 0], sizes = [8, 18, 8], strides = [1, 1, 1]} : vector<10x18x8xf32> to vector<8x18x8xf32>
    %48 = vector.extract_strided_slice %47 {offsets = [0, 0, 0], sizes = [8, 16, 8], strides = [1, 1, 1]} : vector<8x18x8xf32> to vector<8x16x8xf32>
    %49 = vector.extract_strided_slice %47 {offsets = [0, 1, 0], sizes = [8, 16, 8], strides = [1, 1, 1]} : vector<8x18x8xf32> to vector<8x16x8xf32>
    %50 = vector.extract_strided_slice %47 {offsets = [0, 2, 0], sizes = [8, 16, 8], strides = [1, 1, 1]} : vector<8x18x8xf32> to vector<8x16x8xf32>
    %51 = vector.extract_strided_slice %46 {offsets = [1, 0, 0], sizes = [8, 18, 8], strides = [1, 1, 1]} : vector<10x18x8xf32> to vector<8x18x8xf32>
    %52 = vector.extract_strided_slice %51 {offsets = [0, 0, 0], sizes = [8, 16, 8], strides = [1, 1, 1]} : vector<8x18x8xf32> to vector<8x16x8xf32>
    %53 = vector.extract_strided_slice %51 {offsets = [0, 1, 0], sizes = [8, 16, 8], strides = [1, 1, 1]} : vector<8x18x8xf32> to vector<8x16x8xf32>
    %54 = vector.extract_strided_slice %51 {offsets = [0, 2, 0], sizes = [8, 16, 8], strides = [1, 1, 1]} : vector<8x18x8xf32> to vector<8x16x8xf32>
    %55 = vector.extract_strided_slice %46 {offsets = [2, 0, 0], sizes = [8, 18, 8], strides = [1, 1, 1]} : vector<10x18x8xf32> to vector<8x18x8xf32>
    %56 = vector.extract_strided_slice %55 {offsets = [0, 0, 0], sizes = [8, 16, 8], strides = [1, 1, 1]} : vector<8x18x8xf32> to vector<8x16x8xf32>
    %57 = vector.extract_strided_slice %55 {offsets = [0, 1, 0], sizes = [8, 16, 8], strides = [1, 1, 1]} : vector<8x18x8xf32> to vector<8x16x8xf32>
    %58 = vector.extract_strided_slice %55 {offsets = [0, 2, 0], sizes = [8, 16, 8], strides = [1, 1, 1]} : vector<8x18x8xf32> to vector<8x16x8xf32>
    %59 = tpu.concatenate %48, %49, %50, %52, %53, %54, %56, %57, %58 in 2 : vector<8x16x8xf32>, vector<8x16x8xf32>, vector<8x16x8xf32>, vector<8x16x8xf32>, vector<8x16x8xf32>, vector<8x16x8xf32>, vector<8x16x8xf32>, vector<8x16x8xf32>, vector<8x16x8xf32> -> vector<8x16x72xf32>
    %60 = vector.shape_cast %59 : vector<8x16x72xf32> to vector<128x72xf32>
    %c0_15 = arith.constant 0 : index
    %c0_16 = arith.constant 0 : index
    %61 = vector.load %arg6[%c0_15, %c0_16] : memref<72x8xf32, #tpu.memory_space<vmem>>, vector<72x8xf32>
    %cst_17 = arith.constant dense<0.000000e+00> : vector<128x8xf32>
    %62 = tpu.matmul %60, %61, %cst_17 {dimension_numbers = #tpu.dot_dimension_numbers<[1], [0], [0], [1], [0, 0, 1, 1], [], []>} : vector<128x72xf32>, vector<72x8xf32>, vector<128x8xf32> -> vector<128x8xf32>
    %c0_18 = arith.constant 0 : index
    %c0_19 = arith.constant 0 : index
    %63 = vector.load %arg7[%c0_18, %c0_19] : memref<1x8xf32, #tpu.memory_space<vmem>>, vector<1x8xf32>
    %64 = vector.broadcast %63 : vector<1x8xf32> to vector<128x8xf32>
    %65 = arith.addf %62, %64 : vector<128x8xf32>
    %66 = vector.extract_strided_slice %4 {offsets = [2, 2, 0], sizes = [8, 16, 8], strides = [1, 1, 1]} : vector<12x20x8xf32> to vector<8x16x8xf32>
    %67 = vector.shape_cast %66 : vector<8x16x8xf32> to vector<128x8xf32>
    %cst_20 = arith.constant 1.000000e-01 : f32
    %68 = vector.broadcast %cst_20 : f32 to vector<128x8xf32>
    %69 = arith.mulf %65, %68 : vector<128x8xf32>
    %70 = arith.addf %69, %67 : vector<128x8xf32>
    %c0_21 = arith.constant 0 : index
    %c0_22 = arith.constant 0 : index
    %c0_23 = arith.constant 0 : index
    %71 = vector.load %arg8[%c0_21, %c0_22, %c0_23] : memref<1x128x8xf32, #tpu.memory_space<vmem>>, vector<1x128x8xf32>
    %72 = vector.shape_cast %71 : vector<1x128x8xf32> to vector<128x8xf32>
    %73 = vector.shape_cast %70 : vector<128x8xf32> to vector<1x128x8xf32>
    tpu.vector_store %arg8[%c0_21, %c0_22, %c0_23], %73 {strides = array<i32>} : memref<1x128x8xf32, #tpu.memory_space<vmem>>, vector<1x128x8xf32>,
    return
  }
  func.func @transform_0(%arg0: i32, %arg1: i32) -> (i32, i32, i32, i32) {
    %c0_i32 = arith.constant 0 : i32
    %c0_i32_0 = arith.constant 0 : i32
    %c0_i32_1 = arith.constant 0 : i32
    return %arg0, %arg1, %c0_i32, %c0_i32_0 : i32, i32, i32, i32
  }
  func.func @transform_1(%arg0: i32, %arg1: i32) -> (i32, i32, i32, i32) {
    %c1_i32 = arith.constant 1 : i32
    %0 = arith.addi %arg1, %c1_i32 : i32
    %c2_i32 = arith.constant 2 : i32
    %1 = arith.muli %0, %c2_i32 : i32
    %c0_i32 = arith.constant 0 : i32
    %c0_i32_0 = arith.constant 0 : i32
    %c0_i32_1 = arith.constant 0 : i32
    return %arg0, %1, %c0_i32, %c0_i32_0 : i32, i32, i32, i32
  }
  func.func @transform_2(%arg0: i32, %arg1: i32) -> (i32, i32) {
    %c0_i32 = arith.constant 0 : i32
    %c0_i32_0 = arith.constant 0 : i32
    %c0_i32_1 = arith.constant 0 : i32
    return %c0_i32, %c0_i32_0 : i32, i32
  }
  func.func @transform_3(%arg0: i32, %arg1: i32) -> (i32, i32) {
    %c0_i32 = arith.constant 0 : i32
    %c0_i32_0 = arith.constant 0 : i32
    %c0_i32_1 = arith.constant 0 : i32
    return %c0_i32, %c0_i32_0 : i32, i32
  }
  func.func @transform_4(%arg0: i32, %arg1: i32) -> (i32, i32) {
    %c0_i32 = arith.constant 0 : i32
    %c0_i32_0 = arith.constant 0 : i32
    %c0_i32_1 = arith.constant 0 : i32
    return %c0_i32, %c0_i32_0 : i32, i32
  }
  func.func @transform_5(%arg0: i32, %arg1: i32) -> (i32, i32) {
    %c0_i32 = arith.constant 0 : i32
    %c0_i32_0 = arith.constant 0 : i32
    %c0_i32_1 = arith.constant 0 : i32
    return %c0_i32, %c0_i32_0 : i32, i32
  }
  func.func @transform_6(%arg0: i32, %arg1: i32) -> (i32, i32, i32) {
    %c0_i32 = arith.constant 0 : i32
    %c0_i32_0 = arith.constant 0 : i32
    return %arg0, %arg1, %c0_i32 : i32, i32, i32
  }
}

module attributes {stable_mosaic.version = 11 : i64} {
  func.func @_conv3x3_res_kernel(%arg0: i32, %arg1: i32, %arg2: memref<1x8x18x8xf32, #tpu.memory_space<vmem>>, %arg3: memref<1x2x18x8xf32, #tpu.memory_space<vmem>>, %arg4: memref<72x8xf32, #tpu.memory_space<vmem>>, %arg5: memref<1x8xf32, #tpu.memory_space<vmem>>, %arg6: memref<1x128x8xf32, #tpu.memory_space<vmem>>, %arg7: memref<1x128x8xf32, #tpu.memory_space<vmem>>) attributes {dimension_semantics = [#tpu.dimension_semantics<parallel>, #tpu.dimension_semantics<parallel>], iteration_bounds = array<i64: 2, 2>, scalar_prefetch = 0 : i64, scratch_operands = 0 : i64, tpu.core_type = #tpu.core_type<tc>, window_params = [{transform_indices = @transform_0, window_bounds = array<i64: 1, 8, 18, 8>}, {transform_indices = @transform_1, window_bounds = array<i64: 1, 2, 18, 8>}, {pipeline_mode = #tpu.pipeline_mode<synchronous>, transform_indices = @transform_2, window_bounds = array<i64: 72, 8>}, {pipeline_mode = #tpu.pipeline_mode<synchronous>, transform_indices = @transform_3, window_bounds = array<i64: 1, 8>}, {transform_indices = @transform_4, window_bounds = array<i64: 1, 128, 8>}, {transform_indices = @transform_5, window_bounds = array<i64: 1, 128, 8>}]} {
    %c0 = arith.constant 0 : index
    %c0_0 = arith.constant 0 : index
    %c0_1 = arith.constant 0 : index
    %c0_2 = arith.constant 0 : index
    %0 = vector.load %arg2[%c0, %c0_0, %c0_1, %c0_2] : memref<1x8x18x8xf32, #tpu.memory_space<vmem>>, vector<1x8x18x8xf32>
    %1 = vector.shape_cast %0 : vector<1x8x18x8xf32> to vector<8x18x8xf32>
    %c0_3 = arith.constant 0 : index
    %c0_4 = arith.constant 0 : index
    %c0_5 = arith.constant 0 : index
    %c0_6 = arith.constant 0 : index
    %2 = vector.load %arg3[%c0_3, %c0_4, %c0_5, %c0_6] : memref<1x2x18x8xf32, #tpu.memory_space<vmem>>, vector<1x2x18x8xf32>
    %3 = vector.shape_cast %2 : vector<1x2x18x8xf32> to vector<2x18x8xf32>
    %4 = tpu.concatenate %1, %3 in 0 : vector<8x18x8xf32>, vector<2x18x8xf32> -> vector<10x18x8xf32>
    %5 = vector.extract_strided_slice %4 {offsets = [0, 0, 0], sizes = [8, 18, 8], strides = [1, 1, 1]} : vector<10x18x8xf32> to vector<8x18x8xf32>
    %6 = vector.extract_strided_slice %5 {offsets = [0, 0, 0], sizes = [8, 16, 8], strides = [1, 1, 1]} : vector<8x18x8xf32> to vector<8x16x8xf32>
    %7 = vector.extract_strided_slice %5 {offsets = [0, 1, 0], sizes = [8, 16, 8], strides = [1, 1, 1]} : vector<8x18x8xf32> to vector<8x16x8xf32>
    %8 = vector.extract_strided_slice %5 {offsets = [0, 2, 0], sizes = [8, 16, 8], strides = [1, 1, 1]} : vector<8x18x8xf32> to vector<8x16x8xf32>
    %9 = vector.extract_strided_slice %4 {offsets = [1, 0, 0], sizes = [8, 18, 8], strides = [1, 1, 1]} : vector<10x18x8xf32> to vector<8x18x8xf32>
    %10 = vector.extract_strided_slice %9 {offsets = [0, 0, 0], sizes = [8, 16, 8], strides = [1, 1, 1]} : vector<8x18x8xf32> to vector<8x16x8xf32>
    %11 = vector.extract_strided_slice %9 {offsets = [0, 1, 0], sizes = [8, 16, 8], strides = [1, 1, 1]} : vector<8x18x8xf32> to vector<8x16x8xf32>
    %12 = vector.extract_strided_slice %9 {offsets = [0, 2, 0], sizes = [8, 16, 8], strides = [1, 1, 1]} : vector<8x18x8xf32> to vector<8x16x8xf32>
    %13 = vector.extract_strided_slice %4 {offsets = [2, 0, 0], sizes = [8, 18, 8], strides = [1, 1, 1]} : vector<10x18x8xf32> to vector<8x18x8xf32>
    %14 = vector.extract_strided_slice %13 {offsets = [0, 0, 0], sizes = [8, 16, 8], strides = [1, 1, 1]} : vector<8x18x8xf32> to vector<8x16x8xf32>
    %15 = vector.extract_strided_slice %13 {offsets = [0, 1, 0], sizes = [8, 16, 8], strides = [1, 1, 1]} : vector<8x18x8xf32> to vector<8x16x8xf32>
    %16 = vector.extract_strided_slice %13 {offsets = [0, 2, 0], sizes = [8, 16, 8], strides = [1, 1, 1]} : vector<8x18x8xf32> to vector<8x16x8xf32>
    %17 = tpu.concatenate %6, %7, %8, %10, %11, %12, %14, %15, %16 in 2 : vector<8x16x8xf32>, vector<8x16x8xf32>, vector<8x16x8xf32>, vector<8x16x8xf32>, vector<8x16x8xf32>, vector<8x16x8xf32>, vector<8x16x8xf32>, vector<8x16x8xf32>, vector<8x16x8xf32> -> vector<8x16x72xf32>
    %18 = vector.shape_cast %17 : vector<8x16x72xf32> to vector<128x72xf32>
    %c0_7 = arith.constant 0 : index
    %c0_8 = arith.constant 0 : index
    %19 = vector.load %arg4[%c0_7, %c0_8] : memref<72x8xf32, #tpu.memory_space<vmem>>, vector<72x8xf32>
    %cst = arith.constant dense<0.000000e+00> : vector<128x8xf32>
    %20 = tpu.matmul %18, %19, %cst {dimension_numbers = #tpu.dot_dimension_numbers<[1], [0], [0], [1], [0, 0, 1, 1], [], []>} : vector<128x72xf32>, vector<72x8xf32>, vector<128x8xf32> -> vector<128x8xf32>
    %c0_9 = arith.constant 0 : index
    %c0_10 = arith.constant 0 : index
    %21 = vector.load %arg5[%c0_9, %c0_10] : memref<1x8xf32, #tpu.memory_space<vmem>>, vector<1x8xf32>
    %22 = vector.broadcast %21 : vector<1x8xf32> to vector<128x8xf32>
    %23 = arith.addf %20, %22 : vector<128x8xf32>
    %cst_11 = arith.constant 1.000000e+00 : f32
    %24 = vector.broadcast %cst_11 : f32 to vector<128x8xf32>
    %25 = arith.mulf %23, %24 : vector<128x8xf32>
    %c0_12 = arith.constant 0 : index
    %c0_13 = arith.constant 0 : index
    %c0_14 = arith.constant 0 : index
    %26 = vector.load %arg6[%c0_12, %c0_13, %c0_14] : memref<1x128x8xf32, #tpu.memory_space<vmem>>, vector<1x128x8xf32>
    %27 = vector.shape_cast %26 : vector<1x128x8xf32> to vector<128x8xf32>
    %28 = arith.addf %25, %27 : vector<128x8xf32>
    %c0_15 = arith.constant 0 : index
    %c0_16 = arith.constant 0 : index
    %c0_17 = arith.constant 0 : index
    %29 = vector.load %arg7[%c0_15, %c0_16, %c0_17] : memref<1x128x8xf32, #tpu.memory_space<vmem>>, vector<1x128x8xf32>
    %30 = vector.shape_cast %29 : vector<1x128x8xf32> to vector<128x8xf32>
    %31 = vector.shape_cast %28 : vector<128x8xf32> to vector<1x128x8xf32>
    tpu.vector_store %arg7[%c0_15, %c0_16, %c0_17], %31 {strides = array<i32>} : memref<1x128x8xf32, #tpu.memory_space<vmem>>, vector<1x128x8xf32>,
    return
  }
  func.func @transform_0(%arg0: i32, %arg1: i32) -> (i32, i32, i32, i32) {
    %c0_i32 = arith.constant 0 : i32
    %c0_i32_0 = arith.constant 0 : i32
    %c0_i32_1 = arith.constant 0 : i32
    return %arg0, %arg1, %c0_i32, %c0_i32_0 : i32, i32, i32, i32
  }
  func.func @transform_1(%arg0: i32, %arg1: i32) -> (i32, i32, i32, i32) {
    %c1_i32 = arith.constant 1 : i32
    %0 = arith.addi %arg1, %c1_i32 : i32
    %c4_i32 = arith.constant 4 : i32
    %1 = arith.muli %0, %c4_i32 : i32
    %c0_i32 = arith.constant 0 : i32
    %c0_i32_0 = arith.constant 0 : i32
    %c0_i32_1 = arith.constant 0 : i32
    return %arg0, %1, %c0_i32, %c0_i32_0 : i32, i32, i32, i32
  }
  func.func @transform_2(%arg0: i32, %arg1: i32) -> (i32, i32) {
    %c0_i32 = arith.constant 0 : i32
    %c0_i32_0 = arith.constant 0 : i32
    %c0_i32_1 = arith.constant 0 : i32
    return %c0_i32, %c0_i32_0 : i32, i32
  }
  func.func @transform_3(%arg0: i32, %arg1: i32) -> (i32, i32) {
    %c0_i32 = arith.constant 0 : i32
    %c0_i32_0 = arith.constant 0 : i32
    %c0_i32_1 = arith.constant 0 : i32
    return %c0_i32, %c0_i32_0 : i32, i32
  }
  func.func @transform_4(%arg0: i32, %arg1: i32) -> (i32, i32, i32) {
    %c0_i32 = arith.constant 0 : i32
    %c0_i32_0 = arith.constant 0 : i32
    return %arg0, %arg1, %c0_i32 : i32, i32, i32
  }
  func.func @transform_5(%arg0: i32, %arg1: i32) -> (i32, i32, i32) {
    %c0_i32 = arith.constant 0 : i32
    %c0_i32_0 = arith.constant 0 : i32
    return %arg0, %arg1, %c0_i32 : i32, i32, i32
  }
}

</mosaic_0001>

<bundles_post_ra>
// kernel: edsr_forward.4
= control target key start
LH: loop header
LB: loop body
LE: loop exit
PB: predicated region body
PF: predicated region fallthrough
CT: control target
= control target key end

     0   :  { %s1451_s15 = smov 0   ;;  %s1453_s16 = smov 0   ;;  %s2379_s0 = inlined_call_operand.vmem [shape: f32[2,18,18,8], index: 0, kind: input, shape index: {}, may-alias: {0,1}]   ;;  %s2380_s1 = inlined_call_operand.vmem [shape: f32[2,18,18,8], index: 1, kind: input, shape index: {}, may-alias: {0,1}]   ;;  %s2381_s2 = inlined_call_operand.vmem [shape: f32[72,8], index: 2, kind: input, shape index: {}]   ;;  %s2382_s3 = inlined_call_operand.vmem [shape: f32[1,8], index: 3, kind: input, shape index: {}]   ;;  %s2383_s4 = inlined_call_operand.vmem [shape: f32[2,256,8], index: 4, kind: output, shape index: {}]  }
   0x1   :  { %s1455_s17 = smov 0   ;;  %s1457_s18 = smov 0  }
   0x2   :  { %s1459_s19 = smov 0  }
   0x3 LB: > { %s23_s20 = sadd.s32 1, %s1408_s17  ;;  %s26_s21 = sadd.s32 1, %s1412_s18  ;;  %s1416_s19 = sphi %s1459_s19, %s14_s19   ;;  %s1412_s18 = sphi %s1457_s18, %s2397_s18   ;;  %s1408_s17 = sphi %s1455_s17, %s2396_s17   ;;  %s1404_s16 = sphi %s1453_s16, %s2395_s16   ;;  %s1400_s15 = sphi %s1451_s15, %s2394_s15  }
   0x4   : > { %p24_p0 = scmp.ge.s32.totalorder %s23_s20, 2  ;;  %p1263_p1 = scmp.ge.s32.totalorder %s1416_s19, 1 }
   0x5   : > { %p220_p2 = scmp.lt.s32.totalorder %s1416_s19, 5 }
   0x6   : > { %s2399_s20 = smov (%p24_p0, %s23_s20), 0  ;;  %s2401_s21 = smov (!%p24_p0, %s26_s21), %s1412_s18 }
   0x7   : > { %p221_p3 = pnand %p1263_p1, %p220_p2  ;;  %p28_p4 = scmp.ge.s32.totalorder %s2401_s21, 2 }
   0x9   : > { %s2403_s21 = smov (%p28_p4, %s2401_s21), 0  ;;  %224 = sbr.rel (%p221_p3) target bundleno = 611 (0x263), region = 36 }
   0xe   : > { %s1484_s22 = sshll.u32 %s1400_s15, 3  ;;  %p278_p5 = scmp.lt.s32.totalorder %s1404_s16, 1  ;;  %vm372_vm0 = vcmask 1046528   ;;  %vm461_vm1 = vcmask 1045504   ;;  %vm881_vm2 = vcmask 130048   ;;  %vm864_vm3 = vcmask 64512  }
   0xf   : > { %p280_p6 = scmp.lt.s32.totalorder %s1484_s22, 17  ;;  %s1298_s27 = sadd.s32 8, %s1484_s22  ;;  %vm898_vm4 = vcmask 195584   ;;  %vm915_vm5 = vcmask 261120   ;;  %vm932_vm6 = vcmask 326656   ;;  %vm949_vm7 = vcmask 392192  }
  0x10   : > { %s2405_s16 = smov (!%p278_p5, %s1404_s16), 1  ;;  %p1508_p7 = scmp.lt.s32.totalorder %s1298_s27, 17  ;;  %vm966_vm8 = vcmask 457728   ;;  %vm983_vm9 = vcmask 523264   ;;  %vm1013_vm10 = vcmask 588800  }
  0x11   : > { %s281_s23 = scalar_select %p280_p6, %s1484_s22, 17 }
  0x12   : > { %s1327_s24 = smul.u32 54, %s2405_s16  ;;  %s1418_s7 = smov 8  }
  0x13   : > { %s1326_s25 = smul.u32 3, %s281_s23  ;;  %s2407_s27 = smov (!%p1508_p7, %s1298_s27), 17 }
  0x14   : > { %s1328_s8 = smul.u32 3, %s2407_s27  ;;  %s1419_s10 = smov 16  }
  0x15   : > { %s284_s26 = sadd.s32 %s1327_s24, %s1326_s25  ;;  %s1420_s11 = smov 24  }
  0x16   : > { %s1265_s28 = sshll.u32 %s284_s26, 3  ;;  %s1568_s9 = sadd.s32 %s1328_s8, %s1327_s24 }
  0x17   : > { %s1497_s5 = scalar_lea.vmem %s2379_s0, %s1265_s28  ;;  %s1268_s12 = sshll.u32 %s1568_s9, 3 }
  0x18   : > { %v1500_v0 = vld [vmem:[%s1497_s5 + $0x30] sm:$0xff]  ;;  %v1503_v1 = vld [vmem:[%s1497_s5 + $0x38] sm:$0xff]  ;;  %v1515_v5 = vld [vmem:[%s1497_s5 + $0x20] sm:$0xff]  ;;  %s1800_s22 = scalar_lea.vmem %s2380_s1, %s1268_s12  ;;  %s1421_s23 = smov 32  }
  0x19   : > { %v1506_v2 = vld [vmem:[%s1497_s5 + $0x18] sm:$0xff]  ;;  %v383_v3 = vrot.slane %v1500_v0, 1  ;;  %v384_v4 = vrot.slane %v1503_v1, 1  ;;  %v1519_v7 = vld [vmem:[%s1497_s5] sm:$0xff]  ;;  %v1522_v8 = vld [vmem:[%s1497_s5 + $0x8] sm:$0xff]  ;;  %v379_v9 = vrot.slane %v1515_v5, 1 }
  0x1a   : > { %v378_v6 = vrot.slane %v1506_v2, 1  ;;  %v373_v10 = vrot.slane %v1519_v7, 1  ;;  %v374_v11 = vrot.slane %v1522_v8, 1  ;;  %v1528_v12 = vld [vmem:[%s1497_s5 + $0x40] sm:$0x3]  ;;  %v1564_v25 = vld [vmem:[%s1497_s5 + $0x68] sm:$0xff] }
  0x1b   : > { %v1531_v13 = vsel %vm372_vm0, %v383_v3, %v384_v4  ;;  %v1534_v14 = vld [vmem:[%s1497_s5 + $0x28] sm:$0x3]  ;;  %v1537_v15 = vld [vmem:[%s1497_s5 + $0x10] sm:$0x3]  ;;  %v386_v18 = vrot.slane %v1528_v12, 1  ;;  %v1561_v24 = vld [vmem:[%s1497_s5 + $0x60] sm:$0xff] }
  0x1c   : > { %421 = vrot.lane.b32.xlu2 %v1531_v13, %s1418_s7  ;;  %v1542_v16 = vsel %vm372_vm0, %v378_v6, %v379_v9  ;;  %v375_v17 = vsel %vm372_vm0, %v373_v10, %v374_v11  ;;  %v381_v19 = vrot.slane %v1534_v14, 1  ;;  %v376_v20 = vrot.slane %v1537_v15, 1  ;;  %v1571_v26 = vld [vmem:[%s1497_s5 + $0x50] sm:$0xff]  ;;  %v1574_v27 = vld [vmem:[%s1497_s5 + $0x58] sm:$0x3]  ;;  %v1577_v28 = vld [vmem:[%s1497_s5 + $0x48] sm:$0xff] }
  0x1d   : > { %417 = vrot.lane.b32.xlu1 %v1542_v16, %s1418_s7  ;;  %413 = vrot.lane.b32.xlu0 %v375_v17, %s1418_s7  ;;  %v1554_v21 = vsel %vm372_vm0, %v384_v4, %v386_v18  ;;  %2388 = vst [vmem:[#allocation2_spill] sm:$0xff] %v1571_v26  ;;  %v393_v29 = vrot.slane %v1561_v24, 1  ;;  %v394_v30 = vrot.slane %v1564_v25, 1  ;;  %v389_v31 = vrot.slane %v1571_v26, 1  ;;  %v1599_v37 = vld [vmem:[%s1497_s5 + $0x80] sm:$0xff]  ;;  %v1605_v39 = vld [vmem:[%s1497_s5 + $0x78] sm:$0xff] }
  0x1e   : > { %v1557_v22 = vsel %vm372_vm0, %v379_v9, %v381_v19  ;;  %v377_v23 = vsel %vm372_vm0, %v374_v11, %v376_v20  ;;  %v391_v32 = vrot.slane %v1574_v27, 1  ;;  %v388_v33 = vrot.slane %v1577_v28, 1  ;;  %v1602_v38 = vld [vmem:[%s1497_s5 + $0x88] sm:$0x3]  ;;  %v1608_v40 = vld [vmem:[%s1497_s5 + $0x70] sm:$0x3] }
  0x1f   : > { %v1590_v34 = vsel %vm372_vm0, %v393_v29, %v394_v30  ;;  %v399_v41 = vrot.slane %v1599_v37, 1  ;;  %v401_v42 = vrot.slane %v1602_v38, 1  ;;  %v398_v43 = vrot.slane %v1605_v39, 1  ;;  %v1630_v48 = vld [vmem:[%s1497_s5 + $0xa8] sm:$0xff]  ;;  %v1633_v49 = vld [vmem:[%s1497_s5 + $0xb0] sm:$0xff]  ;;  %v1636_v50 = vld [vmem:[%s1497_s5 + $0x98] sm:$0xff] }
  0x20   : > { %v1593_v35 = vsel %vm372_vm0, %v389_v31, %v391_v32  ;;  %v1596_v36 = vsel %vm372_vm0, %v388_v33, %v389_v31  ;;  %v396_v44 = vrot.slane %v1608_v40, 1  ;;  %v1639_v51 = vld [vmem:[%s1497_s5 + $0xa0] sm:$0x3]  ;;  %v1642_v52 = vld [vmem:[%s1497_s5 + $0x90] sm:$0xff]  ;;  %v408_v53 = vrot.slane %v1630_v48, 1  ;;  %s1422_s24 = smov 40  }
  0x21   : > { %2389 = vst [vmem:[#allocation3_spill] sm:$0xff] %v1593_v35  ;;  %v1621_v45 = vsel %vm372_vm0, %v399_v41, %v401_v42  ;;  %v1624_v46 = vsel %vm372_vm0, %v398_v43, %v399_v41  ;;  %v409_v54 = vrot.slane %v1633_v49, 1  ;;  %v404_v55 = vrot.slane %v1636_v50, 1  ;;  %v1665_v61 = vld [vmem:[%s1497_s5 + $0xb8] sm:$0x3]  ;;  %s1423_s25 = smov 56  }
  0x22   : > { %2390 = vst [vmem:[#allocation4_spill] sm:$0xff] %v1621_v45  ;;  %v1627_v47 = vsel %vm372_vm0, %v394_v30, %v396_v44  ;;  %v406_v56 = vrot.slane %v1639_v51, 1  ;;  %v403_v57 = vrot.slane %v1642_v52, 1  ;;  %v463_v62 = vrot.slane %v1522_v8, 2  ;;  %s1424_s26 = smov 48   ;;  %s1425_s27 = smov 64  }
  0x23   : > { %v1656_v58 = vsel %vm372_vm0, %v408_v53, %v409_v54  ;;  %v465_v63 = vrot.slane %v1537_v15, 2  ;;  %v462_v3 = vrot.slane %v1519_v7, 2  ;;  %v411_v4 = vrot.slane %v1665_v61, 1 }
  0x24   : > { %423 = vrot.lane.b32.xlu2 %v1554_v21, %s1418_s7  ;;  %v1659_v59 = vsel %vm372_vm0, %v404_v55, %v406_v56  ;;  %v1662_v60 = vsel %vm372_vm0, %v403_v57, %v404_v55  ;;  %v472_v11 = vrot.slane %v1500_v0, 2  ;;  %v473_v15 = vrot.slane %v1503_v1, 2 }
  0x25   : > { %419 = vrot.lane.b32.xlu1 %v1557_v22, %s1418_s7  ;;  %415 = vrot.lane.b32.xlu0 %v377_v23, %s1418_s7  ;;  %v466_v6 = vsel %vm461_vm1, %v463_v62, %v465_v63  ;;  %v464_v9 = vsel %vm461_vm1, %v462_v3, %v463_v62  ;;  %v1680_v10 = vsel %vm372_vm0, %v409_v54, %v411_v4  ;;  %v468_v17 = vrot.slane %v1515_v5, 2 }
  0x26   : > { %v470_v18 = vrot.slane %v1534_v14, 2  ;;  %v467_v19 = vrot.slane %v1506_v2, 2  ;;  %v1692_v20 = vsel %vm461_vm1, %v472_v11, %v473_v15  ;;  %v478_v14 = vrot.slane %v1571_v26, 2 }
  0x27   : > { %v480_v30 = vrot.slane %v1574_v27, 2  ;;  %v477_v31 = vrot.slane %v1577_v28, 2  ;;  %v475_v32 = vrot.slane %v1528_v12, 2  ;;  %v487_v12 = vrot.slane %v1605_v39, 2 }
  0x28   : > { %v1695_v23 = vsel %vm461_vm1, %v468_v17, %v470_v18  ;;  %v1698_v29 = vsel %vm461_vm1, %v467_v19, %v468_v17  ;;  %v488_v27 = vrot.slane %v1599_v37, 2  ;;  %v483_v43 = vrot.slane %v1564_v25, 2 }
  0x29   : > { %v1711_v33 = vsel %vm461_vm1, %v478_v14, %v480_v30  ;;  %v1714_v41 = vsel %vm461_vm1, %v477_v31, %v478_v14  ;;  %v1717_v42 = vsel %vm461_vm1, %v473_v15, %v475_v32  ;;  %v485_v44 = vrot.slane %v1608_v40, 2  ;;  %v1803_v31 = vld [vmem:[%s1800_s22 + $0x8] sm:$0xff]  ;;  %v1806_v32 = vld [vmem:[%s1800_s22] sm:$0xff] }
  0x2a   : > { %v482_v53 = vrot.slane %v1561_v24, 2  ;;  %v1731_v54 = vsel %vm461_vm1, %v487_v12, %v488_v27  ;;  %v493_v40 = vrot.slane %v1636_v50, 2  ;;  %v495_v57 = vrot.slane %v1639_v51, 2 }
  0x2b   : > { %v1734_v55 = vsel %vm461_vm1, %v483_v43, %v485_v44  ;;  %v492_v62 = vrot.slane %v1642_v52, 2  ;;  %v490_v63 = vrot.slane %v1602_v38, 2  ;;  %v498_v38 = vrot.slane %v1633_v49, 2 }
  0x2c   : > { %429 = vrot.lane.b32.xlu2 %v1590_v34, %s1418_s7  ;;  %v1737_v56 = vsel %vm461_vm1, %v482_v53, %v483_v43  ;;  %v1750_v3 = vsel %vm461_vm1, %v493_v40, %v495_v57  ;;  %v500_v51 = vrot.slane %v1665_v61, 2 }
  0x2d   : > { %427 = vrot.lane.b32.xlu1 %v1593_v35, %s1418_s7  ;;  %425 = vrot.lane.b32.xlu0 %v1596_v36, %s1418_s7  ;;  %v1753_v4 = vsel %vm461_vm1, %v492_v62, %v493_v40 }
  0x2e   : > { %v1768_v11 = vsel %vm461_vm1, %v498_v38, %v500_v51 }
  0x34   : > { %435 = vrot.lane.b32.xlu2 %v1621_v45, %s1418_s7 }
  0x35   : > { %433 = vrot.lane.b32.xlu1 %v1624_v46, %s1418_s7  ;;  %431 = vrot.lane.b32.xlu0 %v1627_v47, %s1418_s7 }
  0x3c   : > { %441 = vrot.lane.b32.xlu2 %v1656_v58, %s1418_s7 }
  0x3d   : > { %439 = vrot.lane.b32.xlu1 %v1659_v59, %s1418_s7  ;;  %437 = vrot.lane.b32.xlu0 %v1662_v60, %s1418_s7 }
  0x44   : > { %504 = vrot.lane.b32.xlu2 %v466_v6, %s1419_s10  ;;  %v1756_v6 = vsel %vm461_vm1, %v488_v27, %v490_v63 }
  0x45   : > { %502 = vrot.lane.b32.xlu1 %v464_v9, %s1419_s10  ;;  %443 = vrot.lane.b32.xlu0 %v1680_v10, %s1418_s7  ;;  %v497_v9 = vrot.slane %v1630_v48, 2 }
  0x47   : > { %v1771_v15 = vsel %vm461_vm1, %v497_v9, %v498_v38 }
  0x4c   : > { %510 = vrot.lane.b32.xlu2 %v1692_v20, %s1419_s10 }
  0x4d   : > { %508 = vrot.lane.b32.xlu1 %v1695_v23, %s1419_s10  ;;  %506 = vrot.lane.b32.xlu0 %v1698_v29, %s1419_s10 }
  0x54   : > { %516 = vrot.lane.b32.xlu2 %v1711_v33, %s1419_s10 }
  0x55   : > { %514 = vrot.lane.b32.xlu1 %v1714_v41, %s1419_s10  ;;  %512 = vrot.lane.b32.xlu0 %v1717_v42, %s1419_s10 }
  0x5c   : > { %522 = vrot.lane.b32.xlu2 %v1731_v54, %s1419_s10 }
  0x5d   : > { %520 = vrot.lane.b32.xlu1 %v1734_v55, %s1419_s10  ;;  %518 = vrot.lane.b32.xlu0 %v1737_v56, %s1419_s10 }
  0x64   : > { %528 = vrot.lane.b32.xlu2 %v1750_v3, %s1419_s10 }
  0x65   : > { %526 = vrot.lane.b32.xlu1 %v1753_v4, %s1419_s10  ;;  %524 = vrot.lane.b32.xlu0 %v1756_v6, %s1419_s10 }
  0x6c   : > { %552 = vrot.lane.b32.xlu2 %v1506_v2, %s1420_s11 }
  0x6d   : > { %532 = vrot.lane.b32.xlu1 %v1768_v11, %s1419_s10  ;;  %530 = vrot.lane.b32.xlu0 %v1771_v15, %s1419_s10 }
  0x74   : > { %558 = vrot.lane.b32.xlu2 %v1503_v1, %s1420_s11 }
  0x75   : > { %556 = vrot.lane.b32.xlu1 %v1500_v0, %s1420_s11  ;;  %554 = vrot.lane.b32.xlu0 %v1515_v5, %s1420_s11 }
  0x76   : > { %v422_v61 = vpop.permute.xlu2 %421 }
  0x7c   : > { %564 = vrot.lane.b32.xlu2 %v1561_v24, %s1420_s11 }
  0x7d   : > { %562 = vrot.lane.b32.xlu1 %v1571_v26, %s1420_s11  ;;  %560 = vrot.lane.b32.xlu0 %v1577_v28, %s1420_s11 }
  0x7e   : > { %v1784_v17 = vpop.permute.xlu2 %423 }
  0x84   : > { %570 = vrot.lane.b32.xlu2 %v1599_v37, %s1420_s11 }
  0x85   : > { %568 = vrot.lane.b32.xlu1 %v1605_v39, %s1420_s11  ;;  %566 = vrot.lane.b32.xlu0 %v1564_v25, %s1420_s11 }
  0x86   : > { %v1789_v18 = vpop.permute.xlu2 %429 }
  0x8c   : > { %576 = vrot.lane.b32.xlu2 %v1630_v48, %s1420_s11 }
  0x8d   : > { %574 = vrot.lane.b32.xlu1 %v1636_v50, %s1420_s11  ;;  %572 = vrot.lane.b32.xlu0 %v1642_v52, %s1420_s11 }
  0x8e   : > { %v1795_v19 = vpop.permute.xlu2 %435 }
  0x8f   : > { %v418_v14 = vpop.permute.xlu1 %417  ;;  %v414_v30 = vpop.permute.xlu0 %413 }
  0x94   : > { %582 = vrot.lane.b32.xlu2 %v1803_v31, %s1420_s11 }
  0x95   : > { %580 = vrot.lane.b32.xlu1 %v1806_v32, %s1420_s11  ;;  %578 = vrot.lane.b32.xlu0 %v1633_v49, %s1420_s11 }
  0x96   : > { %v1811_v12 = vpop.permute.xlu2 %441 }
  0x97   : > { %v420_v27 = vpop.permute.xlu1 %419  ;;  %v416_v43 = vpop.permute.xlu0 %415 }
  0x98   : > { %v866_v44 = vsel %vm864_vm3, %v1522_v8, %v416_v43 }
  0x9c   : > { %610 = vrot.lane.b32.xlu2 %v1531_v13, %s1421_s23 }
  0x9d   : > { %608 = vrot.lane.b32.xlu1 %v1557_v22, %s1421_s23  ;;  %606 = vrot.lane.b32.xlu0 %v1542_v16, %s1421_s23  ;;  %v869_v16 = vsel %vm864_vm3, %v1500_v0, %v422_v61 }
  0x9e   : > { %v505_v53 = vpop.permute.xlu2 %504 }
  0x9f   : > { %v428_v40 = vpop.permute.xlu1 %427  ;;  %v1822_v57 = vsel %vm881_vm2, %v866_v44, %v505_v53  ;;  %v426_v62 = vpop.permute.xlu0 %425 }
  0xa0   : > { %v872_v51 = vsel %vm864_vm3, %v1571_v26, %v428_v40  ;;  %v865_v40 = vsel %vm864_vm3, %v1519_v7, %v414_v30 }
  0xa4   : > { %616 = vrot.lane.b32.xlu2 %v1593_v35, %s1421_s23 }
  0xa5   : > { %614 = vrot.lane.b32.xlu1 %v1596_v36, %s1421_s23  ;;  %612 = vrot.lane.b32.xlu0 %v1554_v21, %s1421_s23 }
  0xa6   : > { %v511_v22 = vpop.permute.xlu2 %510 }
  0xa7   : > { %v434_v8 = vpop.permute.xlu1 %433  ;;  %v1833_v63 = vsel %vm881_vm2, %v869_v16, %v511_v22  ;;  %v432_v38 = vpop.permute.xlu0 %431 }
  0xa8   : > { %v875_v53 = vsel %vm864_vm3, %v1605_v39, %v434_v8  ;;  %v867_v8 = vsel %vm864_vm3, %v1506_v2, %v418_v14  ;;  %v654_v2 = vrot.slane %v1806_v32, 2 }
  0xac   : > { %622 = vrot.lane.b32.xlu2 %v1624_v46, %s1421_s23 }
  0xad   : > { %620 = vrot.lane.b32.xlu1 %v1627_v47, %s1421_s23  ;;  %618 = vrot.lane.b32.xlu0 %v1590_v34, %s1421_s23 }
  0xae   : > { %v517_v9 = vpop.permute.xlu2 %516 }
  0xaf   : > { %v440_v61 = vpop.permute.xlu1 %439  ;;  %v1844_v43 = vsel %vm881_vm2, %v872_v51, %v517_v9  ;;  %v438_v44 = vpop.permute.xlu0 %437 }
  0xb0   : > { %v878_v7 = vsel %vm864_vm3, %v1636_v50, %v440_v61  ;;  %v602_v61 = vrot.slane %v1803_v31, 1 }
  0xb4   : > { %628 = vrot.lane.b32.xlu2 %v1659_v59, %s1421_s23 }
  0xb5   : > { %626 = vrot.lane.b32.xlu1 %v1662_v60, %s1421_s23  ;;  %624 = vrot.lane.b32.xlu0 %v1621_v45, %s1421_s23 }
  0xb6   : > { %v523_v16 = vpop.permute.xlu2 %522 }
  0xb7   : > { %v1857_v22 = vsel %vm881_vm2, %v875_v53, %v523_v16  ;;  %v503_v51 = vpop.permute.xlu1 %502  ;;  %v1859_v9 = vpop.permute.xlu0 %443  ;;  %v868_v53 = vsel %vm864_vm3, %v1515_v5, %v420_v27  ;;  %v655_v5 = vrot.slane %v1803_v31, 2  ;;  %v601_v27 = vrot.slane %v1806_v32, 1 }
  0xb8   : > { %v882_v35 = vsel %vm881_vm2, %v865_v40, %v503_v51 }
  0xbc   : > { %683 = vrot.lane.b32.xlu2 %v1771_v15, %s1422_s24 }
  0xbd   : > { %675 = vrot.lane.b32.xlu1 %v1731_v54, %s1422_s24  ;;  %630 = vrot.lane.b32.xlu0 %v1656_v58, %s1421_s23 }
  0xbe   : > { %v529_v30 = vpop.permute.xlu2 %528 }
  0xbf   : > { %v1875_v16 = vsel %vm881_vm2, %v878_v7, %v529_v30  ;;  %v509_v40 = vpop.permute.xlu1 %508  ;;  %v507_v51 = vpop.permute.xlu0 %506  ;;  %v871_v7 = vsel %vm864_vm3, %v1577_v28, %v426_v62  ;;  %v873_v62 = vsel %vm864_vm3, %v1561_v24, %v1789_v18 }
  0xc0   : > { %v885_v45 = vsel %vm881_vm2, %v868_v53, %v509_v40  ;;  %v1879_v26 = vsel %vm881_vm2, %v867_v8, %v507_v51 }
  0xc4   : > { %779 = vrot.lane.b32.xlu2 %v1662_v60, %s1423_s25  ;;  %v870_v60 = vsel %vm864_vm3, %v1503_v1, %v1784_v17  ;;  %v1909_v17 = vsel %vm372_vm0, %v601_v27, %v602_v61 }
  0xc5   : > { %733 = vrot.lane.b32.xlu1 %v1806_v32, %s1424_s26  ;;  %725 = vrot.lane.b32.xlu0 %v1642_v52, %s1424_s26  ;;  %v1904_v32 = vsel %vm461_vm1, %v654_v2, %v655_v5  ;;  %v874_v2 = vsel %vm864_vm3, %v1564_v25, %v432_v38  ;;  %v877_v38 = vsel %vm864_vm3, %v1642_v52, %v438_v44 }
  0xc6   : > { %v553_v14 = vpop.permute.xlu2 %552  ;;  %v879_v52 = vsel %vm864_vm3, %v1630_v48, %v1811_v12 }
  0xc7   : > { %v1897_v30 = vsel %vm898_vm4, %v882_v35, %v553_v14  ;;  %v515_v8 = vpop.permute.xlu1 %514  ;;  %v513_v53 = vpop.permute.xlu0 %512 }
  0xc8   : > { %v888_v40 = vsel %vm881_vm2, %v871_v7, %v515_v8  ;;  %v887_v51 = vsel %vm881_vm2, %v870_v60, %v513_v53 }
  0xcc   : > { %840 = vrot.lane.b32.xlu2 %v1904_v32, %s1425_s27 }
  0xcd   : > { %832 = vrot.lane.b32.xlu1 %v1753_v4, %s1425_s27  ;;  %787 = vrot.lane.b32.xlu0 %v1909_v17, %s1423_s25 }
  0xce   : > { %v559_v35 = vpop.permute.xlu2 %558 }
  0xcf   : > { %v1923_v14 = vsel %vm898_vm4, %v885_v45, %v559_v35  ;;  %v521_v27 = vpop.permute.xlu1 %520  ;;  %v519_v60 = vpop.permute.xlu0 %518  ;;  %v876_v45 = vsel %vm864_vm3, %v1599_v37, %v1795_v19  ;;  %v880_v19 = vsel %vm864_vm3, %v1633_v49, %v1859_v9 }
  0xd0   : > { %v891_v7 = vsel %vm881_vm2, %v874_v2, %v521_v27  ;;  %v890_v8 = vsel %vm881_vm2, %v873_v62, %v519_v60 }
  0xd4   : > { %632 = vrot.lane.b32.xlu2 %v1680_v10, %s1421_s23 }
  0xd5   : > { %667 = vrot.lane.b32.xlu1 %v1714_v41, %s1422_s24  ;;  %659 = vrot.lane.b32.xlu0 %v1698_v29, %s1422_s24 }
  0xd6   : > { %v565_v18 = vpop.permute.xlu2 %564 }
  0xd7   : > { %v1939_v53 = vsel %vm898_vm4, %v888_v40, %v565_v18  ;;  %v527_v35 = vpop.permute.xlu1 %526  ;;  %v525_v62 = vpop.permute.xlu0 %524 }
  0xd8   : > { %v894_v2 = vsel %vm881_vm2, %v877_v38, %v527_v35  ;;  %v893_v27 = vsel %vm881_vm2, %v876_v45, %v525_v62  ;;  %v344_v35 = vld [vmem:[%s1800_s22 + $0x10] sm:$0x3] }
  0xdc   : > { %677 = vrot.lane.b32.xlu2 %v1756_v6, %s1422_s24 }
  0xdd   : > { %717 = vrot.lane.b32.xlu1 %v1561_v24, %s1424_s26  ;;  %709 = vrot.lane.b32.xlu0 %v1500_v0, %s1424_s26 }
  0xde   : > { %v571_v29 = vpop.permute.xlu2 %570 }
  0xdf   : > { %v1956_v44 = vsel %vm898_vm4, %v891_v7, %v571_v29  ;;  %v533_v40 = vpop.permute.xlu1 %532  ;;  %v531_v60 = vpop.permute.xlu0 %530 }
  0xe0   : > { %v897_v24 = vsel %vm881_vm2, %v880_v19, %v533_v40  ;;  %v896_v18 = vsel %vm881_vm2, %v879_v52, %v531_v60 }
  0xe4   : > { %771 = vrot.lane.b32.xlu2 %v1590_v34, %s1423_s25 }
  0xe5   : > { %763 = vrot.lane.b32.xlu1 %v1531_v13, %s1423_s25  ;;  %685 = vrot.lane.b32.xlu0 %v1768_v11, %s1422_s24  ;;  %v604_v13 = vrot.slane %v344_v35, 1 }
  0xe6   : > { %v577_v0 = vpop.permute.xlu2 %576 }
  0xe7   : > { %v1967_v12 = vsel %vm898_vm4, %v894_v2, %v577_v0  ;;  %v557_v9 = vpop.permute.xlu1 %556  ;;  %v555_v7 = vpop.permute.xlu0 %554  ;;  %v1991_v52 = vsel %vm372_vm0, %v602_v61, %v604_v13 }
  0xe8   : > { %v901_v45 = vsel %vm898_vm4, %v1879_v26, %v557_v9  ;;  %v900_v38 = vsel %vm898_vm4, %v1822_v57, %v555_v7 }
  0xec   : > { %816 = vrot.lane.b32.xlu2 %v1692_v20, %s1425_s27 }
  0xed   : > { %735 = vrot.lane.b32.xlu1 %v1803_v31, %s1424_s26  ;;  %727 = vrot.lane.b32.xlu0 %v1636_v50, %s1424_s26 }
  0xee   : > { %v583_v34 = vpop.permute.xlu2 %582 }
  0xef   : > { %v1981_v62 = vsel %vm898_vm4, %v897_v24, %v583_v34  ;;  %v563_v2 = vpop.permute.xlu1 %562  ;;  %v561_v26 = vpop.permute.xlu0 %560 }
  0xf0   : > { %v904_v29 = vsel %vm898_vm4, %v887_v51, %v563_v2  ;;  %v1986_v57 = vsel %vm898_vm4, %v1833_v63, %v561_v26  ;;  %v657_v51 = vrot.slane %v344_v35, 2  ;;  %v1003_v2 = vld [vmem:[%s2381_s2 + $0x18] sm:$0xff] }
  0xf1   : > { %v345_v26 = vld [vmem:[%s1800_s22 + $0x18] sm:$0xff] }
  0xf4   : > { %789 = vrot.lane.b32.xlu2 %v1991_v52, %s1423_s25 }
  0xf5   : > { %781 = vrot.lane.b32.xlu1 %v1659_v59, %s1423_s25  ;;  %824 = vrot.lane.b32.xlu0 %v1737_v56, %s1425_s27  ;;  %v2012_v59 = vsel %vm461_vm1, %v655_v5, %v657_v51 }
  0xf6   : > { %v611_v50 = vpop.permute.xlu2 %610 }
  0xf7   : > { %v2000_v63 = vsel %vm915_vm5, %v901_v45, %v611_v50  ;;  %v569_v19 = vpop.permute.xlu1 %568  ;;  %v567_v40 = vpop.permute.xlu0 %566  ;;  %v758_v50 = vrot.slane %v345_v26, 1 }
  0xf8   : > { %v2003_v61 = vsel %vm898_vm4, %v890_v8, %v569_v19  ;;  %v2007_v60 = vsel %vm898_vm4, %v1844_v43, %v567_v40 }
  0xfc   : > { %661 = vrot.lane.b32.xlu2 %v1695_v23, %s1422_s24 }
  0xfd   : > { %842 = vrot.lane.b32.xlu1 %v2012_v59, %s1425_s27  ;;  %834 = vrot.lane.b32.xlu0 %v1750_v3, %s1425_s27 }
  0xfe   : > { %v617_v8 = vpop.permute.xlu2 %616 }
  0xff   : > { %v2021_v24 = vsel %vm915_vm5, %v904_v29, %v617_v8  ;;  %v575_v43 = vpop.permute.xlu1 %574  ;;  %v573_v0 = vpop.permute.xlu0 %572  ;;  %v2095_v29 = vld [vmem:[%s1800_s22 + $0x20] sm:$0xff] }
 0x100   : > { %v910_v31 = vsel %vm898_vm4, %v893_v27, %v575_v43  ;;  %v2026_v5 = vsel %vm898_vm4, %v1857_v22, %v573_v0  ;;  %v759_v19 = vrot.slane %v2095_v29, 1  ;;  %v1000_v43 = vld [vmem:[%s2381_s2] sm:$0xff] }
 0x104   : > { %711 = vrot.lane.b32.xlu2 %v1503_v1, %s1424_s26 }
 0x105   : > { %634 = vrot.lane.b32.xlu1 %v1909_v17, %s1421_s23  ;;  %669 = vrot.lane.b32.xlu0 %v1711_v33, %s1422_s24 }
 0x106   : > { %v2034_v23 = vpop.permute.xlu2 %622 }
 0x107   : > { %v581_v9 = vpop.permute.xlu1 %580  ;;  %v579_v7 = vpop.permute.xlu0 %578 }
 0x108   : > { %v2037_v45 = vsel %vm898_vm4, %v896_v18, %v581_v9  ;;  %v2041_v22 = vsel %vm898_vm4, %v1875_v16, %v579_v7  ;;  %v1008_v16 = vld [vmem:[%s2381_s2 + $0x40] sm:$0xff]  ;;  %v760_v9 = vsel %vm372_vm0, %v758_v50, %v759_v19  ;;  %v812_v7 = vrot.slane %v2095_v29, 2 }
 0x109   : > { %1300 = vmatpush.msra.mxu2 %v1008_v16  ;;  %1301 = vmatpush.msra.mxu3 %v1008_v16 }
 0x10a   : > { %1069 = vmatpush.msra.mxu0 %v1008_v16  ;;  %1299 = vmatpush.msra.mxu1 %v1008_v16 }
 0x10c   : > { %687 = vrot.lane.b32.xlu2 %v1904_v32, %s1422_s24 }
 0x10d   : > { %679 = vrot.lane.b32.xlu1 %v1753_v4, %s1422_s24  ;;  %719 = vrot.lane.b32.xlu0 %v1564_v25, %s1424_s26  ;;  %v1007_v25 = vld [vmem:[%s2381_s2 + $0x38] sm:$0xff]  ;;  %v1006_v4 = vld [vmem:[%s2381_s2 + $0x30] sm:$0xff] }
 0x10e   : > { %v629_v1 = vpop.permute.xlu2 %628  ;;  %1303 = vmatpush.msra.mxu2 %v1007_v25  ;;  %1304 = vmatpush.msra.mxu3 %v1007_v25 }
 0x10f   : > { %v2050_v17 = vsel %vm915_vm5, %v910_v31, %v629_v1  ;;  %v609_v27 = vpop.permute.xlu1 %608  ;;  %v607_v18 = vpop.permute.xlu0 %606  ;;  %1070 = vmatpush.msra.mxu0 %v1007_v25  ;;  %1302 = vmatpush.msra.mxu1 %v1007_v25 }
 0x110   : > { %v2056_v35 = vsel %vm915_vm5, %v900_v38, %v609_v27  ;;  %v2060_v32 = vsel %vm915_vm5, %v1897_v30, %v607_v18  ;;  %1306 = vmatpush.msra.mxu2 %v1006_v4  ;;  %v1005_v30 = vld [vmem:[%s2381_s2 + $0x28] sm:$0xff]  ;;  %1307 = vmatpush.msra.mxu3 %v1006_v4 }
 0x111   : > { %1071 = vmatpush.msra.mxu0 %v1006_v4  ;;  %1305 = vmatpush.msra.mxu1 %v1006_v4 }
 0x112   : > { %1309 = vmatpush.msra.mxu2 %v1005_v30  ;;  %1310 = vmatpush.msra.mxu3 %v1005_v30 }
 0x113   : > { %1072 = vmatpush.msra.mxu0 %v1005_v30  ;;  %1308 = vmatpush.msra.mxu1 %v1005_v30 }
 0x114   : > { %729 = vrot.lane.b32.xlu2 %v1630_v48, %s1424_s26  ;;  %v1004_v48 = vld [vmem:[%s2381_s2 + $0x20] sm:$0xff] }
 0x115   : > { %773 = vrot.lane.b32.xlu1 %v1627_v47, %s1423_s25  ;;  %765 = vrot.lane.b32.xlu0 %v1554_v21, %s1423_s25 }
 0x116   : > { %v2077_v38 = vpop.permute.xlu2 %683  ;;  %1312 = vmatpush.msra.mxu2 %v1004_v48  ;;  %1313 = vmatpush.msra.mxu3 %v1004_v48 }
 0x117   : > { %v615_v13 = vpop.permute.xlu1 %614  ;;  %v613_v34 = vpop.permute.xlu0 %612  ;;  %1073 = vmatpush.msra.mxu0 %v1004_v48  ;;  %1311 = vmatpush.msra.mxu1 %v1004_v48 }
 0x118   : > { %v2084_v21 = vsel %vm915_vm5, %v1986_v57, %v615_v13  ;;  %v2088_v47 = vsel %vm915_vm5, %v1923_v14, %v613_v34  ;;  %1315 = vmatpush.msra.mxu2 %v1003_v2  ;;  %v1002_v57 = vld [vmem:[%s2381_s2 + $0x10] sm:$0xff]  ;;  %1316 = vmatpush.msra.mxu3 %v1003_v2  ;;  %v1001_v14 = vld [vmem:[%s2381_s2 + $0x8] sm:$0xff] }
 0x119   : > { %1074 = vmatpush.msra.mxu0 %v1003_v2  ;;  %1314 = vmatpush.msra.mxu1 %v1003_v2 }
 0x11a   : > { %1318 = vmatpush.msra.mxu2 %v1002_v57  ;;  %1319 = vmatpush.msra.mxu3 %v1002_v57 }
 0x11b   : > { %1075 = vmatpush.msra.mxu0 %v1002_v57  ;;  %1317 = vmatpush.msra.mxu1 %v1002_v57 }
 0x11c   : > { %826 = vrot.lane.b32.xlu2 %v1734_v55, %s1425_s27  ;;  %1321 = vmatpush.msra.mxu2 %v1001_v14 }
 0x11d   : > { %818 = vrot.lane.b32.xlu1 %v1717_v42, %s1425_s27  ;;  %737 = vrot.lane.b32.xlu0 %v345_v26, %s1424_s26 }
 0x11e   : > { %v2108_v51 = vpop.permute.xlu2 %779  ;;  %1322 = vmatpush.msra.mxu3 %v1001_v14  ;;  %1324 = vmatpush.msra.mxu2 %v1000_v43 }
 0x11f   : > { %v621_v40 = vpop.permute.xlu1 %620  ;;  %v619_v8 = vpop.permute.xlu0 %618  ;;  %1076 = vmatpush.msra.mxu0 %v1001_v14  ;;  %1320 = vmatpush.msra.mxu1 %v1001_v14 }
 0x120   : > { %v2116_v0 = vsel %vm915_vm5, %v2007_v60, %v621_v40  ;;  %v2120_v31 = vsel %vm915_vm5, %v1939_v53, %v619_v8  ;;  %1325 = vmatpush.msra.mxu3 %v1000_v43  ;;  %v811_v53 = vrot.slane %v345_v26, 2  ;;  %v347_v26 = vld [vmem:[%s1800_s22 + $0x28] sm:$0x3]  ;;  %s1269_s22 = sshll.u32 %s1400_s15, 4 }
 0x121   : > { %1077 = vmatpush.msra.mxu0 %v1000_v43  ;;  %1323 = vmatpush.msra.mxu1 %v1000_v43  ;;  %v814_v57 = vrot.slane %v347_v26, 2  ;;  %v761_v14 = vrot.slane %v347_v26, 1  ;;  %p311_p8 = scmp.lt.s32.totalorder %s1269_s22, 31 }
 0x122   : > { %v813_v16 = vsel %vm461_vm1, %v811_v53, %v812_v7 }
 0x123   : > { %v762_v40 = vsel %vm372_vm0, %v759_v19, %v761_v14  ;;  %s2409_s22 = smov (!%p311_p8, %s1269_s22), 31 }
 0x124   : > { %836 = vrot.lane.b32.xlu2 %v1771_v15, %s1425_s27 }
 0x125   : > { %791 = vrot.lane.b32.xlu1 %v760_v9, %s1423_s25  ;;  %783 = vrot.lane.b32.xlu0 %v1656_v58, %s1423_s25  ;;  %v2391_v9 = vld [vmem:[#allocation2_spill] sm:$0xff] }
 0x126   : > { %v841_v60 = vpop.permute.xlu2 %840 }
 0x127   : > { %v627_v1 = vpop.permute.xlu1 %626  ;;  %v625_v27 = vpop.permute.xlu0 %624 }
 0x128   : > { %v2133_v18 = vsel %vm915_vm5, %v2026_v5, %v627_v1  ;;  %v2137_v15 = vsel %vm915_vm5, %v1956_v44, %v625_v27  ;;  %v2393_v1 = vld [vmem:[#allocation3_spill] sm:$0xff] }
 0x12c   : > { %671 = vrot.lane.b32.xlu2 %v1737_v56, %s1422_s24 }
 0x12d   : > { %663 = vrot.lane.b32.xlu1 %v1692_v20, %s1422_s24  ;;  %844 = vrot.lane.b32.xlu0 %v813_v16, %s1425_s27  ;;  %v924_v20 = vsel %vm915_vm5, %v2003_v61, %v2034_v23 }
 0x12e   : > { %v2145_v58 = vpop.permute.xlu2 %632 }
 0x12f   : > { %v676_v25 = vpop.permute.xlu1 %675  ;;  %v631_v4 = vpop.permute.xlu0 %630 }
 0x130   : > { %v941_v30 = vsel %vm932_vm6, %v924_v20, %v676_v25 }
 0x134   : > { %721 = vrot.lane.b32.xlu2 %v1605_v39, %s1424_s26  ;;  %v928_v39 = vsel %vm915_vm5, %v1967_v12, %v631_v4 }
 0x135   : > { %713 = vrot.lane.b32.xlu1 %v1577_v28, %s1424_s26  ;;  %636 = vrot.lane.b32.xlu0 %v1991_v52, %s1421_s23  ;;  %v945_v52 = vsel %vm932_vm6, %v928_v39, %v2077_v38  ;;  %s1270_s23 = sshll.u32 %s2405_s16, 5 }
 0x136   : > { %v2153_v44 = vpop.permute.xlu2 %677 }
 0x137   : > { %v734_v56 = vpop.permute.xlu1 %733  ;;  %v726_v5 = vpop.permute.xlu0 %725 }
 0x138   : > { %v958_v28 = vsel %vm949_vm7, %v941_v30, %v726_v5  ;;  %v962_v12 = vsel %vm949_vm7, %v945_v52, %v734_v56 }
 0x13c   : > { %767 = vrot.lane.b32.xlu2 %v1596_v36, %s1423_s25  ;;  %v975_v36 = vsel %vm966_vm8, %v958_v28, %v2108_v51  ;;  %v815_v51 = vsel %vm461_vm1, %v812_v7, %v814_v57  ;;  %v2392_v7 = vld [vmem:[#allocation4_spill] sm:$0xff] }
 0x13d   : > { %689 = vrot.lane.b32.xlu1 %v2012_v59, %s1422_s24  ;;  %681 = vrot.lane.b32.xlu0 %v1750_v3, %s1422_s24 }
 0x13e   : > { %v772_v61 = vpop.permute.xlu2 %771 }
 0x13f   : > { %v833_v23 = vpop.permute.xlu1 %832  ;;  %v788_v13 = vpop.permute.xlu0 %787 }
 0x140   : > { %v979_v34 = vsel %vm966_vm8, %v962_v12, %v788_v13  ;;  %v992_v59 = vsel %vm983_vm9, %v975_v36, %v833_v23 }
 0x141   : > { %1280 = vmatmul.msk.f32.vlgmr.msra.gmra.mxu2 %vm1013_vm10, %v992_v59  ;;  %v996_v3 = vsel %vm983_vm9, %v979_v34, %v841_v60 }
 0x142   : > { %1284 = vmatmul.msk.f32.vlgmr.msra.gmra.mxu3 %vm1013_vm10, %v996_v3 }
 0x144   : > { %739 = vrot.lane.b32.xlu2 %v2095_v29, %s1424_s26 }
 0x145   : > { %731 = vrot.lane.b32.xlu1 %v1633_v49, %s1424_s26  ;;  %775 = vrot.lane.b32.xlu0 %v1624_v46, %s1423_s25 }
 0x146   : > { %v817_v2 = vpop.permute.xlu2 %816 }
 0x147   : > { %v668_v38 = vpop.permute.xlu1 %667  ;;  %v660_v48 = vpop.permute.xlu0 %659 }
 0x148   : > { %v937_v53 = vsel %vm932_vm6, %v2084_v21, %v668_v38  ;;  %v929_v21 = vsel %vm915_vm5, %v2041_v22, %v2145_v58 }
 0x14c   : > { %785 = vrot.lane.b32.xlu2 %v1680_v10, %s1423_s25  ;;  %v933_v10 = vsel %vm932_vm6, %v2060_v32, %v660_v48 }
 0x14d   : > { %828 = vrot.lane.b32.xlu1 %v1731_v54, %s1425_s27  ;;  %820 = vrot.lane.b32.xlu0 %v1714_v41, %s1425_s27 }
 0x14e   : > { %v790_v46 = vpop.permute.xlu2 %789 }
 0x14f   : > { %v718_v50 = vpop.permute.xlu1 %717  ;;  %v710_v49 = vpop.permute.xlu0 %709 }
 0x150   : > { %v950_v41 = vsel %vm949_vm7, %v933_v10, %v710_v49  ;;  %v954_v60 = vsel %vm949_vm7, %v937_v53, %v718_v50 }
 0x154   : > { %846 = vrot.lane.b32.xlu2 %v815_v51, %s1425_s27 }
 0x155   : > { %838 = vrot.lane.b32.xlu1 %v1768_v11, %s1425_s27  ;;  %793 = vrot.lane.b32.xlu0 %v762_v40, %s1423_s25 }
 0x156   : > { %v662_v19 = vpop.permute.xlu2 %661 }
 0x157   : > { %v764_v54 = vpop.permute.xlu1 %763  ;;  %v686_v8 = vpop.permute.xlu0 %685  ;;  %v934_v38 = vsel %vm932_vm6, %v2056_v35, %v662_v19 }
 0x158   : > { %v967_v43 = vsel %vm966_vm8, %v950_v41, %v764_v54  ;;  %v946_v4 = vsel %vm932_vm6, %v929_v21, %v686_v8 }
 0x159   : > { %v984_v29 = vsel %vm983_vm9, %v967_v43, %v817_v2 }
 0x15a   : > { %1272 = vmatmul.msk.f32.vlgmr.msra.gmra.mxu0 %vm1013_vm10, %v984_v29 }
 0x15c   : > { %715 = vrot.lane.b32.xlu2 %v2391_v9, %s1424_s26 }
 0x15d   : > { %673 = vrot.lane.b32.xlu1 %v1734_v55, %s1422_s24  ;;  %665 = vrot.lane.b32.xlu0 %v1717_v42, %s1422_s24  ;;  %v971_v42 = vsel %vm966_vm8, %v954_v60, %v772_v61  ;;  %s314_s24 = sadd.s32 %s1270_s23, %s2409_s22 }
 0x15e   : > { %v712_v55 = vpop.permute.xlu2 %711  ;;  %s1271_s15 = sshll.u32 %s314_s24, 3 }
 0x15f   : > { %v736_v11 = vpop.permute.xlu1 %735  ;;  %v728_v32 = vpop.permute.xlu0 %727  ;;  %v951_v48 = vsel %vm949_vm7, %v934_v38, %v712_v55  ;;  %s2295_s7 = scalar_lea.vmem %s2383_s4, %s1271_s15 }
 0x160   : > { %v963_v56 = vsel %vm949_vm7, %v946_v4, %v736_v11 }
 0x161   : > { %v980_v58 = vsel %vm966_vm8, %v963_v56, %v790_v46 }
 0x164   : > { %777 = vrot.lane.b32.xlu2 %v2392_v7, %s1423_s25 }
 0x165   : > { %769 = vrot.lane.b32.xlu1 %v2393_v1, %s1423_s25  ;;  %723 = vrot.lane.b32.xlu0 %v1599_v37, %s1424_s26  ;;  %v942_v37 = vsel %vm932_vm6, %v2137_v15, %v2153_v44 }
 0x166   : > { %v959_v5 = vsel %vm949_vm7, %v942_v37, %v728_v32  ;;  %v688_v39 = vpop.permute.xlu2 %687 }
 0x167   : > { %v782_v27 = vpop.permute.xlu1 %781  ;;  %v825_v16 = vpop.permute.xlu0 %824 }
 0x168   : > { %v988_v25 = vsel %vm983_vm9, %v971_v42, %v825_v16  ;;  %v976_v20 = vsel %vm966_vm8, %v959_v5, %v782_v27 }
 0x169   : > { %1276 = vmatmul.msk.f32.vlgmr.msra.gmra.mxu1 %vm1013_vm10, %v988_v25 }
 0x16d   : > { %830 = vrot.lane.b32.xlu1 %v1756_v6, %s1425_s27  ;;  %822 = vrot.lane.b32.xlu0 %v1711_v33, %s1425_s27 }
 0x16e   : > { %v730_v33 = vpop.permute.xlu2 %729 }
 0x16f   : > { %v843_v30 = vpop.permute.xlu1 %842  ;;  %v835_v22 = vpop.permute.xlu0 %834 }
 0x170   : > { %v993_v28 = vsel %vm983_vm9, %v976_v20, %v835_v22  ;;  %v997_v52 = vsel %vm983_vm9, %v980_v58, %v843_v30 }
 0x171   : > { %1281 = vmatmul.msk.f32.gmra.mxu2 %vm1013_vm10, %v993_v28  ;;  %1285 = vmatmul.msk.f32.gmra.mxu3 %vm1013_vm10, %v997_v52 }
 0x176   : > { %v827_v12 = vpop.permute.xlu2 %826 }
 0x177   : > { %v635_v6 = vpop.permute.xlu1 %634  ;;  %v670_v15 = vpop.permute.xlu0 %669 }
 0x178   : > { %v938_v23 = vsel %vm932_vm6, %v2021_v24, %v670_v15  ;;  %v930_v41 = vsel %vm915_vm5, %v2037_v45, %v635_v6 }
 0x179   : > { %v947_v54 = vsel %vm932_vm6, %v930_v41, %v688_v39 }
 0x17e   : > { %v837_v2 = vpop.permute.xlu2 %836 }
 0x17f   : > { %v680_v44 = vpop.permute.xlu1 %679  ;;  %v720_v61 = vpop.permute.xlu0 %719 }
 0x180   : > { %v955_v13 = vsel %vm949_vm7, %v938_v23, %v720_v61  ;;  %v943_v50 = vsel %vm932_vm6, %v2133_v18, %v680_v44 }
 0x181   : > { %v960_v51 = vsel %vm949_vm7, %v943_v50, %v730_v33 }
 0x186   : > { %v672_v40 = vpop.permute.xlu2 %671 }
 0x187   : > { %v774_v36 = vpop.permute.xlu1 %773  ;;  %v766_v34 = vpop.permute.xlu0 %765  ;;  %v939_v42 = vsel %vm932_vm6, %v2120_v31, %v672_v40  ;;  %v2284_v31 = vld [vmem:[%s2382_s3] ss:$0 sm:$0xff] }
 0x188   : > { %v972_v59 = vsel %vm966_vm8, %v955_v13, %v774_v36  ;;  %v968_v26 = vsel %vm966_vm8, %v951_v48, %v766_v34 }
 0x189   : > { %v989_v3 = vsel %vm983_vm9, %v972_v59, %v827_v12 }
 0x18a   : > { %1277 = vmatmul.msk.f32.gmra.mxu1 %vm1013_vm10, %v989_v3 }
 0x18e   : > { %v722_v9 = vpop.permute.xlu2 %721 }
 0x18f   : > { %v819_v57 = vpop.permute.xlu1 %818  ;;  %v738_v24 = vpop.permute.xlu0 %737  ;;  %v956_v25 = vsel %vm949_vm7, %v939_v42, %v722_v9 }
 0x190   : > { %v985_v14 = vsel %vm983_vm9, %v968_v26, %v819_v57  ;;  %v964_v8 = vsel %vm949_vm7, %v947_v54, %v738_v24 }
 0x191   : > { %1273 = vmatmul.msk.f32.gmra.mxu0 %vm1013_vm10, %v985_v14 }
 0x196   : > { %v768_v53 = vpop.permute.xlu2 %767 }
 0x197   : > { %v792_v49 = vpop.permute.xlu1 %791  ;;  %v784_v46 = vpop.permute.xlu0 %783 }
 0x198   : > { %v977_v35 = vsel %vm966_vm8, %v960_v51, %v784_v46  ;;  %v981_v18 = vsel %vm966_vm8, %v964_v8, %v792_v49 }
 0x199   : > { %v994_v10 = vsel %vm983_vm9, %v977_v35, %v837_v2 }
 0x19a   : > { %1282 = vmatmul.msk.f32.gmra.mxu2 %vm1013_vm10, %v994_v10 }
 0x19e   : > { %v740_v7 = vpop.permute.xlu2 %739 }
 0x19f   : > { %v664_v43 = vpop.permute.xlu1 %663  ;;  %v845_v29 = vpop.permute.xlu0 %844 }
 0x1a0   : > { %v998_v19 = vsel %vm983_vm9, %v981_v18, %v845_v29  ;;  %v935_v27 = vsel %vm932_vm6, %v2000_v63, %v664_v43 }
 0x1a1   : > { %1286 = vmatmul.msk.f32.gmra.mxu3 %vm1013_vm10, %v998_v19 }
 0x1a6   : > { %v786_v21 = vpop.permute.xlu2 %785 }
 0x1a7   : > { %v714_v11 = vpop.permute.xlu1 %713  ;;  %v637_v32 = vpop.permute.xlu0 %636 }
 0x1a8   : > { %v952_v16 = vsel %vm949_vm7, %v935_v27, %v714_v11  ;;  %v931_v30 = vsel %vm915_vm5, %v1981_v62, %v637_v32 }
 0x1a9   : > { %v969_v4 = vsel %vm966_vm8, %v952_v16, %v768_v53 }
 0x1ae   : > { %v847_v15 = vpop.permute.xlu2 %846 }
 0x1af   : > { %v690_v45 = vpop.permute.xlu1 %689  ;;  %v682_v60 = vpop.permute.xlu0 %681 }
 0x1b0   : > { %v944_v22 = vsel %vm932_vm6, %v2050_v17, %v682_v60  ;;  %v948_v58 = vsel %vm932_vm6, %v931_v30, %v690_v45 }
 0x1b1   : > { %v965_v17 = vsel %vm949_vm7, %v948_v58, %v740_v7 }
 0x1b6   : > { %v716_v59 = vpop.permute.xlu2 %715 }
 0x1b7   : > { %v732_v1 = vpop.permute.xlu1 %731  ;;  %v776_v55 = vpop.permute.xlu0 %775 }
 0x1b8   : > { %v973_v56 = vsel %vm966_vm8, %v956_v25, %v776_v55  ;;  %v961_v39 = vsel %vm949_vm7, %v944_v22, %v732_v1 }
 0x1b9   : > { %v978_v33 = vsel %vm966_vm8, %v961_v39, %v786_v21 }
 0x1be   : > { %v778_v14 = vpop.permute.xlu2 %777 }
 0x1bf   : > { %v829_v37 = vpop.permute.xlu1 %828  ;;  %v821_v5 = vpop.permute.xlu0 %820 }
 0x1c0   : > { %v986_v20 = vsel %vm983_vm9, %v969_v4, %v821_v5  ;;  %v990_v63 = vsel %vm983_vm9, %v973_v56, %v829_v37 }
 0x1c1   : > { %1274 = vmatmul.msk.f32.gmra.mxu0 %vm1013_vm10, %v986_v20  ;;  %1278 = vmatmul.msk.f32.gmra.mxu1 %vm1013_vm10, %v990_v63 }
 0x1c4   : > { %v1103_v28 = vpop.f32.mrf.mxu2 }
 0x1c5   : > { %v1104_v52 = vadd.f32 %v2284_v31, %v1103_v28  ;;  %v1115_v6 = vpop.f32.mrf.mxu3 }
 0x1c6   : > { %v1116_v62 = vadd.f32 %v2284_v31, %v1115_v6 }
 0x1c7   : > { %1135 = vst.msk [vmem:[%s2295_s7 + $0x40] sm:$0xff] %vm864_vm3, %v1104_v52  ;;  %v839_v44 = vpop.permute.xlu1 %838  ;;  %v794_v61 = vpop.permute.xlu0 %793 }
 0x1c8   : > { %1139 = vst.msk [vmem:[%s2295_s7 + $0x60] sm:$0xff] %vm864_vm3, %v1116_v62  ;;  %v982_v12 = vsel %vm966_vm8, %v965_v17, %v794_v61  ;;  %v995_v23 = vsel %vm983_vm9, %v978_v33, %v839_v44 }
 0x1c9   : > { %1283 = vmatmul.msk.f32.gmra.mxu2 %vm1013_vm10, %v995_v23  ;;  %v999_v13 = vsel %vm983_vm9, %v982_v12, %v847_v15 }
 0x1ca   : > { %1287 = vmatmul.msk.f32.gmra.mxu3 %vm1013_vm10, %v999_v13 }
 0x1cf   : > { %v674_v36 = vpop.permute.xlu1 %673  ;;  %v666_v34 = vpop.permute.xlu0 %665 }
 0x1d0   : > { %v940_v26 = vsel %vm932_vm6, %v2116_v0, %v674_v36  ;;  %v936_v57 = vsel %vm932_vm6, %v2088_v47, %v666_v34 }
 0x1d1   : > { %v953_v50 = vsel %vm949_vm7, %v936_v57, %v716_v59 }
 0x1d7   : > { %v770_v3 = vpop.permute.xlu1 %769  ;;  %v1079_v38 = vpop.f32.mrf.mxu0 }
 0x1d8   : > { %v1080_v48 = vadd.f32 %v2284_v31, %v1079_v38  ;;  %v724_v2 = vpop.permute.xlu0 %723  ;;  %v970_v46 = vsel %vm966_vm8, %v953_v50, %v770_v3 }
 0x1d9   : > { %v957_v24 = vsel %vm949_vm7, %v940_v26, %v724_v2 }
 0x1da   : > { %1127 = vst.msk [vmem:[%s2295_s7] sm:$0xff] %vm864_vm3, %v1080_v48  ;;  %v974_v49 = vsel %vm966_vm8, %v957_v24, %v778_v14 }
 0x1df   : > { %v831_v51 = vpop.permute.xlu1 %830 }
 0x1e0   : > { %v823_v40 = vpop.permute.xlu0 %822  ;;  %v991_v35 = vsel %vm983_vm9, %v974_v49, %v831_v51 }
 0x1e1   : > { %v987_v0 = vsel %vm983_vm9, %v970_v46, %v823_v40  ;;  %1279 = vmatmul.msk.f32.gmra.mxu1 %vm1013_vm10, %v991_v35 }
 0x1e2   : > { %1275 = vmatmul.msk.f32.gmra.mxu0 %vm1013_vm10, %v987_v0 }
 0x1e6   : > { %v1091_v47 = vpop.f32.mrf.mxu1 }
 0x1e7   : > { %v1092_v10 = vadd.f32 %v2284_v31, %v1091_v47 }
 0x1e9   : > { %1131 = vst.msk [vmem:[%s2295_s7 + $0x20] sm:$0xff] %vm864_vm3, %v1092_v10 }
 0x1f4   : > { %v1106_v41 = vpop.f32.mrf.mxu2  ;;  %v1118_v54 = vpop.f32.mrf.mxu3 }
 0x1f5   : > { %v1107_v8 = vadd.f32 %v2284_v31, %v1106_v41  ;;  %v1119_v18 = vadd.f32 %v2284_v31, %v1118_v54 }
 0x1f7   : > { %1136 = vst.msk [vmem:[%s2295_s7 + $0x48] sm:$0xff] %vm864_vm3, %v1107_v8 }
 0x1f8   : > { %1140 = vst.msk [vmem:[%s2295_s7 + $0x68] sm:$0xff] %vm864_vm3, %v1119_v18 }
 0x207   : > { %v1094_v43 = vpop.f32.mrf.mxu1 }
 0x208   : > { %v1095_v29 = vadd.f32 %v2284_v31, %v1094_v43 }
 0x20a   : > { %1132 = vst.msk [vmem:[%s2295_s7 + $0x28] sm:$0xff] %vm864_vm3, %v1095_v29 }
 0x20e   : > { %v1082_v19 = vpop.f32.mrf.mxu0 }
 0x20f   : > { %v1083_v9 = vadd.f32 %v2284_v31, %v1082_v19 }
 0x211   : > { %1128 = vst.msk [vmem:[%s2295_s7 + $0x8] sm:$0xff] %vm864_vm3, %v1083_v9 }
 0x21d   : > { %v1109_v11 = vpop.f32.mrf.mxu2 }
 0x21e   : > { %v1110_v32 = vadd.f32 %v2284_v31, %v1109_v11 }
 0x220   : > { %1137 = vst.msk [vmem:[%s2295_s7 + $0x50] sm:$0xff] %vm864_vm3, %v1110_v32 }
 0x224   : > { %v1121_v53 = vpop.f32.mrf.mxu3 }
 0x225   : > { %v1122_v45 = vadd.f32 %v2284_v31, %v1121_v53 }
 0x227   : > { %1141 = vst.msk [vmem:[%s2295_s7 + $0x70] sm:$0xff] %vm864_vm3, %v1122_v45 }
 0x23e   : > { %v1085_v60 = vpop.f32.mrf.mxu0  ;;  %v1097_v7 = vpop.f32.mrf.mxu1 }
 0x23f   : > { %v1086_v1 = vadd.f32 %v2284_v31, %v1085_v60  ;;  %v1098_v55 = vadd.f32 %v2284_v31, %v1097_v7 }
 0x241   : > { %1129 = vst.msk [vmem:[%s2295_s7 + $0x10] sm:$0xff] %vm864_vm3, %v1086_v1 }
 0x242   : > { %1133 = vst.msk [vmem:[%s2295_s7 + $0x30] sm:$0xff] %vm864_vm3, %v1098_v55 }
 0x24c   : > { %v1112_v27 = vpop.f32.mrf.mxu2 }
 0x24d   : > { %v1113_v16 = vadd.f32 %v2284_v31, %v1112_v27  ;;  %v1124_v42 = vpop.f32.mrf.mxu3 }
 0x24e   : > { %v1125_v25 = vadd.f32 %v2284_v31, %v1124_v42 }
 0x24f   : > { %1138 = vst.msk [vmem:[%s2295_s7 + $0x58] sm:$0xff] %vm864_vm3, %v1113_v16 }
 0x250   : > { %1142 = vst.msk [vmem:[%s2295_s7 + $0x78] sm:$0xff] %vm864_vm3, %v1125_v25 }
 0x25e   : > { %v1100_v21 = vpop.f32.mrf.mxu1 }
 0x25f   : > { %v1088_v4 = vpop.f32.mrf.mxu0  ;;  %v1101_v56 = vadd.f32 %v2284_v31, %v1100_v21 }
 0x260   : > { %v1089_v37 = vadd.f32 %v2284_v31, %v1088_v4 }
 0x261   : > { %1134 = vst.msk [vmem:[%s2295_s7 + $0x38] sm:$0xff] %vm864_vm3, %v1101_v56 }
 0x262   : > { %1130 = vst.msk [vmem:[%s2295_s7 + $0x18] sm:$0xff] %vm864_vm3, %v1089_v37 }
 0x263 PF: > { %s14_s19 = sadd.s32 1, %s1416_s19   ;;  %s2394_s15 = smov %s1408_s17 }
 0x264   : > { %p11_p9 = scmp.ge.s32.totalorder %s14_s19, 6   ;;  %s2395_s16 = smov %s1412_s18 }
 0x265   : > { %s2396_s17 = smov %s2399_s20  ;;  %s2397_s18 = smov %s2403_s21 }
 0x266   :  { %13 = sbr.rel (!%p11_p9) target bundleno = 3 (0x3), region = 69 }

// kernel: edsr_forward.7
= control target key start
LH: loop header
LB: loop body
LE: loop exit
PB: predicated region body
PF: predicated region fallthrough
CT: control target
= control target key end

     0   :  { %s1572_s18 = smov 0   ;;  %s1574_s19 = smov 0   ;;  %s2521_s0 = inlined_call_operand.vmem [shape: f32[2,18,18,8], index: 0, kind: input, shape index: {}, may-alias: {0,1}]   ;;  %s2522_s1 = inlined_call_operand.vmem [shape: f32[2,18,18,8], index: 1, kind: input, shape index: {}, may-alias: {0,1}]   ;;  %s2523_s2 = inlined_call_operand.vmem [shape: f32[72,8], index: 2, kind: input, shape index: {}]   ;;  %s2524_s3 = inlined_call_operand.vmem [shape: f32[1,8], index: 3, kind: input, shape index: {}]   ;;  %s2525_s4 = inlined_call_operand.vmem [shape: f32[2,256,8], index: 4, kind: input, shape index: {}]   ;;  %s2526_s5 = inlined_call_operand.vmem [shape: f32[2,256,8], index: 5, kind: output, shape index: {}]  }
   0x1   :  { %s1576_s20 = smov 0   ;;  %s1578_s21 = smov 0  }
   0x2   :  { %s1580_s22 = smov 0  }
   0x3 LB: > { %s24_s23 = sadd.s32 1, %s1524_s20  ;;  %s27_s24 = sadd.s32 1, %s1528_s21  ;;  %s1532_s22 = sphi %s1580_s22, %s15_s22   ;;  %s1528_s21 = sphi %s1578_s21, %s2540_s21   ;;  %s1524_s20 = sphi %s1576_s20, %s2539_s20   ;;  %s1520_s19 = sphi %s1574_s19, %s2538_s19   ;;  %s1516_s18 = sphi %s1572_s18, %s2537_s18  }
   0x4   : > { %p25_p0 = scmp.ge.s32.totalorder %s24_s23, 2  ;;  %p1376_p1 = scmp.ge.s32.totalorder %s1532_s22, 1 }
   0x5   : > { %p262_p2 = scmp.lt.s32.totalorder %s1532_s22, 5 }
   0x6   : > { %s2542_s23 = smov (%p25_p0, %s24_s23), 0  ;;  %s2544_s24 = smov (!%p25_p0, %s27_s24), %s1528_s21 }
   0x7   : > { %p263_p3 = pnand %p1376_p1, %p262_p2  ;;  %p29_p4 = scmp.ge.s32.totalorder %s2544_s24, 2 }
   0x9   : > { %s2546_s24 = smov (%p29_p4, %s2544_s24), 0  ;;  %266 = sbr.rel (%p263_p3) target bundleno = 613 (0x265), region = 40 }
   0xe   : > { %s1605_s25 = sshll.u32 %s1516_s18, 3  ;;  %p331_p5 = scmp.lt.s32.totalorder %s1520_s19, 1  ;;  %vm435_vm0 = vcmask 1046528   ;;  %vm524_vm1 = vcmask 1045504   ;;  %vm944_vm2 = vcmask 130048   ;;  %vm927_vm3 = vcmask 64512  }
   0xf   : > { %p333_p6 = scmp.lt.s32.totalorder %s1605_s25, 17  ;;  %s1414_s30 = sadd.s32 8, %s1605_s25  ;;  %vm961_vm4 = vcmask 195584   ;;  %vm978_vm5 = vcmask 261120   ;;  %vm995_vm6 = vcmask 326656   ;;  %vm1012_vm7 = vcmask 392192  }
  0x10   : > { %s2548_s19 = smov (!%p331_p5, %s1520_s19), 1  ;;  %p1629_p7 = scmp.lt.s32.totalorder %s1414_s30, 17  ;;  %vm1029_vm8 = vcmask 457728   ;;  %vm1046_vm9 = vcmask 523264   ;;  %vm1076_vm10 = vcmask 588800  }
  0x11   : > { %s334_s26 = scalar_select %p333_p6, %s1605_s25, 17 }
  0x12   : > { %s1443_s27 = smul.u32 54, %s2548_s19  ;;  %s1534_s11 = smov 8  }
  0x13   : > { %s1442_s28 = smul.u32 3, %s334_s26  ;;  %s2550_s30 = smov (!%p1629_p7, %s1414_s30), 17 }
  0x14   : > { %s1444_s12 = smul.u32 3, %s2550_s30  ;;  %s1535_s14 = smov 16  }
  0x15   : > { %s337_s29 = sadd.s32 %s1443_s27, %s1442_s28  ;;  %s1536_s15 = smov 24  }
  0x16   : > { %s1378_s6 = sshll.u32 %s337_s29, 3  ;;  %s1689_s13 = sadd.s32 %s1444_s12, %s1443_s27 }
  0x17   : > { %s1618_s9 = scalar_lea.vmem %s2521_s0, %s1378_s6  ;;  %s1381_s16 = sshll.u32 %s1689_s13, 3 }
  0x18   : > { %v1621_v0 = vld [vmem:[%s1618_s9 + $0x30] sm:$0xff]  ;;  %v1624_v1 = vld [vmem:[%s1618_s9 + $0x38] sm:$0xff]  ;;  %v1636_v5 = vld [vmem:[%s1618_s9 + $0x20] sm:$0xff]  ;;  %s1921_s26 = scalar_lea.vmem %s2522_s1, %s1381_s16  ;;  %s1537_s27 = smov 32  }
  0x19   : > { %v1627_v2 = vld [vmem:[%s1618_s9 + $0x18] sm:$0xff]  ;;  %v446_v3 = vrot.slane %v1621_v0, 1  ;;  %v447_v4 = vrot.slane %v1624_v1, 1  ;;  %v1640_v7 = vld [vmem:[%s1618_s9] sm:$0xff]  ;;  %v1643_v8 = vld [vmem:[%s1618_s9 + $0x8] sm:$0xff]  ;;  %v442_v9 = vrot.slane %v1636_v5, 1 }
  0x1a   : > { %v441_v6 = vrot.slane %v1627_v2, 1  ;;  %v436_v10 = vrot.slane %v1640_v7, 1  ;;  %v437_v11 = vrot.slane %v1643_v8, 1  ;;  %v1649_v12 = vld [vmem:[%s1618_s9 + $0x40] sm:$0x3]  ;;  %v1685_v25 = vld [vmem:[%s1618_s9 + $0x68] sm:$0xff] }
  0x1b   : > { %v1652_v13 = vsel %vm435_vm0, %v446_v3, %v447_v4  ;;  %v1655_v14 = vld [vmem:[%s1618_s9 + $0x28] sm:$0x3]  ;;  %v1658_v15 = vld [vmem:[%s1618_s9 + $0x10] sm:$0x3]  ;;  %v449_v18 = vrot.slane %v1649_v12, 1  ;;  %v1682_v24 = vld [vmem:[%s1618_s9 + $0x60] sm:$0xff] }
  0x1c   : > { %484 = vrot.lane.b32.xlu2 %v1652_v13, %s1534_s11  ;;  %v1663_v16 = vsel %vm435_vm0, %v441_v6, %v442_v9  ;;  %v438_v17 = vsel %vm435_vm0, %v436_v10, %v437_v11  ;;  %v444_v19 = vrot.slane %v1655_v14, 1  ;;  %v439_v20 = vrot.slane %v1658_v15, 1  ;;  %v1692_v26 = vld [vmem:[%s1618_s9 + $0x50] sm:$0xff]  ;;  %v1695_v27 = vld [vmem:[%s1618_s9 + $0x58] sm:$0x3]  ;;  %v1698_v28 = vld [vmem:[%s1618_s9 + $0x48] sm:$0xff] }
  0x1d   : > { %480 = vrot.lane.b32.xlu1 %v1663_v16, %s1534_s11  ;;  %476 = vrot.lane.b32.xlu0 %v438_v17, %s1534_s11  ;;  %v1675_v21 = vsel %vm435_vm0, %v447_v4, %v449_v18  ;;  %2531 = vst [vmem:[#allocation2_spill] sm:$0xff] %v1692_v26  ;;  %v456_v29 = vrot.slane %v1682_v24, 1  ;;  %v457_v30 = vrot.slane %v1685_v25, 1  ;;  %v452_v31 = vrot.slane %v1692_v26, 1  ;;  %v1720_v37 = vld [vmem:[%s1618_s9 + $0x80] sm:$0xff]  ;;  %v1726_v39 = vld [vmem:[%s1618_s9 + $0x78] sm:$0xff] }
  0x1e   : > { %v1678_v22 = vsel %vm435_vm0, %v442_v9, %v444_v19  ;;  %v440_v23 = vsel %vm435_vm0, %v437_v11, %v439_v20  ;;  %v454_v32 = vrot.slane %v1695_v27, 1  ;;  %v451_v33 = vrot.slane %v1698_v28, 1  ;;  %v1723_v38 = vld [vmem:[%s1618_s9 + $0x88] sm:$0x3]  ;;  %v1729_v40 = vld [vmem:[%s1618_s9 + $0x70] sm:$0x3] }
  0x1f   : > { %v1711_v34 = vsel %vm435_vm0, %v456_v29, %v457_v30  ;;  %v462_v41 = vrot.slane %v1720_v37, 1  ;;  %v464_v42 = vrot.slane %v1723_v38, 1  ;;  %v461_v43 = vrot.slane %v1726_v39, 1  ;;  %v1751_v48 = vld [vmem:[%s1618_s9 + $0xa8] sm:$0xff]  ;;  %v1754_v49 = vld [vmem:[%s1618_s9 + $0xb0] sm:$0xff]  ;;  %v1757_v50 = vld [vmem:[%s1618_s9 + $0x98] sm:$0xff] }
  0x20   : > { %v1714_v35 = vsel %vm435_vm0, %v452_v31, %v454_v32  ;;  %v1717_v36 = vsel %vm435_vm0, %v451_v33, %v452_v31  ;;  %v459_v44 = vrot.slane %v1729_v40, 1  ;;  %v1760_v51 = vld [vmem:[%s1618_s9 + $0xa0] sm:$0x3]  ;;  %v1763_v52 = vld [vmem:[%s1618_s9 + $0x90] sm:$0xff]  ;;  %v471_v53 = vrot.slane %v1751_v48, 1  ;;  %s1538_s28 = smov 40  }
  0x21   : > { %2532 = vst [vmem:[#allocation3_spill] sm:$0xff] %v1714_v35  ;;  %v1742_v45 = vsel %vm435_vm0, %v462_v41, %v464_v42  ;;  %v1745_v46 = vsel %vm435_vm0, %v461_v43, %v462_v41  ;;  %v472_v54 = vrot.slane %v1754_v49, 1  ;;  %v467_v55 = vrot.slane %v1757_v50, 1  ;;  %v1786_v61 = vld [vmem:[%s1618_s9 + $0xb8] sm:$0x3]  ;;  %s1539_s29 = smov 56  }
  0x22   : > { %2533 = vst [vmem:[#allocation4_spill] sm:$0xff] %v1742_v45  ;;  %v1748_v47 = vsel %vm435_vm0, %v457_v30, %v459_v44  ;;  %v469_v56 = vrot.slane %v1760_v51, 1  ;;  %v466_v57 = vrot.slane %v1763_v52, 1  ;;  %v526_v62 = vrot.slane %v1643_v8, 2  ;;  %s1540_s30 = smov 48   ;;  %s1541_s6 = smov 64  }
  0x23   : > { %v1777_v58 = vsel %vm435_vm0, %v471_v53, %v472_v54  ;;  %v528_v63 = vrot.slane %v1658_v15, 2  ;;  %v525_v3 = vrot.slane %v1640_v7, 2  ;;  %v474_v4 = vrot.slane %v1786_v61, 1 }
  0x24   : > { %486 = vrot.lane.b32.xlu2 %v1675_v21, %s1534_s11  ;;  %v1780_v59 = vsel %vm435_vm0, %v467_v55, %v469_v56  ;;  %v1783_v60 = vsel %vm435_vm0, %v466_v57, %v467_v55  ;;  %v535_v11 = vrot.slane %v1621_v0, 2  ;;  %v536_v15 = vrot.slane %v1624_v1, 2 }
  0x25   : > { %482 = vrot.lane.b32.xlu1 %v1678_v22, %s1534_s11  ;;  %478 = vrot.lane.b32.xlu0 %v440_v23, %s1534_s11  ;;  %v529_v6 = vsel %vm524_vm1, %v526_v62, %v528_v63  ;;  %v527_v9 = vsel %vm524_vm1, %v525_v3, %v526_v62  ;;  %v1801_v10 = vsel %vm435_vm0, %v472_v54, %v474_v4  ;;  %v531_v17 = vrot.slane %v1636_v5, 2 }
  0x26   : > { %v533_v18 = vrot.slane %v1655_v14, 2  ;;  %v530_v19 = vrot.slane %v1627_v2, 2  ;;  %v1813_v20 = vsel %vm524_vm1, %v535_v11, %v536_v15  ;;  %v541_v14 = vrot.slane %v1692_v26, 2 }
  0x27   : > { %v543_v30 = vrot.slane %v1695_v27, 2  ;;  %v540_v31 = vrot.slane %v1698_v28, 2  ;;  %v538_v32 = vrot.slane %v1649_v12, 2  ;;  %v550_v12 = vrot.slane %v1726_v39, 2 }
  0x28   : > { %v1816_v23 = vsel %vm524_vm1, %v531_v17, %v533_v18  ;;  %v1819_v29 = vsel %vm524_vm1, %v530_v19, %v531_v17  ;;  %v551_v27 = vrot.slane %v1720_v37, 2  ;;  %v546_v43 = vrot.slane %v1685_v25, 2 }
  0x29   : > { %v1832_v33 = vsel %vm524_vm1, %v541_v14, %v543_v30  ;;  %v1835_v41 = vsel %vm524_vm1, %v540_v31, %v541_v14  ;;  %v1838_v42 = vsel %vm524_vm1, %v536_v15, %v538_v32  ;;  %v548_v44 = vrot.slane %v1729_v40, 2  ;;  %v1924_v31 = vld [vmem:[%s1921_s26 + $0x8] sm:$0xff]  ;;  %v1927_v32 = vld [vmem:[%s1921_s26] sm:$0xff] }
  0x2a   : > { %v545_v53 = vrot.slane %v1682_v24, 2  ;;  %v1852_v54 = vsel %vm524_vm1, %v550_v12, %v551_v27  ;;  %v556_v40 = vrot.slane %v1757_v50, 2  ;;  %v558_v57 = vrot.slane %v1760_v51, 2 }
  0x2b   : > { %v1855_v55 = vsel %vm524_vm1, %v546_v43, %v548_v44  ;;  %v555_v62 = vrot.slane %v1763_v52, 2  ;;  %v553_v63 = vrot.slane %v1723_v38, 2  ;;  %v561_v38 = vrot.slane %v1754_v49, 2 }
  0x2c   : > { %492 = vrot.lane.b32.xlu2 %v1711_v34, %s1534_s11  ;;  %v1858_v56 = vsel %vm524_vm1, %v545_v53, %v546_v43  ;;  %v1871_v3 = vsel %vm524_vm1, %v556_v40, %v558_v57  ;;  %v563_v51 = vrot.slane %v1786_v61, 2 }
  0x2d   : > { %490 = vrot.lane.b32.xlu1 %v1714_v35, %s1534_s11  ;;  %488 = vrot.lane.b32.xlu0 %v1717_v36, %s1534_s11  ;;  %v1874_v4 = vsel %vm524_vm1, %v555_v62, %v556_v40 }
  0x2e   : > { %v1889_v11 = vsel %vm524_vm1, %v561_v38, %v563_v51 }
  0x34   : > { %498 = vrot.lane.b32.xlu2 %v1742_v45, %s1534_s11 }
  0x35   : > { %496 = vrot.lane.b32.xlu1 %v1745_v46, %s1534_s11  ;;  %494 = vrot.lane.b32.xlu0 %v1748_v47, %s1534_s11 }
  0x3c   : > { %504 = vrot.lane.b32.xlu2 %v1777_v58, %s1534_s11 }
  0x3d   : > { %502 = vrot.lane.b32.xlu1 %v1780_v59, %s1534_s11  ;;  %500 = vrot.lane.b32.xlu0 %v1783_v60, %s1534_s11 }
  0x44   : > { %567 = vrot.lane.b32.xlu2 %v529_v6, %s1535_s14  ;;  %v1877_v6 = vsel %vm524_vm1, %v551_v27, %v553_v63 }
  0x45   : > { %565 = vrot.lane.b32.xlu1 %v527_v9, %s1535_s14  ;;  %506 = vrot.lane.b32.xlu0 %v1801_v10, %s1534_s11  ;;  %v560_v9 = vrot.slane %v1751_v48, 2 }
  0x47   : > { %v1892_v15 = vsel %vm524_vm1, %v560_v9, %v561_v38 }
  0x4c   : > { %573 = vrot.lane.b32.xlu2 %v1813_v20, %s1535_s14 }
  0x4d   : > { %571 = vrot.lane.b32.xlu1 %v1816_v23, %s1535_s14  ;;  %569 = vrot.lane.b32.xlu0 %v1819_v29, %s1535_s14 }
  0x54   : > { %579 = vrot.lane.b32.xlu2 %v1832_v33, %s1535_s14 }
  0x55   : > { %577 = vrot.lane.b32.xlu1 %v1835_v41, %s1535_s14  ;;  %575 = vrot.lane.b32.xlu0 %v1838_v42, %s1535_s14 }
  0x5c   : > { %585 = vrot.lane.b32.xlu2 %v1852_v54, %s1535_s14 }
  0x5d   : > { %583 = vrot.lane.b32.xlu1 %v1855_v55, %s1535_s14  ;;  %581 = vrot.lane.b32.xlu0 %v1858_v56, %s1535_s14 }
  0x64   : > { %591 = vrot.lane.b32.xlu2 %v1871_v3, %s1535_s14 }
  0x65   : > { %589 = vrot.lane.b32.xlu1 %v1874_v4, %s1535_s14  ;;  %587 = vrot.lane.b32.xlu0 %v1877_v6, %s1535_s14 }
  0x6c   : > { %615 = vrot.lane.b32.xlu2 %v1627_v2, %s1536_s15 }
  0x6d   : > { %595 = vrot.lane.b32.xlu1 %v1889_v11, %s1535_s14  ;;  %593 = vrot.lane.b32.xlu0 %v1892_v15, %s1535_s14 }
  0x74   : > { %621 = vrot.lane.b32.xlu2 %v1624_v1, %s1536_s15 }
  0x75   : > { %619 = vrot.lane.b32.xlu1 %v1621_v0, %s1536_s15  ;;  %617 = vrot.lane.b32.xlu0 %v1636_v5, %s1536_s15 }
  0x76   : > { %v485_v61 = vpop.permute.xlu2 %484 }
  0x7c   : > { %627 = vrot.lane.b32.xlu2 %v1682_v24, %s1536_s15 }
  0x7d   : > { %625 = vrot.lane.b32.xlu1 %v1692_v26, %s1536_s15  ;;  %623 = vrot.lane.b32.xlu0 %v1698_v28, %s1536_s15 }
  0x7e   : > { %v1905_v17 = vpop.permute.xlu2 %486 }
  0x84   : > { %633 = vrot.lane.b32.xlu2 %v1720_v37, %s1536_s15 }
  0x85   : > { %631 = vrot.lane.b32.xlu1 %v1726_v39, %s1536_s15  ;;  %629 = vrot.lane.b32.xlu0 %v1685_v25, %s1536_s15 }
  0x86   : > { %v1910_v18 = vpop.permute.xlu2 %492 }
  0x8c   : > { %639 = vrot.lane.b32.xlu2 %v1751_v48, %s1536_s15 }
  0x8d   : > { %637 = vrot.lane.b32.xlu1 %v1757_v50, %s1536_s15  ;;  %635 = vrot.lane.b32.xlu0 %v1763_v52, %s1536_s15 }
  0x8e   : > { %v1916_v19 = vpop.permute.xlu2 %498 }
  0x8f   : > { %v481_v14 = vpop.permute.xlu1 %480  ;;  %v477_v30 = vpop.permute.xlu0 %476 }
  0x94   : > { %645 = vrot.lane.b32.xlu2 %v1924_v31, %s1536_s15 }
  0x95   : > { %643 = vrot.lane.b32.xlu1 %v1927_v32, %s1536_s15  ;;  %641 = vrot.lane.b32.xlu0 %v1754_v49, %s1536_s15 }
  0x96   : > { %v1932_v12 = vpop.permute.xlu2 %504 }
  0x97   : > { %v483_v27 = vpop.permute.xlu1 %482  ;;  %v479_v43 = vpop.permute.xlu0 %478 }
  0x98   : > { %v929_v44 = vsel %vm927_vm3, %v1643_v8, %v479_v43 }
  0x9c   : > { %673 = vrot.lane.b32.xlu2 %v1652_v13, %s1537_s27 }
  0x9d   : > { %671 = vrot.lane.b32.xlu1 %v1678_v22, %s1537_s27  ;;  %669 = vrot.lane.b32.xlu0 %v1663_v16, %s1537_s27  ;;  %v932_v16 = vsel %vm927_vm3, %v1621_v0, %v485_v61 }
  0x9e   : > { %v568_v53 = vpop.permute.xlu2 %567 }
  0x9f   : > { %v491_v40 = vpop.permute.xlu1 %490  ;;  %v1943_v57 = vsel %vm944_vm2, %v929_v44, %v568_v53  ;;  %v489_v62 = vpop.permute.xlu0 %488 }
  0xa0   : > { %v935_v51 = vsel %vm927_vm3, %v1692_v26, %v491_v40  ;;  %v928_v40 = vsel %vm927_vm3, %v1640_v7, %v477_v30 }
  0xa4   : > { %679 = vrot.lane.b32.xlu2 %v1714_v35, %s1537_s27 }
  0xa5   : > { %677 = vrot.lane.b32.xlu1 %v1717_v36, %s1537_s27  ;;  %675 = vrot.lane.b32.xlu0 %v1675_v21, %s1537_s27 }
  0xa6   : > { %v574_v22 = vpop.permute.xlu2 %573 }
  0xa7   : > { %v497_v8 = vpop.permute.xlu1 %496  ;;  %v1954_v63 = vsel %vm944_vm2, %v932_v16, %v574_v22  ;;  %v495_v38 = vpop.permute.xlu0 %494 }
  0xa8   : > { %v938_v53 = vsel %vm927_vm3, %v1726_v39, %v497_v8  ;;  %v930_v8 = vsel %vm927_vm3, %v1627_v2, %v481_v14  ;;  %v717_v2 = vrot.slane %v1927_v32, 2 }
  0xac   : > { %685 = vrot.lane.b32.xlu2 %v1745_v46, %s1537_s27 }
  0xad   : > { %683 = vrot.lane.b32.xlu1 %v1748_v47, %s1537_s27  ;;  %681 = vrot.lane.b32.xlu0 %v1711_v34, %s1537_s27 }
  0xae   : > { %v580_v9 = vpop.permute.xlu2 %579 }
  0xaf   : > { %v503_v61 = vpop.permute.xlu1 %502  ;;  %v1965_v43 = vsel %vm944_vm2, %v935_v51, %v580_v9  ;;  %v501_v44 = vpop.permute.xlu0 %500 }
  0xb0   : > { %v941_v7 = vsel %vm927_vm3, %v1757_v50, %v503_v61  ;;  %v665_v61 = vrot.slane %v1924_v31, 1 }
  0xb4   : > { %691 = vrot.lane.b32.xlu2 %v1780_v59, %s1537_s27 }
  0xb5   : > { %689 = vrot.lane.b32.xlu1 %v1783_v60, %s1537_s27  ;;  %687 = vrot.lane.b32.xlu0 %v1742_v45, %s1537_s27 }
  0xb6   : > { %v586_v16 = vpop.permute.xlu2 %585 }
  0xb7   : > { %v1978_v22 = vsel %vm944_vm2, %v938_v53, %v586_v16  ;;  %v566_v51 = vpop.permute.xlu1 %565  ;;  %v1980_v9 = vpop.permute.xlu0 %506  ;;  %v931_v53 = vsel %vm927_vm3, %v1636_v5, %v483_v27  ;;  %v718_v5 = vrot.slane %v1924_v31, 2  ;;  %v664_v27 = vrot.slane %v1927_v32, 1 }
  0xb8   : > { %v945_v35 = vsel %vm944_vm2, %v928_v40, %v566_v51 }
  0xbc   : > { %746 = vrot.lane.b32.xlu2 %v1892_v15, %s1538_s28 }
  0xbd   : > { %738 = vrot.lane.b32.xlu1 %v1852_v54, %s1538_s28  ;;  %693 = vrot.lane.b32.xlu0 %v1777_v58, %s1537_s27 }
  0xbe   : > { %v592_v30 = vpop.permute.xlu2 %591 }
  0xbf   : > { %v1996_v16 = vsel %vm944_vm2, %v941_v7, %v592_v30  ;;  %v572_v40 = vpop.permute.xlu1 %571  ;;  %v570_v51 = vpop.permute.xlu0 %569  ;;  %v934_v7 = vsel %vm927_vm3, %v1698_v28, %v489_v62  ;;  %v936_v62 = vsel %vm927_vm3, %v1682_v24, %v1910_v18 }
  0xc0   : > { %v948_v45 = vsel %vm944_vm2, %v931_v53, %v572_v40  ;;  %v2000_v26 = vsel %vm944_vm2, %v930_v8, %v570_v51 }
  0xc4   : > { %842 = vrot.lane.b32.xlu2 %v1783_v60, %s1539_s29  ;;  %v933_v60 = vsel %vm927_vm3, %v1624_v1, %v1905_v17  ;;  %v2030_v17 = vsel %vm435_vm0, %v664_v27, %v665_v61 }
  0xc5   : > { %796 = vrot.lane.b32.xlu1 %v1927_v32, %s1540_s30  ;;  %788 = vrot.lane.b32.xlu0 %v1763_v52, %s1540_s30  ;;  %v2025_v32 = vsel %vm524_vm1, %v717_v2, %v718_v5  ;;  %v937_v2 = vsel %vm927_vm3, %v1685_v25, %v495_v38  ;;  %v940_v38 = vsel %vm927_vm3, %v1763_v52, %v501_v44 }
  0xc6   : > { %v616_v14 = vpop.permute.xlu2 %615  ;;  %v942_v52 = vsel %vm927_vm3, %v1751_v48, %v1932_v12 }
  0xc7   : > { %v2018_v30 = vsel %vm961_vm4, %v945_v35, %v616_v14  ;;  %v578_v8 = vpop.permute.xlu1 %577  ;;  %v576_v53 = vpop.permute.xlu0 %575 }
  0xc8   : > { %v951_v40 = vsel %vm944_vm2, %v934_v7, %v578_v8  ;;  %v950_v51 = vsel %vm944_vm2, %v933_v60, %v576_v53 }
  0xcc   : > { %903 = vrot.lane.b32.xlu2 %v2025_v32, %s1541_s6 }
  0xcd   : > { %895 = vrot.lane.b32.xlu1 %v1874_v4, %s1541_s6  ;;  %850 = vrot.lane.b32.xlu0 %v2030_v17, %s1539_s29 }
  0xce   : > { %v622_v35 = vpop.permute.xlu2 %621 }
  0xcf   : > { %v2044_v14 = vsel %vm961_vm4, %v948_v45, %v622_v35  ;;  %v584_v27 = vpop.permute.xlu1 %583  ;;  %v582_v60 = vpop.permute.xlu0 %581  ;;  %v939_v45 = vsel %vm927_vm3, %v1720_v37, %v1916_v19  ;;  %v943_v19 = vsel %vm927_vm3, %v1754_v49, %v1980_v9 }
  0xd0   : > { %v954_v7 = vsel %vm944_vm2, %v937_v2, %v584_v27  ;;  %v953_v8 = vsel %vm944_vm2, %v936_v62, %v582_v60 }
  0xd4   : > { %695 = vrot.lane.b32.xlu2 %v1801_v10, %s1537_s27 }
  0xd5   : > { %730 = vrot.lane.b32.xlu1 %v1835_v41, %s1538_s28  ;;  %722 = vrot.lane.b32.xlu0 %v1819_v29, %s1538_s28 }
  0xd6   : > { %v628_v18 = vpop.permute.xlu2 %627 }
  0xd7   : > { %v2060_v53 = vsel %vm961_vm4, %v951_v40, %v628_v18  ;;  %v590_v35 = vpop.permute.xlu1 %589  ;;  %v588_v62 = vpop.permute.xlu0 %587 }
  0xd8   : > { %v957_v2 = vsel %vm944_vm2, %v940_v38, %v590_v35  ;;  %v956_v27 = vsel %vm944_vm2, %v939_v45, %v588_v62  ;;  %v407_v35 = vld [vmem:[%s1921_s26 + $0x10] sm:$0x3] }
  0xdc   : > { %740 = vrot.lane.b32.xlu2 %v1877_v6, %s1538_s28 }
  0xdd   : > { %780 = vrot.lane.b32.xlu1 %v1682_v24, %s1540_s30  ;;  %772 = vrot.lane.b32.xlu0 %v1621_v0, %s1540_s30 }
  0xde   : > { %v634_v29 = vpop.permute.xlu2 %633 }
  0xdf   : > { %v2077_v44 = vsel %vm961_vm4, %v954_v7, %v634_v29  ;;  %v596_v40 = vpop.permute.xlu1 %595  ;;  %v594_v60 = vpop.permute.xlu0 %593 }
  0xe0   : > { %v960_v24 = vsel %vm944_vm2, %v943_v19, %v596_v40  ;;  %v959_v18 = vsel %vm944_vm2, %v942_v52, %v594_v60 }
  0xe4   : > { %834 = vrot.lane.b32.xlu2 %v1711_v34, %s1539_s29 }
  0xe5   : > { %826 = vrot.lane.b32.xlu1 %v1652_v13, %s1539_s29  ;;  %748 = vrot.lane.b32.xlu0 %v1889_v11, %s1538_s28  ;;  %v667_v13 = vrot.slane %v407_v35, 1 }
  0xe6   : > { %v640_v0 = vpop.permute.xlu2 %639 }
  0xe7   : > { %v2088_v12 = vsel %vm961_vm4, %v957_v2, %v640_v0  ;;  %v620_v9 = vpop.permute.xlu1 %619  ;;  %v618_v7 = vpop.permute.xlu0 %617  ;;  %v2112_v52 = vsel %vm435_vm0, %v665_v61, %v667_v13 }
  0xe8   : > { %v964_v45 = vsel %vm961_vm4, %v2000_v26, %v620_v9  ;;  %v963_v38 = vsel %vm961_vm4, %v1943_v57, %v618_v7 }
  0xec   : > { %879 = vrot.lane.b32.xlu2 %v1813_v20, %s1541_s6 }
  0xed   : > { %798 = vrot.lane.b32.xlu1 %v1924_v31, %s1540_s30  ;;  %790 = vrot.lane.b32.xlu0 %v1757_v50, %s1540_s30 }
  0xee   : > { %v646_v34 = vpop.permute.xlu2 %645 }
  0xef   : > { %v2102_v62 = vsel %vm961_vm4, %v960_v24, %v646_v34  ;;  %v626_v2 = vpop.permute.xlu1 %625  ;;  %v624_v26 = vpop.permute.xlu0 %623 }
  0xf0   : > { %v967_v29 = vsel %vm961_vm4, %v950_v51, %v626_v2  ;;  %v2107_v57 = vsel %vm961_vm4, %v1954_v63, %v624_v26  ;;  %v720_v51 = vrot.slane %v407_v35, 2  ;;  %v1066_v2 = vld [vmem:[%s2523_s2 + $0x18] sm:$0xff] }
  0xf1   : > { %v408_v26 = vld [vmem:[%s1921_s26 + $0x18] sm:$0xff] }
  0xf4   : > { %852 = vrot.lane.b32.xlu2 %v2112_v52, %s1539_s29 }
  0xf5   : > { %844 = vrot.lane.b32.xlu1 %v1780_v59, %s1539_s29  ;;  %887 = vrot.lane.b32.xlu0 %v1858_v56, %s1541_s6  ;;  %v2133_v59 = vsel %vm524_vm1, %v718_v5, %v720_v51 }
  0xf6   : > { %v674_v50 = vpop.permute.xlu2 %673 }
  0xf7   : > { %v2121_v63 = vsel %vm978_vm5, %v964_v45, %v674_v50  ;;  %v632_v19 = vpop.permute.xlu1 %631  ;;  %v630_v40 = vpop.permute.xlu0 %629  ;;  %v821_v50 = vrot.slane %v408_v26, 1 }
  0xf8   : > { %v2124_v61 = vsel %vm961_vm4, %v953_v8, %v632_v19  ;;  %v2128_v60 = vsel %vm961_vm4, %v1965_v43, %v630_v40 }
  0xfc   : > { %724 = vrot.lane.b32.xlu2 %v1816_v23, %s1538_s28 }
  0xfd   : > { %905 = vrot.lane.b32.xlu1 %v2133_v59, %s1541_s6  ;;  %897 = vrot.lane.b32.xlu0 %v1871_v3, %s1541_s6 }
  0xfe   : > { %v680_v8 = vpop.permute.xlu2 %679 }
  0xff   : > { %v2142_v24 = vsel %vm978_vm5, %v967_v29, %v680_v8  ;;  %v638_v43 = vpop.permute.xlu1 %637  ;;  %v636_v0 = vpop.permute.xlu0 %635  ;;  %v2216_v29 = vld [vmem:[%s1921_s26 + $0x20] sm:$0xff] }
 0x100   : > { %v973_v31 = vsel %vm961_vm4, %v956_v27, %v638_v43  ;;  %v2147_v5 = vsel %vm961_vm4, %v1978_v22, %v636_v0  ;;  %v822_v19 = vrot.slane %v2216_v29, 1  ;;  %v1063_v43 = vld [vmem:[%s2523_s2] sm:$0xff] }
 0x104   : > { %774 = vrot.lane.b32.xlu2 %v1624_v1, %s1540_s30 }
 0x105   : > { %697 = vrot.lane.b32.xlu1 %v2030_v17, %s1537_s27  ;;  %732 = vrot.lane.b32.xlu0 %v1832_v33, %s1538_s28 }
 0x106   : > { %v2155_v23 = vpop.permute.xlu2 %685 }
 0x107   : > { %v644_v9 = vpop.permute.xlu1 %643  ;;  %v642_v7 = vpop.permute.xlu0 %641 }
 0x108   : > { %v2158_v45 = vsel %vm961_vm4, %v959_v18, %v644_v9  ;;  %v2162_v22 = vsel %vm961_vm4, %v1996_v16, %v642_v7  ;;  %v1071_v16 = vld [vmem:[%s2523_s2 + $0x40] sm:$0xff]  ;;  %v823_v9 = vsel %vm435_vm0, %v821_v50, %v822_v19  ;;  %v875_v7 = vrot.slane %v2216_v29, 2 }
 0x109   : > { %1416 = vmatpush.msra.mxu2 %v1071_v16  ;;  %1417 = vmatpush.msra.mxu3 %v1071_v16 }
 0x10a   : > { %1132 = vmatpush.msra.mxu0 %v1071_v16  ;;  %1415 = vmatpush.msra.mxu1 %v1071_v16 }
 0x10c   : > { %750 = vrot.lane.b32.xlu2 %v2025_v32, %s1538_s28 }
 0x10d   : > { %742 = vrot.lane.b32.xlu1 %v1874_v4, %s1538_s28  ;;  %782 = vrot.lane.b32.xlu0 %v1685_v25, %s1540_s30  ;;  %v1070_v25 = vld [vmem:[%s2523_s2 + $0x38] sm:$0xff]  ;;  %v1069_v4 = vld [vmem:[%s2523_s2 + $0x30] sm:$0xff] }
 0x10e   : > { %v692_v1 = vpop.permute.xlu2 %691  ;;  %1419 = vmatpush.msra.mxu2 %v1070_v25  ;;  %1420 = vmatpush.msra.mxu3 %v1070_v25 }
 0x10f   : > { %v2171_v17 = vsel %vm978_vm5, %v973_v31, %v692_v1  ;;  %v672_v27 = vpop.permute.xlu1 %671  ;;  %v670_v18 = vpop.permute.xlu0 %669  ;;  %1133 = vmatpush.msra.mxu0 %v1070_v25  ;;  %1418 = vmatpush.msra.mxu1 %v1070_v25 }
 0x110   : > { %v2177_v35 = vsel %vm978_vm5, %v963_v38, %v672_v27  ;;  %v2181_v32 = vsel %vm978_vm5, %v2018_v30, %v670_v18  ;;  %1422 = vmatpush.msra.mxu2 %v1069_v4  ;;  %v1068_v30 = vld [vmem:[%s2523_s2 + $0x28] sm:$0xff]  ;;  %1423 = vmatpush.msra.mxu3 %v1069_v4 }
 0x111   : > { %1134 = vmatpush.msra.mxu0 %v1069_v4  ;;  %1421 = vmatpush.msra.mxu1 %v1069_v4 }
 0x112   : > { %1425 = vmatpush.msra.mxu2 %v1068_v30  ;;  %1426 = vmatpush.msra.mxu3 %v1068_v30 }
 0x113   : > { %1135 = vmatpush.msra.mxu0 %v1068_v30  ;;  %1424 = vmatpush.msra.mxu1 %v1068_v30 }
 0x114   : > { %792 = vrot.lane.b32.xlu2 %v1751_v48, %s1540_s30  ;;  %v1067_v48 = vld [vmem:[%s2523_s2 + $0x20] sm:$0xff] }
 0x115   : > { %836 = vrot.lane.b32.xlu1 %v1748_v47, %s1539_s29  ;;  %828 = vrot.lane.b32.xlu0 %v1675_v21, %s1539_s29 }
 0x116   : > { %v2198_v38 = vpop.permute.xlu2 %746  ;;  %1428 = vmatpush.msra.mxu2 %v1067_v48  ;;  %1429 = vmatpush.msra.mxu3 %v1067_v48 }
 0x117   : > { %v678_v13 = vpop.permute.xlu1 %677  ;;  %v676_v34 = vpop.permute.xlu0 %675  ;;  %1136 = vmatpush.msra.mxu0 %v1067_v48  ;;  %1427 = vmatpush.msra.mxu1 %v1067_v48 }
 0x118   : > { %v2205_v21 = vsel %vm978_vm5, %v2107_v57, %v678_v13  ;;  %v2209_v47 = vsel %vm978_vm5, %v2044_v14, %v676_v34  ;;  %1431 = vmatpush.msra.mxu2 %v1066_v2  ;;  %v1065_v57 = vld [vmem:[%s2523_s2 + $0x10] sm:$0xff]  ;;  %1432 = vmatpush.msra.mxu3 %v1066_v2  ;;  %v1064_v14 = vld [vmem:[%s2523_s2 + $0x8] sm:$0xff] }
 0x119   : > { %1137 = vmatpush.msra.mxu0 %v1066_v2  ;;  %1430 = vmatpush.msra.mxu1 %v1066_v2 }
 0x11a   : > { %1434 = vmatpush.msra.mxu2 %v1065_v57  ;;  %1435 = vmatpush.msra.mxu3 %v1065_v57 }
 0x11b   : > { %1138 = vmatpush.msra.mxu0 %v1065_v57  ;;  %1433 = vmatpush.msra.mxu1 %v1065_v57 }
 0x11c   : > { %889 = vrot.lane.b32.xlu2 %v1855_v55, %s1541_s6  ;;  %1437 = vmatpush.msra.mxu2 %v1064_v14 }
 0x11d   : > { %881 = vrot.lane.b32.xlu1 %v1838_v42, %s1541_s6  ;;  %800 = vrot.lane.b32.xlu0 %v408_v26, %s1540_s30 }
 0x11e   : > { %v2229_v51 = vpop.permute.xlu2 %842  ;;  %1438 = vmatpush.msra.mxu3 %v1064_v14  ;;  %1440 = vmatpush.msra.mxu2 %v1063_v43 }
 0x11f   : > { %v684_v40 = vpop.permute.xlu1 %683  ;;  %v682_v8 = vpop.permute.xlu0 %681  ;;  %1139 = vmatpush.msra.mxu0 %v1064_v14  ;;  %1436 = vmatpush.msra.mxu1 %v1064_v14 }
 0x120   : > { %v2237_v0 = vsel %vm978_vm5, %v2128_v60, %v684_v40  ;;  %v2241_v31 = vsel %vm978_vm5, %v2060_v53, %v682_v8  ;;  %1441 = vmatpush.msra.mxu3 %v1063_v43  ;;  %v874_v53 = vrot.slane %v408_v26, 2  ;;  %v410_v26 = vld [vmem:[%s1921_s26 + $0x28] sm:$0x3]  ;;  %s1382_s26 = sshll.u32 %s1516_s18, 4 }
 0x121   : > { %1140 = vmatpush.msra.mxu0 %v1063_v43  ;;  %1439 = vmatpush.msra.mxu1 %v1063_v43  ;;  %v877_v57 = vrot.slane %v410_v26, 2  ;;  %v824_v14 = vrot.slane %v410_v26, 1  ;;  %p364_p8 = scmp.lt.s32.totalorder %s1382_s26, 31 }
 0x122   : > { %v876_v16 = vsel %vm524_vm1, %v874_v53, %v875_v7 }
 0x123   : > { %v825_v40 = vsel %vm435_vm0, %v822_v19, %v824_v14  ;;  %s2552_s26 = smov (!%p364_p8, %s1382_s26), 31 }
 0x124   : > { %899 = vrot.lane.b32.xlu2 %v1892_v15, %s1541_s6 }
 0x125   : > { %854 = vrot.lane.b32.xlu1 %v823_v9, %s1539_s29  ;;  %846 = vrot.lane.b32.xlu0 %v1777_v58, %s1539_s29  ;;  %v2534_v9 = vld [vmem:[#allocation2_spill] sm:$0xff] }
 0x126   : > { %v904_v60 = vpop.permute.xlu2 %903 }
 0x127   : > { %v690_v1 = vpop.permute.xlu1 %689  ;;  %v688_v27 = vpop.permute.xlu0 %687 }
 0x128   : > { %v2254_v18 = vsel %vm978_vm5, %v2147_v5, %v690_v1  ;;  %v2258_v15 = vsel %vm978_vm5, %v2077_v44, %v688_v27  ;;  %v2536_v1 = vld [vmem:[#allocation3_spill] sm:$0xff] }
 0x12c   : > { %734 = vrot.lane.b32.xlu2 %v1858_v56, %s1538_s28 }
 0x12d   : > { %726 = vrot.lane.b32.xlu1 %v1813_v20, %s1538_s28  ;;  %907 = vrot.lane.b32.xlu0 %v876_v16, %s1541_s6  ;;  %v987_v20 = vsel %vm978_vm5, %v2124_v61, %v2155_v23 }
 0x12e   : > { %v2266_v58 = vpop.permute.xlu2 %695 }
 0x12f   : > { %v739_v25 = vpop.permute.xlu1 %738  ;;  %v694_v4 = vpop.permute.xlu0 %693 }
 0x130   : > { %v1004_v30 = vsel %vm995_vm6, %v987_v20, %v739_v25 }
 0x134   : > { %784 = vrot.lane.b32.xlu2 %v1726_v39, %s1540_s30  ;;  %v991_v39 = vsel %vm978_vm5, %v2088_v12, %v694_v4 }
 0x135   : > { %776 = vrot.lane.b32.xlu1 %v1698_v28, %s1540_s30  ;;  %699 = vrot.lane.b32.xlu0 %v2112_v52, %s1537_s27  ;;  %v1008_v52 = vsel %vm995_vm6, %v991_v39, %v2198_v38  ;;  %s1383_s27 = sshll.u32 %s2548_s19, 5 }
 0x136   : > { %v2274_v44 = vpop.permute.xlu2 %740 }
 0x137   : > { %v797_v56 = vpop.permute.xlu1 %796  ;;  %v789_v5 = vpop.permute.xlu0 %788 }
 0x138   : > { %v1021_v28 = vsel %vm1012_vm7, %v1004_v30, %v789_v5  ;;  %v1025_v12 = vsel %vm1012_vm7, %v1008_v52, %v797_v56 }
 0x13c   : > { %830 = vrot.lane.b32.xlu2 %v1717_v36, %s1539_s29  ;;  %v1038_v36 = vsel %vm1029_vm8, %v1021_v28, %v2229_v51  ;;  %v878_v51 = vsel %vm524_vm1, %v875_v7, %v877_v57  ;;  %v2535_v7 = vld [vmem:[#allocation4_spill] sm:$0xff] }
 0x13d   : > { %752 = vrot.lane.b32.xlu1 %v2133_v59, %s1538_s28  ;;  %744 = vrot.lane.b32.xlu0 %v1871_v3, %s1538_s28 }
 0x13e   : > { %v835_v61 = vpop.permute.xlu2 %834 }
 0x13f   : > { %v896_v23 = vpop.permute.xlu1 %895  ;;  %v851_v13 = vpop.permute.xlu0 %850 }
 0x140   : > { %v1042_v34 = vsel %vm1029_vm8, %v1025_v12, %v851_v13  ;;  %v1055_v59 = vsel %vm1046_vm9, %v1038_v36, %v896_v23 }
 0x141   : > { %1396 = vmatmul.msk.f32.vlgmr.msra.gmra.mxu2 %vm1076_vm10, %v1055_v59  ;;  %v1059_v3 = vsel %vm1046_vm9, %v1042_v34, %v904_v60 }
 0x142   : > { %1400 = vmatmul.msk.f32.vlgmr.msra.gmra.mxu3 %vm1076_vm10, %v1059_v3 }
 0x144   : > { %802 = vrot.lane.b32.xlu2 %v2216_v29, %s1540_s30 }
 0x145   : > { %794 = vrot.lane.b32.xlu1 %v1754_v49, %s1540_s30  ;;  %838 = vrot.lane.b32.xlu0 %v1745_v46, %s1539_s29 }
 0x146   : > { %v880_v2 = vpop.permute.xlu2 %879 }
 0x147   : > { %v731_v38 = vpop.permute.xlu1 %730  ;;  %v723_v48 = vpop.permute.xlu0 %722 }
 0x148   : > { %v1000_v53 = vsel %vm995_vm6, %v2205_v21, %v731_v38  ;;  %v992_v21 = vsel %vm978_vm5, %v2162_v22, %v2266_v58 }
 0x14c   : > { %848 = vrot.lane.b32.xlu2 %v1801_v10, %s1539_s29  ;;  %v996_v10 = vsel %vm995_vm6, %v2181_v32, %v723_v48 }
 0x14d   : > { %891 = vrot.lane.b32.xlu1 %v1852_v54, %s1541_s6  ;;  %883 = vrot.lane.b32.xlu0 %v1835_v41, %s1541_s6 }
 0x14e   : > { %v853_v46 = vpop.permute.xlu2 %852 }
 0x14f   : > { %v781_v50 = vpop.permute.xlu1 %780  ;;  %v773_v49 = vpop.permute.xlu0 %772 }
 0x150   : > { %v1013_v41 = vsel %vm1012_vm7, %v996_v10, %v773_v49  ;;  %v1017_v60 = vsel %vm1012_vm7, %v1000_v53, %v781_v50 }
 0x154   : > { %909 = vrot.lane.b32.xlu2 %v878_v51, %s1541_s6 }
 0x155   : > { %901 = vrot.lane.b32.xlu1 %v1889_v11, %s1541_s6  ;;  %856 = vrot.lane.b32.xlu0 %v825_v40, %s1539_s29 }
 0x156   : > { %v725_v19 = vpop.permute.xlu2 %724 }
 0x157   : > { %v827_v54 = vpop.permute.xlu1 %826  ;;  %v749_v8 = vpop.permute.xlu0 %748  ;;  %v997_v38 = vsel %vm995_vm6, %v2177_v35, %v725_v19 }
 0x158   : > { %v1030_v43 = vsel %vm1029_vm8, %v1013_v41, %v827_v54  ;;  %v1009_v4 = vsel %vm995_vm6, %v992_v21, %v749_v8 }
 0x159   : > { %v1047_v29 = vsel %vm1046_vm9, %v1030_v43, %v880_v2 }
 0x15a   : > { %1388 = vmatmul.msk.f32.vlgmr.msra.gmra.mxu0 %vm1076_vm10, %v1047_v29 }
 0x15c   : > { %778 = vrot.lane.b32.xlu2 %v2534_v9, %s1540_s30 }
 0x15d   : > { %736 = vrot.lane.b32.xlu1 %v1855_v55, %s1538_s28  ;;  %728 = vrot.lane.b32.xlu0 %v1838_v42, %s1538_s28  ;;  %v1034_v42 = vsel %vm1029_vm8, %v1017_v60, %v835_v61  ;;  %s367_s28 = sadd.s32 %s1383_s27, %s2552_s26 }
 0x15e   : > { %v775_v55 = vpop.permute.xlu2 %774 }
 0x15f   : > { %v799_v11 = vpop.permute.xlu1 %798  ;;  %v791_v32 = vpop.permute.xlu0 %790  ;;  %v1014_v48 = vsel %vm1012_vm7, %v997_v38, %v775_v55 }
 0x160   : > { %v1026_v56 = vsel %vm1012_vm7, %v1009_v4, %v799_v11 }
 0x161   : > { %v1043_v58 = vsel %vm1029_vm8, %v1026_v56, %v853_v46 }
 0x164   : > { %840 = vrot.lane.b32.xlu2 %v2535_v7, %s1539_s29 }
 0x165   : > { %832 = vrot.lane.b32.xlu1 %v2536_v1, %s1539_s29  ;;  %786 = vrot.lane.b32.xlu0 %v1720_v37, %s1540_s30  ;;  %v1005_v37 = vsel %vm995_vm6, %v2258_v15, %v2274_v44  ;;  %s1384_s29 = sshll.u32 %s367_s28, 3 }
 0x166   : > { %v1022_v5 = vsel %vm1012_vm7, %v1005_v37, %v791_v32  ;;  %v751_v39 = vpop.permute.xlu2 %750  ;;  %s2405_s30 = scalar_lea.vmem %s2525_s4, %s1384_s29  ;;  %s2424_s16 = scalar_lea.vmem %s2526_s5, %s1384_s29 }
 0x167   : > { %v845_v27 = vpop.permute.xlu1 %844  ;;  %v888_v16 = vpop.permute.xlu0 %887 }
 0x168   : > { %v1051_v25 = vsel %vm1046_vm9, %v1034_v42, %v888_v16  ;;  %v1039_v20 = vsel %vm1029_vm8, %v1022_v5, %v845_v27 }
 0x169   : > { %1392 = vmatmul.msk.f32.vlgmr.msra.gmra.mxu1 %vm1076_vm10, %v1051_v25 }
 0x16d   : > { %893 = vrot.lane.b32.xlu1 %v1877_v6, %s1541_s6  ;;  %885 = vrot.lane.b32.xlu0 %v1832_v33, %s1541_s6 }
 0x16e   : > { %v793_v33 = vpop.permute.xlu2 %792 }
 0x16f   : > { %v906_v30 = vpop.permute.xlu1 %905  ;;  %v898_v22 = vpop.permute.xlu0 %897 }
 0x170   : > { %v1056_v28 = vsel %vm1046_vm9, %v1039_v20, %v898_v22  ;;  %v1060_v52 = vsel %vm1046_vm9, %v1043_v58, %v906_v30 }
 0x171   : > { %1397 = vmatmul.msk.f32.gmra.mxu2 %vm1076_vm10, %v1056_v28  ;;  %1401 = vmatmul.msk.f32.gmra.mxu3 %vm1076_vm10, %v1060_v52  ;;  %v1198_v52 = vld [vmem:[%s2405_s30 + $0x40] sm:$0xff] }
 0x176   : > { %v890_v12 = vpop.permute.xlu2 %889 }
 0x177   : > { %v698_v6 = vpop.permute.xlu1 %697  ;;  %v733_v15 = vpop.permute.xlu0 %732 }
 0x178   : > { %v1001_v23 = vsel %vm995_vm6, %v2142_v24, %v733_v15  ;;  %v993_v41 = vsel %vm978_vm5, %v2158_v45, %v698_v6 }
 0x179   : > { %v1010_v54 = vsel %vm995_vm6, %v993_v41, %v751_v39 }
 0x17e   : > { %v900_v2 = vpop.permute.xlu2 %899 }
 0x17f   : > { %v743_v44 = vpop.permute.xlu1 %742  ;;  %v783_v61 = vpop.permute.xlu0 %782 }
 0x180   : > { %v1018_v13 = vsel %vm1012_vm7, %v1001_v23, %v783_v61  ;;  %v1006_v50 = vsel %vm995_vm6, %v2254_v18, %v743_v44 }
 0x181   : > { %v1023_v51 = vsel %vm1012_vm7, %v1006_v50, %v793_v33  ;;  %v1202_v33 = vld [vmem:[%s2405_s30 + $0x60] sm:$0xff] }
 0x186   : > { %v735_v40 = vpop.permute.xlu2 %734 }
 0x187   : > { %v837_v36 = vpop.permute.xlu1 %836  ;;  %v829_v34 = vpop.permute.xlu0 %828  ;;  %v1002_v42 = vsel %vm995_vm6, %v2241_v31, %v735_v40  ;;  %v2410_v31 = vld [vmem:[%s2524_s3] ss:$0 sm:$0xff] }
 0x188   : > { %v1035_v59 = vsel %vm1029_vm8, %v1018_v13, %v837_v36  ;;  %v1031_v26 = vsel %vm1029_vm8, %v1014_v48, %v829_v34 }
 0x189   : > { %v1052_v3 = vsel %vm1046_vm9, %v1035_v59, %v890_v12 }
 0x18a   : > { %1393 = vmatmul.msk.f32.gmra.mxu1 %vm1076_vm10, %v1052_v3 }
 0x18e   : > { %v785_v9 = vpop.permute.xlu2 %784 }
 0x18f   : > { %v882_v57 = vpop.permute.xlu1 %881  ;;  %v801_v24 = vpop.permute.xlu0 %800  ;;  %v1019_v25 = vsel %vm1012_vm7, %v1002_v42, %v785_v9 }
 0x190   : > { %v1048_v14 = vsel %vm1046_vm9, %v1031_v26, %v882_v57  ;;  %v1027_v8 = vsel %vm1012_vm7, %v1010_v54, %v801_v24  ;;  %v1190_v24 = vld [vmem:[%s2405_s30] sm:$0xff] }
 0x191   : > { %1389 = vmatmul.msk.f32.gmra.mxu0 %vm1076_vm10, %v1048_v14 }
 0x196   : > { %v831_v53 = vpop.permute.xlu2 %830 }
 0x197   : > { %v855_v49 = vpop.permute.xlu1 %854  ;;  %v847_v46 = vpop.permute.xlu0 %846 }
 0x198   : > { %v1040_v35 = vsel %vm1029_vm8, %v1023_v51, %v847_v46  ;;  %v1044_v18 = vsel %vm1029_vm8, %v1027_v8, %v855_v49 }
 0x199   : > { %v1057_v10 = vsel %vm1046_vm9, %v1040_v35, %v900_v2 }
 0x19a   : > { %1398 = vmatmul.msk.f32.gmra.mxu2 %vm1076_vm10, %v1057_v10 }
 0x19e   : > { %v803_v7 = vpop.permute.xlu2 %802 }
 0x19f   : > { %v727_v43 = vpop.permute.xlu1 %726  ;;  %v908_v29 = vpop.permute.xlu0 %907 }
 0x1a0   : > { %v1061_v19 = vsel %vm1046_vm9, %v1044_v18, %v908_v29  ;;  %v998_v27 = vsel %vm995_vm6, %v2121_v63, %v727_v43  ;;  %v1194_v29 = vld [vmem:[%s2405_s30 + $0x20] sm:$0xff] }
 0x1a1   : > { %1402 = vmatmul.msk.f32.gmra.mxu3 %vm1076_vm10, %v1061_v19 }
 0x1a6   : > { %v849_v21 = vpop.permute.xlu2 %848 }
 0x1a7   : > { %v777_v11 = vpop.permute.xlu1 %776  ;;  %v700_v32 = vpop.permute.xlu0 %699 }
 0x1a8   : > { %v1015_v16 = vsel %vm1012_vm7, %v998_v27, %v777_v11  ;;  %v994_v30 = vsel %vm978_vm5, %v2102_v62, %v700_v32  ;;  %v1199_v32 = vld [vmem:[%s2405_s30 + $0x48] sm:$0xff] }
 0x1a9   : > { %v1032_v4 = vsel %vm1029_vm8, %v1015_v16, %v831_v53  ;;  %v1195_v16 = vld [vmem:[%s2405_s30 + $0x28] sm:$0xff] }
 0x1af   : > { %v753_v45 = vpop.permute.xlu1 %752  ;;  %v745_v60 = vpop.permute.xlu0 %744 }
 0x1b0   : > { %v1007_v22 = vsel %vm995_vm6, %v2171_v17, %v745_v60  ;;  %v1011_v58 = vsel %vm995_vm6, %v994_v30, %v753_v45  ;;  %v910_v17 = vpop.permute.xlu2 %909  ;;  %v1203_v45 = vld [vmem:[%s2405_s30 + $0x68] sm:$0xff] }
 0x1b1   : > { %v1028_v44 = vsel %vm1012_vm7, %v1011_v58, %v803_v7  ;;  %v1204_v58 = vld [vmem:[%s2405_s30 + $0x70] sm:$0xff] }
 0x1b7   : > { %v795_v1 = vpop.permute.xlu1 %794  ;;  %v839_v55 = vpop.permute.xlu0 %838 }
 0x1b8   : > { %v1036_v56 = vsel %vm1029_vm8, %v1019_v25, %v839_v55  ;;  %v1024_v39 = vsel %vm1012_vm7, %v1007_v22, %v795_v1  ;;  %v779_v2 = vpop.permute.xlu2 %778 }
 0x1b9   : > { %v1041_v61 = vsel %vm1029_vm8, %v1024_v39, %v849_v21 }
 0x1bf   : > { %v892_v37 = vpop.permute.xlu1 %891  ;;  %v884_v5 = vpop.permute.xlu0 %883 }
 0x1c0   : > { %v1049_v20 = vsel %vm1046_vm9, %v1032_v4, %v884_v5  ;;  %v1053_v63 = vsel %vm1046_vm9, %v1036_v56, %v892_v37  ;;  %v841_v35 = vpop.permute.xlu2 %840  ;;  %v1191_v4 = vld [vmem:[%s2405_s30 + $0x8] sm:$0xff] }
 0x1c1   : > { %1390 = vmatmul.msk.f32.gmra.mxu0 %vm1076_vm10, %v1049_v20  ;;  %1394 = vmatmul.msk.f32.gmra.mxu1 %vm1076_vm10, %v1053_v63  ;;  %v1200_v20 = vld [vmem:[%s2405_s30 + $0x50] sm:$0xff] }
 0x1c4   : > { %v1166_v28 = vpop.f32.mrf.mxu2 }
 0x1c5   : > { %v1167_v6 = vadd.f32 %v2410_v31, %v1166_v28  ;;  %v1178_v15 = vpop.f32.mrf.mxu3 }
 0x1c6   : > { %v1179_v62 = vadd.f32 %v2410_v31, %v1178_v15 }
 0x1c7   : > { %v1214_v12 = vadd.f32 %v1198_v52, %v1167_v6  ;;  %v902_v23 = vpop.permute.xlu1 %901  ;;  %v857_v13 = vpop.permute.xlu0 %856  ;;  %v1192_v6 = vld [vmem:[%s2405_s30 + $0x10] sm:$0xff] }
 0x1c8   : > { %v1218_v36 = vadd.f32 %v1202_v33, %v1179_v62  ;;  %v1045_v34 = vsel %vm1029_vm8, %v1028_v44, %v857_v13  ;;  %v1058_v59 = vsel %vm1046_vm9, %v1041_v61, %v902_v23  ;;  %v1196_v33 = vld [vmem:[%s2405_s30 + $0x30] sm:$0xff]  ;;  %v1201_v23 = vld [vmem:[%s2405_s30 + $0x58] sm:$0xff] }
 0x1c9   : > { %1230 = vst.msk [vmem:[%s2424_s16 + $0x40] sm:$0xff] %vm927_vm3, %v1214_v12  ;;  %1399 = vmatmul.msk.f32.gmra.mxu2 %vm1076_vm10, %v1058_v59  ;;  %v1062_v3 = vsel %vm1046_vm9, %v1045_v34, %v910_v17  ;;  %v1205_v34 = vld [vmem:[%s2405_s30 + $0x78] sm:$0xff] }
 0x1ca   : > { %1234 = vst.msk [vmem:[%s2424_s16 + $0x60] sm:$0xff] %vm927_vm3, %v1218_v36  ;;  %1403 = vmatmul.msk.f32.gmra.mxu3 %vm1076_vm10, %v1062_v3 }
 0x1cf   : > { %v737_v38 = vpop.permute.xlu1 %736  ;;  %v729_v48 = vpop.permute.xlu0 %728 }
 0x1d0   : > { %v1003_v51 = vsel %vm995_vm6, %v2237_v0, %v737_v38  ;;  %v999_v46 = vsel %vm995_vm6, %v2209_v47, %v729_v48 }
 0x1d1   : > { %v1016_v10 = vsel %vm1012_vm7, %v999_v46, %v779_v2  ;;  %v1197_v2 = vld [vmem:[%s2405_s30 + $0x38] sm:$0xff] }
 0x1d7   : > { %v833_v26 = vpop.permute.xlu1 %832  ;;  %v1142_v57 = vpop.f32.mrf.mxu0 }
 0x1d8   : > { %v1143_v14 = vadd.f32 %v2410_v31, %v1142_v57  ;;  %v787_v50 = vpop.permute.xlu0 %786  ;;  %v1033_v8 = vsel %vm1029_vm8, %v1016_v10, %v833_v26  ;;  %v1193_v57 = vld [vmem:[%s2405_s30 + $0x18] sm:$0xff] }
 0x1d9   : > { %v1020_v40 = vsel %vm1012_vm7, %v1003_v51, %v787_v50 }
 0x1da   : > { %v1206_v49 = vadd.f32 %v1190_v24, %v1143_v14  ;;  %v1037_v41 = vsel %vm1029_vm8, %v1020_v40, %v841_v35 }
 0x1dc   : > { %1222 = vst.msk [vmem:[%s2424_s16] sm:$0xff] %vm927_vm3, %v1206_v49 }
 0x1df   : > { %v894_v54 = vpop.permute.xlu1 %893 }
 0x1e0   : > { %v886_v18 = vpop.permute.xlu0 %885  ;;  %v1054_v0 = vsel %vm1046_vm9, %v1037_v41, %v894_v54 }
 0x1e1   : > { %v1050_v47 = vsel %vm1046_vm9, %v1033_v8, %v886_v18  ;;  %1395 = vmatmul.msk.f32.gmra.mxu1 %vm1076_vm10, %v1054_v0 }
 0x1e2   : > { %1391 = vmatmul.msk.f32.gmra.mxu0 %vm1076_vm10, %v1050_v47 }
 0x1e6   : > { %v1154_v43 = vpop.f32.mrf.mxu1 }
 0x1e7   : > { %v1155_v19 = vadd.f32 %v2410_v31, %v1154_v43 }
 0x1e9   : > { %v1210_v9 = vadd.f32 %v1194_v29, %v1155_v19 }
 0x1eb   : > { %1226 = vst.msk [vmem:[%s2424_s16 + $0x20] sm:$0xff] %vm927_vm3, %v1210_v9 }
 0x1f4   : > { %v1169_v11 = vpop.f32.mrf.mxu2  ;;  %v1181_v53 = vpop.f32.mrf.mxu3 }
 0x1f5   : > { %v1170_v60 = vadd.f32 %v2410_v31, %v1169_v11  ;;  %v1182_v7 = vadd.f32 %v2410_v31, %v1181_v53 }
 0x1f7   : > { %v1215_v1 = vadd.f32 %v1199_v32, %v1170_v60  ;;  %v1219_v55 = vadd.f32 %v1203_v45, %v1182_v7 }
 0x1f9   : > { %1231 = vst.msk [vmem:[%s2424_s16 + $0x48] sm:$0xff] %vm927_vm3, %v1215_v1 }
 0x1fa   : > { %1235 = vst.msk [vmem:[%s2424_s16 + $0x68] sm:$0xff] %vm927_vm3, %v1219_v55 }
 0x207   : > { %v1157_v27 = vpop.f32.mrf.mxu1 }
 0x208   : > { %v1158_v42 = vadd.f32 %v2410_v31, %v1157_v27 }
 0x20a   : > { %v1211_v25 = vadd.f32 %v1195_v16, %v1158_v42 }
 0x20c   : > { %1227 = vst.msk [vmem:[%s2424_s16 + $0x28] sm:$0xff] %vm927_vm3, %v1211_v25 }
 0x20e   : > { %v1145_v21 = vpop.f32.mrf.mxu0 }
 0x20f   : > { %v1146_v56 = vadd.f32 %v2410_v31, %v1145_v21 }
 0x211   : > { %v1207_v37 = vadd.f32 %v1191_v4, %v1146_v56 }
 0x213   : > { %1223 = vst.msk [vmem:[%s2424_s16 + $0x8] sm:$0xff] %vm927_vm3, %v1207_v37 }
 0x21d   : > { %v1172_v5 = vpop.f32.mrf.mxu2 }
 0x21e   : > { %v1173_v63 = vadd.f32 %v2410_v31, %v1172_v5 }
 0x220   : > { %v1216_v30 = vadd.f32 %v1200_v20, %v1173_v63 }
 0x222   : > { %1232 = vst.msk [vmem:[%s2424_s16 + $0x50] sm:$0xff] %vm927_vm3, %v1216_v30 }
 0x224   : > { %v1184_v22 = vpop.f32.mrf.mxu3 }
 0x225   : > { %v1185_v39 = vadd.f32 %v2410_v31, %v1184_v22 }
 0x227   : > { %v1220_v28 = vadd.f32 %v1204_v58, %v1185_v39 }
 0x229   : > { %1236 = vst.msk [vmem:[%s2424_s16 + $0x70] sm:$0xff] %vm927_vm3, %v1220_v28 }
 0x23e   : > { %v1148_v52 = vpop.f32.mrf.mxu0  ;;  %v1160_v15 = vpop.f32.mrf.mxu1 }
 0x23f   : > { %v1149_v62 = vadd.f32 %v2410_v31, %v1148_v52  ;;  %v1161_v17 = vadd.f32 %v2410_v31, %v1160_v15 }
 0x241   : > { %v1208_v44 = vadd.f32 %v1192_v6, %v1149_v62  ;;  %v1212_v61 = vadd.f32 %v1196_v33, %v1161_v17 }
 0x243   : > { %1224 = vst.msk [vmem:[%s2424_s16 + $0x10] sm:$0xff] %vm927_vm3, %v1208_v44 }
 0x244   : > { %1228 = vst.msk [vmem:[%s2424_s16 + $0x30] sm:$0xff] %vm927_vm3, %v1212_v61 }
 0x24c   : > { %v1175_v12 = vpop.f32.mrf.mxu2 }
 0x24d   : > { %v1176_v13 = vadd.f32 %v2410_v31, %v1175_v12  ;;  %v1187_v36 = vpop.f32.mrf.mxu3 }
 0x24e   : > { %v1188_v59 = vadd.f32 %v2410_v31, %v1187_v36 }
 0x24f   : > { %v1217_v3 = vadd.f32 %v1201_v23, %v1176_v13 }
 0x250   : > { %v1221_v38 = vadd.f32 %v1205_v34, %v1188_v59 }
 0x251   : > { %1233 = vst.msk [vmem:[%s2424_s16 + $0x58] sm:$0xff] %vm927_vm3, %v1217_v3 }
 0x252   : > { %1237 = vst.msk [vmem:[%s2424_s16 + $0x78] sm:$0xff] %vm927_vm3, %v1221_v38 }
 0x25e   : > { %v1163_v48 = vpop.f32.mrf.mxu1 }
 0x25f   : > { %v1151_v26 = vpop.f32.mrf.mxu0  ;;  %v1164_v24 = vadd.f32 %v2410_v31, %v1163_v48 }
 0x260   : > { %v1152_v14 = vadd.f32 %v2410_v31, %v1151_v26 }
 0x261   : > { %v1213_v50 = vadd.f32 %v1197_v2, %v1164_v24 }
 0x262   : > { %v1209_v49 = vadd.f32 %v1193_v57, %v1152_v14 }
 0x263   : > { %1229 = vst.msk [vmem:[%s2424_s16 + $0x38] sm:$0xff] %vm927_vm3, %v1213_v50 }
 0x264   : > { %1225 = vst.msk [vmem:[%s2424_s16 + $0x18] sm:$0xff] %vm927_vm3, %v1209_v49 }
 0x265 PF: > { %s15_s22 = sadd.s32 1, %s1532_s22   ;;  %s2537_s18 = smov %s1524_s20 }
 0x266   : > { %p12_p9 = scmp.ge.s32.totalorder %s15_s22, 6   ;;  %s2538_s19 = smov %s1528_s21 }
 0x267   : > { %s2539_s20 = smov %s2542_s23  ;;  %s2540_s21 = smov %s2546_s24 }
 0x268   :  { %14 = sbr.rel (!%p12_p9) target bundleno = 3 (0x3), region = 76 }

// kernel: edsr_forward.5
= control target key start
LH: loop header
LB: loop body
LE: loop exit
PB: predicated region body
PF: predicated region fallthrough
CT: control target
= control target key end

     0   :  { %s3175_s21 = smov 0   ;;  %s3177_s22 = smov 0   ;;  %s5987_s0 = inlined_call_operand.vmem [shape: f32[2,20,20,8], index: 0, kind: input, shape index: {}, may-alias: {0,1}]   ;;  %s5988_s1 = inlined_call_operand.vmem [shape: f32[2,20,20,8], index: 1, kind: input, shape index: {}, may-alias: {0,1}]   ;;  %s5989_s2 = inlined_call_operand.vmem [shape: f32[72,8], index: 2, kind: input, shape index: {}]   ;;  %s5990_s3 = inlined_call_operand.vmem [shape: f32[1,8], index: 3, kind: input, shape index: {}]   ;;  %s5991_s4 = inlined_call_operand.vmem [shape: f32[72,8], index: 4, kind: input, shape index: {}]   ;;  %s5992_s5 = inlined_call_operand.vmem [shape: f32[1,8], index: 5, kind: input, shape index: {}]   ;;  %s5993_s6 = inlined_call_operand.vmem [shape: f32[2,256,8], index: 6, kind: output, shape index: {}]  }
   0x1   :  { %s3179_s23 = smov 0   ;;  %s3181_s24 = smov 0  }
   0x2   :  { %s3183_s25 = smov 0  }
   0x3 LB: > { %s25_s26 = sadd.s32 1, %s3122_s23  ;;  %s28_s27 = sadd.s32 1, %s3126_s24  ;;  %s3130_s25 = sphi %s3183_s25, %s16_s25   ;;  %s3126_s24 = sphi %s3181_s24, %s6533_s24   ;;  %s3122_s23 = sphi %s3179_s23, %s6532_s23   ;;  %s3118_s22 = sphi %s3177_s22, %s6531_s22   ;;  %s3114_s21 = sphi %s3175_s21, %s6530_s21  }
   0x4   : > { %p26_p0 = scmp.ge.s32.totalorder %s25_s26, 2  ;;  %p2933_p1 = scmp.ge.s32.totalorder %s3130_s25, 1 }
   0x5   : > { %p270_p2 = scmp.lt.s32.totalorder %s3130_s25, 5 }
   0x6   : > { %s6535_s26 = smov (%p26_p0, %s25_s26), 0  ;;  %s6537_s27 = smov (!%p26_p0, %s28_s27), %s3126_s24 }
   0x7   : > { %p271_p3 = pnand %p2933_p1, %p270_p2  ;;  %p30_p4 = scmp.ge.s32.totalorder %s6537_s27, 2 }
   0x9   : > { %s6539_s27 = smov (%p30_p4, %s6537_s27), 0  ;;  %274 = sbr.rel (%p271_p3) target bundleno = 1472 (0x5c0), region = 44 }
   0xe   : > { %s3208_s28 = sshll.u32 %s3114_s21, 3  ;;  %p332_p5 = scmp.lt.s32.totalorder %s3118_s22, 1  ;;  %vm438_vm0 = vcmask 1046528   ;;  %vm579_vm1 = vcmask 1045504   ;;  %vm1286_vm2 = vcmask 64512   ;;  %vm1317_vm3 = vcmask 130048  }
   0xf   : > { %p334_p6 = scmp.lt.s32.totalorder %s3208_s28, 19  ;;  %s3132_s13 = smov 8   ;;  %vm1348_vm4 = vcmask 195584   ;;  %vm1379_vm5 = vcmask 261120   ;;  %vm1410_vm6 = vcmask 326656   ;;  %vm1441_vm7 = vcmask 392192  }
  0x10   : > { %s6541_s22 = smov (!%p332_p5, %s3118_s22), 1  ;;  %s2990_s14 = sadd.s32 8, %s3208_s28  ;;  %vm6053_vm8 = vcmask 523264   ;;  %vm6054_vm9 = vcmask 457728   ;;  %vm6052_vm10 = vcmask 588800   ;;  %vm1912_vm14 = vcmask 1040384  }
  0x11   : > { %s335_s29 = scalar_select %p334_p6, %s3208_s28, 19 }
  0x12   : > { %s3010_s30 = smul.u32 60, %s6541_s22  ;;  %p352_p7 = scmp.lt.s32.totalorder %s2990_s14, 19 }
  0x13   : > { %s3009_s7 = smul.u32 3, %s335_s29  ;;  %s3133_s29 = smov 16  }
  0x14   : > { %s6543_s14 = smov (!%p352_p7, %s2990_s14), 19  ;;  %s6050_s10 = smov 56  }
  0x15   : > { %s338_s8 = sadd.s32 %s3010_s30, %s3009_s7  ;;  %s3011_s15 = smul.u32 3, %s6543_s14 }
  0x16   : > { %s2935_s9 = sshll.u32 %s338_s8, 3  ;;  %s3135_s7 = smov 32  }
  0x17   : > { %s3220_s12 = scalar_lea.vmem %s5987_s0, %s2935_s9  ;;  %s356_s16 = sadd.s32 %s3011_s15, %s3010_s30 }
  0x18   : > { %v3223_v0 = vld [vmem:[%s3220_s12 + $0x28] sm:$0xf]  ;;  %v3226_v1 = vld [vmem:[%s3220_s12 + $0x10] sm:$0xf]  ;;  %v3229_v2 = vld [vmem:[%s3220_s12] sm:$0xff]  ;;  %s2938_s17 = sshll.u32 %s356_s16, 3 }
  0x19   : > { %v3232_v3 = vrot.slane %v3223_v0, 1  ;;  %v442_v4 = vrot.slane %v3226_v1, 1  ;;  %v3236_v5 = vld [vmem:[%s3220_s12 + $0x8] sm:$0xff]  ;;  %v439_v6 = vrot.slane %v3229_v2, 1  ;;  %v3240_v7 = vld [vmem:[%s3220_s12 + $0x20] sm:$0xff]  ;;  %v3243_v8 = vld [vmem:[%s3220_s12 + $0x18] sm:$0xff]  ;;  %s3421_s20 = scalar_lea.vmem %s5988_s1, %s2938_s17 }
  0x1a   : > { %v440_v9 = vrot.slane %v3236_v5, 1  ;;  %v445_v11 = vrot.slane %v3240_v7, 1  ;;  %v444_v12 = vrot.slane %v3243_v8, 1  ;;  %v3261_v15 = vld [vmem:[%s3220_s12 + $0x40] sm:$0xf]  ;;  %v3264_v16 = vld [vmem:[%s3220_s12 + $0x38] sm:$0xff] }
  0x1b   : > { %499 = vrot.lane.b32.xlu2 %v3232_v3, %s3132_s13  ;;  %493 = vrot.lane.b32.xlu1 %v442_v4, %s3132_s13  ;;  %v3272_v18 = vld [vmem:[%s3220_s12 + $0x30] sm:$0xff]  ;;  %v3275_v19 = vrot.slane %v3261_v15, 1  ;;  %v450_v20 = vrot.slane %v3264_v16, 1  ;;  %v3285_v23 = vld [vmem:[%s3220_s12 + $0x58] sm:$0xf]  ;;  %s3134_s30 = smov 24  }
  0x1c   : > { %v441_v10 = vsel %vm438_vm0, %v439_v6, %v440_v9  ;;  %v3255_v13 = vsel %vm438_vm0, %v445_v11, %v3232_v3  ;;  %v3258_v14 = vsel %vm438_vm0, %v444_v12, %v445_v11  ;;  %v443_v17 = vsel %vm438_vm0, %v440_v9, %v442_v4  ;;  %v3288_v24 = vld [vmem:[%s3220_s12 + $0x50] sm:$0xff]  ;;  %v3298_v26 = vld [vmem:[%s3220_s12 + $0x48] sm:$0xff]  ;;  %v3325_v34 = vld [vmem:[%s3220_s12 + $0x60] sm:$0xff]  ;;  %s3136_s8 = smov 40   ;;  %s3137_s9 = smov 48  }
  0x1d   : > { %489 = vrot.lane.b32.xlu0 %v441_v10, %s3132_s13  ;;  %v449_v21 = vrot.slane %v3272_v18, 1  ;;  %v3282_v22 = vsel %vm438_vm0, %v450_v20, %v3275_v19  ;;  %v3301_v27 = vrot.slane %v3285_v23, 1  ;;  %v455_v28 = vrot.slane %v3288_v24, 1  ;;  %v3312_v31 = vld [vmem:[%s3220_s12 + $0x70] sm:$0xf]  ;;  %v3315_v32 = vld [vmem:[%s3220_s12 + $0x68] sm:$0xff] }
  0x1e   : > { %v454_v29 = vrot.slane %v3298_v26, 1  ;;  %v3328_v35 = vrot.slane %v3312_v31, 1  ;;  %v460_v36 = vrot.slane %v3315_v32, 1  ;;  %v459_v37 = vrot.slane %v3325_v34, 1  ;;  %v3339_v39 = vld [vmem:[%s3220_s12 + $0x88] sm:$0xf] }
  0x1f   : > { %v3291_v25 = vsel %vm438_vm0, %v449_v21, %v450_v20  ;;  %v3309_v30 = vsel %vm438_vm0, %v455_v28, %v3301_v27  ;;  %v3342_v40 = vld [vmem:[%s3220_s12 + $0x80] sm:$0xff]  ;;  %v3353_v42 = vld [vmem:[%s3220_s12 + $0x78] sm:$0xff]  ;;  %v3356_v43 = vrot.slane %v3339_v39, 1  ;;  %v3380_v50 = vld [vmem:[%s3220_s12 + $0x90] sm:$0xff]  ;;  %s6048_s11 = smov 64  }
  0x20   : > { %v3318_v33 = vsel %vm438_vm0, %v454_v29, %v455_v28  ;;  %v3336_v38 = vsel %vm438_vm0, %v460_v36, %v3328_v35  ;;  %v3346_v41 = vsel %vm438_vm0, %v459_v37, %v460_v36  ;;  %v465_v44 = vrot.slane %v3342_v40, 1  ;;  %v3367_v47 = vld [vmem:[%s3220_s12 + $0xa0] sm:$0xf]  ;;  %v3370_v48 = vld [vmem:[%s3220_s12 + $0x98] sm:$0xff]  ;;  %v3399_v56 = vld [vmem:[%s3220_s12 + $0xb0] sm:$0xff] }
  0x21   : > { %v464_v45 = vrot.slane %v3353_v42, 1  ;;  %v3383_v51 = vrot.slane %v3367_v47, 1  ;;  %v470_v52 = vrot.slane %v3370_v48, 1  ;;  %v469_v53 = vrot.slane %v3380_v50, 1  ;;  %v3396_v55 = vld [vmem:[%s3220_s12 + $0xb8] sm:$0xf] }
  0x22   : > { %v3364_v46 = vsel %vm438_vm0, %v465_v44, %v3356_v43  ;;  %v3409_v58 = vld [vmem:[%s3220_s12 + $0xa8] sm:$0xff]  ;;  %v3412_v59 = vrot.slane %v3396_v55, 1  ;;  %v475_v60 = vrot.slane %v3399_v56, 1  ;;  %v3428_v63 = vld [vmem:[%s3421_s20 + $0x10] sm:$0xf]  ;;  %v3441_v9 = vld [vmem:[%s3421_s20] sm:$0xff] }
  0x23   : > { %497 = vrot.lane.b32.xlu2 %v3255_v13, %s3132_s13  ;;  %495 = vrot.lane.b32.xlu1 %v3258_v14, %s3132_s13  ;;  %v3373_v49 = vsel %vm438_vm0, %v464_v45, %v465_v44  ;;  %v3391_v54 = vsel %vm438_vm0, %v470_v52, %v3383_v51  ;;  %v3402_v57 = vsel %vm438_vm0, %v469_v53, %v470_v52  ;;  %v474_v61 = vrot.slane %v3409_v58, 1  ;;  %v3431_v4 = vld [vmem:[%s3421_s20 + $0x8] sm:$0xff]  ;;  %v3458_v21 = vld [vmem:[%s3421_s20 + $0x20] sm:$0xff] }
  0x24   : > { %v3425_v62 = vsel %vm438_vm0, %v475_v60, %v3412_v59  ;;  %v3444_v10 = vrot.slane %v3428_v63, 1  ;;  %v480_v11 = vrot.slane %v3431_v4, 1  ;;  %v479_v12 = vrot.slane %v3441_v9, 1  ;;  %v3455_v20 = vld [vmem:[%s3421_s20 + $0x28] sm:$0xf]  ;;  %v3468_v29 = vld [vmem:[%s3421_s20 + $0x18] sm:$0xff] }
  0x25   : > { %491 = vrot.lane.b32.xlu0 %v443_v17, %s3132_s13  ;;  %v3434_v6 = vsel %vm438_vm0, %v474_v61, %v475_v60  ;;  %v3471_v36 = vrot.slane %v3455_v20, 1  ;;  %v485_v37 = vrot.slane %v3458_v21, 1  ;;  %v484_v44 = vrot.slane %v3468_v29, 1 }
  0x26   : > { %v3452_v17 = vsel %vm438_vm0, %v480_v11, %v3444_v10  ;;  %v3461_v28 = vsel %vm438_vm0, %v479_v12, %v480_v11  ;;  %v583_v53 = vrot.slane %v3226_v1, 2  ;;  %v581_v60 = vrot.slane %v3236_v5, 2 }
  0x27   : > { %v3479_v45 = vsel %vm438_vm0, %v485_v37, %v3471_v36  ;;  %v3482_v52 = vsel %vm438_vm0, %v484_v44, %v485_v37  ;;  %v580_v61 = vrot.slane %v3229_v2, 2  ;;  %v3498_v37 = vrot.slane %v3223_v0, 2 }
  0x28   : > { %v584_v11 = vsel %vm579_vm1, %v581_v60, %v583_v53  ;;  %v586_v1 = vrot.slane %v3240_v7, 2  ;;  %v585_v5 = vrot.slane %v3243_v8, 2 }
  0x29   : > { %v582_v12 = vsel %vm579_vm1, %v580_v61, %v581_v60  ;;  %v591_v60 = vrot.slane %v3264_v16, 2 }
  0x2a   : > { %v3505_v2 = vsel %vm579_vm1, %v586_v1, %v3498_v37  ;;  %v3508_v44 = vsel %vm579_vm1, %v585_v5, %v586_v1  ;;  %v3535_v5 = vrot.slane %v3285_v23, 2 }
  0x2b   : > { %505 = vrot.lane.b32.xlu2 %v3275_v19, %s3132_s13  ;;  %503 = vrot.lane.b32.xlu1 %v3282_v22, %s3132_s13  ;;  %6060 = vst [vmem:[#allocation2_spill] sm:$0xff] %v3505_v2 }
  0x2c   : > { %6061 = vst [vmem:[#allocation3_spill] sm:$0xff] %v3508_v44 }
  0x2d   : > { %501 = vrot.lane.b32.xlu0 %v3291_v25, %s3132_s13  ;;  %6066 = vst [vmem:[#allocation8_spill] sm:$0xff] %v3535_v5 }
  0x33   : > { %511 = vrot.lane.b32.xlu2 %v3301_v27, %s3132_s13  ;;  %509 = vrot.lane.b32.xlu1 %v3309_v30, %s3132_s13 }
  0x35   : > { %507 = vrot.lane.b32.xlu0 %v3318_v33, %s3132_s13 }
  0x3b   : > { %517 = vrot.lane.b32.xlu2 %v3328_v35, %s3132_s13  ;;  %515 = vrot.lane.b32.xlu1 %v3336_v38, %s3132_s13 }
  0x3d   : > { %513 = vrot.lane.b32.xlu0 %v3346_v41, %s3132_s13 }
  0x43   : > { %523 = vrot.lane.b32.xlu2 %v3356_v43, %s3132_s13  ;;  %521 = vrot.lane.b32.xlu1 %v3364_v46, %s3132_s13 }
  0x45   : > { %519 = vrot.lane.b32.xlu0 %v3373_v49, %s3132_s13 }
  0x4b   : > { %529 = vrot.lane.b32.xlu2 %v3383_v51, %s3132_s13  ;;  %527 = vrot.lane.b32.xlu1 %v3391_v54, %s3132_s13 }
  0x4d   : > { %525 = vrot.lane.b32.xlu0 %v3402_v57, %s3132_s13 }
  0x53   : > { %535 = vrot.lane.b32.xlu2 %v3412_v59, %s3132_s13  ;;  %533 = vrot.lane.b32.xlu1 %v3425_v62, %s3132_s13 }
  0x55   : > { %531 = vrot.lane.b32.xlu0 %v3434_v6, %s3132_s13 }
  0x5b   : > { %541 = vrot.lane.b32.xlu2 %v3444_v10, %s3132_s13  ;;  %539 = vrot.lane.b32.xlu1 %v3452_v17, %s3132_s13 }
  0x5d   : > { %537 = vrot.lane.b32.xlu0 %v3461_v28, %s3132_s13 }
  0x63   : > { %547 = vrot.lane.b32.xlu2 %v3471_v36, %s3132_s13  ;;  %545 = vrot.lane.b32.xlu1 %v3479_v45, %s3132_s13 }
  0x65   : > { %543 = vrot.lane.b32.xlu0 %v3482_v52, %s3132_s13 }
  0x6b   : > { %634 = vrot.lane.b32.xlu2 %v583_v53, %s3133_s29  ;;  %632 = vrot.lane.b32.xlu1 %v584_v11, %s3133_s29  ;;  %v3515_v53 = vrot.slane %v3261_v15, 2  ;;  %v590_v11 = vrot.slane %v3272_v18, 2 }
  0x6d   : > { %630 = vrot.lane.b32.xlu0 %v582_v12, %s3133_s29  ;;  %6062 = vst [vmem:[#allocation4_spill] sm:$0xff] %v3515_v53  ;;  %v3525_v12 = vsel %vm579_vm1, %v591_v60, %v3515_v53  ;;  %v3528_v1 = vsel %vm579_vm1, %v590_v11, %v591_v60 }
  0x6e   : > { %6064 = vst [vmem:[#allocation6_spill] sm:$0xff] %v3525_v12 }
  0x6f   : > { %6065 = vst [vmem:[#allocation7_spill] sm:$0xff] %v3528_v1 }
  0x73   : > { %640 = vrot.lane.b32.xlu2 %v3498_v37, %s3133_s29  ;;  %638 = vrot.lane.b32.xlu1 %v3505_v2, %s3133_s29  ;;  %v595_v2 = vrot.slane %v3298_v26, 2 }
  0x75   : > { %636 = vrot.lane.b32.xlu0 %v3508_v44, %s3133_s29  ;;  %v3520_v61 = vpop.permute.xlu2 %499 }
  0x76   : > { %6063 = vst [vmem:[#allocation5_spill] sm:$0xff] %v3520_v61  ;;  %v596_v61 = vrot.slane %v3288_v24, 2 }
  0x78   : > { %v3545_v60 = vsel %vm579_vm1, %v596_v61, %v3535_v5  ;;  %v3548_v11 = vsel %vm579_vm1, %v595_v2, %v596_v61 }
  0x79   : > { %6068 = vst [vmem:[#allocation10_spill] sm:$0xff] %v3545_v60 }
  0x7a   : > { %6069 = vst [vmem:[#allocation11_spill] sm:$0xff] %v3548_v11 }
  0x7b   : > { %646 = vrot.lane.b32.xlu2 %v3515_v53, %s3133_s29  ;;  %644 = vrot.lane.b32.xlu1 %v3525_v12, %s3133_s29  ;;  %v3555_v12 = vrot.slane %v3312_v31, 2  ;;  %v600_v53 = vrot.slane %v3325_v34, 2 }
  0x7d   : > { %642 = vrot.lane.b32.xlu0 %v3528_v1, %s3133_s29  ;;  %v3540_v44 = vpop.permute.xlu2 %497  ;;  %6070 = vst [vmem:[#allocation12_spill] sm:$0xff] %v3555_v12 }
  0x7e   : > { %6067 = vst [vmem:[#allocation9_spill] sm:$0xff] %v3540_v44  ;;  %v601_v44 = vrot.slane %v3315_v32, 2 }
  0x80   : > { %v3565_v2 = vsel %vm579_vm1, %v601_v44, %v3555_v12  ;;  %v3568_v61 = vsel %vm579_vm1, %v600_v53, %v601_v44  ;;  %v605_v44 = vrot.slane %v3353_v42, 2 }
  0x81   : > { %6072 = vst [vmem:[#allocation14_spill] sm:$0xff] %v3565_v2 }
  0x82   : > { %6073 = vst [vmem:[#allocation15_spill] sm:$0xff] %v3568_v61 }
  0x83   : > { %652 = vrot.lane.b32.xlu2 %v3535_v5, %s3133_s29  ;;  %650 = vrot.lane.b32.xlu1 %v3545_v60, %s3133_s29  ;;  %v3575_v60 = vrot.slane %v3339_v39, 2 }
  0x85   : > { %648 = vrot.lane.b32.xlu0 %v3548_v11, %s3133_s29  ;;  %v3560_v1 = vpop.permute.xlu2 %505  ;;  %6074 = vst [vmem:[#allocation16_spill] sm:$0xff] %v3575_v60 }
  0x86   : > { %6071 = vst [vmem:[#allocation13_spill] sm:$0xff] %v3560_v1  ;;  %v606_v1 = vrot.slane %v3342_v40, 2 }
  0x8b   : > { %658 = vrot.lane.b32.xlu2 %v3555_v12, %s3133_s29  ;;  %656 = vrot.lane.b32.xlu1 %v3565_v2, %s3133_s29  ;;  %v3589_v12 = vsel %vm579_vm1, %v606_v1, %v3575_v60  ;;  %v3592_v2 = vsel %vm579_vm1, %v605_v44, %v606_v1  ;;  %v610_v1 = vrot.slane %v3380_v50, 2 }
  0x8c   : > { %6078 = vst [vmem:[#allocation20_spill] sm:$0xff] %v3589_v12 }
  0x8d   : > { %654 = vrot.lane.b32.xlu0 %v3568_v61, %s3133_s29  ;;  %v3580_v11 = vpop.permute.xlu2 %511  ;;  %v3582_v5 = vpop.permute.xlu1 %493  ;;  %6079 = vst [vmem:[#allocation21_spill] sm:$0xff] %v3592_v2 }
  0x8e   : > { %6075 = vst [vmem:[#allocation17_spill] sm:$0xff] %v3580_v11  ;;  %v3599_v11 = vrot.slane %v3367_v47, 2 }
  0x8f   : > { %6076 = vst [vmem:[#allocation18_spill] sm:$0xff] %v3582_v5  ;;  %v3585_v53 = vpop.permute.xlu0 %489  ;;  %v611_v5 = vrot.slane %v3370_v48, 2 }
  0x90   : > { %6077 = vst [vmem:[#allocation19_spill] sm:$0xff] %v3585_v53 }
  0x91   : > { %6080 = vst [vmem:[#allocation22_spill] sm:$0xff] %v3599_v11 }
  0x93   : > { %664 = vrot.lane.b32.xlu2 %v3575_v60, %s3133_s29  ;;  %662 = vrot.lane.b32.xlu1 %v3589_v12, %s3133_s29  ;;  %v3613_v60 = vsel %vm579_vm1, %v611_v5, %v3599_v11  ;;  %v3616_v12 = vsel %vm579_vm1, %v610_v1, %v611_v5  ;;  %v615_v5 = vrot.slane %v3409_v58, 2 }
  0x94   : > { %6084 = vst [vmem:[#allocation26_spill] sm:$0xff] %v3613_v60 }
  0x95   : > { %660 = vrot.lane.b32.xlu0 %v3592_v2, %s3133_s29  ;;  %v3604_v53 = vpop.permute.xlu2 %517  ;;  %v3606_v61 = vpop.permute.xlu1 %495  ;;  %6085 = vst [vmem:[#allocation27_spill] sm:$0xff] %v3616_v12 }
  0x96   : > { %6081 = vst [vmem:[#allocation23_spill] sm:$0xff] %v3604_v53  ;;  %v3623_v53 = vrot.slane %v3396_v55, 2 }
  0x97   : > { %6082 = vst [vmem:[#allocation24_spill] sm:$0xff] %v3606_v61  ;;  %v3609_v44 = vpop.permute.xlu0 %491  ;;  %v616_v61 = vrot.slane %v3399_v56, 2 }
  0x98   : > { %6083 = vst [vmem:[#allocation25_spill] sm:$0xff] %v3609_v44 }
  0x99   : > { %6086 = vst [vmem:[#allocation28_spill] sm:$0xff] %v3623_v53 }
  0x9b   : > { %670 = vrot.lane.b32.xlu2 %v3599_v11, %s3133_s29  ;;  %668 = vrot.lane.b32.xlu1 %v3613_v60, %s3133_s29  ;;  %v3637_v11 = vsel %vm579_vm1, %v616_v61, %v3623_v53  ;;  %v3640_v60 = vsel %vm579_vm1, %v615_v5, %v616_v61  ;;  %v620_v61 = vrot.slane %v3441_v9, 2 }
  0x9c   : > { %6090 = vst [vmem:[#allocation32_spill] sm:$0xff] %v3637_v11 }
  0x9d   : > { %666 = vrot.lane.b32.xlu0 %v3616_v12, %s3133_s29  ;;  %v3628_v44 = vpop.permute.xlu2 %523  ;;  %v3630_v2 = vpop.permute.xlu1 %503  ;;  %6091 = vst [vmem:[#allocation33_spill] sm:$0xff] %v3640_v60 }
  0x9e   : > { %6087 = vst [vmem:[#allocation29_spill] sm:$0xff] %v3628_v44  ;;  %v3647_v44 = vrot.slane %v3428_v63, 2 }
  0x9f   : > { %6088 = vst [vmem:[#allocation30_spill] sm:$0xff] %v3630_v2  ;;  %v3633_v1 = vpop.permute.xlu0 %501  ;;  %v621_v2 = vrot.slane %v3431_v4, 2 }
  0xa0   : > { %6089 = vst [vmem:[#allocation31_spill] sm:$0xff] %v3633_v1 }
  0xa1   : > { %6092 = vst [vmem:[#allocation34_spill] sm:$0xff] %v3647_v44 }
  0xa3   : > { %676 = vrot.lane.b32.xlu2 %v3623_v53, %s3133_s29  ;;  %674 = vrot.lane.b32.xlu1 %v3637_v11, %s3133_s29  ;;  %v3661_v53 = vsel %vm579_vm1, %v621_v2, %v3647_v44  ;;  %v3664_v11 = vsel %vm579_vm1, %v620_v61, %v621_v2  ;;  %v625_v2 = vrot.slane %v3468_v29, 2 }
  0xa4   : > { %6096 = vst [vmem:[#allocation38_spill] sm:$0xff] %v3661_v53 }
  0xa5   : > { %672 = vrot.lane.b32.xlu0 %v3640_v60, %s3133_s29  ;;  %v3652_v1 = vpop.permute.xlu2 %529  ;;  %v3654_v12 = vpop.permute.xlu1 %509  ;;  %6097 = vst [vmem:[#allocation39_spill] sm:$0xff] %v3664_v11 }
  0xa6   : > { %6093 = vst [vmem:[#allocation35_spill] sm:$0xff] %v3652_v1  ;;  %v3671_v1 = vrot.slane %v3455_v20, 2 }
  0xa7   : > { %6094 = vst [vmem:[#allocation36_spill] sm:$0xff] %v3654_v12  ;;  %v3657_v5 = vpop.permute.xlu0 %507  ;;  %v626_v12 = vrot.slane %v3458_v21, 2 }
  0xa8   : > { %6095 = vst [vmem:[#allocation37_spill] sm:$0xff] %v3657_v5 }
  0xa9   : > { %6098 = vst [vmem:[#allocation40_spill] sm:$0xff] %v3671_v1 }
  0xab   : > { %682 = vrot.lane.b32.xlu2 %v3647_v44, %s3133_s29  ;;  %680 = vrot.lane.b32.xlu1 %v3661_v53, %s3133_s29  ;;  %v3685_v44 = vsel %vm579_vm1, %v626_v12, %v3671_v1  ;;  %v3688_v53 = vsel %vm579_vm1, %v625_v2, %v626_v12 }
  0xac   : > { %6102 = vst [vmem:[#allocation44_spill] sm:$0xff] %v3685_v44 }
  0xad   : > { %678 = vrot.lane.b32.xlu0 %v3664_v11, %s3133_s29  ;;  %v3676_v5 = vpop.permute.xlu2 %535  ;;  %v3678_v60 = vpop.permute.xlu1 %515  ;;  %6103 = vst [vmem:[#allocation45_spill] sm:$0xff] %v3688_v53 }
  0xae   : > { %6099 = vst [vmem:[#allocation41_spill] sm:$0xff] %v3676_v5 }
  0xaf   : > { %6100 = vst [vmem:[#allocation42_spill] sm:$0xff] %v3678_v60  ;;  %v3681_v61 = vpop.permute.xlu0 %513 }
  0xb0   : > { %6101 = vst [vmem:[#allocation43_spill] sm:$0xff] %v3681_v61 }
  0xb3   : > { %688 = vrot.lane.b32.xlu2 %v3671_v1, %s3133_s29  ;;  %686 = vrot.lane.b32.xlu1 %v3685_v44, %s3133_s29 }
  0xb5   : > { %684 = vrot.lane.b32.xlu0 %v3688_v53, %s3133_s29  ;;  %v3696_v5 = vpop.permute.xlu2 %541  ;;  %v3698_v60 = vpop.permute.xlu1 %521 }
  0xb6   : > { %6104 = vst [vmem:[#allocation46_spill] sm:$0xff] %v3696_v5 }
  0xb7   : > { %6105 = vst [vmem:[#allocation47_spill] sm:$0xff] %v3698_v60  ;;  %v3700_v61 = vpop.permute.xlu0 %519 }
  0xb8   : > { %6106 = vst [vmem:[#allocation48_spill] sm:$0xff] %v3700_v61 }
  0xbb   : > { %727 = vrot.lane.b32.xlu2 %v3223_v0, %s3134_s30  ;;  %725 = vrot.lane.b32.xlu1 %v3240_v7, %s3134_s30 }
  0xbd   : > { %723 = vrot.lane.b32.xlu0 %v3243_v8, %s3134_s30  ;;  %v3708_v12 = vpop.permute.xlu2 %547  ;;  %v3710_v2 = vpop.permute.xlu1 %527 }
  0xbe   : > { %6107 = vst [vmem:[#allocation49_spill] sm:$0xff] %v3708_v12 }
  0xbf   : > { %6108 = vst [vmem:[#allocation50_spill] sm:$0xff] %v3710_v2  ;;  %v3712_v53 = vpop.permute.xlu0 %525 }
  0xc0   : > { %6109 = vst [vmem:[#allocation51_spill] sm:$0xff] %v3712_v53 }
  0xc3   : > { %733 = vrot.lane.b32.xlu2 %v3261_v15, %s3134_s30  ;;  %731 = vrot.lane.b32.xlu1 %v3264_v16, %s3134_s30 }
  0xc5   : > { %729 = vrot.lane.b32.xlu0 %v3272_v18, %s3134_s30  ;;  %v3720_v0 = vpop.permute.xlu2 %634  ;;  %v3722_v7 = vpop.permute.xlu1 %533 }
  0xc6   : > { %6110 = vst [vmem:[#allocation52_spill] sm:$0xff] %v3720_v0 }
  0xc7   : > { %6111 = vst [vmem:[#allocation53_spill] sm:$0xff] %v3722_v7  ;;  %v3724_v8 = vpop.permute.xlu0 %531 }
  0xc8   : > { %6112 = vst [vmem:[#allocation54_spill] sm:$0xff] %v3724_v8 }
  0xcb   : > { %739 = vrot.lane.b32.xlu2 %v3285_v23, %s3134_s30  ;;  %737 = vrot.lane.b32.xlu1 %v3288_v24, %s3134_s30 }
  0xcd   : > { %735 = vrot.lane.b32.xlu0 %v3298_v26, %s3134_s30  ;;  %v3732_v12 = vpop.permute.xlu2 %640  ;;  %v3734_v5 = vpop.permute.xlu1 %539 }
  0xce   : > { %6113 = vst [vmem:[#allocation55_spill] sm:$0xff] %v3732_v12 }
  0xcf   : > { %6114 = vst [vmem:[#allocation56_spill] sm:$0xff] %v3734_v5  ;;  %v3736_v53 = vpop.permute.xlu0 %537 }
  0xd0   : > { %6115 = vst [vmem:[#allocation57_spill] sm:$0xff] %v3736_v53 }
  0xd3   : > { %745 = vrot.lane.b32.xlu2 %v3312_v31, %s3134_s30  ;;  %743 = vrot.lane.b32.xlu1 %v3315_v32, %s3134_s30 }
  0xd5   : > { %741 = vrot.lane.b32.xlu0 %v3325_v34, %s3134_s30  ;;  %v3744_v8 = vpop.permute.xlu2 %646  ;;  %v3746_v7 = vpop.permute.xlu1 %545 }
  0xd6   : > { %6116 = vst [vmem:[#allocation58_spill] sm:$0xff] %v3744_v8 }
  0xd7   : > { %6117 = vst [vmem:[#allocation59_spill] sm:$0xff] %v3746_v7  ;;  %v3748_v2 = vpop.permute.xlu0 %543 }
  0xd8   : > { %6118 = vst [vmem:[#allocation60_spill] sm:$0xff] %v3748_v2 }
  0xdb   : > { %751 = vrot.lane.b32.xlu2 %v3339_v39, %s3134_s30  ;;  %749 = vrot.lane.b32.xlu1 %v3342_v40, %s3134_s30 }
  0xdd   : > { %747 = vrot.lane.b32.xlu0 %v3353_v42, %s3134_s30  ;;  %v3756_v53 = vpop.permute.xlu2 %652  ;;  %v3758_v5 = vpop.permute.xlu1 %632 }
  0xde   : > { %6119 = vst [vmem:[#allocation61_spill] sm:$0xff] %v3756_v53 }
  0xdf   : > { %6120 = vst [vmem:[#allocation62_spill] sm:$0xff] %v3758_v5  ;;  %v3760_v12 = vpop.permute.xlu0 %630 }
  0xe0   : > { %6121 = vst [vmem:[#allocation63_spill] sm:$0xff] %v3760_v12 }
  0xe3   : > { %757 = vrot.lane.b32.xlu2 %v3367_v47, %s3134_s30  ;;  %755 = vrot.lane.b32.xlu1 %v3370_v48, %s3134_s30 }
  0xe5   : > { %753 = vrot.lane.b32.xlu0 %v3380_v50, %s3134_s30  ;;  %v3768_v2 = vpop.permute.xlu2 %658  ;;  %v3770_v7 = vpop.permute.xlu1 %638 }
  0xe6   : > { %6122 = vst [vmem:[#allocation64_spill] sm:$0xff] %v3768_v2 }
  0xe7   : > { %6123 = vst [vmem:[#allocation65_spill] sm:$0xff] %v3770_v7  ;;  %v3772_v8 = vpop.permute.xlu0 %636 }
  0xe8   : > { %6124 = vst [vmem:[#allocation66_spill] sm:$0xff] %v3772_v8 }
  0xeb   : > { %763 = vrot.lane.b32.xlu2 %v3396_v55, %s3134_s30  ;;  %761 = vrot.lane.b32.xlu1 %v3399_v56, %s3134_s30 }
  0xed   : > { %759 = vrot.lane.b32.xlu0 %v3409_v58, %s3134_s30  ;;  %v3780_v53 = vpop.permute.xlu2 %664  ;;  %v3782_v61 = vpop.permute.xlu1 %644 }
  0xee   : > { %6125 = vst [vmem:[#allocation67_spill] sm:$0xff] %v3780_v53 }
  0xef   : > { %6126 = vst [vmem:[#allocation68_spill] sm:$0xff] %v3782_v61  ;;  %v3784_v2 = vpop.permute.xlu0 %642 }
  0xf0   : > { %6127 = vst [vmem:[#allocation69_spill] sm:$0xff] %v3784_v2 }
  0xf3   : > { %769 = vrot.lane.b32.xlu2 %v3428_v63, %s3134_s30  ;;  %767 = vrot.lane.b32.xlu1 %v3431_v4, %s3134_s30 }
  0xf5   : > { %765 = vrot.lane.b32.xlu0 %v3441_v9, %s3134_s30  ;;  %v3792_v8 = vpop.permute.xlu2 %670  ;;  %v3794_v7 = vpop.permute.xlu1 %650 }
  0xf6   : > { %6128 = vst [vmem:[#allocation70_spill] sm:$0xff] %v3792_v8  ;;  %v3811_v8 = vld [vmem:[%s3421_s20 + $0x40] sm:$0xf] }
  0xf7   : > { %6129 = vst [vmem:[#allocation71_spill] sm:$0xff] %v3794_v7  ;;  %v3796_v53 = vpop.permute.xlu0 %648  ;;  %v3814_v7 = vld [vmem:[%s3421_s20 + $0x38] sm:$0xff] }
  0xf8   : > { %6130 = vst [vmem:[#allocation72_spill] sm:$0xff] %v3796_v53  ;;  %v3817_v53 = vld [vmem:[%s3421_s20 + $0x30] sm:$0xff] }
  0xfb   : > { %775 = vrot.lane.b32.xlu2 %v3455_v20, %s3134_s30  ;;  %773 = vrot.lane.b32.xlu1 %v3458_v21, %s3134_s30 }
  0xfd   : > { %771 = vrot.lane.b32.xlu0 %v3468_v29, %s3134_s30  ;;  %v3804_v2 = vpop.permute.xlu2 %676  ;;  %v3806_v61 = vpop.permute.xlu1 %656 }
  0xfe   : > { %6131 = vst [vmem:[#allocation73_spill] sm:$0xff] %v3804_v2 }
  0xff   : > { %6132 = vst [vmem:[#allocation74_spill] sm:$0xff] %v3806_v61  ;;  %v3808_v60 = vpop.permute.xlu0 %654 }
 0x100   : > { %6133 = vst [vmem:[#allocation75_spill] sm:$0xff] %v3808_v60 }
 0x103   : > { %781 = vrot.lane.b32.xlu2 %v3811_v8, %s3134_s30  ;;  %779 = vrot.lane.b32.xlu1 %v3814_v7, %s3134_s30 }
 0x105   : > { %777 = vrot.lane.b32.xlu0 %v3817_v53, %s3134_s30  ;;  %v3825_v2 = vpop.permute.xlu2 %682  ;;  %v3827_v61 = vpop.permute.xlu1 %662 }
 0x106   : > { %6134 = vst [vmem:[#allocation76_spill] sm:$0xff] %v3825_v2 }
 0x107   : > { %6135 = vst [vmem:[#allocation77_spill] sm:$0xff] %v3827_v61  ;;  %v3829_v60 = vpop.permute.xlu0 %660 }
 0x108   : > { %6136 = vst [vmem:[#allocation78_spill] sm:$0xff] %v3829_v60 }
 0x10b   : > { %822 = vrot.lane.b32.xlu2 %v3232_v3, %s3135_s7  ;;  %820 = vrot.lane.b32.xlu1 %v3255_v13, %s3135_s7 }
 0x10d   : > { %818 = vrot.lane.b32.xlu0 %v3258_v14, %s3135_s7  ;;  %v3837_v0 = vpop.permute.xlu2 %688  ;;  %v3839_v5 = vpop.permute.xlu1 %668 }
 0x10e   : > { %6137 = vst [vmem:[#allocation79_spill] sm:$0xff] %v3837_v0 }
 0x10f   : > { %6138 = vst [vmem:[#allocation80_spill] sm:$0xff] %v3839_v5  ;;  %v3841_v12 = vpop.permute.xlu0 %666 }
 0x110   : > { %6139 = vst [vmem:[#allocation81_spill] sm:$0xff] %v3841_v12 }
 0x113   : > { %828 = vrot.lane.b32.xlu2 %v3275_v19, %s3135_s7  ;;  %826 = vrot.lane.b32.xlu1 %v3282_v22, %s3135_s7 }
 0x115   : > { %824 = vrot.lane.b32.xlu0 %v3291_v25, %s3135_s7  ;;  %v3849_v3 = vpop.permute.xlu2 %727  ;;  %v3851_v13 = vpop.permute.xlu1 %674 }
 0x116   : > { %6140 = vst [vmem:[#allocation82_spill] sm:$0xff] %v3849_v3 }
 0x117   : > { %6141 = vst [vmem:[#allocation83_spill] sm:$0xff] %v3851_v13  ;;  %v3853_v14 = vpop.permute.xlu0 %672 }
 0x118   : > { %6142 = vst [vmem:[#allocation84_spill] sm:$0xff] %v3853_v14 }
 0x11b   : > { %834 = vrot.lane.b32.xlu2 %v3301_v27, %s3135_s7  ;;  %832 = vrot.lane.b32.xlu1 %v3309_v30, %s3135_s7 }
 0x11d   : > { %830 = vrot.lane.b32.xlu0 %v3318_v33, %s3135_s7  ;;  %v3861_v0 = vpop.permute.xlu2 %733  ;;  %v3863_v2 = vpop.permute.xlu1 %680 }
 0x11e   : > { %6143 = vst [vmem:[#allocation85_spill] sm:$0xff] %v3861_v0 }
 0x11f   : > { %6144 = vst [vmem:[#allocation86_spill] sm:$0xff] %v3863_v2  ;;  %v3865_v12 = vpop.permute.xlu0 %678 }
 0x120   : > { %6145 = vst [vmem:[#allocation87_spill] sm:$0xff] %v3865_v12 }
 0x123   : > { %840 = vrot.lane.b32.xlu2 %v3328_v35, %s3135_s7  ;;  %838 = vrot.lane.b32.xlu1 %v3336_v38, %s3135_s7 }
 0x125   : > { %836 = vrot.lane.b32.xlu0 %v3346_v41, %s3135_s7  ;;  %v3873_v14 = vpop.permute.xlu2 %739  ;;  %v3875_v13 = vpop.permute.xlu1 %686 }
 0x126   : > { %6146 = vst [vmem:[#allocation88_spill] sm:$0xff] %v3873_v14 }
 0x127   : > { %6147 = vst [vmem:[#allocation89_spill] sm:$0xff] %v3875_v13  ;;  %v3877_v5 = vpop.permute.xlu0 %684 }
 0x128   : > { %6148 = vst [vmem:[#allocation90_spill] sm:$0xff] %v3877_v5 }
 0x12b   : > { %846 = vrot.lane.b32.xlu2 %v3356_v43, %s3135_s7  ;;  %844 = vrot.lane.b32.xlu1 %v3364_v46, %s3135_s7 }
 0x12d   : > { %842 = vrot.lane.b32.xlu0 %v3373_v49, %s3135_s7  ;;  %v3885_v12 = vpop.permute.xlu2 %745  ;;  %v3887_v2 = vpop.permute.xlu1 %725 }
 0x12e   : > { %6149 = vst [vmem:[#allocation91_spill] sm:$0xff] %v3885_v12 }
 0x12f   : > { %6150 = vst [vmem:[#allocation92_spill] sm:$0xff] %v3887_v2  ;;  %v3889_v0 = vpop.permute.xlu0 %723 }
 0x130   : > { %6151 = vst [vmem:[#allocation93_spill] sm:$0xff] %v3889_v0 }
 0x133   : > { %852 = vrot.lane.b32.xlu2 %v3383_v51, %s3135_s7  ;;  %850 = vrot.lane.b32.xlu1 %v3391_v54, %s3135_s7 }
 0x135   : > { %848 = vrot.lane.b32.xlu0 %v3402_v57, %s3135_s7  ;;  %v3897_v5 = vpop.permute.xlu2 %751  ;;  %v3899_v13 = vpop.permute.xlu1 %731 }
 0x136   : > { %6152 = vst [vmem:[#allocation94_spill] sm:$0xff] %v3897_v5 }
 0x137   : > { %6153 = vst [vmem:[#allocation95_spill] sm:$0xff] %v3899_v13  ;;  %v3901_v14 = vpop.permute.xlu0 %729 }
 0x138   : > { %6154 = vst [vmem:[#allocation96_spill] sm:$0xff] %v3901_v14 }
 0x13b   : > { %858 = vrot.lane.b32.xlu2 %v3412_v59, %s3135_s7  ;;  %856 = vrot.lane.b32.xlu1 %v3425_v62, %s3135_s7 }
 0x13d   : > { %854 = vrot.lane.b32.xlu0 %v3434_v6, %s3135_s7  ;;  %v3909_v12 = vpop.permute.xlu2 %757  ;;  %v3911_v60 = vpop.permute.xlu1 %737 }
 0x13e   : > { %6155 = vst [vmem:[#allocation97_spill] sm:$0xff] %v3909_v12  ;;  %v814_v12 = vrot.slane %v3814_v7, 1 }
 0x13f   : > { %6156 = vst [vmem:[#allocation98_spill] sm:$0xff] %v3911_v60  ;;  %v3913_v61 = vpop.permute.xlu0 %735 }
 0x140   : > { %6157 = vst [vmem:[#allocation99_spill] sm:$0xff] %v3913_v61  ;;  %v3932_v61 = vrot.slane %v3811_v8, 1 }
 0x142   : > { %v3946_v3 = vsel %vm438_vm0, %v814_v12, %v3932_v61 }
 0x143   : > { %864 = vrot.lane.b32.xlu2 %v3444_v10, %s3135_s7  ;;  %862 = vrot.lane.b32.xlu1 %v3452_v17, %s3135_s7  ;;  %6164 = vst [vmem:[#allocation106_spill] sm:$0xff] %v3946_v3 }
 0x145   : > { %860 = vrot.lane.b32.xlu0 %v3461_v28, %s3135_s7  ;;  %v3921_v14 = vpop.permute.xlu2 %763  ;;  %v3923_v13 = vpop.permute.xlu1 %743 }
 0x146   : > { %6158 = vst [vmem:[#allocation100_spill] sm:$0xff] %v3921_v14 }
 0x147   : > { %6159 = vst [vmem:[#allocation101_spill] sm:$0xff] %v3923_v13  ;;  %v3925_v5 = vpop.permute.xlu0 %741 }
 0x148   : > { %6160 = vst [vmem:[#allocation102_spill] sm:$0xff] %v3925_v5  ;;  %v813_v5 = vrot.slane %v3817_v53, 1 }
 0x14a   : > { %v3949_v2 = vsel %vm438_vm0, %v813_v5, %v814_v12  ;;  %v6169_v5 = vld [vmem:[#allocation2_spill] sm:$0xff]  ;;  %v6170_v12 = vld [vmem:[#allocation3_spill] sm:$0xff] }
 0x14b   : > { %870 = vrot.lane.b32.xlu2 %v3471_v36, %s3135_s7  ;;  %868 = vrot.lane.b32.xlu1 %v3479_v45, %s3135_s7  ;;  %6165 = vst [vmem:[#allocation107_spill] sm:$0xff] %v3949_v2 }
 0x14d   : > { %866 = vrot.lane.b32.xlu0 %v3482_v52, %s3135_s7  ;;  %v3937_v60 = vpop.permute.xlu2 %769  ;;  %v3939_v14 = vpop.permute.xlu1 %749 }
 0x14e   : > { %6161 = vst [vmem:[#allocation103_spill] sm:$0xff] %v3937_v60 }
 0x14f   : > { %6162 = vst [vmem:[#allocation104_spill] sm:$0xff] %v3939_v14  ;;  %v3942_v13 = vpop.permute.xlu0 %747 }
 0x150   : > { %6163 = vst [vmem:[#allocation105_spill] sm:$0xff] %v3942_v13 }
 0x153   : > { %876 = vrot.lane.b32.xlu2 %v3932_v61, %s3135_s7  ;;  %874 = vrot.lane.b32.xlu1 %v3946_v3, %s3135_s7 }
 0x155   : > { %872 = vrot.lane.b32.xlu0 %v3949_v2, %s3135_s7  ;;  %v3957_v60 = vpop.permute.xlu2 %775  ;;  %v3959_v14 = vpop.permute.xlu1 %755 }
 0x156   : > { %6166 = vst [vmem:[#allocation108_spill] sm:$0xff] %v3957_v60  ;;  %v6174_v60 = vld [vmem:[#allocation4_spill] sm:$0xff] }
 0x157   : > { %6167 = vst [vmem:[#allocation109_spill] sm:$0xff] %v3959_v14  ;;  %v3961_v13 = vpop.permute.xlu0 %753 }
 0x158   : > { %6168 = vst [vmem:[#allocation110_spill] sm:$0xff] %v3961_v13  ;;  %v6175_v13 = vld [vmem:[#allocation6_spill] sm:$0xff] }
 0x15b   : > { %917 = vrot.lane.b32.xlu2 %v3498_v37, %s3136_s8  ;;  %915 = vrot.lane.b32.xlu1 %v6169_v5, %s3136_s8  ;;  %v6176_v37 = vld [vmem:[#allocation7_spill] sm:$0xff] }
 0x15d   : > { %913 = vrot.lane.b32.xlu0 %v6170_v12, %s3136_s8  ;;  %v3969_v0 = vpop.permute.xlu2 %781  ;;  %v3971_v3 = vpop.permute.xlu1 %761 }
 0x15e   : > { %6171 = vst [vmem:[#allocation2_spill] sm:$0xff] %v3969_v0  ;;  %v6180_v0 = vld [vmem:[#allocation8_spill] sm:$0xff] }
 0x15f   : > { %6172 = vst [vmem:[#allocation3_spill] sm:$0xff] %v3971_v3  ;;  %v3973_v2 = vpop.permute.xlu0 %759  ;;  %v6182_v3 = vld [vmem:[#allocation11_spill] sm:$0xff] }
 0x160   : > { %6173 = vst [vmem:[#allocation111_spill] sm:$0xff] %v3973_v2  ;;  %v6181_v2 = vld [vmem:[#allocation10_spill] sm:$0xff] }
 0x163   : > { %923 = vrot.lane.b32.xlu2 %v6174_v60, %s3136_s8  ;;  %921 = vrot.lane.b32.xlu1 %v6175_v13, %s3136_s8 }
 0x165   : > { %919 = vrot.lane.b32.xlu0 %v6176_v37, %s3136_s8  ;;  %v3981_v14 = vpop.permute.xlu2 %822  ;;  %v3983_v5 = vpop.permute.xlu1 %767 }
 0x166   : > { %6177 = vst [vmem:[#allocation112_spill] sm:$0xff] %v3981_v14  ;;  %v6186_v14 = vld [vmem:[#allocation12_spill] sm:$0xff] }
 0x167   : > { %6178 = vst [vmem:[#allocation113_spill] sm:$0xff] %v3983_v5  ;;  %v3985_v12 = vpop.permute.xlu0 %765  ;;  %v6188_v5 = vld [vmem:[#allocation15_spill] sm:$0xff] }
 0x168   : > { %6179 = vst [vmem:[#allocation114_spill] sm:$0xff] %v3985_v12  ;;  %v6187_v12 = vld [vmem:[#allocation14_spill] sm:$0xff] }
 0x16b   : > { %929 = vrot.lane.b32.xlu2 %v6180_v0, %s3136_s8  ;;  %927 = vrot.lane.b32.xlu1 %v6181_v2, %s3136_s8 }
 0x16d   : > { %925 = vrot.lane.b32.xlu0 %v6182_v3, %s3136_s8  ;;  %v3993_v60 = vpop.permute.xlu2 %828  ;;  %v3995_v13 = vpop.permute.xlu1 %773 }
 0x16e   : > { %6183 = vst [vmem:[#allocation115_spill] sm:$0xff] %v3993_v60  ;;  %v6192_v60 = vld [vmem:[#allocation16_spill] sm:$0xff] }
 0x16f   : > { %6184 = vst [vmem:[#allocation116_spill] sm:$0xff] %v3995_v13  ;;  %v3997_v37 = vpop.permute.xlu0 %771  ;;  %v6194_v13 = vld [vmem:[#allocation21_spill] sm:$0xff] }
 0x170   : > { %6185 = vst [vmem:[#allocation117_spill] sm:$0xff] %v3997_v37  ;;  %v6193_v37 = vld [vmem:[#allocation20_spill] sm:$0xff] }
 0x173   : > { %935 = vrot.lane.b32.xlu2 %v6186_v14, %s3136_s8  ;;  %933 = vrot.lane.b32.xlu1 %v6187_v12, %s3136_s8 }
 0x175   : > { %931 = vrot.lane.b32.xlu0 %v6188_v5, %s3136_s8  ;;  %v4005_v0 = vpop.permute.xlu2 %834  ;;  %v4007_v2 = vpop.permute.xlu1 %779 }
 0x176   : > { %6189 = vst [vmem:[#allocation118_spill] sm:$0xff] %v4005_v0  ;;  %v6198_v0 = vld [vmem:[#allocation22_spill] sm:$0xff] }
 0x177   : > { %6190 = vst [vmem:[#allocation119_spill] sm:$0xff] %v4007_v2  ;;  %v4009_v3 = vpop.permute.xlu0 %777  ;;  %v6200_v2 = vld [vmem:[#allocation27_spill] sm:$0xff] }
 0x178   : > { %6191 = vst [vmem:[#allocation120_spill] sm:$0xff] %v4009_v3  ;;  %v6199_v3 = vld [vmem:[#allocation26_spill] sm:$0xff] }
 0x17b   : > { %941 = vrot.lane.b32.xlu2 %v6192_v60, %s3136_s8  ;;  %939 = vrot.lane.b32.xlu1 %v6193_v37, %s3136_s8 }
 0x17d   : > { %937 = vrot.lane.b32.xlu0 %v6194_v13, %s3136_s8  ;;  %v4017_v14 = vpop.permute.xlu2 %840  ;;  %v4019_v12 = vpop.permute.xlu1 %820 }
 0x17e   : > { %6195 = vst [vmem:[#allocation121_spill] sm:$0xff] %v4017_v14  ;;  %v6204_v14 = vld [vmem:[#allocation28_spill] sm:$0xff] }
 0x17f   : > { %6196 = vst [vmem:[#allocation122_spill] sm:$0xff] %v4019_v12  ;;  %v4021_v5 = vpop.permute.xlu0 %818  ;;  %v6205_v12 = vld [vmem:[#allocation32_spill] sm:$0xff] }
 0x180   : > { %6197 = vst [vmem:[#allocation123_spill] sm:$0xff] %v4021_v5  ;;  %v6206_v5 = vld [vmem:[#allocation33_spill] sm:$0xff] }
 0x183   : > { %947 = vrot.lane.b32.xlu2 %v6198_v0, %s3136_s8  ;;  %945 = vrot.lane.b32.xlu1 %v6199_v3, %s3136_s8 }
 0x185   : > { %943 = vrot.lane.b32.xlu0 %v6200_v2, %s3136_s8  ;;  %v4029_v60 = vpop.permute.xlu2 %846  ;;  %v4031_v37 = vpop.permute.xlu1 %826 }
 0x186   : > { %6201 = vst [vmem:[#allocation124_spill] sm:$0xff] %v4029_v60  ;;  %v6210_v60 = vld [vmem:[#allocation34_spill] sm:$0xff] }
 0x187   : > { %6202 = vst [vmem:[#allocation125_spill] sm:$0xff] %v4031_v37  ;;  %v4033_v13 = vpop.permute.xlu0 %824 }
 0x188   : > { %6203 = vst [vmem:[#allocation126_spill] sm:$0xff] %v4033_v13  ;;  %v6211_v13 = vld [vmem:[#allocation38_spill] sm:$0xff] }
 0x18b   : > { %953 = vrot.lane.b32.xlu2 %v6204_v14, %s3136_s8  ;;  %951 = vrot.lane.b32.xlu1 %v6205_v12, %s3136_s8 }
 0x18d   : > { %949 = vrot.lane.b32.xlu0 %v6206_v5, %s3136_s8  ;;  %v4041_v0 = vpop.permute.xlu2 %852  ;;  %v4043_v3 = vpop.permute.xlu1 %832 }
 0x18e   : > { %6207 = vst [vmem:[#allocation127_spill] sm:$0xff] %v4041_v0  ;;  %v4065_v0 = vrot.slane %v3811_v8, 2 }
 0x18f   : > { %6208 = vst [vmem:[#allocation128_spill] sm:$0xff] %v4043_v3  ;;  %v4045_v2 = vpop.permute.xlu0 %830  ;;  %v6215_v3 = vld [vmem:[#allocation45_spill] sm:$0xff] }
 0x190   : > { %6209 = vst [vmem:[#allocation129_spill] sm:$0xff] %v4045_v2  ;;  %v909_v2 = vrot.slane %v3814_v7, 2 }
 0x193   : > { %959 = vrot.lane.b32.xlu2 %v6210_v60, %s3136_s8  ;;  %957 = vrot.lane.b32.xlu1 %v6211_v13, %s3136_s8 }
 0x195   : > { %955 = vrot.lane.b32.xlu0 %v3664_v11, %s3136_s8  ;;  %v4053_v37 = vpop.permute.xlu2 %858  ;;  %v4055_v14 = vpop.permute.xlu1 %838 }
 0x196   : > { %6212 = vst [vmem:[#allocation130_spill] sm:$0xff] %v4053_v37 }
 0x197   : > { %6213 = vst [vmem:[#allocation131_spill] sm:$0xff] %v4055_v14  ;;  %v4057_v5 = vpop.permute.xlu0 %836 }
 0x198   : > { %6214 = vst [vmem:[#allocation132_spill] sm:$0xff] %v4057_v5  ;;  %v908_v5 = vrot.slane %v3817_v53, 2 }
 0x19b   : > { %965 = vrot.lane.b32.xlu2 %v3671_v1, %s3136_s8  ;;  %963 = vrot.lane.b32.xlu1 %v3685_v44, %s3136_s8  ;;  %v4078_v1 = vsel %vm579_vm1, %v909_v2, %v4065_v0  ;;  %v4081_v44 = vsel %vm579_vm1, %v908_v5, %v909_v2 }
 0x19c   : > { %6219 = vst [vmem:[#allocation136_spill] sm:$0xff] %v4081_v44 }
 0x19d   : > { %961 = vrot.lane.b32.xlu0 %v6215_v3, %s3136_s8  ;;  %v4069_v60 = vpop.permute.xlu2 %864  ;;  %v4071_v37 = vpop.permute.xlu1 %844 }
 0x19e   : > { %6216 = vst [vmem:[#allocation133_spill] sm:$0xff] %v4069_v60 }
 0x19f   : > { %6217 = vst [vmem:[#allocation134_spill] sm:$0xff] %v4071_v37  ;;  %v4074_v14 = vpop.permute.xlu0 %842 }
 0x1a0   : > { %6218 = vst [vmem:[#allocation135_spill] sm:$0xff] %v4074_v14 }
 0x1a3   : > { %971 = vrot.lane.b32.xlu2 %v4065_v0, %s3136_s8  ;;  %969 = vrot.lane.b32.xlu1 %v4078_v1, %s3136_s8 }
 0x1a5   : > { %967 = vrot.lane.b32.xlu0 %v4081_v44, %s3136_s8  ;;  %v4089_v60 = vpop.permute.xlu2 %870  ;;  %v4091_v37 = vpop.permute.xlu1 %850 }
 0x1a6   : > { %6220 = vst [vmem:[#allocation137_spill] sm:$0xff] %v4089_v60 }
 0x1a7   : > { %v4093_v14 = vpop.permute.xlu0 %848 }
 0x1ab   : > { %1010 = vrot.lane.b32.xlu2 %v3261_v15, %s3137_s9  ;;  %1008 = vrot.lane.b32.xlu1 %v3264_v16, %s3137_s9 }
 0x1ad   : > { %1006 = vrot.lane.b32.xlu0 %v3272_v18, %s3137_s9  ;;  %v4101_v2 = vpop.permute.xlu2 %876  ;;  %v4103_v5 = vpop.permute.xlu1 %856 }
 0x1ae   : > { %6221 = vst [vmem:[#allocation138_spill] sm:$0xff] %v4101_v2  ;;  %v4204_v2 = vld [vmem:[%s3421_s20 + $0x58] sm:$0xf] }
 0x1af   : > { %v4105_v44 = vpop.permute.xlu0 %854 }
 0x1b3   : > { %1016 = vrot.lane.b32.xlu2 %v3285_v23, %s3137_s9  ;;  %1014 = vrot.lane.b32.xlu1 %v3288_v24, %s3137_s9 }
 0x1b5   : > { %1012 = vrot.lane.b32.xlu0 %v3298_v26, %s3137_s9  ;;  %v4113_v15 = vpop.permute.xlu2 %917  ;;  %v4115_v16 = vpop.permute.xlu1 %862 }
 0x1b6   : > { %6222 = vst [vmem:[#allocation139_spill] sm:$0xff] %v4115_v16 }
 0x1b7   : > { %v4117_v18 = vpop.permute.xlu0 %860 }
 0x1b8   : > { %6223 = vst [vmem:[#allocation140_spill] sm:$0xff] %v4117_v18 }
 0x1bb   : > { %1022 = vrot.lane.b32.xlu2 %v3312_v31, %s3137_s9  ;;  %1020 = vrot.lane.b32.xlu1 %v3315_v32, %s3137_s9 }
 0x1bd   : > { %1018 = vrot.lane.b32.xlu0 %v3325_v34, %s3137_s9  ;;  %v4125_v23 = vpop.permute.xlu2 %923  ;;  %v4127_v24 = vpop.permute.xlu1 %868 }
 0x1be   : > { %6224 = vst [vmem:[#allocation141_spill] sm:$0xff] %v4127_v24 }
 0x1bf   : > { %v4129_v26 = vpop.permute.xlu0 %866 }
 0x1c0   : > { %6225 = vst [vmem:[#allocation142_spill] sm:$0xff] %v4129_v26 }
 0x1c3   : > { %1028 = vrot.lane.b32.xlu2 %v3339_v39, %s3137_s9  ;;  %1026 = vrot.lane.b32.xlu1 %v3342_v40, %s3137_s9 }
 0x1c5   : > { %1024 = vrot.lane.b32.xlu0 %v3353_v42, %s3137_s9  ;;  %v4137_v31 = vpop.permute.xlu2 %929  ;;  %v4139_v32 = vpop.permute.xlu1 %874 }
 0x1c6   : > { %6226 = vst [vmem:[#allocation143_spill] sm:$0xff] %v4139_v32  ;;  %v4210_v32 = vld [vmem:[%s3421_s20 + $0x48] sm:$0xff] }
 0x1c7   : > { %v4141_v34 = vpop.permute.xlu0 %872 }
 0x1c8   : > { %6227 = vst [vmem:[#allocation144_spill] sm:$0xff] %v4141_v34  ;;  %v4207_v34 = vld [vmem:[%s3421_s20 + $0x50] sm:$0xff] }
 0x1cb   : > { %1034 = vrot.lane.b32.xlu2 %v3367_v47, %s3137_s9  ;;  %1032 = vrot.lane.b32.xlu1 %v3370_v48, %s3137_s9 }
 0x1cd   : > { %1030 = vrot.lane.b32.xlu0 %v3380_v50, %s3137_s9  ;;  %v4149_v39 = vpop.permute.xlu2 %935  ;;  %v4151_v40 = vpop.permute.xlu1 %915 }
 0x1ce   : > { %6228 = vst [vmem:[#allocation145_spill] sm:$0xff] %v4149_v39  ;;  %v6280_v39 = vld [vmem:[#allocation44_spill] sm:$0xff] }
 0x1cf   : > { %v4153_v42 = vpop.permute.xlu0 %913 }
 0x1d3   : > { %1040 = vrot.lane.b32.xlu2 %v3396_v55, %s3137_s9  ;;  %1038 = vrot.lane.b32.xlu1 %v3399_v56, %s3137_s9 }
 0x1d5   : > { %1036 = vrot.lane.b32.xlu0 %v3409_v58, %s3137_s9  ;;  %v4161_v47 = vpop.permute.xlu2 %941  ;;  %v4163_v48 = vpop.permute.xlu1 %921 }
 0x1d7   : > { %v4165_v50 = vpop.permute.xlu0 %919 }
 0x1db   : > { %1046 = vrot.lane.b32.xlu2 %v3428_v63, %s3137_s9  ;;  %1044 = vrot.lane.b32.xlu1 %v3431_v4, %s3137_s9 }
 0x1dd   : > { %1042 = vrot.lane.b32.xlu0 %v3441_v9, %s3137_s9  ;;  %v4173_v55 = vpop.permute.xlu2 %947  ;;  %v4175_v56 = vpop.permute.xlu1 %927 }
 0x1df   : > { %v4177_v58 = vpop.permute.xlu0 %925 }
 0x1e3   : > { %1052 = vrot.lane.b32.xlu2 %v3455_v20, %s3137_s9  ;;  %1050 = vrot.lane.b32.xlu1 %v3458_v21, %s3137_s9 }
 0x1e5   : > { %1048 = vrot.lane.b32.xlu0 %v3468_v29, %s3137_s9  ;;  %v4185_v63 = vpop.permute.xlu2 %953  ;;  %v4187_v4 = vpop.permute.xlu1 %933 }
 0x1e6   : > { %6229 = vst [vmem:[#allocation146_spill] sm:$0xff] %v4185_v63  ;;  %v3062_v63 = vld [vmem:[%s3220_s12] sm:$0xff] }
 0x1e7   : > { %6230 = vst [vmem:[#allocation147_spill] sm:$0xff] %v4187_v4  ;;  %v4189_v9 = vpop.permute.xlu0 %931  ;;  %v6297_v4 = vld [vmem:[#allocation63_spill] sm:$0xff] }
 0x1e8   : > { %6231 = vst [vmem:[#allocation148_spill] sm:$0xff] %v4189_v9 }
 0x1eb   : > { %1058 = vrot.lane.b32.xlu2 %v3811_v8, %s3137_s9  ;;  %1056 = vrot.lane.b32.xlu1 %v3814_v7, %s3137_s9 }
 0x1ed   : > { %1054 = vrot.lane.b32.xlu0 %v3817_v53, %s3137_s9  ;;  %v4197_v20 = vpop.permute.xlu2 %959  ;;  %v4199_v21 = vpop.permute.xlu1 %939 }
 0x1ee   : > { %6232 = vst [vmem:[#allocation149_spill] sm:$0xff] %v4197_v20 }
 0x1ef   : > { %v4201_v29 = vpop.permute.xlu0 %937 }
 0x1f0   : > { %6233 = vst [vmem:[#allocation150_spill] sm:$0xff] %v4201_v29  ;;  %v6258_v29 = vld [vmem:[#allocation11_spill] sm:$0xff] }
 0x1f3   : > { %1064 = vrot.lane.b32.xlu2 %v4204_v2, %s3137_s9  ;;  %1062 = vrot.lane.b32.xlu1 %v4207_v34, %s3137_s9 }
 0x1f5   : > { %1060 = vrot.lane.b32.xlu0 %v4210_v32, %s3137_s9  ;;  %v4218_v53 = vpop.permute.xlu2 %965  ;;  %v4220_v7 = vpop.permute.xlu1 %945 }
 0x1f6   : > { %6234 = vst [vmem:[#allocation151_spill] sm:$0xff] %v4218_v53 }
 0x1f7   : > { %v4222_v8 = vpop.permute.xlu0 %943 }
 0x1fb   : > { %1105 = vrot.lane.b32.xlu2 %v3275_v19, %s6050_s10  ;;  %1103 = vrot.lane.b32.xlu1 %v3282_v22, %s6050_s10 }
 0x1fd   : > { %1101 = vrot.lane.b32.xlu0 %v3291_v25, %s6050_s10  ;;  %v4230_v60 = vpop.permute.xlu2 %971  ;;  %v4232_v26 = vpop.permute.xlu1 %951 }
 0x1fe   : > { %6235 = vst [vmem:[#allocation152_spill] sm:$0xff] %v4230_v60  ;;  %v1097_v60 = vrot.slane %v4207_v34, 1 }
 0x1ff   : > { %v4234_v24 = vpop.permute.xlu0 %949 }
 0x203   : > { %1111 = vrot.lane.b32.xlu2 %v3301_v27, %s6050_s10  ;;  %1109 = vrot.lane.b32.xlu1 %v3309_v30, %s6050_s10 }
 0x205   : > { %1107 = vrot.lane.b32.xlu0 %v3318_v33, %s6050_s10  ;;  %v4242_v19 = vpop.permute.xlu2 %1010  ;;  %v4244_v22 = vpop.permute.xlu1 %957 }
 0x206   : > { %6236 = vst [vmem:[#allocation153_spill] sm:$0xff] %v4244_v22  ;;  %v6271_v22 = vld [vmem:[#allocation21_spill] sm:$0xff] }
 0x207   : > { %v4246_v25 = vpop.permute.xlu0 %955 }
 0x208   : > { %6237 = vst [vmem:[#allocation154_spill] sm:$0xff] %v4246_v25  ;;  %v6262_v25 = vld [vmem:[#allocation26_spill] sm:$0xff] }
 0x20b   : > { %1117 = vrot.lane.b32.xlu2 %v3328_v35, %s6050_s10  ;;  %1115 = vrot.lane.b32.xlu1 %v3336_v38, %s6050_s10 }
 0x20d   : > { %1113 = vrot.lane.b32.xlu0 %v3346_v41, %s6050_s10  ;;  %v4254_v27 = vpop.permute.xlu2 %1016  ;;  %v4256_v30 = vpop.permute.xlu1 %963 }
 0x20e   : > { %6238 = vst [vmem:[#allocation155_spill] sm:$0xff] %v4256_v30  ;;  %v6250_v30 = vld [vmem:[#allocation7_spill] sm:$0xff] }
 0x20f   : > { %v4258_v33 = vpop.permute.xlu0 %961 }
 0x210   : > { %6239 = vst [vmem:[#allocation156_spill] sm:$0xff] %v4258_v33 }
 0x213   : > { %1123 = vrot.lane.b32.xlu2 %v3356_v43, %s6050_s10  ;;  %1121 = vrot.lane.b32.xlu1 %v3364_v46, %s6050_s10 }
 0x215   : > { %1119 = vrot.lane.b32.xlu0 %v3373_v49, %s6050_s10  ;;  %v4266_v35 = vpop.permute.xlu2 %1022  ;;  %v4268_v38 = vpop.permute.xlu1 %969  ;;  %v1099_v49 = vrot.slane %v4204_v2, 1 }
 0x216   : > { %6240 = vst [vmem:[#allocation157_spill] sm:$0xff] %v4268_v38  ;;  %v1096_v38 = vrot.slane %v4210_v32, 1 }
 0x217   : > { %v4270_v41 = vpop.permute.xlu0 %967 }
 0x218   : > { %6241 = vst [vmem:[#allocation158_spill] sm:$0xff] %v4270_v41 }
 0x21b   : > { %1129 = vrot.lane.b32.xlu2 %v3383_v51, %s6050_s10  ;;  %1127 = vrot.lane.b32.xlu1 %v3391_v54, %s6050_s10  ;;  %v1100_v51 = vsel %vm438_vm0, %v1097_v60, %v1099_v49  ;;  %v1098_v54 = vsel %vm438_vm0, %v1096_v38, %v1097_v60  ;;  %v6246_v60 = vld [vmem:[#allocation106_spill] sm:$0xff] }
 0x21d   : > { %1125 = vrot.lane.b32.xlu0 %v3402_v57, %s6050_s10  ;;  %v4278_v43 = vpop.permute.xlu2 %1028  ;;  %v4280_v46 = vpop.permute.xlu1 %1008 }
 0x21e   : > { %6242 = vst [vmem:[#allocation159_spill] sm:$0xff] %v4278_v43  ;;  %v1192_v43 = vrot.slane %v4207_v34, 2 }
 0x21f   : > { %v4285_v41 = vpop.permute.xlu0 %1006 }
 0x223   : > { %1135 = vrot.lane.b32.xlu2 %v3412_v59, %s6050_s10  ;;  %1133 = vrot.lane.b32.xlu1 %v3425_v62, %s6050_s10 }
 0x225   : > { %1131 = vrot.lane.b32.xlu0 %v3434_v6, %s6050_s10  ;;  %v4295_v57 = vpop.permute.xlu2 %1034  ;;  %v4297_v53 = vpop.permute.xlu1 %1014 }
 0x227   : > { %v4299_v33 = vpop.permute.xlu0 %1012 }
 0x22b   : > { %1141 = vrot.lane.b32.xlu2 %v3444_v10, %s6050_s10  ;;  %1139 = vrot.lane.b32.xlu1 %v3452_v17, %s6050_s10 }
 0x22d   : > { %1137 = vrot.lane.b32.xlu0 %v3461_v28, %s6050_s10  ;;  %v4307_v59 = vpop.permute.xlu2 %1040  ;;  %v4309_v62 = vpop.permute.xlu1 %1020 }
 0x22f   : > { %v4311_v6 = vpop.permute.xlu0 %1018 }
 0x233   : > { %1147 = vrot.lane.b32.xlu2 %v3471_v36, %s6050_s10  ;;  %1145 = vrot.lane.b32.xlu1 %v3479_v45, %s6050_s10  ;;  %v6247_v36 = vld [vmem:[#allocation107_spill] sm:$0xff] }
 0x235   : > { %1143 = vrot.lane.b32.xlu0 %v3482_v52, %s6050_s10  ;;  %v4319_v10 = vpop.permute.xlu2 %1046  ;;  %v4321_v17 = vpop.permute.xlu1 %1026 }
 0x236   : > { %6243 = vst [vmem:[#allocation160_spill] sm:$0xff] %v4319_v10 }
 0x237   : > { %6244 = vst [vmem:[#allocation161_spill] sm:$0xff] %v4321_v17  ;;  %v4323_v28 = vpop.permute.xlu0 %1024  ;;  %v6295_v17 = vld [vmem:[#allocation19_spill] sm:$0xff] }
 0x238   : > { %6245 = vst [vmem:[#allocation162_spill] sm:$0xff] %v4323_v28 }
 0x23b   : > { %1153 = vrot.lane.b32.xlu2 %v3932_v61, %s6050_s10  ;;  %1151 = vrot.lane.b32.xlu1 %v6246_v60, %s6050_s10 }
 0x23d   : > { %1149 = vrot.lane.b32.xlu0 %v6247_v36, %s6050_s10  ;;  %v4331_v38 = vpop.permute.xlu2 %1052  ;;  %v4333_v45 = vpop.permute.xlu1 %1032  ;;  %v6252_v36 = vld [vmem:[#allocation4_spill] sm:$0xff] }
 0x23e   : > { %6248 = vst [vmem:[#allocation106_spill] sm:$0xff] %v4331_v38  ;;  %v6253_v38 = vld [vmem:[#allocation6_spill] sm:$0xff] }
 0x23f   : > { %v4335_v52 = vpop.permute.xlu0 %1030 }
 0x240   : > { %6249 = vst [vmem:[#allocation107_spill] sm:$0xff] %v4335_v52 }
 0x243   : > { %1196 = vrot.lane.b32.xlu2 %v6250_v30, %s6048_s11  ;;  %1157 = vrot.lane.b32.xlu1 %v1100_v51, %s6050_s10 }
 0x245   : > { %1155 = vrot.lane.b32.xlu0 %v1098_v54, %s6050_s10  ;;  %v4341_v61 = vpop.permute.xlu2 %1058  ;;  %v4343_v60 = vpop.permute.xlu1 %1038  ;;  %v6256_v54 = vld [vmem:[#allocation8_spill] sm:$0xff] }
 0x246   : > { %6251 = vst [vmem:[#allocation163_spill] sm:$0xff] %v4341_v61  ;;  %v6257_v61 = vld [vmem:[#allocation10_spill] sm:$0xff] }
 0x247   : > { %v4345_v20 = vpop.permute.xlu0 %1036 }
 0x24b   : > { %1200 = vrot.lane.b32.xlu2 %v6252_v36, %s6048_s11  ;;  %1159 = vrot.lane.b32.xlu1 %v1099_v49, %s6050_s10 }
 0x24d   : > { %1198 = vrot.lane.b32.xlu0 %v6253_v38, %s6048_s11  ;;  %v4352_v52 = vpop.permute.xlu2 %1064  ;;  %v4354_v30 = vpop.permute.xlu1 %1044 }
 0x24e   : > { %6254 = vst [vmem:[#allocation4_spill] sm:$0xff] %v4352_v52  ;;  %v6261_v52 = vld [vmem:[#allocation22_spill] sm:$0xff] }
 0x24f   : > { %v4356_v51 = vpop.permute.xlu0 %1042 }
 0x250   : > { %6255 = vst [vmem:[#allocation164_spill] sm:$0xff] %v4356_v51  ;;  %v6299_v51 = vld [vmem:[#allocation93_spill] sm:$0xff] }
 0x253   : > { %1206 = vrot.lane.b32.xlu2 %v6256_v54, %s6048_s11  ;;  %1204 = vrot.lane.b32.xlu1 %v6257_v61, %s6048_s11  ;;  %v6263_v54 = vld [vmem:[#allocation15_spill] sm:$0xff] }
 0x255   : > { %1202 = vrot.lane.b32.xlu0 %v6258_v29, %s6048_s11  ;;  %v4364_v36 = vpop.permute.xlu2 %1105  ;;  %v4366_v49 = vpop.permute.xlu1 %1050 }
 0x256   : > { %6259 = vst [vmem:[#allocation8_spill] sm:$0xff] %v4366_v49 }
 0x257   : > { %v4368_v38 = vpop.permute.xlu0 %1048 }
 0x258   : > { %6260 = vst [vmem:[#allocation165_spill] sm:$0xff] %v4368_v38  ;;  %v6266_v38 = vld [vmem:[#allocation33_spill] sm:$0xff] }
 0x25b   : > { %1224 = vrot.lane.b32.xlu2 %v6261_v52, %s6048_s11  ;;  %1222 = vrot.lane.b32.xlu1 %v6262_v25, %s6048_s11  ;;  %v6267_v52 = vld [vmem:[#allocation14_spill] sm:$0xff] }
 0x25d   : > { %1208 = vrot.lane.b32.xlu0 %v6263_v54, %s6048_s11  ;;  %v4376_v18 = vpop.permute.xlu2 %1111  ;;  %v4378_v61 = vpop.permute.xlu1 %1056 }
 0x25e   : > { %6264 = vst [vmem:[#allocation22_spill] sm:$0xff] %v4378_v61 }
 0x25f   : > { %v4380_v29 = vpop.permute.xlu0 %1054 }
 0x260   : > { %6265 = vst [vmem:[#allocation166_spill] sm:$0xff] %v4380_v29  ;;  %v6272_v29 = vld [vmem:[#allocation28_spill] sm:$0xff] }
 0x263   : > { %1228 = vrot.lane.b32.xlu2 %v6205_v12, %s6048_s11  ;;  %1226 = vrot.lane.b32.xlu1 %v6266_v38, %s6048_s11  ;;  %v6273_v12 = vld [vmem:[#allocation12_spill] sm:$0xff] }
 0x265   : > { %1210 = vrot.lane.b32.xlu0 %v6267_v52, %s6048_s11  ;;  %v4388_v49 = vpop.permute.xlu2 %1117  ;;  %v4390_v25 = vpop.permute.xlu1 %1062  ;;  %v1194_v52 = vrot.slane %v4204_v2, 2 }
 0x266   : > { %6268 = vst [vmem:[#allocation167_spill] sm:$0xff] %v4388_v49  ;;  %v6321_v49 = vld [vmem:[#allocation104_spill] sm:$0xff] }
 0x267   : > { %6269 = vst [vmem:[#allocation168_spill] sm:$0xff] %v4390_v25  ;;  %v4392_v54 = vpop.permute.xlu0 %1060  ;;  %v1191_v25 = vrot.slane %v4210_v32, 2 }
 0x268   : > { %6270 = vst [vmem:[#allocation169_spill] sm:$0xff] %v4392_v54 }
 0x26b   : > { %1214 = vrot.lane.b32.xlu2 %v6271_v22, %s6048_s11  ;;  %1230 = vrot.lane.b32.xlu1 %v6272_v29, %s6048_s11  ;;  %v1193_v29 = vsel %vm579_vm1, %v1191_v25, %v1192_v43  ;;  %v6275_v22 = vld [vmem:[#allocation20_spill] sm:$0xff] }
 0x26d   : > { %1212 = vrot.lane.b32.xlu0 %v6273_v12, %s6048_s11  ;;  %v4400_v61 = vpop.permute.xlu2 %1123  ;;  %v4402_v38 = vpop.permute.xlu1 %1103  ;;  %v1195_v12 = vsel %vm579_vm1, %v1192_v43, %v1194_v52 }
 0x26e   : > { %6274 = vst [vmem:[#allocation28_spill] sm:$0xff] %v4400_v61  ;;  %v6276_v61 = vld [vmem:[#allocation27_spill] sm:$0xff] }
 0x26f   : > { %v4407_v54 = vpop.permute.xlu0 %1101 }
 0x273   : > { %1234 = vrot.lane.b32.xlu2 %v6211_v13, %s6048_s11  ;;  %1232 = vrot.lane.b32.xlu1 %v3664_v11, %s6048_s11  ;;  %v6277_v13 = vld [vmem:[#allocation34_spill] sm:$0xff]  ;;  %v6278_v11 = vld [vmem:[#allocation16_spill] sm:$0xff] }
 0x275   : > { %1216 = vrot.lane.b32.xlu0 %v6275_v22, %s6048_s11  ;;  %v4417_v2 = vpop.permute.xlu2 %1129  ;;  %v4419_v34 = vpop.permute.xlu1 %1109  ;;  %v6279_v22 = vld [vmem:[#allocation40_spill] sm:$0xff] }
 0x277   : > { %v4421_v32 = vpop.permute.xlu0 %1107 }
 0x27b   : > { %1220 = vrot.lane.b32.xlu2 %v6276_v61, %s6048_s11  ;;  %1236 = vrot.lane.b32.xlu1 %v6277_v13, %s6048_s11 }
 0x27d   : > { %1218 = vrot.lane.b32.xlu0 %v6278_v11, %s6048_s11  ;;  %v4429_v16 = vpop.permute.xlu2 %1135  ;;  %v4431_v25 = vpop.permute.xlu1 %1115 }
 0x27f   : > { %v4433_v43 = vpop.permute.xlu0 %1113 }
 0x283   : > { %1242 = vrot.lane.b32.xlu2 %v6279_v22, %s6048_s11  ;;  %1240 = vrot.lane.b32.xlu1 %v6280_v39, %s6048_s11  ;;  %v6284_v22 = vld [vmem:[#allocation136_spill] sm:$0xff] }
 0x285   : > { %1238 = vrot.lane.b32.xlu0 %v6215_v3, %s6048_s11  ;;  %v4441_v61 = vpop.permute.xlu1 %1121  ;;  %v4443_v13 = vpop.permute.xlu2 %1141  ;;  %v1622_v3 = vld [vmem:[%s5989_s2 + $0x40] sm:$0xff] }
 0x286   : > { %6281 = vst [vmem:[#allocation12_spill] sm:$0xff] %v4441_v61  ;;  %1675 = vmatpush.msra.mxu0 %v1622_v3  ;;  %2991 = vmatpush.msra.mxu2 %v1622_v3  ;;  %v1619_v3 = vld [vmem:[%s5989_s2 + $0x28] sm:$0xff] }
 0x287   : > { %6282 = vst [vmem:[#allocation34_spill] sm:$0xff] %v4443_v13  ;;  %v4445_v11 = vpop.permute.xlu0 %1119 }
 0x288   : > { %6283 = vst [vmem:[#allocation16_spill] sm:$0xff] %v4445_v11 }
 0x28b   : > { %1248 = vrot.lane.b32.xlu2 %v4065_v0, %s6048_s11  ;;  %1246 = vrot.lane.b32.xlu1 %v4078_v1, %s6048_s11  ;;  %v1621_v0 = vld [vmem:[%s5989_s2 + $0x38] sm:$0xff] }
 0x28c   : > { %1676 = vmatpush.msra.mxu0 %v1621_v0  ;;  %2992 = vmatpush.msra.mxu2 %v1621_v0 }
 0x28d   : > { %1244 = vrot.lane.b32.xlu0 %v6284_v22, %s6048_s11  ;;  %v4453_v28 = vpop.permute.xlu1 %1127  ;;  %v4460_v13 = vpop.permute.xlu2 %1147  ;;  %v1620_v22 = vld [vmem:[%s5989_s2 + $0x30] sm:$0xff] }
 0x28e   : > { %6286 = vst [vmem:[#allocation136_spill] sm:$0xff] %v4460_v13  ;;  %1677 = vmatpush.msra.mxu0 %v1620_v22  ;;  %2993 = vmatpush.msra.mxu2 %v1620_v22  ;;  %v1616_v22 = vld [vmem:[%s5989_s2 + $0x10] sm:$0xff] }
 0x28f   : > { %v4455_v39 = vpop.permute.xlu0 %1125 }
 0x290   : > { %6285 = vst [vmem:[#allocation40_spill] sm:$0xff] %v4455_v39  ;;  %1678 = vmatpush.msra.mxu0 %v1619_v3  ;;  %2994 = vmatpush.msra.mxu2 %v1619_v3  ;;  %v1615_v3 = vld [vmem:[%s5989_s2 + $0x8] sm:$0xff] }
 0x293   : > { %1254 = vrot.lane.b32.xlu2 %v1194_v52, %s6048_s11  ;;  %1252 = vrot.lane.b32.xlu1 %v1195_v12, %s6048_s11  ;;  %v1618_v52 = vld [vmem:[%s5989_s2 + $0x20] sm:$0xff]  ;;  %v1617_v12 = vld [vmem:[%s5989_s2 + $0x18] sm:$0xff] }
 0x294   : > { %1679 = vmatpush.msra.mxu0 %v1618_v52  ;;  %2995 = vmatpush.msra.mxu2 %v1618_v52  ;;  %v1614_v52 = vld [vmem:[%s5989_s2] sm:$0xff] }
 0x295   : > { %1250 = vrot.lane.b32.xlu0 %v1193_v29, %s6048_s11  ;;  %v4468_v1 = vpop.permute.xlu1 %1133  ;;  %v4484_v29 = vpop.permute.xlu2 %1153 }
 0x296   : > { %6287 = vst [vmem:[#allocation170_spill] sm:$0xff] %v4484_v29  ;;  %1680 = vmatpush.msra.mxu0 %v1617_v12  ;;  %2996 = vmatpush.msra.mxu2 %v1617_v12 }
 0x297   : > { %v4473_v13 = vpop.permute.xlu0 %1131 }
 0x298   : > { %1681 = vmatpush.msra.mxu0 %v1616_v22  ;;  %2997 = vmatpush.msra.mxu2 %v1616_v22 }
 0x29a   : > { %1682 = vmatpush.msra.mxu0 %v1615_v3  ;;  %2998 = vmatpush.msra.mxu2 %v1615_v3  ;;  %v1287_v3 = vsel %vm1286_vm2, %v3062_v63, %v6295_v17  ;;  %v6301_v17 = vld [vmem:[#allocation123_spill] sm:$0xff] }
 0x29c   : > { %1683 = vmatpush.msra.mxu0 %v1614_v52  ;;  %2999 = vmatpush.msra.mxu2 %v1614_v52 }
 0x29d   : > { %v4486_v0 = vpop.permute.xlu1 %1139  ;;  %v1197_v12 = vpop.permute.xlu2 %1196 }
 0x29e   : > { %6288 = vst [vmem:[#allocation171_spill] sm:$0xff] %v4486_v0  ;;  %v6300_v0 = vld [vmem:[#allocation62_spill] sm:$0xff] }
 0x29f   : > { %v4491_v39 = vpop.permute.xlu0 %1137 }
 0x2a0   : > { %6289 = vst [vmem:[#allocation172_spill] sm:$0xff] %v4491_v39 }
 0x2a5   : > { %v4499_v29 = vpop.permute.xlu1 %1145  ;;  %v4505_v22 = vpop.permute.xlu2 %1200 }
 0x2a6   : > { %6290 = vst [vmem:[#allocation173_spill] sm:$0xff] %v4499_v29  ;;  %v1318_v29 = vsel %vm1317_vm3, %v1287_v3, %v6297_v4  ;;  %v6302_v4 = vld [vmem:[#allocation92_spill] sm:$0xff] }
 0x2a7   : > { %v4501_v11 = vpop.permute.xlu0 %1143 }
 0x2a8   : > { %6291 = vst [vmem:[#allocation174_spill] sm:$0xff] %v4501_v11  ;;  %v3063_v11 = vld [vmem:[%s3220_s12 + $0x8] sm:$0xff] }
 0x2ad   : > { %v4503_v10 = vpop.permute.xlu1 %1151 }
 0x2ae   : > { %6292 = vst [vmem:[#allocation175_spill] sm:$0xff] %v4503_v10  ;;  %v6298_v10 = vld [vmem:[#allocation25_spill] sm:$0xff] }
 0x2af   : > { %v4507_v61 = vpop.permute.xlu0 %1149  ;;  %v1288_v39 = vsel %vm1286_vm2, %v3063_v11, %v6298_v10 }
 0x2b0   : > { %6293 = vst [vmem:[#allocation176_spill] sm:$0xff] %v4507_v61  ;;  %v1349_v61 = vsel %vm1348_vm4, %v1318_v29, %v6299_v51  ;;  %v1319_v63 = vsel %vm1317_vm3, %v1288_v39, %v6300_v0  ;;  %v6303_v51 = vld [vmem:[#allocation122_spill] sm:$0xff] }
 0x2b1   : > { %v1350_v3 = vsel %vm1348_vm4, %v1319_v63, %v6302_v4  ;;  %v3064_v63 = vld [vmem:[%s3220_s12 + $0x10] sm:$0xf] }
 0x2b2   : > { %v1381_v11 = vsel %vm1379_vm5, %v1350_v3, %v6303_v51  ;;  %v6306_v3 = vld [vmem:[#allocation52_spill] sm:$0xff]  ;;  %v6307_v51 = vld [vmem:[#allocation82_spill] sm:$0xff] }
 0x2b3   : > { %v1412_v39 = vsel %vm1410_vm6, %v1381_v11, %v4151_v40 }
 0x2b5   : > { %v4509_v9 = vpop.permute.xlu1 %1157 }
 0x2b6   : > { %6294 = vst [vmem:[#allocation177_spill] sm:$0xff] %v4509_v9  ;;  %v4523_v9 = vpop.permute.xlu2 %1206 }
 0x2b7   : > { %v4514_v52 = vpop.permute.xlu0 %1155 }
 0x2b8   : > { %6296 = vst [vmem:[#allocation19_spill] sm:$0xff] %v4514_v52  ;;  %v1380_v52 = vsel %vm1379_vm5, %v1349_v61, %v6301_v17  ;;  %v6305_v17 = vld [vmem:[#allocation18_spill] sm:$0xff] }
 0x2b9   : > { %v1411_v10 = vsel %vm1410_vm6, %v1380_v52, %v4153_v42  ;;  %v1443_v42 = vsel %vm1441_vm7, %v1412_v39, %v4280_v46 }
 0x2ba   : > { %v1442_v29 = vsel %vm1441_vm7, %v1411_v10, %v4285_v41  ;;  %v1289_v41 = vsel %vm1286_vm2, %v3064_v63, %v6305_v17  ;;  %v1474_v4 = vsel %vm6054_vm9, %v1443_v42, %v4402_v38  ;;  %v3065_v63 = vld [vmem:[%s3220_s12 + $0x20] sm:$0xff]  ;;  %v6309_v17 = vld [vmem:[#allocation9_spill] sm:$0xff] }
 0x2bb   : > { %v1473_v61 = vsel %vm6054_vm9, %v1442_v29, %v4407_v54  ;;  %v1320_v54 = vsel %vm1317_vm3, %v1289_v41, %v6306_v3  ;;  %v6308_v29 = vld [vmem:[#allocation112_spill] sm:$0xff]  ;;  %v1291_v41 = vsel %vm1286_vm2, %v3065_v63, %v6309_v17  ;;  %v3067_v3 = vld [vmem:[%s3220_s12 + $0x18] sm:$0xff] }
 0x2bc   : > { %v1504_v52 = vsel %vm6053_vm8, %v1473_v61, %v1197_v12  ;;  %v1351_v46 = vsel %vm1348_vm4, %v1320_v54, %v6307_v51  ;;  %v6311_v54 = vld [vmem:[#allocation24_spill] sm:$0xff] }
 0x2bd   : > { %v4541_v0 = vpop.permute.xlu1 %1159  ;;  %v1564_v12 = vrot.slane %v1504_v52, 1  ;;  %v1382_v39 = vsel %vm1379_vm5, %v1351_v46, %v6308_v29  ;;  %v6312_v46 = vld [vmem:[#allocation42_spill] sm:$0xff]  ;;  %v6314_v17 = vld [vmem:[#allocation64_spill] sm:$0xff] }
 0x2be   : > { %6304 = vst [vmem:[#allocation63_spill] sm:$0xff] %v4541_v0  ;;  %v1413_v38 = vsel %vm1410_vm6, %v1382_v39, %v4113_v15  ;;  %v1225_v61 = vpop.permute.xlu2 %1224  ;;  %v3068_v15 = vld [vmem:[%s3220_s12 + $0x68] sm:$0xff]  ;;  %v3069_v29 = vld [vmem:[%s3220_s12 + $0x80] sm:$0xff] }
 0x2bf   : > { %v1199_v40 = vpop.permute.xlu0 %1198  ;;  %v1444_v51 = vsel %vm1441_vm7, %v1413_v38, %v4242_v19  ;;  %v6313_v39 = vld [vmem:[#allocation47_spill] sm:$0xff]  ;;  %v6316_v38 = vld [vmem:[#allocation66_spill] sm:$0xff] }
 0x2c0   : > { %v1505_v10 = vsel %vm6053_vm8, %v1474_v4, %v1199_v40  ;;  %v3066_v4 = vld [vmem:[%s3220_s12 + $0x70] sm:$0xf]  ;;  %v6310_v40 = vld [vmem:[#allocation23_spill] sm:$0xff]  ;;  %v1303_v63 = vsel %vm1286_vm2, %v3069_v29, %v6313_v39  ;;  %v6317_v0 = vld [vmem:[#allocation74_spill] sm:$0xff] }
 0x2c1   : > { %v1565_v11 = vrot.slane %v1505_v10, 1  ;;  %v1301_v52 = vsel %vm1286_vm2, %v3066_v4, %v6310_v40  ;;  %v1290_v10 = vsel %vm1286_vm2, %v3067_v3, %v6311_v54  ;;  %v1475_v40 = vsel %vm6054_vm9, %v1444_v51, %v4364_v36  ;;  %v6315_v54 = vld [vmem:[#allocation65_spill] sm:$0xff]  ;;  %v6318_v29 = vld [vmem:[#allocation94_spill] sm:$0xff]  ;;  %v6320_v36 = vld [vmem:[#allocation96_spill] sm:$0xff] }
 0x2c2   : > { %v1332_v4 = vsel %vm1317_vm3, %v1301_v52, %v6314_v17  ;;  %v1322_v19 = vsel %vm1317_vm3, %v1291_v41, %v6315_v54  ;;  %v6319_v52 = vld [vmem:[#allocation95_spill] sm:$0xff] }
 0x2c3   : > { %v1566_v42 = vsel %vm438_vm0, %v1564_v12, %v1565_v11  ;;  %v1300_v12 = vsel %vm1286_vm2, %v3068_v15, %v6312_v46  ;;  %v1506_v46 = vsel %vm6053_vm8, %v1475_v40, %v4505_v22  ;;  %v1363_v39 = vsel %vm1348_vm4, %v1332_v4, %v6318_v29  ;;  %v6324_v22 = vld [vmem:[#allocation126_spill] sm:$0xff] }
 0x2c4   : > { %2942 = vmatmul.msk.f32.vlgmr.msra.gmra.mxu0 %vm6052_vm10, %v1566_v42  ;;  %v1321_v42 = vsel %vm1317_vm3, %v1290_v10, %v6316_v38  ;;  %v1331_v15 = vsel %vm1317_vm3, %v1300_v12, %v6317_v0  ;;  %v1353_v17 = vsel %vm1348_vm4, %v1322_v19, %v6319_v52  ;;  %v6322_v10 = vld [vmem:[#allocation124_spill] sm:$0xff]  ;;  %v6323_v0 = vld [vmem:[#allocation125_spill] sm:$0xff]  ;;  %v6325_v4 = vld [vmem:[#allocation134_spill] sm:$0xff] }
 0x2c5   : > { %v1205_v3 = vpop.permute.xlu1 %1204  ;;  %v1352_v51 = vsel %vm1348_vm4, %v1321_v42, %v6320_v36  ;;  %v1362_v41 = vsel %vm1348_vm4, %v1331_v15, %v6321_v49  ;;  %v1394_v38 = vsel %vm1379_vm5, %v1363_v39, %v6322_v10  ;;  %v1384_v12 = vsel %vm1379_vm5, %v1353_v17, %v6323_v0  ;;  %v6327_v10 = vld [vmem:[#allocation5_spill] sm:$0xff] }
 0x2c6   : > { %v1383_v40 = vsel %vm1379_vm5, %v1352_v51, %v6324_v22  ;;  %v1393_v29 = vsel %vm1379_vm5, %v1362_v41, %v6325_v4  ;;  %v1425_v19 = vsel %vm1410_vm6, %v1394_v38, %v4161_v47  ;;  %v1415_v42 = vsel %vm1410_vm6, %v1384_v12, %v4163_v48  ;;  %v1229_v51 = vpop.permute.xlu2 %1228  ;;  %v3070_v41 = vld [vmem:[%s3220_s12 + $0x28] sm:$0xf]  ;;  %v6328_v38 = vld [vmem:[#allocation48_spill] sm:$0xff]  ;;  %v6329_v0 = vld [vmem:[#allocation109_spill] sm:$0xff] }
 0x2c7   : > { %v1203_v54 = vpop.permute.xlu0 %1202  ;;  %v1414_v49 = vsel %vm1410_vm6, %v1383_v40, %v4165_v50  ;;  %v1567_v15 = vrot.slane %v1506_v46, 1  ;;  %v1424_v39 = vsel %vm1410_vm6, %v1393_v29, %v4199_v21  ;;  %v1456_v52 = vsel %vm1441_vm7, %v1425_v19, %v4295_v57  ;;  %v6330_v29 = vld [vmem:[#allocation55_spill] sm:$0xff] }
 0x2c8   : > { %v1446_v17 = vsel %vm1441_vm7, %v1415_v42, %v4297_v53  ;;  %v1445_v47 = vsel %vm1441_vm7, %v1414_v49, %v4299_v33  ;;  %v1487_v48 = vsel %vm6054_vm9, %v1456_v52, %v4417_v2  ;;  %v1455_v57 = vsel %vm1441_vm7, %v1424_v39, %v4333_v45  ;;  %v6326_v2 = vld [vmem:[#allocation77_spill] sm:$0xff]  ;;  %v6331_v42 = vld [vmem:[#allocation78_spill] sm:$0xff] }
 0x2c9   : > { %v1477_v50 = vsel %vm6054_vm9, %v1446_v17, %v4419_v34  ;;  %v1476_v21 = vsel %vm6054_vm9, %v1445_v47, %v4421_v32  ;;  %v1568_v46 = vsel %vm438_vm0, %v1565_v11, %v1567_v15  ;;  %v1518_v53 = vsel %vm6053_vm8, %v1487_v48, %v1225_v61  ;;  %v3071_v61 = vld [vmem:[%s3220_s12 + $0x78] sm:$0xff]  ;;  %v6333_v17 = vld [vmem:[#allocation110_spill] sm:$0xff] }
 0x2ca   : > { %v4632_v36 = vsel %vm6053_vm8, %v1477_v50, %v1205_v3  ;;  %v1507_v33 = vsel %vm6053_vm8, %v1476_v21, %v1203_v54  ;;  %v1334_v34 = vsel %vm1317_vm3, %v1303_v63, %v6326_v2  ;;  %v1486_v32 = vsel %vm6054_vm9, %v1455_v57, %v4453_v28  ;;  %v6332_v39 = vld [vmem:[#allocation85_spill] sm:$0xff]  ;;  %v6334_v21 = vld [vmem:[#allocation115_spill] sm:$0xff] }
 0x2cb   : > { %v1292_v45 = vsel %vm1286_vm2, %v3070_v41, %v6327_v10  ;;  %v1302_v3 = vsel %vm1286_vm2, %v3071_v61, %v6328_v38  ;;  %v1365_v54 = vsel %vm1348_vm4, %v1334_v34, %v6329_v0  ;;  %v1587_v63 = vrot.slane %v1518_v53, 1  ;;  %v6335_v34 = vld [vmem:[#allocation29_spill] sm:$0xff]  ;;  %v3074_v10 = vld [vmem:[%s3220_s12 + $0x30] sm:$0xff] }
 0x2cc   : > { %2943 = vmatmul.msk.f32.gmra.mxu0 %vm6052_vm10, %v1568_v46  ;;  %v1570_v22 = vrot.slane %v4632_v36, 1  ;;  %v1569_v28 = vrot.slane %v1507_v33, 1  ;;  %v1323_v19 = vsel %vm1317_vm3, %v1292_v45, %v6330_v29  ;;  %v1333_v49 = vsel %vm1317_vm3, %v1302_v3, %v6331_v42  ;;  %v6338_v61 = vld [vmem:[#allocation68_spill] sm:$0xff] }
 0x2cd   : > { %v1223_v11 = vpop.permute.xlu1 %1222  ;;  %v1396_v15 = vsel %vm1379_vm5, %v1365_v54, %v4091_v37  ;;  %v1354_v52 = vsel %vm1348_vm4, %v1323_v19, %v6332_v39  ;;  %v1364_v47 = vsel %vm1348_vm4, %v1333_v49, %v6333_v17  ;;  %v6339_v54 = vld [vmem:[#allocation67_spill] sm:$0xff]  ;;  %v6341_v49 = vld [vmem:[#allocation69_spill] sm:$0xff] }
 0x2ce   : > { %v4649_v12 = vsel %vm6053_vm8, %v1486_v32, %v1223_v11  ;;  %v1427_v48 = vsel %vm1410_vm6, %v1396_v15, %v4220_v7  ;;  %v1385_v46 = vsel %vm1379_vm5, %v1354_v52, %v6334_v21  ;;  %v1395_v37 = vsel %vm1379_vm5, %v1364_v47, %v4093_v14  ;;  %v3073_v32 = vld [vmem:[%s3220_s12 + $0x38] sm:$0xff]  ;;  %v6336_v11 = vld [vmem:[#allocation30_spill] sm:$0xff]  ;;  %v4715_v29 = vpop.permute.xlu2 %1214  ;;  %v6343_v52 = vld [vmem:[#allocation128_spill] sm:$0xff] }
 0x2cf   : > { %v1585_v40 = vrot.slane %v4649_v12, 1  ;;  %v4653_v4 = vpop.permute.xlu0 %1208  ;;  %v1458_v57 = vsel %vm1441_vm7, %v1427_v48, %v4343_v60  ;;  %v1416_v7 = vsel %vm1410_vm6, %v1385_v46, %v4125_v23  ;;  %v1426_v53 = vsel %vm1410_vm6, %v1395_v37, %v4222_v8  ;;  %v3072_v23 = vld [vmem:[%s3220_s12 + $0x88] sm:$0xf]  ;;  %v6342_v39 = vld [vmem:[#allocation97_spill] sm:$0xff]  ;;  %v3075_v37 = vld [vmem:[%s3220_s12 + $0x40] sm:$0xf] }
 0x2d0   : > { %v1489_v36 = vsel %vm6054_vm9, %v1458_v57, %v4468_v1  ;;  %v1571_v33 = vsel %vm438_vm0, %v1569_v28, %v1570_v22  ;;  %v1447_v14 = vsel %vm1441_vm7, %v1416_v7, %v4254_v27  ;;  %v1457_v60 = vsel %vm1441_vm7, %v1426_v53, %v4345_v20  ;;  %v6344_v47 = vld [vmem:[#allocation99_spill] sm:$0xff]  ;;  %v6345_v57 = vld [vmem:[#allocation13_spill] sm:$0xff] }
 0x2d1   : > { %v1588_v50 = vsel %vm438_vm0, %v1585_v40, %v1587_v63  ;;  %v4689_v2 = vsel %vm6053_vm8, %v1489_v36, %v1229_v51  ;;  %v1304_v8 = vsel %vm1286_vm2, %v3072_v23, %v6335_v34  ;;  %v1294_v1 = vsel %vm1286_vm2, %v3073_v32, %v6336_v11  ;;  %v6337_v51 = vld [vmem:[#allocation31_spill] sm:$0xff]  ;;  %v6340_v63 = vld [vmem:[#allocation98_spill] sm:$0xff] }
 0x2d2   : > { %2951 = vmatmul.msk.f32.vlgmr.msra.gmra.mxu2 %vm6052_vm10, %v1588_v50  ;;  %v1478_v41 = vsel %vm6054_vm9, %v1447_v14, %v4376_v18  ;;  %v1488_v27 = vsel %vm6054_vm9, %v1457_v60, %v4473_v13  ;;  %v1293_v45 = vsel %vm1286_vm2, %v3074_v10, %v6337_v51  ;;  %v1325_v38 = vsel %vm1317_vm3, %v1294_v1, %v6338_v61  ;;  %v6346_v53 = vld [vmem:[#allocation127_spill] sm:$0xff]  ;;  %v6348_v32 = vld [vmem:[#allocation50_spill] sm:$0xff] }
 0x2d3   : > { %v1509_v3 = vsel %vm6053_vm8, %v1478_v41, %v4523_v9  ;;  %v1335_v18 = vsel %vm1317_vm3, %v1304_v8, %v6339_v54  ;;  %v1356_v13 = vsel %vm1348_vm4, %v1325_v38, %v6340_v63  ;;  %v1590_v28 = vrot.slane %v4689_v2, 1  ;;  %v3076_v8 = vld [vmem:[%s3220_s12 + $0x98] sm:$0xff]  ;;  %v6349_v41 = vld [vmem:[#allocation51_spill] sm:$0xff] }
 0x2d4   : > { %2944 = vmatmul.msk.f32.gmra.mxu0 %vm6052_vm10, %v1571_v33  ;;  %v1324_v15 = vsel %vm1317_vm3, %v1293_v45, %v6341_v49  ;;  %v1366_v9 = vsel %vm1348_vm4, %v1335_v18, %v6342_v39  ;;  %v1387_v17 = vsel %vm1379_vm5, %v1356_v13, %v6343_v52  ;;  %v1572_v21 = vrot.slane %v1509_v3, 1  ;;  %v6347_v33 = vld [vmem:[#allocation129_spill] sm:$0xff]  ;;  %v6354_v18 = vld [vmem:[#allocation3_spill] sm:$0xff]  ;;  %v6356_v49 = vld [vmem:[#allocation118_spill] sm:$0xff] }
 0x2d5   : > { %v1227_v20 = vpop.permute.xlu1 %1226  ;;  %v1355_v48 = vsel %vm1348_vm4, %v1324_v15, %v6344_v47  ;;  %v1418_v50 = vsel %vm1410_vm6, %v1387_v17, %v4175_v56  ;;  %v1295_v7 = vsel %vm1286_vm2, %v3075_v37, %v6345_v57  ;;  %v1397_v36 = vsel %vm1379_vm5, %v1366_v9, %v6346_v53  ;;  %v6352_v45 = vld [vmem:[#allocation81_spill] sm:$0xff]  ;;  %v6359_v37 = vld [vmem:[#allocation164_spill] sm:$0xff] }
 0x2d6   : > { %v1519_v0 = vsel %vm6053_vm8, %v1488_v27, %v1227_v20  ;;  %v1386_v14 = vsel %vm1379_vm5, %v1355_v48, %v6347_v33  ;;  %v1449_v60 = vsel %vm1441_vm7, %v1418_v50, %v4309_v62  ;;  %v1428_v56 = vsel %vm1410_vm6, %v1397_v36, %v4173_v55  ;;  %v1235_v52 = vpop.permute.xlu2 %1234  ;;  %v6360_v53 = vld [vmem:[#allocation36_spill] sm:$0xff] }
 0x2d7   : > { %v1589_v19 = vrot.slane %v1519_v0, 1  ;;  %v1211_v42 = vpop.permute.xlu0 %1210  ;;  %v1417_v2 = vsel %vm1410_vm6, %v1386_v14, %v4177_v58  ;;  %v1480_v23 = vsel %vm6054_vm9, %v1449_v60, %v4431_v25  ;;  %v1573_v34 = vsel %vm438_vm0, %v1570_v22, %v1572_v21  ;;  %v3077_v58 = vld [vmem:[%s3220_s12 + $0x90] sm:$0xff]  ;;  %v6350_v22 = vld [vmem:[#allocation58_spill] sm:$0xff] }
 0x2d8   : > { %v1306_v11 = vsel %vm1286_vm2, %v3076_v8, %v6348_v32  ;;  %v1459_v62 = vsel %vm1441_vm7, %v1428_v56, %v4307_v59  ;;  %v1448_v1 = vsel %vm1441_vm7, %v1417_v2, %v4311_v6  ;;  %v4753_v55 = vsel %vm6053_vm8, %v1480_v23, %v1211_v42  ;;  %v6351_v6 = vld [vmem:[#allocation80_spill] sm:$0xff]  ;;  %v3079_v60 = vld [vmem:[%s3220_s12 + $0xa0] sm:$0xf]  ;;  %v6362_v56 = vld [vmem:[#allocation35_spill] sm:$0xff] }
 0x2d9   : > { %v1591_v46 = vsel %vm438_vm0, %v1589_v19, %v1590_v28  ;;  %v1305_v25 = vsel %vm1286_vm2, %v3077_v58, %v6349_v41  ;;  %v1326_v27 = vsel %vm1317_vm3, %v1295_v7, %v6350_v22  ;;  %v1490_v20 = vsel %vm6054_vm9, %v1459_v62, %v4429_v16  ;;  %v6353_v0 = vld [vmem:[#allocation88_spill] sm:$0xff]  ;;  %v6355_v19 = vld [vmem:[#allocation111_spill] sm:$0xff] }
 0x2da   : > { %2952 = vmatmul.msk.f32.gmra.mxu2 %vm6052_vm10, %v1591_v46  ;;  %v1479_v59 = vsel %vm6054_vm9, %v1448_v1, %v4433_v43  ;;  %v1337_v51 = vsel %vm1317_vm3, %v1306_v11, %v6351_v6  ;;  %v1336_v61 = vsel %vm1317_vm3, %v1305_v25, %v6352_v45  ;;  %v1357_v54 = vsel %vm1348_vm4, %v1326_v27, %v6353_v0  ;;  %v3078_v7 = vld [vmem:[%s3220_s12 + $0x50] sm:$0xff]  ;;  %v3080_v23 = vld [vmem:[%s3220_s12 + $0x48] sm:$0xff]  ;;  %v6365_v1 = vld [vmem:[#allocation101_spill] sm:$0xff] }
 0x2db   : > { %v1510_v38 = vsel %vm6053_vm8, %v1479_v59, %v4653_v4  ;;  %v1368_v16 = vsel %vm1348_vm4, %v1337_v51, %v6354_v18  ;;  %v1575_v43 = vrot.slane %v4753_v55, 1  ;;  %v1367_v42 = vsel %vm1348_vm4, %v1336_v61, %v6355_v19  ;;  %v6361_v36 = vld [vmem:[#allocation172_spill] sm:$0xff]  ;;  %v6364_v32 = vld [vmem:[#allocation71_spill] sm:$0xff]  ;;  %v6366_v27 = vld [vmem:[#allocation70_spill] sm:$0xff] }
 0x2dc   : > { %2945 = vmatmul.msk.f32.gmra.mxu0 %vm6052_vm10, %v1573_v34  ;;  %v1388_v15 = vsel %vm1379_vm5, %v1357_v54, %v6356_v49  ;;  %v1399_v4 = vsel %vm1379_vm5, %v1368_v16, %v4103_v5  ;;  %v1574_v17 = vrot.slane %v1510_v38, 1  ;;  %v1398_v48 = vsel %vm1379_vm5, %v1367_v42, %v4105_v44  ;;  %v6363_v34 = vld [vmem:[#allocation37_spill] sm:$0xff]  ;;  %v6367_v59 = vld [vmem:[#allocation72_spill] sm:$0xff]  ;;  %v6368_v6 = vld [vmem:[#allocation131_spill] sm:$0xff] }
 0x2dd   : > { %v1231_v10 = vpop.permute.xlu1 %1230  ;;  %v1419_v39 = vsel %vm1410_vm6, %v1388_v15, %v4137_v31  ;;  %v1430_v9 = vsel %vm1410_vm6, %v1399_v4, %v4232_v26  ;;  %v1429_v26 = vsel %vm1410_vm6, %v1398_v48, %v4234_v24  ;;  %v6357_v31 = vld [vmem:[#allocation167_spill] sm:$0xff]  ;;  %v1297_v24 = vsel %vm1286_vm2, %v3078_v7, %v6360_v53  ;;  %v6369_v45 = vld [vmem:[#allocation100_spill] sm:$0xff]  ;;  %v6370_v38 = vld [vmem:[#allocation102_spill] sm:$0xff] }
 0x2de   : > { %v1521_v3 = vsel %vm6053_vm8, %v1490_v20, %v1231_v10  ;;  %v1450_v50 = vsel %vm1441_vm7, %v1419_v39, %v4266_v35  ;;  %v1461_v5 = vsel %vm1441_vm7, %v1430_v9, %v4354_v30  ;;  %v1576_v44 = vsel %vm438_vm0, %v1574_v17, %v1575_v43  ;;  %v6371_v0 = vld [vmem:[#allocation147_spill] sm:$0xff]  ;;  %v6372_v16 = vld [vmem:[#allocation130_spill] sm:$0xff]  ;;  %v6374_v42 = vld [vmem:[#allocation161_spill] sm:$0xff] }
 0x2df   : > { %v1592_v63 = vrot.slane %v1521_v3, 1  ;;  %v1213_v13 = vpop.permute.xlu0 %1212  ;;  %v1481_v21 = vsel %vm6054_vm9, %v1450_v50, %v6357_v31  ;;  %v1460_v35 = vsel %vm1441_vm7, %v1429_v26, %v6359_v37  ;;  %v1307_v2 = vsel %vm1286_vm2, %v3079_v60, %v6362_v56  ;;  %v6375_v15 = vld [vmem:[#allocation146_spill] sm:$0xff]  ;;  %v6376_v39 = vld [vmem:[#allocation148_spill] sm:$0xff]  ;;  %v6385_v60 = vld [vmem:[#allocation91_spill] sm:$0xff] }
 0x2e0   : > { %v1512_v30 = vsel %vm6053_vm8, %v1481_v21, %v1213_v13  ;;  %v1491_v33 = vsel %vm6054_vm9, %v1460_v35, %v6361_v36  ;;  %v1296_v8 = vsel %vm1286_vm2, %v3080_v23, %v6363_v34  ;;  %v1328_v11 = vsel %vm1317_vm3, %v1297_v24, %v6364_v32  ;;  %v6373_v13 = vld [vmem:[#allocation132_spill] sm:$0xff]  ;;  %v3081_v21 = vld [vmem:[%s3220_s12 + $0x58] sm:$0xf]  ;;  %v6386_v32 = vld [vmem:[#allocation54_spill] sm:$0xff] }
 0x2e1   : > { %v1593_v47 = vsel %vm438_vm0, %v1590_v28, %v1592_v63  ;;  %v6358_v28 = vld [vmem:[#allocation171_spill] sm:$0xff]  ;;  %v1359_v55 = vsel %vm1348_vm4, %v1328_v11, %v6365_v1  ;;  %v1577_v41 = vrot.slane %v1512_v30, 1  ;;  %v1338_v20 = vsel %vm1317_vm3, %v1307_v2, %v6366_v27  ;;  %v6378_v48 = vld [vmem:[#allocation160_spill] sm:$0xff]  ;;  %v6383_v30 = vld [vmem:[#allocation61_spill] sm:$0xff] }
 0x2e2   : > { %2953 = vmatmul.msk.f32.gmra.mxu2 %vm6052_vm10, %v1593_v47  ;;  %v1492_v46 = vsel %vm6054_vm9, %v1461_v5, %v6358_v28  ;;  %v1327_v10 = vsel %vm1317_vm3, %v1296_v8, %v6367_v59  ;;  %v1390_v51 = vsel %vm1379_vm5, %v1359_v55, %v6368_v6  ;;  %v1369_v61 = vsel %vm1348_vm4, %v1338_v20, %v6369_v45  ;;  %v6379_v5 = vld [vmem:[#allocation162_spill] sm:$0xff]  ;;  %v6380_v28 = vld [vmem:[#allocation17_spill] sm:$0xff]  ;;  %v3082_v36 = vld [vmem:[%s3220_s12 + $0xb0] sm:$0xff]  ;;  %v1221_v59 = vpop.permute.xlu2 %1220 }
 0x2e3   : > { %v1523_v57 = vsel %vm6053_vm8, %v1492_v46, %v1235_v52  ;;  %v1358_v3 = vsel %vm1348_vm4, %v1327_v10, %v6370_v38  ;;  %v1421_v54 = vsel %vm1410_vm6, %v1390_v51, %v6371_v0  ;;  %v1400_v63 = vsel %vm1379_vm5, %v1369_v61, %v6372_v16  ;;  %v6377_v52 = vld [vmem:[#allocation12_spill] sm:$0xff]  ;;  %v3083_v8 = vld [vmem:[%s3220_s12 + $0xa8] sm:$0xff]  ;;  %v6388_v1 = vld [vmem:[#allocation121_spill] sm:$0xff] }
 0x2e4   : > { %2946 = vmatmul.msk.f32.gmra.mxu0 %vm6052_vm10, %v1576_v44  ;;  %v1595_v58 = vrot.slane %v1523_v57, 1  ;;  %v1389_v19 = vsel %vm1379_vm5, %v1358_v3, %v6373_v13  ;;  %v1452_v49 = vsel %vm1441_vm7, %v1421_v54, %v6374_v42  ;;  %v1431_v4 = vsel %vm1410_vm6, %v1400_v63, %v6375_v15  ;;  %v6381_v44 = vld [vmem:[#allocation34_spill] sm:$0xff]  ;;  %v6391_v6 = vld [vmem:[#allocation84_spill] sm:$0xff]  ;;  %v6392_v45 = vld [vmem:[#allocation139_spill] sm:$0xff] }
 0x2e5   : > { %v1233_v14 = vpop.permute.xlu1 %1232  ;;  %v1420_v9 = vsel %vm1410_vm6, %v1389_v19, %v6376_v39  ;;  %v1483_v17 = vsel %vm6054_vm9, %v1452_v49, %v6377_v52  ;;  %v1578_v47 = vsel %vm438_vm0, %v1575_v43, %v1577_v41  ;;  %v1462_v50 = vsel %vm1441_vm7, %v1431_v4, %v6378_v48  ;;  %v6382_v43 = vld [vmem:[#allocation16_spill] sm:$0xff]  ;;  %v6389_v41 = vld [vmem:[#allocation113_spill] sm:$0xff]  ;;  %v6393_v38 = vld [vmem:[#allocation159_spill] sm:$0xff] }
 0x2e6   : > { %v1522_v62 = vsel %vm6053_vm8, %v1491_v33, %v1233_v14  ;;  %v1451_v26 = vsel %vm1441_vm7, %v1420_v9, %v6379_v5  ;;  %v1298_v46 = vsel %vm1286_vm2, %v3081_v21, %v6380_v28  ;;  %v1493_v37 = vsel %vm6054_vm9, %v1462_v50, %v6381_v44  ;;  %v6384_v33 = vld [vmem:[#allocation53_spill] sm:$0xff]  ;;  %v6394_v0 = vld [vmem:[#allocation114_spill] sm:$0xff]  ;;  %v6396_v63 = vld [vmem:[#allocation28_spill] sm:$0xff] }
 0x2e7   : > { %v1594_v25 = vrot.slane %v1522_v62, 1  ;;  %v1217_v22 = vpop.permute.xlu0 %1216  ;;  %v1482_v35 = vsel %vm6054_vm9, %v1451_v26, %v6382_v43  ;;  %v1329_v7 = vsel %vm1317_vm3, %v1298_v46, %v6383_v30  ;;  %v1309_v14 = vsel %vm1286_vm2, %v3082_v36, %v6384_v33  ;;  %v6387_v62 = vld [vmem:[#allocation83_spill] sm:$0xff]  ;;  %v6397_v19 = vld [vmem:[#allocation140_spill] sm:$0xff]  ;;  %v3084_v39 = vld [vmem:[%s3220_s12 + $0x60] sm:$0xff] }
 0x2e8   : > { %v4855_v31 = vsel %vm6053_vm8, %v1483_v17, %v1217_v22  ;;  %v1513_v53 = vsel %vm6053_vm8, %v1482_v35, %v4715_v29  ;;  %v1360_v56 = vsel %vm1348_vm4, %v1329_v7, %v6385_v60  ;;  %v1308_v11 = vsel %vm1286_vm2, %v3083_v8, %v6386_v32  ;;  %v6390_v22 = vld [vmem:[#allocation145_spill] sm:$0xff]  ;;  %v6398_v49 = vld [vmem:[#allocation8_spill] sm:$0xff]  ;;  %v6399_v9 = vld [vmem:[#allocation43_spill] sm:$0xff] }
 0x2e9   : > { %v1596_v18 = vsel %vm438_vm0, %v1594_v25, %v1595_v58  ;;  %v1580_v2 = vrot.slane %v4855_v31, 1  ;;  %v1340_v29 = vsel %vm1317_vm3, %v1309_v14, %v6387_v62  ;;  %v1391_v55 = vsel %vm1379_vm5, %v1360_v56, %v6388_v1  ;;  %v6400_v17 = vld [vmem:[#allocation154_spill] sm:$0xff]  ;;  %v6401_v48 = vld [vmem:[#allocation173_spill] sm:$0xff]  ;;  %v6403_v28 = vld [vmem:[#allocation75_spill] sm:$0xff] }
 0x2ea   : > { %2954 = vmatmul.msk.f32.gmra.mxu2 %vm6052_vm10, %v1596_v18  ;;  %v1371_v25 = vsel %vm1348_vm4, %v1340_v29, %v6389_v41  ;;  %v1422_v27 = vsel %vm1410_vm6, %v1391_v55, %v6390_v22  ;;  %v1579_v20 = vrot.slane %v1513_v53, 1  ;;  %v1339_v51 = vsel %vm1317_vm3, %v1308_v11, %v6391_v6  ;;  %v6395_v18 = vld [vmem:[#allocation153_spill] sm:$0xff]  ;;  %v6406_v30 = vld [vmem:[#allocation174_spill] sm:$0xff]  ;;  %v6408_v60 = vld [vmem:[#allocation135_spill] sm:$0xff] }
 0x2eb   : > { %v1402_v61 = vsel %vm1379_vm5, %v1371_v25, %v6392_v45  ;;  %v1453_v3 = vsel %vm1441_vm7, %v1422_v27, %v6393_v38  ;;  %v1370_v54 = vsel %vm1348_vm4, %v1339_v51, %v6394_v0  ;;  %v1299_v52 = vsel %vm1286_vm2, %v3084_v39, %v6399_v9  ;;  %v3085_v26 = vld [vmem:[%s3220_s12 + $0xb8] sm:$0xf]  ;;  %v6410_v32 = vld [vmem:[#allocation150_spill] sm:$0xff]  ;;  %v6412_v55 = vld [vmem:[#allocation107_spill] sm:$0xff]  ;;  %s2963_s12 = sadd.s32 4294967295, %s3208_s28  ;;  %s6466_s28 = smov 56  }
 0x2ec   : > { %2947 = vmatmul.msk.f32.gmra.mxu0 %vm6052_vm10, %v1578_v47  ;;  %v1433_v16 = vsel %vm1410_vm6, %v1402_v61, %v6395_v18  ;;  %v1581_v13 = vsel %vm438_vm0, %v1579_v20, %v1580_v2  ;;  %v1401_v42 = vsel %vm1379_vm5, %v1370_v54, %v6397_v19  ;;  %v6402_v31 = vld [vmem:[#allocation41_spill] sm:$0xff]  ;;  %v1330_v46 = vsel %vm1317_vm3, %v1299_v52, %v6403_v28  ;;  %v6414_v27 = vld [vmem:[#allocation40_spill] sm:$0xff]  ;;  %v6415_v45 = vld [vmem:[#allocation106_spill] sm:$0xff] }
 0x2ed   : > { %v1237_v57 = vpop.permute.xlu1 %1236  ;;  %v1464_v15 = vsel %vm1441_vm7, %v1433_v16, %v6398_v49  ;;  %v1432_v47 = vsel %vm1410_vm6, %v1401_v42, %v6400_v17  ;;  %v1310_v21 = vsel %vm1286_vm2, %v3085_v26, %v6402_v31  ;;  %v6404_v44 = vld [vmem:[#allocation165_spill] sm:$0xff]  ;;  %v6416_v0 = vld [vmem:[#allocation56_spill] sm:$0xff]  ;;  %v3087_v18 = vld [vmem:[%s3421_s20] sm:$0xff] }
 0x2ee   : > { %v1524_v24 = vsel %vm6053_vm8, %v1493_v37, %v1237_v57  ;;  %v1495_v50 = vsel %vm6054_vm9, %v1464_v15, %v6401_v48  ;;  %v1463_v37 = vsel %vm1441_vm7, %v1432_v47, %v6404_v44  ;;  %v6405_v35 = vld [vmem:[#allocation105_spill] sm:$0xff]  ;;  %v6420_v42 = vld [vmem:[#allocation87_spill] sm:$0xff]  ;;  %v6421_v15 = vld [vmem:[#allocation116_spill] sm:$0xff] }
 0x2ef   : > { %v1597_v23 = vrot.slane %v1524_v24, 1  ;;  %v1219_v34 = vpop.permute.xlu0 %1218  ;;  %v1361_v57 = vsel %vm1348_vm4, %v1330_v46, %v6405_v35  ;;  %v1494_v7 = vsel %vm6054_vm9, %v1463_v37, %v6406_v30  ;;  %v6407_v33 = vld [vmem:[#allocation73_spill] sm:$0xff]  ;;  %v6424_v48 = vld [vmem:[#allocation142_spill] sm:$0xff]  ;;  %v6426_v31 = vld [vmem:[#allocation156_spill] sm:$0xff] }
 0x2f0   : > { %v1341_v14 = vsel %vm1317_vm3, %v1310_v21, %v6407_v33  ;;  %v1392_v56 = vsel %vm1379_vm5, %v1361_v57, %v6408_v60  ;;  %v6411_v29 = vld [vmem:[#allocation133_spill] sm:$0xff]  ;;  %v6427_v37 = vld [vmem:[#allocation22_spill] sm:$0xff]  ;;  %v6429_v30 = vld [vmem:[#allocation175_spill] sm:$0xff] }
 0x2f1   : > { %v1598_v10 = vsel %vm438_vm0, %v1595_v58, %v1597_v23  ;;  %v1484_v58 = vsel %vm6054_vm9, %v1453_v3, %v6396_v63  ;;  %v1423_v11 = vsel %vm1410_vm6, %v1392_v56, %v6410_v32  ;;  %v6413_v25 = vld [vmem:[#allocation149_spill] sm:$0xff]  ;;  %v3086_v3 = vld [vmem:[%s3421_s20 + $0x8] sm:$0xff]  ;;  %v6428_v35 = vld [vmem:[#allocation166_spill] sm:$0xff] }
 0x2f2   : > { %2955 = vmatmul.msk.f32.gmra.mxu2 %vm6052_vm10, %v1598_v10  ;;  %v1515_v4 = vsel %vm6053_vm8, %v1484_v58, %v1219_v34  ;;  %v6409_v34 = vld [vmem:[#allocation103_spill] sm:$0xff]  ;;  %v1454_v41 = vsel %vm1441_vm7, %v1423_v11, %v6412_v55  ;;  %v1243_v10 = vpop.permute.xlu2 %1242  ;;  %v1312_v54 = vsel %vm1286_vm2, %v3086_v3, %v6416_v0  ;;  %v6417_v16 = vld [vmem:[#allocation57_spill] sm:$0xff]  ;;  %v6432_v11 = vld [vmem:[#allocation76_spill] sm:$0xff] }
 0x2f3   : > { %v1582_v53 = vrot.slane %v1515_v4, 1  ;;  %v1372_v8 = vsel %vm1348_vm4, %v1341_v14, %v6409_v34  ;;  %v1485_v20 = vsel %vm6054_vm9, %v1454_v41, %v6414_v27  ;;  %v1311_v63 = vsel %vm1286_vm2, %v3087_v18, %v6417_v16  ;;  %v6422_v39 = vld [vmem:[#allocation117_spill] sm:$0xff]  ;;  %v6431_v34 = vld [vmem:[#allocation46_spill] sm:$0xff]  ;;  %v6435_v55 = vld [vmem:[#allocation151_spill] sm:$0xff] }
 0x2f4   : > { %2948 = vmatmul.msk.f32.gmra.mxu0 %vm6052_vm10, %v1581_v13  ;;  %v1403_v1 = vsel %vm1379_vm5, %v1372_v8, %v6411_v29  ;;  %v1516_v38 = vsel %vm6053_vm8, %v1485_v20, %v1221_v59  ;;  %v6419_v13 = vld [vmem:[#allocation86_spill] sm:$0xff]  ;;  %v1342_v59 = vsel %vm1317_vm3, %v1311_v63, %v6420_v42  ;;  %v6423_v17 = vld [vmem:[#allocation141_spill] sm:$0xff]  ;;  %v6436_v27 = vld [vmem:[#allocation163_spill] sm:$0xff] }
 0x2f5   : > { %v1241_v5 = vpop.permute.xlu1 %1240  ;;  %v1434_v22 = vsel %vm1410_vm6, %v1403_v1, %v6413_v25  ;;  %v1583_v6 = vsel %vm438_vm0, %v1580_v2, %v1582_v53  ;;  %v6418_v2 = vld [vmem:[#allocation136_spill] sm:$0xff]  ;;  %v1343_v19 = vsel %vm1317_vm3, %v1312_v54, %v6419_v13  ;;  %v1373_v9 = vsel %vm1348_vm4, %v1342_v59, %v6422_v39  ;;  %v6434_v29 = vld [vmem:[#allocation137_spill] sm:$0xff]  ;;  %v6439_v3 = vld [vmem:[#allocation170_spill] sm:$0xff] }
 0x2f6   : > { %v1526_v43 = vsel %vm6053_vm8, %v1495_v50, %v1241_v5  ;;  %v1465_v61 = vsel %vm1441_vm7, %v1434_v22, %v6415_v45  ;;  %v1374_v4 = vsel %vm1348_vm4, %v1343_v19, %v6421_v15  ;;  %v1584_v52 = vrot.slane %v1516_v38, 1  ;;  %v6425_v5 = vld [vmem:[#allocation155_spill] sm:$0xff]  ;;  %v6430_v53 = vld [vmem:[#allocation176_spill] sm:$0xff]  ;;  %v3090_v45 = vld [vmem:[%s3421_s20 + $0x18] sm:$0xff] }
 0x2f7   : > { %v1600_v24 = vrot.slane %v1526_v43, 1  ;;  %v1239_v36 = vpop.permute.xlu0 %1238  ;;  %v1496_v58 = vsel %vm6054_vm9, %v1465_v61, %v6418_v2  ;;  %v1405_v47 = vsel %vm1379_vm5, %v1374_v4, %v6423_v17  ;;  %v1404_v50 = vsel %vm1379_vm5, %v1373_v9, %v6424_v48  ;;  %v6438_v61 = vld [vmem:[#allocation60_spill] sm:$0xff]  ;;  %v6440_v54 = vld [vmem:[#allocation89_spill] sm:$0xff]  ;;  %v6441_v16 = vld [vmem:[#allocation90_spill] sm:$0xff] }
 0x2f8   : > { %v1525_v23 = vsel %vm6053_vm8, %v1494_v7, %v1239_v36  ;;  %v1527_v49 = vsel %vm6053_vm8, %v1496_v58, %v1243_v10  ;;  %v1436_v26 = vsel %vm1410_vm6, %v1405_v47, %v6425_v5  ;;  %v1435_v21 = vsel %vm1410_vm6, %v1404_v50, %v6426_v31  ;;  %v3089_v10 = vld [vmem:[%s3421_s20 + $0x20] sm:$0xff]  ;;  %v6442_v58 = vld [vmem:[#allocation119_spill] sm:$0xff]  ;;  %v6443_v19 = vld [vmem:[#allocation120_spill] sm:$0xff] }
 0x2f9   : > { %v1599_v62 = vrot.slane %v1525_v23, 1  ;;  %v1602_v28 = vrot.slane %v1527_v49, 1  ;;  %v1467_v43 = vsel %vm1441_vm7, %v1436_v26, %v6427_v37  ;;  %v1466_v57 = vsel %vm1441_vm7, %v1435_v21, %v6428_v35  ;;  %v3088_v23 = vld [vmem:[%s3421_s20 + $0x10] sm:$0xf]  ;;  %v6444_v59 = vld [vmem:[#allocation143_spill] sm:$0xff]  ;;  %v6446_v39 = vld [vmem:[#allocation157_spill] sm:$0xff] }
 0x2fa   : > { %v1498_v7 = vsel %vm6054_vm9, %v1467_v43, %v6429_v30  ;;  %v1497_v36 = vsel %vm6054_vm9, %v1466_v57, %v6430_v53  ;;  %v1586_v33 = vsel %vm438_vm0, %v1584_v52, %v1585_v40  ;;  %v1313_v8 = vsel %vm1286_vm2, %v3088_v23, %v6431_v34  ;;  %v1249_v25 = vpop.permute.xlu2 %1248  ;;  %v6445_v15 = vld [vmem:[#allocation144_spill] sm:$0xff]  ;;  %v6447_v52 = vld [vmem:[#allocation158_spill] sm:$0xff]  ;;  %v6449_v31 = vld [vmem:[#allocation169_spill] sm:$0xff] }
 0x2fb   : > { %v1601_v51 = vsel %vm438_vm0, %v1599_v62, %v1600_v24  ;;  %v1603_v14 = vsel %vm438_vm0, %v1600_v24, %v1602_v28  ;;  %v1344_v40 = vsel %vm1317_vm3, %v1313_v8, %v6432_v11  ;;  %v6433_v24 = vld [vmem:[#allocation108_spill] sm:$0xff]  ;;  %v1314_v38 = vsel %vm1286_vm2, %v3090_v45, %v6438_v61  ;;  %v6450_v28 = vld [vmem:[#allocation177_spill] sm:$0xff]  ;;  %v3091_v30 = vld [vmem:[%s3421_s20 + $0x28] sm:$0xf] }
 0x2fc   : > { %2949 = vmatmul.msk.f32.gmra.mxu0 %vm6052_vm10, %v1583_v6  ;;  %2956 = vmatmul.msk.f32.gmra.mxu2 %vm6052_vm10, %v1601_v51  ;;  %v1375_v62 = vsel %vm1348_vm4, %v1344_v40, %v6433_v24  ;;  %v6437_v6 = vld [vmem:[#allocation59_spill] sm:$0xff]  ;;  %v1345_v63 = vsel %vm1317_vm3, %v1314_v38, %v6441_v16  ;;  %v6448_v5 = vld [vmem:[#allocation168_spill] sm:$0xff]  ;;  %v6455_v34 = vld [vmem:[#allocation138_spill] sm:$0xff] }
 0x2fd   : > { %v1247_v46 = vpop.permute.xlu1 %1246  ;;  %v1406_v1 = vsel %vm1379_vm5, %v1375_v62, %v6434_v29  ;;  %v1315_v51 = vsel %vm1286_vm2, %v3089_v10, %v6437_v6  ;;  %v1376_v42 = vsel %vm1348_vm4, %v1345_v63, %v6443_v19  ;;  %v6457_v24 = vld [vmem:[#allocation4_spill] sm:$0xff]  ;;  %v6458_v29 = vld [vmem:[#allocation63_spill] sm:$0xff] }
 0x2fe   : > { %v1529_v60 = vsel %vm6053_vm8, %v1498_v7, %v1247_v46  ;;  %v1437_v41 = vsel %vm1410_vm6, %v1406_v1, %v6435_v55  ;;  %v1346_v18 = vsel %vm1317_vm3, %v1315_v51, %v6440_v54  ;;  %v1407_v4 = vsel %vm1379_vm5, %v1376_v42, %v6445_v15  ;;  %v6452_v7 = vld [vmem:[#allocation49_spill] sm:$0xff] }
 0x2ff   : > { %v1245_v44 = vpop.permute.xlu0 %1244  ;;  %v1605_v32 = vrot.slane %v1529_v60, 1  ;;  %v1468_v20 = vsel %vm1441_vm7, %v1437_v41, %v6436_v27  ;;  %v1377_v13 = vsel %vm1348_vm4, %v1346_v18, %v6442_v58  ;;  %v1438_v17 = vsel %vm1410_vm6, %v1407_v4, %v6447_v52 }
 0x300   : > { %v1528_v56 = vsel %vm6053_vm8, %v1497_v36, %v1245_v44  ;;  %v1499_v0 = vsel %vm6054_vm9, %v1468_v20, %v6439_v3  ;;  %v1408_v49 = vsel %vm1379_vm5, %v1377_v13, %v6444_v59  ;;  %v1469_v21 = vsel %vm1441_vm7, %v1438_v17, %v6449_v31  ;;  %v6451_v44 = vld [vmem:[#allocation19_spill] sm:$0xff] }
 0x301   : > { %v1604_v12 = vrot.slane %v1528_v56, 1  ;;  %v1530_v2 = vsel %vm6053_vm8, %v1499_v0, %v1249_v25  ;;  %v1439_v9 = vsel %vm1410_vm6, %v1408_v49, %v6446_v39  ;;  %v1500_v37 = vsel %vm6054_vm9, %v1469_v21, %v6451_v44  ;;  %v6454_v56 = vld [vmem:[#allocation2_spill] sm:$0xff] }
 0x302   : > { %v1607_v47 = vrot.slane %v1530_v2, 1  ;;  %v1470_v26 = vsel %vm1441_vm7, %v1439_v9, %v6448_v5  ;;  %v1316_v53 = vsel %vm1286_vm2, %v3091_v30, %v6452_v7  ;;  %v1255_v11 = vpop.permute.xlu2 %1254  ;;  %v5070_v27 = vstv %s2963_s12 }
 0x303   : > { %v1606_v22 = vsel %vm438_vm0, %v1604_v12, %v1605_v32  ;;  %v1501_v46 = vsel %vm6054_vm9, %v1470_v26, %v6450_v28  ;;  %vm1780_vm11 = vcmp.ge.s32.totalorder %v5070_v27, 0  ;;  %vm1790_vm12 = vcmp.lt.s32.totalorder %v5070_v27, 16 }
 0x304   : > { %2950 = vmatmul.msk.f32.gmra.mxu0 %vm6052_vm10, %v1586_v33  ;;  %2957 = vmatmul.msk.f32.gmra.mxu2 %vm6052_vm10, %v1603_v14  ;;  %v1608_v43 = vsel %vm438_vm0, %v1605_v32, %v1607_v47  ;;  %v6453_v14 = vld [vmem:[#allocation79_spill] sm:$0xff]  ;;  %v6456_v32 = vld [vmem:[#allocation152_spill] sm:$0xff]  ;;  %vm1800_vm13 = vmand %vm1780_vm11, %vm1790_vm12  ;;  %v1771_v16 = vadd.s32 1, %v5070_v27  ;;  %v1772_v31 = vadd.s32 2, %v5070_v27 }
 0x305   : > { %v1253_v48 = vpop.permute.xlu1 %1252  ;;  %v1347_v60 = vsel %vm1317_vm3, %v1316_v53, %v6453_v14 }
 0x306   : > { %v1532_v35 = vsel %vm6053_vm8, %v1501_v46, %v1253_v48  ;;  %v1378_v23 = vsel %vm1348_vm4, %v1347_v60, %v6454_v56  ;;  %vm1781_vm15 = vcmp.ge.s32.totalorder %v1771_v16, 0  ;;  %vm1791_vm11 = vcmp.lt.s32.totalorder %v1771_v16, 16 }
 0x307   : > { %v1251_v50 = vpop.permute.xlu0 %1250  ;;  %v1610_v36 = vrot.slane %v1532_v35, 1  ;;  %v1409_v8 = vsel %vm1379_vm5, %v1378_v23, %v6455_v34  ;;  %vm1801_vm12 = vmand %vm1781_vm15, %vm1791_vm11  ;;  %vm1792_vm15 = vcmp.lt.s32.totalorder %v1772_v31, 16 }
 0x308   : > { %v1531_v57 = vsel %vm6053_vm8, %v1500_v37, %v1251_v50  ;;  %v1440_v12 = vsel %vm1410_vm6, %v1409_v8, %v6456_v32 }
 0x309   : > { %v1609_v33 = vrot.slane %v1531_v57, 1  ;;  %v1471_v62 = vsel %vm1441_vm7, %v1440_v12, %v6457_v24  ;;  %v1773_v12 = vadd.s32 3, %v5070_v27 }
 0x30a   : > { %v1502_v1 = vsel %vm6054_vm9, %v1471_v62, %v6458_v29  ;;  %v1774_v29 = vadd.s32 4, %v5070_v27 }
 0x30b   : > { %v1611_v40 = vsel %vm438_vm0, %v1609_v33, %v1610_v36  ;;  %v1533_v55 = vsel %vm6053_vm8, %v1502_v1, %v1255_v11 }
 0x30c   : > { %2958 = vmatmul.msk.f32.gmra.mxu2 %vm6052_vm10, %v1606_v22  ;;  %v1612_v41 = vrot.slane %v1533_v55, 1  ;;  %v5068_v22 = vld [vmem:[%s5990_s3] ss:$0 sm:$0xff] }
 0x30e   : > { %v1613_v25 = vsel %vm438_vm0, %v1610_v36, %v1612_v41 }
 0x314   : > { %2959 = vmatmul.msk.f32.gmra.mxu2 %vm6052_vm10, %v1608_v43 }
 0x31c   : > { %2960 = vmatmul.msk.f32.gmra.mxu2 %vm6052_vm10, %v1611_v40 }
 0x324   : > { %2961 = vmatmul.msk.f32.gmra.mxu2 %vm6052_vm10, %v1613_v25  ;;  %vm1794_vm10 = vcmp.lt.s32.totalorder %v1774_v29, 16 }
 0x341   : > { %v1685_v20 = vpop.f32.mrf.mxu0 }
 0x342   : > { %v1686_v10 = vadd.f32 %v5068_v22, %v1685_v20 }
 0x344   : > { %v1745_v6 = vmax.f32 %v1686_v10, 0.0 }
 0x346   : > { %v1872_v51 = vsel %vm1800_vm13, %v1745_v6, 0.0 }
 0x347   : > { %v1913_v38 = vrot.slane %v1872_v51, 7 }
 0x349   : > { %v1688_v45 = vpop.f32.mrf.mxu0  ;;  %v5077_v54 = vsel %vm1912_vm14, 0.0, %v1913_v38 }
 0x34a   : > { %v1689_v61 = vadd.f32 %v5068_v22, %v1688_v45  ;;  %v2007_v13 = vrot.slane %v5077_v54, 1 }
 0x34c   : > { %v1746_v3 = vmax.f32 %v1689_v61, 0.0 }
 0x34e   : > { %v1873_v0 = vsel %vm1800_vm13, %v1746_v3, 0.0  ;;  %vm1782_vm13 = vcmp.ge.s32.totalorder %v1772_v31, 0 }
 0x34f   : > { %v1914_v18 = vrot.slane %v1873_v0, 7  ;;  %vm1802_vm11 = vmand %vm1782_vm13, %vm1792_vm15  ;;  %vm1793_vm13 = vcmp.lt.s32.totalorder %v1773_v12, 16 }
 0x351   : > { %v5081_v63 = vsel %vm1912_vm14, %v1913_v38, %v1914_v18  ;;  %v5084_v2 = vsel %vm1912_vm14, %v1914_v18, 0.0  ;;  %v1691_v58 = vpop.f32.mrf.mxu0  ;;  %v1775_v38 = vadd.s32 5, %v5070_v27 }
 0x352   : > { %v2010_v19 = vrot.slane %v5084_v2, 1  ;;  %v1692_v42 = vadd.f32 %v5068_v22, %v1691_v58  ;;  %v2008_v59 = vrot.slane %v5081_v63, 1 }
 0x353   : > { %vm1795_vm8 = vcmp.lt.s32.totalorder %v1775_v38, 16 }
 0x354   : > { %v2011_v49 = vsel %vm438_vm0, %v2008_v59, %v2010_v19  ;;  %v2009_v15 = vsel %vm438_vm0, %v2007_v13, %v2008_v59  ;;  %v1747_v4 = vmax.f32 %v1692_v42, 0.0  ;;  %v1776_v59 = vadd.s32 6, %v5070_v27 }
 0x355   : > { %2049 = vrot.lane.b32.xlu1 %v2011_v49, %s3132_s13  ;;  %2047 = vrot.lane.b32.xlu0 %v2009_v15, %s3132_s13  ;;  %v1712_v39 = vpop.f32.mrf.mxu2 }
 0x356   : > { %v1874_v9 = vsel %vm1801_vm12, %v1747_v4, 0.0  ;;  %v1713_v20 = vadd.f32 %v5068_v22, %v1712_v39 }
 0x357   : > { %v1916_v47 = vrot.slane %v1874_v9, 7 }
 0x358   : > { %v1754_v0 = vmax.f32 %v1713_v20, 0.0 }
 0x359   : > { %v1694_v52 = vpop.f32.mrf.mxu0  ;;  %v5097_v21 = vsel %vm1912_vm14, 0.0, %v1916_v47 }
 0x35a   : > { %v1695_v17 = vadd.f32 %v5068_v22, %v1694_v52  ;;  %v2012_v57 = vrot.slane %v5097_v21, 1 }
 0x35c   : > { %v1748_v48 = vmax.f32 %v1695_v17, 0.0 }
 0x35d   : > { %v1715_v50 = vpop.f32.mrf.mxu2 }
 0x35e   : > { %v1875_v5 = vsel %vm1801_vm12, %v1748_v48, 0.0  ;;  %vm1783_vm12 = vcmp.ge.s32.totalorder %v1773_v12, 0  ;;  %v1716_v18 = vadd.f32 %v5068_v22, %v1715_v50 }
 0x35f   : > { %v1917_v26 = vrot.slane %v1875_v5, 7  ;;  %vm5142_vm15 = vmand %vm1783_vm12, %vm1793_vm13  ;;  %vm1785_vm13 = vcmp.ge.s32.totalorder %v1775_v38, 0 }
 0x360   : > { %v1755_v39 = vmax.f32 %v1716_v18, 0.0  ;;  %vm1805_vm9 = vmand %vm1785_vm13, %vm1795_vm8  ;;  %vm1796_vm8 = vcmp.lt.s32.totalorder %v1776_v59, 16 }
 0x361   : > { %v5100_v28 = vsel %vm1912_vm14, %v1916_v47, %v1917_v26  ;;  %v5103_v46 = vsel %vm1912_vm14, %v1917_v26, 0.0  ;;  %v1697_v44 = vpop.f32.mrf.mxu0 }
 0x362   : > { %v2015_v37 = vrot.slane %v5103_v46, 1  ;;  %v1698_v43 = vadd.f32 %v5068_v22, %v1697_v44  ;;  %v2013_v35 = vrot.slane %v5100_v28, 1  ;;  %v1882_v26 = vsel %vm1805_vm9, %v1755_v39, 0.0 }
 0x364   : > { %v1749_v30 = vmax.f32 %v1698_v43, 0.0  ;;  %v5110_v7 = vsel %vm438_vm0, %v2013_v35, %v2015_v37  ;;  %v5113_v53 = vsel %vm438_vm0, %v2012_v57, %v2013_v35 }
 0x365   : > { %v1718_v36 = vpop.f32.mrf.mxu2  ;;  %2053 = vrot.lane.b32.xlu0 %v5110_v7, %s3132_s13  ;;  %2051 = vrot.lane.b32.xlu2 %v5113_v53, %s3132_s13 }
 0x366   : > { %v1876_v33 = vsel %vm1802_vm11, %v1749_v30, 0.0  ;;  %v1719_v3 = vadd.f32 %v5068_v22, %v1718_v36 }
 0x367   : > { %v1919_v56 = vrot.slane %v1876_v33, 7  ;;  %v1777_v33 = vadd.s32 7, %v5070_v27 }
 0x368   : > { %v1756_v42 = vmax.f32 %v1719_v3, 0.0 }
 0x369   : > { %v1700_v14 = vpop.f32.mrf.mxu0  ;;  %v5122_v11 = vsel %vm1912_vm14, 0.0, %v1919_v56 }
 0x36a   : > { %v1701_v60 = vadd.f32 %v5068_v22, %v1700_v14  ;;  %v2017_v25 = vrot.slane %v5122_v11, 1  ;;  %v1883_v52 = vsel %vm1805_vm9, %v1756_v42, 0.0 }
 0x36b   : > { %v1929_v35 = vrot.slane %v1883_v52, 7 }
 0x36c   : > { %v1750_v23 = vmax.f32 %v1701_v60, 0.0 }
 0x36d   : > { %v1721_v34 = vpop.f32.mrf.mxu2 }
 0x36e   : > { %v1877_v8 = vsel %vm1802_vm11, %v1750_v23, 0.0  ;;  %vm1784_vm11 = vcmp.ge.s32.totalorder %v1774_v29, 0  ;;  %v1722_v31 = vadd.f32 %v5068_v22, %v1721_v34  ;;  %v1928_v23 = vrot.slane %v1882_v26, 7 }
 0x36f   : > { %v1920_v32 = vrot.slane %v1877_v8, 7  ;;  %vm5155_vm12 = vmand %vm1784_vm11, %vm1794_vm10  ;;  %vm1786_vm10 = vcmp.ge.s32.totalorder %v1776_v59, 0  ;;  %vm1797_vm11 = vcmp.lt.s32.totalorder %v1777_v33, 16 }
 0x370   : > { %v1881_v4 = vsel %vm5155_vm12, %v1754_v0, 0.0  ;;  %v1757_v8 = vmax.f32 %v1722_v31, 0.0  ;;  %vm1806_vm9 = vmand %vm1786_vm10, %vm1796_vm8  ;;  %v5202_v20 = vsel %vm1912_vm14, 0.0, %v1928_v23 }
 0x371   : > { %v5125_v40 = vsel %vm1912_vm14, %v1919_v56, %v1920_v32  ;;  %v5128_v24 = vsel %vm1912_vm14, %v1920_v32, 0.0  ;;  %v1703_v62 = vpop.f32.mrf.mxu0  ;;  %v1926_v50 = vrot.slane %v1881_v4, 7  ;;  %v5223_v4 = vsel %vm1912_vm14, %v1929_v35, 0.0 }
 0x372   : > { %v2020_v1 = vrot.slane %v5128_v24, 1  ;;  %v1704_v55 = vadd.f32 %v5068_v22, %v1703_v62  ;;  %v2018_v41 = vrot.slane %v5125_v40, 1  ;;  %v5191_v62 = vsel %vm1912_vm14, %v1928_v23, %v1929_v35 }
 0x373   : > { %v5182_v56 = vsel %vm1912_vm14, %v1926_v50, 0.0  ;;  %v1884_v61 = vsel %vm1806_vm9, %v1757_v8, 0.0  ;;  %v2033_v0 = vrot.slane %v5191_v62, 1 }
 0x374   : > { %v1751_v10 = vmax.f32 %v1704_v55, 0.0  ;;  %v5137_v6 = vsel %vm438_vm0, %v2018_v41, %v2020_v1  ;;  %v5140_v51 = vsel %vm438_vm0, %v2017_v25, %v2018_v41  ;;  %v2030_v1 = vrot.slane %v5182_v56, 1 }
 0x375   : > { %v1724_v45 = vpop.f32.mrf.mxu2  ;;  %2057 = vrot.lane.b32.xlu2 %v5137_v6, %s3132_s13  ;;  %2055 = vrot.lane.b32.xlu1 %v5140_v51, %s3132_s13  ;;  %v1931_v42 = vrot.slane %v1884_v61, 7  ;;  %v2103_v61 = vrot.slane %v5103_v46, 2  ;;  %v2108_v46 = vrot.slane %v5128_v24, 2 }
 0x376   : > { %v1878_v16 = vsel %vm5142_vm15, %v1751_v10, 0.0  ;;  %v1725_v17 = vadd.f32 %v5068_v22, %v1724_v45 }
 0x377   : > { %v1922_v49 = vrot.slane %v1878_v16, 7 }
 0x378   : > { %v1758_v36 = vmax.f32 %v1725_v17, 0.0 }
 0x379   : > { %v1706_v58 = vpop.f32.mrf.mxu0  ;;  %v5167_v5 = vsel %vm1912_vm14, 0.0, %v1922_v49 }
 0x37a   : > { %v1707_v19 = vadd.f32 %v5068_v22, %v1706_v58  ;;  %v2022_v60 = vrot.slane %v5167_v5, 1  ;;  %v1885_v55 = vsel %vm1806_vm9, %v1758_v36, 0.0  ;;  %vm6469_vm9 = vcmask 523264  }
 0x37b   : > { %v1932_v18 = vrot.slane %v1885_v55, 7  ;;  %v2095_v55 = vrot.slane %v5077_v54, 2 }
 0x37c   : > { %v1752_v15 = vmax.f32 %v1707_v19, 0.0  ;;  %v2032_v19 = vrot.slane %v5202_v20, 1 }
 0x37d   : > { %v5236_v52 = vsel %vm1912_vm14, %v1932_v18, 0.0 }
 0x37e   : > { %v1879_v9 = vsel %vm5142_vm15, %v1752_v15, 0.0  ;;  %vm1787_vm15 = vcmp.ge.s32.totalorder %v1777_v33, 0  ;;  %v5230_v39 = vsel %vm438_vm0, %v2032_v19, %v2033_v0  ;;  %v2040_v26 = vrot.slane %v5236_v52, 1 }
 0x37f   : > { %v1923_v47 = vrot.slane %v1879_v9, 7  ;;  %v1727_v48 = vpop.f32.mrf.mxu2  ;;  %v5233_v9 = vsel %vm1912_vm14, %v1931_v42, %v1932_v18  ;;  %v2100_v18 = vrot.slane %v5097_v21, 2 }
 0x380   : > { %v1728_v10 = vadd.f32 %v5068_v22, %v1727_v48  ;;  %v5244_v48 = vsel %vm1912_vm14, 0.0, %v1931_v42  ;;  %v2105_v42 = vrot.slane %v5122_v11, 2 }
 0x381   : > { %v5171_v44 = vsel %vm1912_vm14, %v1922_v49, %v1923_v47  ;;  %v5174_v37 = vsel %vm1912_vm14, %v1923_v47, 0.0  ;;  %v1709_v43 = vpop.f32.mrf.mxu0  ;;  %v2035_v47 = vrot.slane %v5223_v4, 1 }
 0x382   : > { %v2025_v57 = vrot.slane %v5174_v37, 1  ;;  %v1710_v30 = vadd.f32 %v5068_v22, %v1709_v43  ;;  %v2023_v14 = vrot.slane %v5171_v44, 1  ;;  %v1759_v59 = vmax.f32 %v1728_v10, 0.0 }
 0x383   : > { %v2038_v43 = vrot.slane %v5233_v9, 1  ;;  %v2111_v19 = vrot.slane %v5171_v44, 2  ;;  %v2113_v24 = vrot.slane %v5174_v37, 2  ;;  %v2121_v37 = vrot.slane %v5191_v62, 2 }
 0x384   : > { %v1753_v34 = vmax.f32 %v1710_v30, 0.0  ;;  %v5185_v32 = vsel %vm438_vm0, %v2023_v14, %v2025_v57  ;;  %v5188_v12 = vsel %vm438_vm0, %v2022_v60, %v2023_v14  ;;  %v2037_v57 = vrot.slane %v5244_v48, 1 }
 0x385   : > { %2061 = vrot.lane.b32.xlu1 %v5185_v32, %s3132_s13  ;;  %2059 = vrot.lane.b32.xlu0 %v5188_v12, %s3132_s13  ;;  %v5250_v30 = vsel %vm438_vm0, %v2033_v0, %v2035_v47  ;;  %v5258_v33 = vsel %vm438_vm0, %v2038_v43, %v2040_v26  ;;  %v2101_v0 = vrot.slane %v5100_v28, 2 }
 0x386   : > { %v1880_v29 = vsel %vm5155_vm12, %v1753_v34, 0.0  ;;  %vm1807_vm12 = vmand %vm1787_vm15, %vm1797_vm11  ;;  %6463 = vst [vmem:[#allocation25_spill] sm:$0xff] %v5250_v30  ;;  %v5261_v14 = vsel %vm438_vm0, %v2037_v57, %v2038_v43  ;;  %v2118_v43 = vrot.slane %v5182_v56, 2  ;;  %v2123_v56 = vrot.slane %v5223_v4, 2 }
 0x387   : > { %v1925_v41 = vrot.slane %v1880_v29, 7  ;;  %v1730_v25 = vpop.f32.mrf.mxu2  ;;  %v2096_v29 = vrot.slane %v5081_v63, 2  ;;  %v2128_v4 = vrot.slane %v5236_v52, 2  ;;  %vm6470_vm15 = vcmask 588800  }
 0x388   : > { %v1731_v45 = vadd.f32 %v5068_v22, %v1730_v25 }
 0x389   : > { %v5207_v38 = vsel %vm1912_vm14, %v1925_v41, %v1926_v50  ;;  %v5210_v3 = vsel %vm1912_vm14, 0.0, %v1925_v41  ;;  %v1886_v50 = vsel %vm1807_vm12, %v1759_v59, 0.0  ;;  %v2097_v25 = vsel %vm579_vm1, %v2095_v55, %v2096_v29 }
 0x38a   : > { %v1760_v16 = vmax.f32 %v1731_v45, 0.0  ;;  %v2027_v58 = vrot.slane %v5210_v3, 1  ;;  %v2028_v13 = vrot.slane %v5207_v38, 1  ;;  %v1934_v35 = vrot.slane %v1886_v50, 7 }
 0x38b   : > { %v2098_v45 = vrot.slane %v5084_v2, 2  ;;  %v2106_v2 = vrot.slane %v5125_v40, 2  ;;  %v2110_v59 = vrot.slane %v5167_v5, 2  ;;  %v2116_v26 = vrot.slane %v5207_v38, 2 }
 0x38c   : > { %v5217_v49 = vsel %vm438_vm0, %v2027_v58, %v2028_v13  ;;  %v5220_v15 = vsel %vm438_vm0, %v2028_v13, %v2030_v1  ;;  %v1887_v17 = vsel %vm1807_vm12, %v1760_v16, 0.0  ;;  %v5271_v23 = vsel %vm1912_vm14, 0.0, %v1934_v35 }
 0x38d   : > { %2063 = vrot.lane.b32.xlu2 %v5217_v49, %s3132_s13  ;;  %2067 = vrot.lane.b32.xlu1 %v5230_v39, %s3132_s13  ;;  %v1935_v31 = vrot.slane %v1887_v17, 7  ;;  %v2042_v1 = vrot.slane %v5271_v23, 1  ;;  %v2099_v16 = vsel %vm579_vm1, %v2096_v29, %v2098_v45  ;;  %v5296_v58 = vsel %vm579_vm1, %v2101_v0, %v2103_v61 }
 0x38e   : > { %2065 = vrot.lane.b32.xlu0 %v5220_v15, %s3132_s13  ;;  %v5299_v13 = vsel %vm579_vm1, %v2100_v18, %v2101_v0  ;;  %v5312_v17 = vsel %vm579_vm1, %v2105_v42, %v2106_v2  ;;  %v5315_v47 = vsel %vm579_vm1, %v2110_v59, %v2111_v19  ;;  %v5318_v50 = vsel %vm579_vm1, %v2106_v2, %v2108_v46 }
 0x38f   : > { %v5253_v36 = vsel %vm1912_vm14, %v1934_v35, %v1935_v31  ;;  %v5264_v60 = vsel %vm1912_vm14, %v1935_v31, 0.0  ;;  %v2115_v31 = vrot.slane %v5210_v3, 2  ;;  %v5331_v35 = vsel %vm579_vm1, %v2111_v19, %v2113_v24 }
 0x390   : > { %v2043_v34 = vrot.slane %v5253_v36, 1  ;;  %v2045_v8 = vrot.slane %v5264_v60, 1  ;;  %v5334_v57 = vsel %vm579_vm1, %v2116_v26, %v2118_v43  ;;  %v2120_v29 = vrot.slane %v5202_v20, 2 }
 0x391   : > { %v5357_v45 = vsel %vm579_vm1, %v2121_v37, %v2123_v56  ;;  %v2133_v61 = vrot.slane %v5264_v60, 2  ;;  %v2131_v0 = vrot.slane %v5253_v36, 2  ;;  %v2130_v18 = vrot.slane %v5271_v23, 2  ;;  %v1733_v60 = vpop.f32.mrf.mxu2 }
 0x392   : > { %v5279_v41 = vsel %vm438_vm0, %v2042_v1, %v2043_v34  ;;  %v5283_v10 = vsel %vm438_vm0, %v2043_v34, %v2045_v8  ;;  %v5337_v34 = vsel %vm579_vm1, %v2115_v31, %v2116_v26  ;;  %v2126_v8 = vrot.slane %v5233_v9, 2  ;;  %6465 = vst [vmem:[#allocation62_spill] sm:$0xff] %v5357_v45 }
 0x393   : > { %v2125_v1 = vrot.slane %v5244_v48, 2  ;;  %v5351_v55 = vsel %vm579_vm1, %v2120_v29, %v2121_v37  ;;  %v5373_v2 = vsel %vm579_vm1, %v2131_v0, %v2133_v61  ;;  %v5376_v46 = vsel %vm579_vm1, %v2130_v18, %v2131_v0 }
 0x394   : > { %6464 = vst [vmem:[#allocation93_spill] sm:$0xff] %v5351_v55  ;;  %v1778_v19 = vadd.s32 8, %v5070_v27  ;;  %v1734_v42 = vadd.f32 %v5068_v22, %v1733_v60 }
 0x395   : > { %2069 = vrot.lane.b32.xlu2 %v5250_v30, %s3132_s13  ;;  %2073 = vrot.lane.b32.xlu1 %v5258_v33, %s3132_s13 }
 0x396   : > { %2071 = vrot.lane.b32.xlu0 %v5261_v14, %s3132_s13  ;;  %vm1788_vm13 = vcmp.ge.s32.totalorder %v1778_v19, 0  ;;  %vm1798_vm10 = vcmp.lt.s32.totalorder %v1778_v19, 16  ;;  %v1761_v24 = vmax.f32 %v1734_v42, 0.0 }
 0x397   : > { %vm1808_vm8 = vmand %vm1788_vm13, %vm1798_vm10 }
 0x398   : > { %v1888_v43 = vsel %vm1808_vm8, %v1761_v24, 0.0  ;;  %vm6474_vm10 = vmmov %vm6469_vm9 }
 0x399   : > { %v1736_v26 = vpop.f32.mrf.mxu2  ;;  %v1937_v29 = vrot.slane %v1888_v43, 7 }
 0x39a   : > { %v1737_v31 = vadd.f32 %v5068_v22, %v1736_v26 }
 0x39b   : > { %v5422_v61 = vsel %vm1912_vm14, 0.0, %v1937_v29 }
 0x39d   : > { %2075 = vrot.lane.b32.xlu2 %v5279_v41, %s3132_s13  ;;  %2135 = vrot.lane.b32.xlu1 %v2097_v25, %s3133_s29  ;;  %v5354_v25 = vsel %vm579_vm1, %v2125_v1, %v2126_v8  ;;  %v1762_v1 = vmax.f32 %v1737_v31, 0.0 }
 0x39e   : > { %2077 = vrot.lane.b32.xlu0 %v5283_v10, %s3132_s13  ;;  %s6467_s13 = smov 64  }
 0x3a5   : > { %2137 = vrot.lane.b32.xlu2 %v2099_v16, %s3133_s29  ;;  %2141 = vrot.lane.b32.xlu1 %v5296_v58, %s3133_s29  ;;  %v5370_v16 = vsel %vm579_vm1, %v2126_v8, %v2128_v4  ;;  %v5417_v4 = vsel %vm1808_vm8, %v1762_v1, 0.0  ;;  %vm6475_vm8 = vmmov %vm6470_vm15 }
 0x3a6   : > { %2139 = vrot.lane.b32.xlu0 %v5299_v13, %s3133_s29  ;;  %v6055_v18 = vrot.slane %v5417_v4, 7 }
 0x3a8   : > { %v5434_v42 = vsel %vm1912_vm14, %v1937_v29, %v6055_v18 }
 0x3ad   : > { %2143 = vrot.lane.b32.xlu2 %v5312_v17, %s3133_s29  ;;  %2147 = vrot.lane.b32.xlu1 %v5315_v47, %s3133_s29 }
 0x3ae   : > { %2145 = vrot.lane.b32.xlu0 %v5318_v50, %s3133_s29 }
 0x3b5   : > { %2149 = vrot.lane.b32.xlu2 %v5331_v35, %s3133_s29  ;;  %2153 = vrot.lane.b32.xlu1 %v5334_v57, %s3133_s29 }
 0x3b6   : > { %2151 = vrot.lane.b32.xlu0 %v5337_v34, %s3133_s29 }
 0x3bd   : > { %2155 = vrot.lane.b32.xlu2 %v5351_v55, %s3133_s29  ;;  %2159 = vrot.lane.b32.xlu1 %v5354_v25, %s3133_s29 }
 0x3be   : > { %2157 = vrot.lane.b32.xlu0 %v5357_v45, %s3133_s29 }
 0x3bf   : > { %v5396_v52 = vpop.permute.xlu2 %2051 }
 0x3c5   : > { %2161 = vrot.lane.b32.xlu2 %v5370_v16, %s3133_s29  ;;  %2165 = vrot.lane.b32.xlu1 %v5373_v2, %s3133_s29 }
 0x3c6   : > { %2163 = vrot.lane.b32.xlu0 %v5376_v46, %s3133_s29 }
 0x3c7   : > { %v2050_v56 = vpop.permute.xlu1 %2049  ;;  %v2048_v8 = vpop.permute.xlu0 %2047 }
 0x3c8   : > { %v2496_v43 = vsel %vm1286_vm2, %v5081_v63, %v2050_v56 }
 0x3cd   : > { %2184 = vrot.lane.b32.xlu2 %v5097_v21, %s3134_s30  ;;  %2188 = vrot.lane.b32.xlu1 %v5122_v11, %s3134_s30 }
 0x3ce   : > { %2186 = vrot.lane.b32.xlu0 %v5100_v28, %s3134_s30 }
 0x3cf   : > { %v5406_v59 = vpop.permute.xlu2 %2057 }
 0x3d5   : > { %2190 = vrot.lane.b32.xlu2 %v5125_v40, %s3134_s30  ;;  %2194 = vrot.lane.b32.xlu1 %v5171_v44, %s3134_s30 }
 0x3d6   : > { %2192 = vrot.lane.b32.xlu0 %v5167_v5, %s3134_s30 }
 0x3d7   : > { %v2054_v60 = vpop.permute.xlu0 %2053 }
 0x3dd   : > { %2196 = vrot.lane.b32.xlu2 %v5210_v3, %s3134_s30  ;;  %2200 = vrot.lane.b32.xlu1 %v5202_v20, %s3134_s30 }
 0x3de   : > { %2198 = vrot.lane.b32.xlu0 %v5207_v38, %s3134_s30 }
 0x3e5   : > { %2202 = vrot.lane.b32.xlu2 %v5191_v62, %s3134_s30  ;;  %2206 = vrot.lane.b32.xlu1 %v5233_v9, %s3134_s30 }
 0x3e6   : > { %2204 = vrot.lane.b32.xlu0 %v5244_v48, %s3134_s30 }
 0x3e7   : > { %v5415_v37 = vpop.permute.xlu2 %2063  ;;  %v2056_v19 = vpop.permute.xlu1 %2055 }
 0x3e8   : > { %v2499_v18 = vsel %vm1286_vm2, %v5122_v11, %v2056_v19 }
 0x3ed   : > { %2208 = vrot.lane.b32.xlu2 %v5271_v23, %s3134_s30  ;;  %2212 = vrot.lane.b32.xlu1 %v5422_v61, %s3134_s30 }
 0x3ee   : > { %2210 = vrot.lane.b32.xlu0 %v5253_v36, %s3134_s30 }
 0x3ef   : > { %v5428_v0 = vpop.permute.xlu2 %2069 }
 0x3f5   : > { %2214 = vrot.lane.b32.xlu2 %v5434_v42, %s3134_s30  ;;  %2291 = vrot.lane.b32.xlu1 %v5299_v13, %s3136_s8 }
 0x3f6   : > { %2238 = vrot.lane.b32.xlu0 %v5113_v53, %s3135_s7 }
 0x3f7   : > { %v5442_v24 = vpop.permute.xlu2 %2075  ;;  %v2062_v26 = vpop.permute.xlu1 %2061 }
 0x3f8   : > { %v2060_v31 = vpop.permute.xlu0 %2059 }
 0x3fd   : > { %2340 = vrot.lane.b32.xlu2 %v5122_v11, %s3137_s9  ;;  %2447 = vrot.lane.b32.xlu1 %v5312_v17, %s6467_s13  ;;  %v2495_v11 = vsel %vm1286_vm2, %v5077_v54, %v2048_v8 }
 0x3fe   : > { %2394 = vrot.lane.b32.xlu0 %v5140_v51, %s6466_s28 }
 0x3ff   : > { %v2138_v53 = vpop.permute.xlu2 %2137  ;;  %v2068_v29 = vpop.permute.xlu1 %2067 }
 0x400   : > { %v5453_v13 = vsel %vm1317_vm3, %v2496_v43, %v2138_v53  ;;  %v2066_v1 = vpop.permute.xlu0 %2065  ;;  %v2505_v54 = vsel %vm1286_vm2, %v5202_v20, %v2068_v29 }
 0x405   : > { %2240 = vrot.lane.b32.xlu2 %v5110_v7, %s3135_s7  ;;  %2256 = vrot.lane.b32.xlu1 %v5250_v30, %s3135_s7  ;;  %v2502_v7 = vsel %vm1286_vm2, %v5171_v44, %v2062_v26  ;;  %v2497_v26 = vsel %vm1286_vm2, %v5097_v21, %v5396_v52  ;;  %v2500_v52 = vsel %vm1286_vm2, %v5125_v40, %v5406_v59 }
 0x406   : > { %2293 = vrot.lane.b32.xlu0 %v5296_v58, %s3136_s8  ;;  %v2504_v59 = vsel %vm1286_vm2, %v5207_v38, %v2066_v1 }
 0x407   : > { %v2144_v55 = vpop.permute.xlu2 %2143  ;;  %v2074_v63 = vpop.permute.xlu1 %2073 }
 0x408   : > { %v5464_v56 = vsel %vm1317_vm3, %v2499_v18, %v2144_v55  ;;  %v2072_v43 = vpop.permute.xlu0 %2071  ;;  %v2508_v21 = vsel %vm1286_vm2, %v5233_v9, %v2074_v63 }
 0x409   : > { %v2507_v1 = vsel %vm1286_vm2, %v5244_v48, %v2072_v43 }
 0x40d   : > { %2342 = vrot.lane.b32.xlu2 %v5125_v40, %s3137_s9  ;;  %2396 = vrot.lane.b32.xlu1 %v5137_v6, %s6466_s28 }
 0x40e   : > { %2309 = vrot.lane.b32.xlu0 %v5357_v45, %s3136_s8 }
 0x40f   : > { %v2150_v58 = vpop.permute.xlu2 %2149  ;;  %v2136_v19 = vpop.permute.xlu1 %2135 }
 0x410   : > { %v5477_v55 = vsel %vm1317_vm3, %v2502_v7, %v2150_v58  ;;  %v2078_v18 = vpop.permute.xlu0 %2077  ;;  %v5480_v53 = vsel %vm1317_vm3, %v2495_v11, %v2136_v19  ;;  %v2498_v7 = vsel %vm1286_vm2, %v5100_v28, %v2054_v60  ;;  %v2501_v60 = vsel %vm1286_vm2, %v5167_v5, %v2060_v31 }
 0x411   : > { %v2510_v43 = vsel %vm1286_vm2, %v5253_v36, %v2078_v18 }
 0x415   : > { %2358 = vrot.lane.b32.xlu2 %v5233_v9, %s3137_s9  ;;  %2412 = vrot.lane.b32.xlu1 %v5258_v33, %s6466_s28  ;;  %v2503_v9 = vsel %vm1286_vm2, %v5210_v3, %v5415_v37  ;;  %v2506_v37 = vsel %vm1286_vm2, %v5191_v62, %v5428_v0 }
 0x416   : > { %2449 = vrot.lane.b32.xlu0 %v5318_v50, %s6467_s13 }
 0x417   : > { %v2156_v8 = vpop.permute.xlu2 %2155  ;;  %v2142_v58 = vpop.permute.xlu1 %2141 }
 0x418   : > { %v5496_v11 = vsel %vm1317_vm3, %v2505_v54, %v2156_v8  ;;  %v2140_v19 = vpop.permute.xlu0 %2139  ;;  %v2514_v45 = vsel %vm1317_vm3, %v2498_v7, %v2142_v58 }
 0x419   : > { %v2513_v30 = vsel %vm1317_vm3, %v2497_v26, %v2140_v19 }
 0x41d   : > { %2465 = vrot.lane.b32.xlu2 %v5370_v16, %s6467_s13  ;;  %2295 = vrot.lane.b32.xlu1 %v5312_v17, %s3136_s8 }
 0x41e   : > { %2242 = vrot.lane.b32.xlu0 %v5140_v51, %s3135_s7 }
 0x41f   : > { %v2162_v28 = vpop.permute.xlu2 %2161  ;;  %v2148_v29 = vpop.permute.xlu1 %2147 }
 0x420   : > { %v5514_v54 = vsel %vm1317_vm3, %v2508_v21, %v2162_v28  ;;  %v2146_v8 = vpop.permute.xlu0 %2145  ;;  %v2517_v51 = vsel %vm1317_vm3, %v2501_v60, %v2148_v29 }
 0x421   : > { %v2516_v17 = vsel %vm1317_vm3, %v2500_v52, %v2146_v8 }
 0x425   : > { %2258 = vrot.lane.b32.xlu2 %v5261_v14, %s3135_s7  ;;  %2311 = vrot.lane.b32.xlu1 %v5354_v25, %s3136_s8 }
 0x426   : > { %2344 = vrot.lane.b32.xlu0 %v5167_v5, %s3137_s9 }
 0x427   : > { %v5524_v40 = vpop.permute.xlu2 %2184  ;;  %v2154_v31 = vpop.permute.xlu1 %2153 }
 0x428   : > { %v2152_v63 = vpop.permute.xlu0 %2151  ;;  %v5532_v26 = vsel %vm1317_vm3, %v2504_v59, %v2154_v31 }
 0x429   : > { %v5535_v7 = vsel %vm1317_vm3, %v2503_v9, %v2152_v63 }
 0x42d   : > { %2398 = vrot.lane.b32.xlu2 %v5188_v12, %s6466_s28  ;;  %2451 = vrot.lane.b32.xlu1 %v5315_v47, %s6467_s13 }
 0x42e   : > { %2360 = vrot.lane.b32.xlu0 %v5271_v23, %s3137_s9 }
 0x42f   : > { %v2191_v5 = vpop.permute.xlu2 %2190  ;;  %v2160_v58 = vpop.permute.xlu1 %2159 }
 0x430   : > { %v5549_v19 = vsel %vm1348_vm4, %v2514_v45, %v2191_v5  ;;  %v2158_v21 = vpop.permute.xlu0 %2157  ;;  %v2523_v28 = vsel %vm1317_vm3, %v2507_v1, %v2160_v58  ;;  %v2509_v45 = vsel %vm1286_vm2, %v5271_v23, %v5442_v24  ;;  %v2626_v1 = vld [vmem:[%s5991_s4 + $0x18] sm:$0xff] }
 0x431   : > { %v5553_v52 = vsel %vm1317_vm3, %v2506_v37, %v2158_v21 }
 0x435   : > { %2414 = vrot.lane.b32.xlu2 %v5279_v41, %s6466_s28  ;;  %2244 = vrot.lane.b32.xlu1 %v5137_v6, %s3135_s7 }
 0x436   : > { %2467 = vrot.lane.b32.xlu0 %v5376_v46, %s6467_s13 }
 0x437   : > { %v2197_v0 = vpop.permute.xlu2 %2196  ;;  %v2166_v60 = vpop.permute.xlu1 %2165 }
 0x438   : > { %v5567_v29 = vsel %vm1348_vm4, %v2517_v51, %v2197_v0  ;;  %v2164_v8 = vpop.permute.xlu0 %2163  ;;  %v2526_v9 = vsel %vm1317_vm3, %v2510_v43, %v2166_v60  ;;  %v2623_v60 = vld [vmem:[%s5991_s4] sm:$0xff] }
 0x439   : > { %v5571_v59 = vsel %vm1317_vm3, %v2509_v45, %v2164_v8  ;;  %vm6468_vm3 = vcmask 457728  }
 0x43a   : > { %vm6472_vm12 = vmmov %vm6468_vm3 }
 0x43b   : > { %vm6473_vm13 = vmmov %vm6468_vm3 }
 0x43d   : > { %2297 = vrot.lane.b32.xlu2 %v5318_v50, %s3136_s8  ;;  %2346 = vrot.lane.b32.xlu1 %v5171_v44, %s3137_s9  ;;  %v2631_v50 = vld [vmem:[%s5991_s4 + $0x40] sm:$0xff]  ;;  %v2629_v44 = vld [vmem:[%s5991_s4 + $0x30] sm:$0xff] }
 0x43e   : > { %2260 = vrot.lane.b32.xlu0 %v5258_v33, %s3135_s7  ;;  %v2630_v33 = vld [vmem:[%s5991_s4 + $0x38] sm:$0xff]  ;;  %2691 = vmatpush.msra.mxu1 %v2631_v50 }
 0x43f   : > { %v5579_v6 = vpop.permute.xlu2 %2202  ;;  %v2189_v23 = vpop.permute.xlu1 %2188  ;;  %3000 = vmatpush.msra.mxu3 %v2631_v50  ;;  %v2287_v50 = vrot.slane %v5434_v42, 2 }
 0x440   : > { %v2187_v24 = vpop.permute.xlu0 %2186  ;;  %v5582_v18 = vsel %vm1348_vm4, %v2513_v30, %v2189_v23  ;;  %2692 = vmatpush.msra.mxu1 %v2630_v33  ;;  %v2628_v30 = vld [vmem:[%s5991_s4 + $0x28] sm:$0xff] }
 0x441   : > { %v5586_v51 = vsel %vm1348_vm4, %v5453_v13, %v2187_v24  ;;  %3001 = vmatpush.msra.mxu3 %v2630_v33  ;;  %v2234_v24 = vrot.slane %v5434_v42, 1 }
 0x442   : > { %2693 = vmatpush.msra.mxu1 %v2629_v44 }
 0x443   : > { %3002 = vmatpush.msra.mxu3 %v2629_v44  ;;  %v2527_v44 = vsel %vm1348_vm4, %v5480_v53, %v5524_v40 }
 0x444   : > { %2694 = vmatpush.msra.mxu1 %v2628_v30 }
 0x445   : > { %2313 = vrot.lane.b32.xlu2 %v5370_v16, %s3136_s8  ;;  %2362 = vrot.lane.b32.xlu1 %v5253_v36, %s3137_s9  ;;  %v2627_v36 = vld [vmem:[%s5991_s4 + $0x20] sm:$0xff] }
 0x446   : > { %2400 = vrot.lane.b32.xlu0 %v5185_v32, %s6466_s28  ;;  %3003 = vmatpush.msra.mxu3 %v2628_v30  ;;  %v2286_v30 = vrot.slane %v5422_v61, 2 }
 0x447   : > { %v2209_v13 = vpop.permute.xlu2 %2208  ;;  %v2195_v31 = vpop.permute.xlu1 %2194  ;;  %2695 = vmatpush.msra.mxu1 %v2627_v36 }
 0x448   : > { %v5607_v63 = vsel %vm1348_vm4, %v2523_v28, %v2209_v13  ;;  %v2193_v5 = vpop.permute.xlu0 %2192  ;;  %v5610_v16 = vsel %vm1348_vm4, %v2516_v17, %v2195_v31  ;;  %3004 = vmatpush.msra.mxu3 %v2627_v36  ;;  %v2625_v17 = vld [vmem:[%s5991_s4 + $0x10] sm:$0xff]  ;;  %v5694_v31 = vsel %vm579_vm1, %v2286_v30, %v2287_v50 }
 0x449   : > { %v5614_v37 = vsel %vm1348_vm4, %v5464_v56, %v2193_v5  ;;  %2696 = vmatpush.msra.mxu1 %v2626_v1  ;;  %v2624_v56 = vld [vmem:[%s5991_s4 + $0x8] sm:$0xff] }
 0x44a   : > { %3005 = vmatpush.msra.mxu3 %v2626_v1 }
 0x44b   : > { %2697 = vmatpush.msra.mxu1 %v2625_v17 }
 0x44c   : > { %3006 = vmatpush.msra.mxu3 %v2625_v17 }
 0x44d   : > { %2453 = vrot.lane.b32.xlu2 %v5331_v35, %s6467_s13  ;;  %2469 = vrot.lane.b32.xlu1 %v5373_v2, %s6467_s13 }
 0x44e   : > { %2416 = vrot.lane.b32.xlu0 %v5283_v10, %s6466_s28  ;;  %2698 = vmatpush.msra.mxu1 %v2624_v56 }
 0x44f   : > { %v2215_v58 = vpop.permute.xlu2 %2214  ;;  %v2201_v21 = vpop.permute.xlu1 %2200  ;;  %3007 = vmatpush.msra.mxu3 %v2624_v56 }
 0x450   : > { %v5635_v28 = vsel %vm1348_vm4, %v2526_v9, %v2215_v58  ;;  %v2199_v0 = vpop.permute.xlu0 %2198  ;;  %v5639_v45 = vsel %vm1348_vm4, %v5535_v7, %v2201_v21  ;;  %2699 = vmatpush.msra.mxu1 %v2623_v60  ;;  %v1739_v58 = vpop.f32.mrf.mxu2  ;;  %v6471_v21 = vrot.slane %v5417_v4, 7  ;;  %v2536_v4 = vsel %vm1348_vm4, %v5532_v26, %v5579_v6 }
 0x451   : > { %v5643_v43 = vsel %vm1348_vm4, %v5477_v55, %v2199_v0  ;;  %3008 = vmatpush.msra.mxu3 %v2623_v60  ;;  %v1740_v26 = vadd.f32 %v5068_v22, %v1739_v58 }
 0x452   : > { %v1989_v0 = vsel %vm1912_vm14, %v6471_v21, 0.0 }
 0x455   : > { %2246 = vrot.lane.b32.xlu2 %v5188_v12, %s3135_s7  ;;  %2262 = vrot.lane.b32.xlu1 %v5279_v41, %s3135_s7 }
 0x456   : > { %2299 = vrot.lane.b32.xlu0 %v5315_v47, %s3136_s8 }
 0x457   : > { %v2341_v55 = vpop.permute.xlu2 %2340  ;;  %v2207_v7 = vpop.permute.xlu1 %2206 }
 0x458   : > { %v2205_v8 = vpop.permute.xlu0 %2204  ;;  %v5656_v9 = vsel %vm1348_vm4, %v5553_v52, %v2207_v7 }
 0x459   : > { %v5660_v23 = vsel %vm1348_vm4, %v5496_v11, %v2205_v8  ;;  %v1779_v8 = vadd.s32 9, %v5070_v27 }
 0x45b   : > { %vm1799_vm11 = vcmp.lt.s32.totalorder %v1779_v8, 16 }
 0x45d   : > { %2348 = vrot.lane.b32.xlu2 %v5210_v3, %s3137_s9  ;;  %2402 = vrot.lane.b32.xlu1 %v5217_v49, %s6466_s28  ;;  %v2233_v3 = vrot.slane %v5422_v61, 1 }
 0x45e   : > { %2315 = vrot.lane.b32.xlu0 %v5376_v46, %s3136_s8 }
 0x45f   : > { %v2241_v12 = vpop.permute.xlu2 %2240  ;;  %v2213_v41 = vpop.permute.xlu1 %2212  ;;  %v5681_v46 = vsel %vm438_vm0, %v2233_v3, %v2234_v24 }
 0x460   : > { %v2211_v47 = vpop.permute.xlu0 %2210  ;;  %v5671_v52 = vsel %vm1348_vm4, %v5571_v59, %v2213_v41  ;;  %v2544_v7 = vsel %vm1379_vm5, %v5586_v51, %v2241_v12  ;;  %v1742_v41 = vpop.f32.mrf.mxu2 }
 0x461   : > { %v5675_v11 = vsel %vm1348_vm4, %v5514_v54, %v2211_v47  ;;  %v1743_v27 = vadd.f32 %v5068_v22, %v1742_v41  ;;  %vm1789_vm4 = vcmp.ge.s32.totalorder %v1779_v8, 0 }
 0x465   : > { %2364 = vrot.lane.b32.xlu2 %v5422_v61, %s3137_s9  ;;  %2418 = vrot.lane.b32.xlu1 %v5681_v46, %s6466_s28 }
 0x466   : > { %2455 = vrot.lane.b32.xlu0 %v5337_v34, %s6467_s13 }
 0x467   : > { %v2343_v59 = vpop.permute.xlu2 %2342  ;;  %v2292_v33 = vpop.permute.xlu1 %2291 }
 0x468   : > { %v2239_v54 = vpop.permute.xlu0 %2238 }
 0x469   : > { %v2543_v13 = vsel %vm1379_vm5, %v2527_v44, %v2239_v54 }
 0x46a   : > { %v2559_v5 = vsel %vm1410_vm6, %v2543_v13, %v2292_v33 }
 0x46b   : > { %v2575_v61 = vsel %vm1441_vm7, %v2559_v5, %v2341_v55  ;;  %v2289_v55 = vrot.slane %v1989_v0, 2  ;;  %v1763_v5 = vmax.f32 %v1740_v26, 0.0 }
 0x46d   : > { %2471 = vrot.lane.b32.xlu2 %v5694_v31, %s6467_s13  ;;  %2301 = vrot.lane.b32.xlu1 %v5331_v35, %s3136_s8  ;;  %v5737_v54 = vsel %vm579_vm1, %v2287_v50, %v2289_v55 }
 0x46e   : > { %2248 = vrot.lane.b32.xlu0 %v5185_v32, %s3135_s7 }
 0x46f   : > { %v2359_v36 = vpop.permute.xlu2 %2358  ;;  %v2448_v53 = vpop.permute.xlu1 %2447 }
 0x470   : > { %v2395_v40 = vpop.permute.xlu0 %2394 }
 0x471   : > { %v2591_v1 = vsel %vm6468_vm3, %v2575_v61, %v2395_v40  ;;  %vm6476_vm3 = vmmov %vm6469_vm9 }
 0x472   : > { %v2607_v17 = vsel %vm6469_vm9, %v2591_v1, %v2448_v53  ;;  %vm1809_vm9 = vmand %vm1789_vm4, %vm1799_vm11 }
 0x473   : > { %2964 = vmatmul.msk.f32.vlgmr.msra.gmra.mxu1 %vm6470_vm15, %v2607_v17  ;;  %vm6477_vm15 = vmmov %vm6475_vm8 }
 0x474   : > { %vm6479_vm4 = vmmov %vm6472_vm12 }
 0x475   : > { %2264 = vrot.lane.b32.xlu2 %v5283_v10, %s3135_s7  ;;  %2317 = vrot.lane.b32.xlu1 %v5373_v2, %s3136_s8  ;;  %v2236_v10 = vrot.slane %v1989_v0, 1  ;;  %vm6480_vm11 = vmmov %vm6476_vm3 }
 0x476   : > { %2350 = vrot.lane.b32.xlu0 %v5207_v38, %s3137_s9 }
 0x477   : > { %v2466_v32 = vpop.permute.xlu2 %2465  ;;  %v2257_v35 = vpop.permute.xlu1 %2256  ;;  %v5733_v3 = vsel %vm438_vm0, %v2234_v24, %v2236_v10 }
 0x478   : > { %v2294_v56 = vpop.permute.xlu0 %2293 }
 0x479   : > { %v2560_v47 = vsel %vm1410_vm6, %v2544_v7, %v2294_v56 }
 0x47a   : > { %v2576_v6 = vsel %vm1441_vm7, %v2560_v47, %v2343_v59  ;;  %v1890_v59 = vsel %vm1809_vm9, %v1763_v5, 0.0 }
 0x47b   : > { %v1940_v1 = vrot.slane %v1890_v59, 7 }
 0x47d   : > { %2404 = vrot.lane.b32.xlu2 %v5220_v15, %s6466_s28  ;;  %2457 = vrot.lane.b32.xlu1 %v5334_v57, %s6467_s13 }
 0x47e   : > { %2366 = vrot.lane.b32.xlu0 %v5434_v42, %s3137_s9  ;;  %v2552_v42 = vsel %vm1379_vm5, %v2536_v4, %v2257_v35 }
 0x47f   : > { %v5722_v38 = vpop.permute.xlu2 %2258  ;;  %v2397_v2 = vpop.permute.xlu1 %2396 }
 0x480   : > { %v2310_v60 = vpop.permute.xlu0 %2309  ;;  %v2592_v12 = vsel %vm6472_vm12, %v2576_v6, %v2397_v2  ;;  %vm6481_vm12 = vmmov %vm6475_vm8  ;;  %v2553_v47 = vsel %vm1379_vm5, %v5660_v23, %v5722_v38  ;;  %v6484_v38 = vld [vmem:[#allocation25_spill] sm:$0xff] }
 0x481   : > { %v2568_v33 = vsel %vm1410_vm6, %v2552_v42, %v2310_v60  ;;  %v6478_v60 = vld [vmem:[#allocation93_spill] sm:$0xff] }
 0x482   : > { %v2584_v50 = vsel %vm1441_vm7, %v2568_v33, %v2359_v36 }
 0x485   : > { %2420 = vrot.lane.b32.xlu2 %v5733_v3, %s6466_s28  ;;  %2250 = vrot.lane.b32.xlu1 %v5217_v49, %s3135_s7  ;;  %v1764_v49 = vmax.f32 %v1743_v27, 0.0 }
 0x486   : > { %2473 = vrot.lane.b32.xlu0 %v5737_v54, %s6467_s13 }
 0x487   : > { %v2399_v51 = vpop.permute.xlu2 %2398  ;;  %v2413_v24 = vpop.permute.xlu1 %2412  ;;  %v1891_v36 = vsel %vm1809_vm9, %v1764_v49, 0.0  ;;  %vm6487_vm9 = vmmov %vm6475_vm8 }
 0x488   : > { %v2450_v44 = vpop.permute.xlu0 %2449  ;;  %v2600_v30 = vsel %vm6473_vm13, %v2584_v50, %v2413_v24  ;;  %v1941_v17 = vrot.slane %v1891_v36, 7  ;;  %vm6482_vm13 = vmmov %vm6479_vm4 }
 0x489   : > { %v2608_v13 = vsel %vm6474_vm10, %v2592_v12, %v2450_v44  ;;  %v2616_v22 = vsel %vm6476_vm3, %v2600_v30, %v2466_v32  ;;  %v1980_v32 = vsel %vm1912_vm14, 0.0, %v1940_v1  ;;  %vm6483_vm10 = vmmov %vm6476_vm3 }
 0x48a   : > { %2965 = vmatmul.msk.f32.gmra.mxu1 %vm6475_vm8, %v2608_v13  ;;  %2973 = vmatmul.msk.f32.vlgmr.msra.gmra.mxu3 %vm6477_vm15, %v2616_v22  ;;  %v2389_v0 = vrot.slane %v1980_v32, 1  ;;  %v2442_v10 = vrot.slane %v1980_v32, 2  ;;  %vm6489_vm15 = vmmov %vm6476_vm3 }
 0x48d   : > { %2303 = vrot.lane.b32.xlu2 %v5337_v34, %s3136_s8  ;;  %2352 = vrot.lane.b32.xlu1 %v5202_v20, %s3137_s9  ;;  %v1942_v34 = vsel %vm1912_vm14, %v1940_v1, %v1941_v17 }
 0x48e   : > { %2266 = vrot.lane.b32.xlu0 %v5681_v46, %s3135_s7  ;;  %v2443_v58 = vrot.slane %v1942_v34, 2  ;;  %v2390_v21 = vrot.slane %v1942_v34, 1 }
 0x48f   : > { %v2415_v53 = vpop.permute.xlu2 %2414  ;;  %v2296_v61 = vpop.permute.xlu1 %2295 }
 0x490   : > { %v2243_v40 = vpop.permute.xlu0 %2242  ;;  %v2444_v55 = vsel %vm579_vm1, %v2442_v10, %v2443_v58  ;;  %v2391_v4 = vsel %vm438_vm0, %v2389_v0, %v2390_v21 }
 0x491   : > { %v2545_v56 = vsel %vm1379_vm5, %v5582_v18, %v2243_v40 }
 0x495   : > { %2319 = vrot.lane.b32.xlu2 %v5694_v31, %s3136_s8  ;;  %2368 = vrot.lane.b32.xlu1 %v1980_v32, %s3137_s9  ;;  %v2561_v31 = vsel %vm1410_vm6, %v2545_v56, %v2296_v61 }
 0x496   : > { %2406 = vrot.lane.b32.xlu0 %v5230_v39, %s6466_s28 }
 0x497   : > { %v2298_v46 = vpop.permute.xlu2 %2297  ;;  %v2312_v20 = vpop.permute.xlu1 %2311 }
 0x498   : > { %v2345_v35 = vpop.permute.xlu0 %2344  ;;  %v2569_v33 = vsel %vm1410_vm6, %v2553_v47, %v2312_v20 }
 0x499   : > { %v2577_v2 = vsel %vm1441_vm7, %v2561_v31, %v2345_v35 }
 0x49a   : > { %v2593_v41 = vsel %vm6479_vm4, %v2577_v2, %v2399_v51 }
 0x49d   : > { %2459 = vrot.lane.b32.xlu2 %v6478_v60, %s6467_s13  ;;  %2475 = vrot.lane.b32.xlu1 %v2444_v55, %s6467_s13 }
 0x49e   : > { %2422 = vrot.lane.b32.xlu0 %v2391_v4, %s6466_s28 }
 0x49f   : > { %v2314_v18 = vpop.permute.xlu2 %2313  ;;  %v2452_v7 = vpop.permute.xlu1 %2451 }
 0x4a0   : > { %v2361_v8 = vpop.permute.xlu0 %2360  ;;  %v2609_v42 = vsel %vm6480_vm11, %v2593_v41, %v2452_v7 }
 0x4a1   : > { %2966 = vmatmul.msk.f32.gmra.mxu1 %vm6481_vm12, %v2609_v42  ;;  %v2585_v26 = vsel %vm1441_vm7, %v2569_v33, %v2361_v8  ;;  %vm6493_vm12 = vmmov %vm6476_vm3 }
 0x4a2   : > { %v2601_v12 = vsel %vm6482_vm13, %v2585_v26, %v2415_v53 }
 0x4a5   : > { %2252 = vrot.lane.b32.xlu2 %v5220_v15, %s3135_s7  ;;  %2268 = vrot.lane.b32.xlu1 %v5733_v3, %s3135_s7  ;;  %v1990_v15 = vsel %vm1912_vm14, %v1941_v17, 0.0  ;;  %vm6486_vm14 = vmmov %vm6479_vm4 }
 0x4a6   : > { %2305 = vrot.lane.b32.xlu0 %v5334_v57, %s3136_s8  ;;  %v2392_v50 = vrot.slane %v1990_v15, 1 }
 0x4a7   : > { %v2454_v27 = vpop.permute.xlu2 %2453  ;;  %v2245_v6 = vpop.permute.xlu1 %2244 }
 0x4a8   : > { %v2468_v51 = vpop.permute.xlu0 %2467  ;;  %v2546_v44 = vsel %vm1379_vm5, %v5549_v19, %v2245_v6  ;;  %v2393_v30 = vsel %vm438_vm0, %v2390_v21, %v2392_v50  ;;  %vm6488_vm0 = vmmov %vm6479_vm4 }
 0x4a9   : > { %v2617_v23 = vsel %vm6483_vm10, %v2601_v12, %v2468_v51  ;;  %v2562_v13 = vsel %vm1410_vm6, %v2546_v44, %v2298_v46  ;;  %vm6491_vm4 = vmmov %vm6488_vm0  ;;  %v5856_v51 = vld [vmem:[%s5992_s5] ss:$0 sm:$0xff]  ;;  %v6499_v44 = vld [vmem:[#allocation7_spill] sm:$0xff] }
 0x4aa   : > { %2974 = vmatmul.msk.f32.gmra.mxu3 %vm6475_vm8, %v2617_v23  ;;  %vm6492_vm11 = vmmov %vm6488_vm0 }
 0x4ab   : > { %vm6495_vm10 = vmmov %vm6476_vm3 }
 0x4ad   : > { %2354 = vrot.lane.b32.xlu2 %v5191_v62, %s3137_s9  ;;  %2408 = vrot.lane.b32.xlu1 %v6484_v38, %s6466_s28  ;;  %v6485_v62 = vld [vmem:[#allocation62_spill] sm:$0xff] }
 0x4ae   : > { %2321 = vrot.lane.b32.xlu0 %v5737_v54, %s3136_s8  ;;  %v2445_v54 = vrot.slane %v1990_v15, 2 }
 0x4af   : > { %v2247_v57 = vpop.permute.xlu2 %2246  ;;  %v2347_v3 = vpop.permute.xlu1 %2346 }
 0x4b0   : > { %v2261_v24 = vpop.permute.xlu0 %2260  ;;  %v2578_v22 = vsel %vm1441_vm7, %v2562_v13, %v2347_v3  ;;  %v2446_v61 = vsel %vm579_vm1, %v2443_v58, %v2445_v54  ;;  %vm6490_vm1 = vmmov %vm6475_vm8  ;;  %v2547_v0 = vsel %vm1379_vm5, %v5614_v37, %v2247_v57 }
 0x4b1   : > { %v2554_v53 = vsel %vm1379_vm5, %v5656_v9, %v2261_v24  ;;  %vm6494_vm13 = vmmov %vm6490_vm1 }
 0x4b2   : > { %v2570_v40 = vsel %vm1410_vm6, %v2554_v53, %v2314_v18  ;;  %vm6496_vm8 = vmmov %vm6490_vm1 }
 0x4b5   : > { %2370 = vrot.lane.b32.xlu2 %v1942_v34, %s3137_s9  ;;  %2424 = vrot.lane.b32.xlu1 %v2393_v30, %s6466_s28 }
 0x4b6   : > { %2461 = vrot.lane.b32.xlu0 %v6485_v62, %s6467_s13 }
 0x4b7   : > { %v2349_v5 = vpop.permute.xlu2 %2348  ;;  %v2363_v49 = vpop.permute.xlu1 %2362 }
 0x4b8   : > { %v2401_v59 = vpop.permute.xlu0 %2400  ;;  %v2586_v17 = vsel %vm1441_vm7, %v2570_v40, %v2363_v49 }
 0x4b9   : > { %v2594_v36 = vsel %vm6486_vm14, %v2578_v22, %v2401_v59  ;;  %vm6497_vm14 = vmmov %vm6488_vm0 }
 0x4ba   : > { %v2610_v19 = vsel %vm6476_vm3, %v2594_v36, %v2454_v27 }
 0x4bb   : > { %2967 = vmatmul.msk.f32.gmra.mxu1 %vm6487_vm9, %v2610_v19  ;;  %vm6498_vm9 = vmmov %vm6490_vm1 }
 0x4bd   : > { %2477 = vrot.lane.b32.xlu2 %v2446_v61, %s6467_s13  ;;  %2307 = vrot.lane.b32.xlu1 %v6478_v60, %s3136_s8  ;;  %s2940_s8 = sshll.u32 %s6541_s22, 5 }
 0x4be   : > { %2254 = vrot.lane.b32.xlu0 %v5230_v39, %s3135_s7  ;;  %s2939_s7 = sshll.u32 %s3114_s21, 4 }
 0x4bf   : > { %v2365_v1 = vpop.permute.xlu2 %2364  ;;  %v2470_v32 = vpop.permute.xlu1 %2469  ;;  %p365_p8 = scmp.lt.s32.totalorder %s2939_s7, 31 }
 0x4c0   : > { %v2417_v34 = vpop.permute.xlu0 %2416 }
 0x4c1   : > { %v2602_v46 = vsel %vm6488_vm0, %v2586_v17, %v2417_v34  ;;  %s6545_s7 = smov (!%p365_p8, %s2939_s7), 31 }
 0x4c2   : > { %v2618_v9 = vsel %vm6489_vm15, %v2602_v46, %v2470_v32  ;;  %vm6500_vm15 = vmmov %vm6476_vm3 }
 0x4c3   : > { %2975 = vmatmul.msk.f32.gmra.mxu3 %vm6490_vm1, %v2618_v9 }
 0x4c5   : > { %2356 = vrot.lane.b32.xlu2 %v5244_v48, %s3137_s9  ;;  %2463 = vrot.lane.b32.xlu1 %v5354_v25, %s6467_s13  ;;  %s368_s13 = sadd.s32 %s2940_s8, %s6545_s7 }
 0x4c6   : > { %2410 = vrot.lane.b32.xlu0 %v5261_v14, %s6466_s28  ;;  %s2941_s21 = sshll.u32 %s368_s13, 3 }
 0x4c7   : > { %v2472_v39 = vpop.permute.xlu2 %2471  ;;  %v2263_v20 = vpop.permute.xlu1 %2262  ;;  %s5867_s11 = scalar_lea.vmem %s5993_s6, %s2941_s21 }
 0x4c8   : > { %v2300_v35 = vpop.permute.xlu0 %2299  ;;  %v2555_v10 = vsel %vm1379_vm5, %v5607_v63, %v2263_v20  ;;  %v6503_v20 = vld [vmem:[#allocation6_spill] sm:$0xff] }
 0x4c9   : > { %v2563_v48 = vsel %vm1410_vm6, %v2547_v0, %v2300_v35 }
 0x4ca   : > { %v2579_v31 = vsel %vm1441_vm7, %v2563_v48, %v2349_v5 }
 0x4cf   : > { %v2265_v56 = vpop.permute.xlu2 %2264  ;;  %v2403_v58 = vpop.permute.xlu1 %2402 }
 0x4d0   : > { %v2316_v21 = vpop.permute.xlu0 %2315  ;;  %v2595_v14 = vsel %vm6491_vm4, %v2579_v31, %v2403_v58  ;;  %v2556_v24 = vsel %vm1379_vm5, %v5675_v11, %v2265_v56  ;;  %vm6501_vm4 = vmmov %vm6488_vm0 }
 0x4d1   : > { %v2571_v25 = vsel %vm1410_vm6, %v2555_v10, %v2316_v21 }
 0x4d2   : > { %v2587_v60 = vsel %vm1441_vm7, %v2571_v25, %v2365_v1 }
 0x4d7   : > { %v2419_v2 = vpop.permute.xlu1 %2418  ;;  %v2405_v4 = vpop.permute.xlu2 %2404 }
 0x4d8   : > { %v2456_v55 = vpop.permute.xlu0 %2455  ;;  %v2603_v37 = vsel %vm6492_vm11, %v2587_v60, %v2419_v2  ;;  %vm6502_vm11 = vmmov %vm6476_vm3 }
 0x4d9   : > { %v2611_v18 = vsel %vm6493_vm12, %v2595_v14, %v2456_v55  ;;  %v2619_v63 = vsel %vm6495_vm10, %v2603_v37, %v2472_v39  ;;  %vm6504_vm12 = vmmov %vm6490_vm1  ;;  %v6506_v14 = vld [vmem:[#allocation26_spill] sm:$0xff] }
 0x4da   : > { %2968 = vmatmul.msk.f32.gmra.mxu1 %vm6494_vm13, %v2611_v18  ;;  %2976 = vmatmul.msk.f32.gmra.mxu3 %vm6496_vm8, %v2619_v63  ;;  %vm6505_vm13 = vmmov %vm6488_vm0 }
 0x4db   : > { %vm6507_vm10 = vmmov %vm6476_vm3 }
 0x4dc   : > { %vm6508_vm8 = vmmov %vm6490_vm1 }
 0x4df   : > { %v2302_v7 = vpop.permute.xlu1 %2301  ;;  %v2421_v41 = vpop.permute.xlu2 %2420 }
 0x4e0   : > { %v2249_v8 = vpop.permute.xlu0 %2248 }
 0x4e1   : > { %v2548_v33 = vsel %vm1379_vm5, %v5610_v16, %v2249_v8 }
 0x4e2   : > { %v2564_v26 = vsel %vm1410_vm6, %v2548_v33, %v2302_v7  ;;  %v6509_v33 = vld [vmem:[#allocation11_spill] sm:$0xff] }
 0x4e7   : > { %v2318_v42 = vpop.permute.xlu1 %2317  ;;  %v2304_v27 = vpop.permute.xlu2 %2303 }
 0x4e8   : > { %v2351_v47 = vpop.permute.xlu0 %2350  ;;  %v2572_v50 = vsel %vm1410_vm6, %v2556_v24, %v2318_v42 }
 0x4e9   : > { %v2580_v6 = vsel %vm1441_vm7, %v2564_v26, %v2351_v47 }
 0x4ea   : > { %v2596_v15 = vsel %vm6497_vm14, %v2580_v6, %v2405_v4  ;;  %vm6510_vm14 = vmmov %vm6488_vm0 }
 0x4ef   : > { %v2458_v12 = vpop.permute.xlu1 %2457  ;;  %v2320_v13 = vpop.permute.xlu2 %2319 }
 0x4f0   : > { %v2701_v23 = vpop.f32.mrf.mxu1  ;;  %v2367_v38 = vpop.permute.xlu0 %2366  ;;  %v2612_v57 = vsel %vm6476_vm3, %v2596_v15, %v2458_v12  ;;  %vm6511_vm3 = vmmov %vm6488_vm0 }
 0x4f1   : > { %v2702_v16 = vadd.f32 %v5856_v51, %v2701_v23  ;;  %2969 = vmatmul.msk.f32.gmra.mxu1 %vm6498_vm9, %v2612_v57  ;;  %v2588_v62 = vsel %vm1441_vm7, %v2572_v50, %v2367_v38  ;;  %vm6512_vm9 = vmmov %vm6507_vm10 }
 0x4f2   : > { %v2604_v22 = vsel %vm6488_vm0, %v2588_v62, %v2421_v41  ;;  %vm6513_vm0 = vmmov %vm6512_vm9 }
 0x4f3   : > { %v2765_v3 = vmul.f32 0.1, %v2702_v16 }
 0x4f5   : > { %v2781_v30 = vadd.f32 %v2765_v3, %v6499_v44 }
 0x4f7   : > { %2797 = vst.msk [vmem:[%s5867_s11] sm:$0xff] %vm1286_vm2, %v2781_v30  ;;  %v2251_v5 = vpop.permute.xlu1 %2250  ;;  %v2460_v59 = vpop.permute.xlu2 %2459 }
 0x4f8   : > { %v2474_v54 = vpop.permute.xlu0 %2473  ;;  %v2549_v19 = vsel %vm1379_vm5, %v5567_v29, %v2251_v5 }
 0x4f9   : > { %v2620_v11 = vsel %vm6500_vm15, %v2604_v22, %v2474_v54  ;;  %v2565_v61 = vsel %vm1410_vm6, %v2549_v19, %v2304_v27  ;;  %vm6514_vm15 = vmmov %vm6490_vm1 }
 0x4fa   : > { %2977 = vmatmul.msk.f32.gmra.mxu3 %vm6490_vm1, %v2620_v11 }
 0x4ff   : > { %v2353_v49 = vpop.permute.xlu1 %2352  ;;  %v2253_v9 = vpop.permute.xlu2 %2252 }
 0x500   : > { %v2267_v36 = vpop.permute.xlu0 %2266  ;;  %v2581_v17 = vsel %vm1441_vm7, %v2565_v61, %v2353_v49  ;;  %v2550_v42 = vsel %vm1379_vm5, %v5643_v43, %v2253_v9  ;;  %v6520_v9 = vld [vmem:[#allocation32_spill] sm:$0xff] }
 0x501   : > { %v2557_v29 = vsel %vm1379_vm5, %v5671_v52, %v2267_v36 }
 0x502   : > { %v2573_v21 = vsel %vm1410_vm6, %v2557_v29, %v2320_v13  ;;  %v6515_v13 = vld [vmem:[#allocation33_spill] sm:$0xff] }
 0x507   : > { %v2704_v53 = vpop.f32.mrf.mxu1  ;;  %v2369_v1 = vpop.permute.xlu1 %2368 }
 0x508   : > { %v2705_v40 = vadd.f32 %v5856_v51, %v2704_v53  ;;  %v2407_v32 = vpop.permute.xlu0 %2406  ;;  %v2589_v10 = vsel %vm1441_vm7, %v2573_v21, %v2369_v1  ;;  %v2355_v52 = vpop.permute.xlu2 %2354 }
 0x509   : > { %v2597_v46 = vsel %vm6501_vm4, %v2581_v17, %v2407_v32  ;;  %vm6516_vm4 = vmmov %vm6511_vm3 }
 0x50a   : > { %v2766_v34 = vmul.f32 0.1, %v2705_v40  ;;  %v2613_v39 = vsel %vm6502_vm11, %v2597_v46, %v2460_v59  ;;  %vm6517_vm11 = vmmov %vm6513_vm0 }
 0x50b   : > { %2970 = vmatmul.msk.f32.gmra.mxu1 %vm6504_vm12, %v2613_v39 }
 0x50c   : > { %v2782_v35 = vadd.f32 %v2766_v34, %v6503_v20 }
 0x50d   : > { %v2728_v56 = vpop.f32.mrf.mxu3 }
 0x50e   : > { %2798 = vst.msk [vmem:[%s5867_s11 + $0x8] sm:$0xff] %vm1286_vm2, %v2782_v35  ;;  %v2729_v58 = vadd.f32 %v5856_v51, %v2728_v56  ;;  %v6521_v56 = vld [vmem:[#allocation15_spill] sm:$0xff] }
 0x50f   : > { %v2476_v0 = vpop.permute.xlu1 %2475 }
 0x510   : > { %v2774_v48 = vmul.f32 0.1, %v2729_v58  ;;  %v2423_v25 = vpop.permute.xlu0 %2422  ;;  %v2371_v37 = vpop.permute.xlu2 %2370 }
 0x511   : > { %v2605_v31 = vsel %vm6505_vm13, %v2589_v10, %v2423_v25 }
 0x512   : > { %v2790_v2 = vadd.f32 %v2774_v48, %v6506_v14  ;;  %v2621_v60 = vsel %vm6507_vm10, %v2605_v31, %v2476_v0  ;;  %v6522_v48 = vld [vmem:[#allocation39_spill] sm:$0xff] }
 0x513   : > { %2978 = vmatmul.msk.f32.gmra.mxu3 %vm6508_vm8, %v2621_v60  ;;  %v6523_v60 = vld [vmem:[#allocation14_spill] sm:$0xff] }
 0x514   : > { %2806 = vst.msk [vmem:[%s5867_s11 + $0x48] sm:$0xff] %vm1286_vm2, %v2790_v2 }
 0x517   : > { %v2269_v55 = vpop.permute.xlu1 %2268 }
 0x518   : > { %v2306_v4 = vpop.permute.xlu0 %2305  ;;  %v2558_v47 = vsel %vm1379_vm5, %v5635_v28, %v2269_v55  ;;  %v2478_v16 = vpop.permute.xlu2 %2477 }
 0x519   : > { %v2566_v27 = vsel %vm1410_vm6, %v2550_v42, %v2306_v4  ;;  %v6525_v42 = vld [vmem:[#allocation21_spill] sm:$0xff] }
 0x51a   : > { %v2582_v12 = vsel %vm1441_vm7, %v2566_v27, %v2355_v52 }
 0x51e   : > { %v2707_v18 = vpop.f32.mrf.mxu1 }
 0x51f   : > { %v2708_v63 = vadd.f32 %v5856_v51, %v2707_v18  ;;  %v2409_v7 = vpop.permute.xlu1 %2408  ;;  %v6524_v18 = vld [vmem:[#allocation38_spill] sm:$0xff] }
 0x520   : > { %v2322_v8 = vpop.permute.xlu0 %2321  ;;  %v2598_v43 = vsel %vm6510_vm14, %v2582_v12, %v2409_v7  ;;  %v2357_v11 = vpop.permute.xlu2 %2356 }
 0x521   : > { %v2767_v41 = vmul.f32 0.1, %v2708_v63  ;;  %v2574_v6 = vsel %vm1410_vm6, %v2558_v47, %v2322_v8 }
 0x522   : > { %v2590_v15 = vsel %vm1441_vm7, %v2574_v6, %v2371_v37  ;;  %v6526_v6 = vld [vmem:[#allocation45_spill] sm:$0xff] }
 0x523   : > { %v2783_v26 = vadd.f32 %v2767_v41, %v6509_v33 }
 0x525   : > { %2799 = vst.msk [vmem:[%s5867_s11 + $0x10] sm:$0xff] %vm1286_vm2, %v2783_v26 }
 0x527   : > { %v2425_v23 = vpop.permute.xlu1 %2424 }
 0x528   : > { %v2606_v38 = vsel %vm6511_vm3, %v2590_v15, %v2425_v23  ;;  %v2462_v28 = vpop.permute.xlu0 %2461 }
 0x529   : > { %v2614_v57 = vsel %vm6512_vm9, %v2598_v43, %v2462_v28  ;;  %v2622_v3 = vsel %vm6513_vm0, %v2606_v38, %v2478_v16  ;;  %v6527_v43 = vld [vmem:[#allocation20_spill] sm:$0xff] }
 0x52a   : > { %2971 = vmatmul.msk.f32.gmra.mxu1 %vm6514_vm15, %v2614_v57  ;;  %2979 = vmatmul.msk.f32.gmra.mxu3 %vm6490_vm1, %v2622_v3 }
 0x52d   : > { %v2731_v24 = vpop.f32.mrf.mxu3 }
 0x52e   : > { %v2732_v50 = vadd.f32 %v5856_v51, %v2731_v24  ;;  %v6528_v24 = vld [vmem:[#allocation44_spill] sm:$0xff] }
 0x52f   : > { %v2308_v30 = vpop.permute.xlu1 %2307 }
 0x530   : > { %v2775_v44 = vmul.f32 0.1, %v2732_v50  ;;  %v2255_v62 = vpop.permute.xlu0 %2254 }
 0x531   : > { %v2551_v54 = vsel %vm1379_vm5, %v5639_v45, %v2255_v62  ;;  %vm6518_vm5 = vmmov %vm6490_vm1  ;;  %v6519_v45 = vld [vmem:[#allocation10_spill] sm:$0xff] }
 0x532   : > { %v2791_v5 = vadd.f32 %v2775_v44, %v6515_v13  ;;  %v2567_v22 = vsel %vm1410_vm6, %v2551_v54, %v2308_v30  ;;  %v6529_v13 = vld [vmem:[#allocation27_spill] sm:$0xff] }
 0x533   : > { %v2583_v19 = vsel %vm1441_vm7, %v2567_v22, %v2357_v11 }
 0x534   : > { %2807 = vst.msk [vmem:[%s5867_s11 + $0x50] sm:$0xff] %vm1286_vm2, %v2791_v5 }
 0x537   : > { %v2464_v49 = vpop.permute.xlu1 %2463 }
 0x538   : > { %v2710_v59 = vpop.f32.mrf.mxu1  ;;  %v2411_v53 = vpop.permute.xlu0 %2410 }
 0x539   : > { %v2711_v36 = vadd.f32 %v5856_v51, %v2710_v59  ;;  %v2599_v61 = vsel %vm6516_vm4, %v2583_v19, %v2411_v53 }
 0x53a   : > { %v2615_v1 = vsel %vm6517_vm11, %v2599_v61, %v2464_v49 }
 0x53b   : > { %v2768_v40 = vmul.f32 0.1, %v2711_v36  ;;  %2972 = vmatmul.msk.f32.gmra.mxu1 %vm6518_vm5, %v2615_v1 }
 0x53d   : > { %v2784_v17 = vadd.f32 %v2768_v40, %v6519_v45 }
 0x53f   : > { %2800 = vst.msk [vmem:[%s5867_s11 + $0x18] sm:$0xff] %vm1286_vm2, %v2784_v17 }
 0x546   : > { %v2734_v32 = vpop.f32.mrf.mxu3 }
 0x547   : > { %v2735_v34 = vadd.f32 %v5856_v51, %v2734_v32 }
 0x549   : > { %v2776_v46 = vmul.f32 0.1, %v2735_v34 }
 0x54b   : > { %v2792_v39 = vadd.f32 %v2776_v46, %v6520_v9 }
 0x54d   : > { %2808 = vst.msk [vmem:[%s5867_s11 + $0x58] sm:$0xff] %vm1286_vm2, %v2792_v39 }
 0x557   : > { %v2713_v20 = vpop.f32.mrf.mxu1 }
 0x558   : > { %v2714_v35 = vadd.f32 %v5856_v51, %v2713_v20 }
 0x55a   : > { %v2769_v29 = vmul.f32 0.1, %v2714_v35 }
 0x55c   : > { %v2785_v58 = vadd.f32 %v2769_v29, %v6521_v56 }
 0x55d   : > { %v2737_v21 = vpop.f32.mrf.mxu3 }
 0x55e   : > { %2801 = vst.msk [vmem:[%s5867_s11 + $0x20] sm:$0xff] %vm1286_vm2, %v2785_v58  ;;  %v2738_v0 = vadd.f32 %v5856_v51, %v2737_v21 }
 0x560   : > { %v2777_v10 = vmul.f32 0.1, %v2738_v0 }
 0x562   : > { %v2793_v25 = vadd.f32 %v2777_v10, %v6522_v48 }
 0x564   : > { %2809 = vst.msk [vmem:[%s5867_s11 + $0x60] sm:$0xff] %vm1286_vm2, %v2793_v25 }
 0x56e   : > { %v2716_v31 = vpop.f32.mrf.mxu1 }
 0x56f   : > { %v2717_v14 = vadd.f32 %v5856_v51, %v2716_v31 }
 0x571   : > { %v2770_v2 = vmul.f32 0.1, %v2717_v14 }
 0x573   : > { %v2786_v52 = vadd.f32 %v2770_v2, %v6523_v60 }
 0x575   : > { %2802 = vst.msk [vmem:[%s5867_s11 + $0x28] sm:$0xff] %vm1286_vm2, %v2786_v52 }
 0x57d   : > { %v2740_v55 = vpop.f32.mrf.mxu3 }
 0x57e   : > { %v2741_v4 = vadd.f32 %v5856_v51, %v2740_v55 }
 0x580   : > { %v2778_v37 = vmul.f32 0.1, %v2741_v4 }
 0x582   : > { %v2794_v63 = vadd.f32 %v2778_v37, %v6524_v18 }
 0x584   : > { %2810 = vst.msk [vmem:[%s5867_s11 + $0x68] sm:$0xff] %vm1286_vm2, %v2794_v63 }
 0x588   : > { %v2719_v7 = vpop.f32.mrf.mxu1 }
 0x589   : > { %v2720_v8 = vadd.f32 %v5856_v51, %v2719_v7 }
 0x58b   : > { %v2771_v41 = vmul.f32 0.1, %v2720_v8 }
 0x58d   : > { %v2787_v47 = vadd.f32 %v2771_v41, %v6525_v42 }
 0x58f   : > { %2803 = vst.msk [vmem:[%s5867_s11 + $0x30] sm:$0xff] %vm1286_vm2, %v2787_v47 }
 0x596   : > { %v2743_v33 = vpop.f32.mrf.mxu3 }
 0x597   : > { %v2744_v26 = vadd.f32 %v5856_v51, %v2743_v33 }
 0x599   : > { %v2779_v27 = vmul.f32 0.1, %v2744_v26 }
 0x59b   : > { %v2795_v12 = vadd.f32 %v2779_v27, %v6526_v6 }
 0x59d   : > { %2811 = vst.msk [vmem:[%s5867_s11 + $0x70] sm:$0xff] %vm1286_vm2, %v2795_v12 }
 0x5a7   : > { %v2722_v23 = vpop.f32.mrf.mxu1 }
 0x5a8   : > { %v2723_v15 = vadd.f32 %v5856_v51, %v2722_v23 }
 0x5aa   : > { %v2772_v16 = vmul.f32 0.1, %v2723_v15 }
 0x5ac   : > { %v2788_v38 = vadd.f32 %v2772_v16, %v6527_v43 }
 0x5ad   : > { %v2746_v28 = vpop.f32.mrf.mxu3 }
 0x5ae   : > { %2804 = vst.msk [vmem:[%s5867_s11 + $0x38] sm:$0xff] %vm1286_vm2, %v2788_v38  ;;  %v2747_v57 = vadd.f32 %v5856_v51, %v2746_v28 }
 0x5b0   : > { %v2780_v3 = vmul.f32 0.1, %v2747_v57 }
 0x5b2   : > { %v2796_v50 = vadd.f32 %v2780_v3, %v6528_v24 }
 0x5b4   : > { %2812 = vst.msk [vmem:[%s5867_s11 + $0x78] sm:$0xff] %vm1286_vm2, %v2796_v50 }
 0x5b8   : > { %v2725_v44 = vpop.f32.mrf.mxu1 }
 0x5b9   : > { %v2726_v30 = vadd.f32 %v5856_v51, %v2725_v44 }
 0x5bb   : > { %v2773_v62 = vmul.f32 0.1, %v2726_v30 }
 0x5bd   : > { %v2789_v5 = vadd.f32 %v2773_v62, %v6529_v13 }
 0x5bf   : > { %2805 = vst.msk [vmem:[%s5867_s11 + $0x40] sm:$0xff] %vm1286_vm2, %v2789_v5 }
 0x5c0 PF: > { %s16_s25 = sadd.s32 1, %s3130_s25   ;;  %s6530_s21 = smov %s3122_s23 }
 0x5c1   : > { %p13_p9 = scmp.ge.s32.totalorder %s16_s25, 6   ;;  %s6531_s22 = smov %s3126_s24 }
 0x5c2   : > { %s6532_s23 = smov %s6535_s26  ;;  %s6533_s24 = smov %s6539_s27 }
 0x5c3   :  { %15 = sbr.rel (!%p13_p9) target bundleno = 3 (0x3), region = 77 }

</bundles_post_ra>
